<compile_context>
chip_gen: v7x
topology: tpu7x:2x2x1
jax: 0.10.0
libtpu: 0.0.40
codegen_flags: <defaults>
</compile_context>

<pallas_src>
import functools

import numpy as np
import jax
import jax.numpy as jnp
from jax import lax
from jax.experimental import pallas as pl
from jax.experimental.pallas import tpu as pltpu


_A_PRE = 255.0 / 128.0        # preprocess (x*255 - 127.5)/128 = a*x + b
_B_PRE = -127.5 / 128.0
_LANE = 128


def _round_up(x, m):
    return (x + m - 1) // m * m


# ----------------------------------------------------------------------------
# Stem configuration (facenet children[:6]).  (kind, cin, cout, k, stride, pad)
# ----------------------------------------------------------------------------
_FACENET_STEM = [
    ("conv", 3, 32, 3, 2, 0),    # 0: conv2d_1a (padding=0 -> 'replicate' mode is a no-op)
    ("conv", 32, 32, 3, 1, 0),   # 1: conv2d_2a
    ("conv", 32, 64, 3, 1, 1),   # 2: conv2d_2b
    ("maxpool",),                # 3: maxpool_3a (3x3 stride 2)
    ("conv", 64, 80, 1, 1, 0),   # 4: conv2d_3b
    ("conv", 80, 192, 3, 1, 0),  # 5: conv2d_4a
]
_CONV_LAYERS = (0, 1, 2, 4, 5)
_COUT = {0: 32, 1: 32, 2: 64, 3: 64, 4: 80, 5: 192}


# ----------------------------------------------------------------------------
# Static layout plan: every activation is a zero-padded flat (L, CP) slab with a
# common row stride W_P; valid data lives at rows [r0, r0+h), cols [c0, c0+w),
# where (r0, c0) is the zero padding required by the op that READS the buffer.
# ----------------------------------------------------------------------------
def _build_plan(h_img, w_img):
    h_in, w_in = (h_img + 1) // 2, (w_img + 1) // 2     # space-to-depth spatial size

    h0, w0 = h_in - 1, w_in - 1                         # conv2d_1a (2x2/s1 on s2d input)
    h1, w1 = h0 - 2, w0 - 2                             # conv2d_2a
    h2, w2 = h1, w1                                     # conv2d_2b (pad=1)
    h3, w3 = (h2 - 3) // 2 + 1, (w2 - 3) // 2 + 1       # maxpool_3a
    h4, w4 = h3, w3                                     # conv2d_3b (1x1)
    h5, w5 = h4 - 2, w4 - 2                             # conv2d_4a
    sizes = [(h0, w0), (h1, w1), (h2, w2), (h3, w3), (h4, w4), (h5, w5)]
    assert h5 > 0 and w5 > 0, "input image too small for the facenet stem"

    wp = _round_up(max([w_in] + [s[1] for s in sizes]) + 2, 8)   # common row stride

    bufs = {
        "in": dict(h=h_in, w=w_in, r0=0, c0=0, cp=_LANE, cout=12),
        0: dict(h=h0, w=w0, r0=0, c0=0, cp=_LANE, cout=_COUT[0]),
        1: dict(h=h1, w=w1, r0=1, c0=1, cp=_LANE, cout=_COUT[1]),   # read with pad=1
        2: dict(h=h2, w=w2, r0=0, c0=0, cp=_LANE, cout=_COUT[2]),
        3: dict(h=h3, w=w3, r0=0, c0=0, cp=_LANE, cout=_COUT[3]),
        4: dict(h=h4, w=w4, r0=0, c0=0, cp=_LANE, cout=_COUT[4]),
        5: dict(h=h5, w=w5, r0=0, c0=0, cp=_round_up(_COUT[5], _LANE), cout=_COUT[5]),
    }
    for b in bufs.values():
        b["write_end"] = (b["r0"] + b["h"]) * wp + b["c0"]

    ops = []
    read_end = {k: 0 for k in bufs}

    def add_conv(src, dst, k, pad, widx):
        sb, db = bufs[src], bufs[dst]
        base0 = (sb["r0"] - pad) * wp + (sb["c0"] - pad)
        m = db["h"] * wp
        taps = tuple(ki * wp + kj for ki in range(k) for kj in range(k))
        ops.append(dict(kind="conv", src=src, dst=dst, widx=widx, base0=base0,
                        m=m, wp=wp, taps=taps, w_valid=db["w"],
                        dst_off=db["r0"] * wp + db["c0"]))
        read_end[src] = max(read_end[src], base0 + (m - 1) + max(taps) + 1)

    def add_pool(src, dst):
        sb, db = bufs[src], bufs[dst]
        base0 = sb["r0"] * wp + sb["c0"]
        m = db["h"] * wp
        taps = tuple(dy * wp + dx for dy in range(3) for dx in range(3))
        ops.append(dict(kind="pool", src=src, dst=dst, base0=base0,
                        m=m, wp=wp, taps=taps, w_valid=db["w"],
                        dst_off=db["r0"] * wp + db["c0"]))
        read_end[src] = max(read_end[src], base0 + 2 * (m - 1) + max(taps) + 1)

    add_conv("in", 0, k=2, pad=0, widx=0)   # conv2d_1a  (s2d form)
    add_conv(0, 1, k=3, pad=0, widx=1)      # conv2d_2a
    add_conv(1, 2, k=3, pad=1, widx=2)      # conv2d_2b
    add_pool(2, 3)                          # maxpool_3a
    add_conv(3, 4, k=1, pad=0, widx=3)      # conv2d_3b
    add_conv(4, 5, k=3, pad=0, widx=4)      # conv2d_4a

    for key, b in bufs.items():
        b["L"] = _round_up(max(b["write_end"], read_end[key]), 8)

    return dict(wp=wp, bufs=bufs, ops=ops)


# ----------------------------------------------------------------------------
# Fused stem kernel: one grid step == one image, everything VMEM-resident.
# ----------------------------------------------------------------------------
def _stem_kernel(x_ref, *refs, ops, n_conv):
    wrefs = refs[:2 * n_conv]
    orefs = refs[2 * n_conv:]

    # Zero-init every activation buffer: padding / wrap-margin regions must read 0.
    for o in orefs:
        o[...] = jnp.zeros(o.shape, o.dtype)

    bufs = {"in": x_ref}
    for op in ops:
        src = bufs[op["src"]]
        dst = orefs[op["dst"]]
        m, wp = op["m"], op["wp"]
        cp = dst.shape[-1]
        # garbage (wrap-around) column mask: valid iff (flat_row mod W_P) < w_valid
        col = lax.broadcasted_iota(jnp.int32, (m, cp), 0) % wp
        valid = col < op["w_valid"]

        if op["kind"] == "conv":
            w_ref = wrefs[2 * op["widx"]]
            b_ref = wrefs[2 * op["widx"] + 1]
            # Build the (M, k*k*CP) LHS from 128-lane-aligned contiguous tap slices,
            # then ONE MXU matmul (f32 accumulation), bias + ReLU epilogue in f32.
            pieces = [src[pl.ds(op["base0"] + off, m), :] for off in op["taps"]]
            lhs = pieces[0] if len(pieces) == 1 else jnp.concatenate(pieces, axis=-1)
            acc = jnp.dot(lhs, w_ref[...], preferred_element_type=jnp.float32)
            acc = jnp.maximum(acc + b_ref[...], 0.0)
        else:
            # MaxPool 3x3 / stride 2: 9 sublane-stride-2 loads, elementwise max.
            acc = None
            for off in op["taps"]:
                v = src[pl.ds(op["base0"] + off, m, stride=2), :]
                acc = v if acc is None else jnp.maximum(acc, v)

        res = jnp.where(valid, acc, 0).astype(dst.dtype)
        dst[pl.ds(op["dst_off"], m), :] = res
        bufs[op["dst"]] = dst


def _stem_pallas(xflat, weights, plan, compute_dtype):
    n, l_in, _ = xflat.shape
    bufs = plan["bufs"]
    n_conv = len(weights) // 2
    kernel = functools.partial(_stem_kernel, ops=plan["ops"], n_conv=n_conv)

    in_specs = [pl.BlockSpec((None, l_in, _LANE), lambda i: (i, 0, 0))]
    for a in weights:                               # weights/biases: VMEM-resident
        in_specs.append(pl.BlockSpec(a.shape, lambda i: (0, 0)))

    # Layer-2's buffer stays f32 so the pool's stride-2 sublane loads never hit a
    # packed-bf16 layout; everything else uses the (bf16) compute dtype.
    out_dtypes = {l: compute_dtype for l in range(6)}
    out_dtypes[2] = jnp.float32

    out_specs, out_shape = [], []
    for l in range(6):
        b = bufs[l]
        out_specs.append(pl.BlockSpec((None, b["L"], b["cp"]), lambda i: (i, 0, 0)))
        out_shape.append(jax.ShapeDtypeStruct((n, b["L"], b["cp"]), out_dtypes[l]))

    return pl.pallas_call(
        kernel,
        grid=(n,),
        in_specs=in_specs,
        out_specs=out_specs,
        out_shape=out_shape,
        compiler_params=pltpu.CompilerParams(
            dimension_semantics=("parallel",)),
    )(xflat, *weights)


# ----------------------------------------------------------------------------
# Host-side glue: input space-to-depth + canonical flat layout (done ONCE).
# ----------------------------------------------------------------------------
def _prep_input(x_nchw, plan, compute_dtype):
    n, c, h, w = x_nchw.shape
    wp = plan["wp"]
    l_in = plan["bufs"]["in"]["L"]
    x = jnp.transpose(x_nchw, (0, 2, 3, 1)).astype(jnp.float32)
    he, we = h + (h % 2), w + (w % 2)
    x = jnp.pad(x, ((0, 0), (0, he - h), (0, we - w), (0, 0)))
    # space-to-depth(2): channel order (row parity, col parity, channel)
    x = x.reshape(n, he // 2, 2, we // 2, 2, c).transpose(0, 1, 3, 2, 4, 5)
    x = x.reshape(n, he // 2, we // 2, 4 * c)
    # canonical padded-flat layout: width -> W_P, channels -> 128, rows -> L_in
    x = jnp.pad(x, ((0, 0), (0, 0), (0, wp - x.shape[2]), (0, _LANE - 4 * c)))
    x = x.reshape(n, (he // 2) * wp, _LANE)
    x = jnp.pad(x, ((0, 0), (0, l_in - x.shape[1]), (0, 0)))
    return x.astype(compute_dtype)


def _space_to_depth_weights(w_oihw):
    """(O, C, 3, 3) stride-2 conv weights -> (O, 4C, 2, 2) stride-1 weights."""
    o, c, _, _ = w_oihw.shape
    w4 = jnp.pad(w_oihw, ((0, 0), (0, 0), (0, 1), (0, 1)))   # 3x3 -> 4x4 (zeros)
    w4 = w4.reshape(o, c, 2, 2, 2, 2)                        # [o, c, a, p, b, q]
    w4 = jnp.transpose(w4, (0, 3, 5, 1, 2, 4))               # [o, p, q, c, a, b]
    return w4.reshape(o, 4 * c, 2, 2)


# ----------------------------------------------------------------------------
# Synthetic deterministic parameters + folding (preprocess + eval BatchNorm).
# ----------------------------------------------------------------------------
def _init_basic_conv(key, cin, cout, k):
    k1, k2, k3, k4, k5 = jax.random.split(key, 5)
    w = jax.random.normal(k1, (cout, cin, k, k), jnp.float32)
    w = w * (1.0 / np.sqrt(cin * k * k))
    gamma = 1.0 + 0.1 * jax.random.normal(k2, (cout,), jnp.float32)
    beta = 0.1 * jax.random.normal(k3, (cout,), jnp.float32)
    running_mean = 0.1 * jax.random.normal(k4, (cout,), jnp.float32)
    running_var = jnp.abs(jax.random.normal(k5, (cout,), jnp.float32)) + 0.5
    eps = 1e-3  # BatchNorm2d eps in BasicConv2d
    scale = gamma / jnp.sqrt(running_var + eps)
    bias = beta - running_mean * scale
    return {"w": w, "scale": scale, "bias": bias}


def _prep_conv(idx, raw, cfg):
    """Fold preprocess (layer 0) + BN into weights; tap-major (k*k*128, CP) layout."""
    _, cin, cout, k, stride, pad = cfg
    w, scale, bias = raw["w"], raw["scale"], raw["bias"]
    if idx == 0:
        # Fold (x*255 - 127.5)/128 into conv2d_1a, then convert the stride-2 3x3
        # conv into a stride-1 2x2 conv on the space-to-depth input.
        bias = bias + scale * _B_PRE * jnp.sum(w, axis=(1, 2, 3))
        w = _space_to_depth_weights(w * _A_PRE)
    w = w * scale[:, None, None, None]                    # fold BN scale
    o, cin_e, kh, kw = w.shape
    cp_out = _round_up(cout, _LANE)
    wt = jnp.transpose(w, (2, 3, 1, 0))                   # (kh, kw, cin_e, o)
    wt = jnp.pad(wt, ((0, 0), (0, 0), (0, _LANE - cin_e), (0, cp_out - cout)))
    wt = wt.reshape(kh * kw * _LANE, cp_out).astype(jnp.float32)
    bz = jnp.pad(bias, (0, cp_out - cout)).reshape(1, cp_out).astype(jnp.float32)
    return dict(w=wt, b=bz, cout=cout, cp=cp_out)


class FacialFeaturesPallas:
    """Pallas re-implementation of FacialFeatures.forward (faces_boxes=None path)."""

    def __init__(self, layers, key):
        self.layers = list(layers)
        self.notable_layers = [1, 3, 4, 5, 7, 9]
        self.faces_boxes = None          # TODO(synk): MTCNN.detect / face-crop path not ported
        self.min_face_size_percent = 0.01
        self.padding_scale_fac = 0.2
        self.square_faces = True
        self.raw = {}
        self.prepped = {}
        keys = jax.random.split(key, len(_FACENET_STEM))
        for idx, cfg in enumerate(_FACENET_STEM):
            if cfg[0] == "conv":
                _, cin, cout, k, _, _ = cfg
                self.raw[idx] = _init_basic_conv(keys[idx], cin, cout, k)
                self.prepped[idx] = _prep_conv(idx, self.raw[idx], cfg)
        self._jit_cache = {}

    # --- fused Pallas path --------------------------------------------------
    def _forward_impl(self, x_nchw, layers, compute_dtype):
        n, _, h, w = x_nchw.shape
        plan = _build_plan(h, w)
        xflat = _prep_input(x_nchw, plan, compute_dtype)
        wb = []
        for li in _CONV_LAYERS:
            p = self.prepped[li]
            wb += [p["w"].astype(compute_dtype), p["b"]]
        outs = _stem_pallas(xflat, wb, plan, compute_dtype)
        wp = plan["wp"]
        feats = {}
        for l in layers:
            b = plan["bufs"][l]
            o = outs[l]
            f = o[:, b["r0"] * wp:(b["r0"] + b["h"]) * wp, :]
            f = f.reshape(n, b["h"], wp, o.shape[-1])
            f = f[:, :, b["c0"]:b["c0"] + b["w"], :b["cout"]]
            feats[l] = jnp.transpose(f, (0, 3, 1, 2)).astype(jnp.float32)
        return feats

    def forward(self, x_nchw, layers=None, compute_dtype=jnp.bfloat16):
        layers = self.layers if layers is None else list(layers)
        if 14 in layers:
            # TODO(synk): FaceMesh (layer 14) not implemented.
            layers = [l for l in layers if l != 14]
        if not layers:
            return {}
        if max(layers) > 5:
            # TODO(synk): InceptionResnet repeat blocks (layers 6..13) not ported.
            raise NotImplementedError("only facenet stem layers 0..5 are supported")
        key = (x_nchw.shape, tuple(sorted(set(layers))), jnp.dtype(compute_dtype).name)
        if key not in self._jit_cache:
            self._jit_cache[key] = jax.jit(functools.partial(
                self._forward_impl, layers=key[1], compute_dtype=compute_dtype))
        return self._jit_cache[key](x_nchw)

    # --- pure-JAX reference (correctness check only) ------------------------
    def reference_forward(self, x_nchw, layers=None):
        layers = self.layers if layers is None else layers
        h = jnp.transpose(x_nchw, (0, 2, 3, 1)).astype(jnp.float32)
        h = (h * 255.0 - 127.5) / 128.0
        feats = {}
        for idx in range(max(l for l in layers if l != 14) + 1):
            cfg = _FACENET_STEM[idx]
            if cfg[0] == "conv":
                _, _, _, _, stride, pad = cfg
                p = self.raw[idx]
                w_hwio = jnp.transpose(p["w"], (2, 3, 1, 0))
                h = lax.conv_general_dilated(
                    h, w_hwio, window_strides=(stride, stride),
                    padding=[(pad, pad), (pad, pad)],
                    dimension_numbers=("NHWC", "HWIO", "NHWC"))
                h = jnp.maximum(h * p["scale"] + p["bias"], 0.0)
            else:
                h = lax.reduce_window(
                    h, -jnp.inf, lax.max,
                    window_dimensions=(1, 3, 3, 1),
                    window_strides=(1, 2, 2, 1), padding="VALID")
            if idx in layers:
                feats[idx] = jnp.transpose(h, (0, 3, 1, 2))
        return feats


if __name__ == "__main__":
    key = jax.random.PRNGKey(0)
    kx, kx2, kp = jax.random.split(key, 3)

    model = FacialFeaturesPallas(layers=[1, 3, 4, 5], key=kp)

    # Strict f32 check (validates folding, s2d, padded-flat convs, strided maxpool,
    # garbage-column masking) at a smaller size to keep f32 temporaries modest.
    x_small = jax.random.uniform(kx, (2, 3, 33, 33), dtype=jnp.float32)
    ref_s = model.reference_forward(x_small, layers=[0, 1, 2, 3, 4, 5])
    got_s = jax.block_until_ready(
        model.forward(x_small, layers=[0, 1, 2, 3, 4, 5], compute_dtype=jnp.float32))
    for l in sorted(got_s):
        np.testing.assert_allclose(np.asarray(got_s[l]), np.asarray(ref_s[l]),
                                   rtol=3e-4, atol=3e-4)

    # bf16 fast path (MXU bf16 operands, f32 accumulation) at the "real" size.
    x = jax.random.uniform(kx2, (2, 3, 65, 65), dtype=jnp.float32)
    ref = model.reference_forward(x)
    got = jax.block_until_ready(model.forward(x))
    for l in sorted(got):
        np.testing.assert_allclose(np.asarray(got[l]), np.asarray(ref[l]),
                                   rtol=5e-2, atol=5e-2)

    print("KERNEL_OK")
</pallas_src>

<mosaic_0001>
module attributes {stable_mosaic.version = 11 : i64} {
  func.func @_stem_kernel(%arg0: i32, %arg1: memref<1x416x128xf32, #tpu.memory_space<vmem>>, %arg2: memref<512x128xf32, #tpu.memory_space<vmem>>, %arg3: memref<1x128xf32, #tpu.memory_space<vmem>>, %arg4: memref<1152x128xf32, #tpu.memory_space<vmem>>, %arg5: memref<1x128xf32, #tpu.memory_space<vmem>>, %arg6: memref<1152x128xf32, #tpu.memory_space<vmem>>, %arg7: memref<1x128xf32, #tpu.memory_space<vmem>>, %arg8: memref<128x128xf32, #tpu.memory_space<vmem>>, %arg9: memref<1x128xf32, #tpu.memory_space<vmem>>, %arg10: memref<1152x256xf32, #tpu.memory_space<vmem>>, %arg11: memref<1x256xf32, #tpu.memory_space<vmem>>, %arg12: memref<1x392x128xf32, #tpu.memory_space<vmem>>, %arg13: memref<1x392x128xf32, #tpu.memory_space<vmem>>, %arg14: memref<1x344x128xf32, #tpu.memory_space<vmem>>, %arg15: memref<1x144x128xf32, #tpu.memory_space<vmem>>, %arg16: memref<1x152x128xf32, #tpu.memory_space<vmem>>, %arg17: memref<1x96x256xf32, #tpu.memory_space<vmem>>) attributes {dimension_semantics = [#tpu.dimension_semantics<parallel>], iteration_bounds = array<i64: 2>, scalar_prefetch = 0 : i64, scratch_operands = 0 : i64, tpu.core_type = #tpu.core_type<tc>, window_params = [{transform_indices = @transform_0, window_bounds = array<i64: 1, 416, 128>}, {pipeline_mode = #tpu.pipeline_mode<synchronous>, transform_indices = @transform_1, window_bounds = array<i64: 512, 128>}, {pipeline_mode = #tpu.pipeline_mode<synchronous>, transform_indices = @transform_2, window_bounds = array<i64: 1, 128>}, {pipeline_mode = #tpu.pipeline_mode<synchronous>, transform_indices = @transform_3, window_bounds = array<i64: 1152, 128>}, {pipeline_mode = #tpu.pipeline_mode<synchronous>, transform_indices = @transform_4, window_bounds = array<i64: 1, 128>}, {pipeline_mode = #tpu.pipeline_mode<synchronous>, transform_indices = @transform_5, window_bounds = array<i64: 1152, 128>}, {pipeline_mode = #tpu.pipeline_mode<synchronous>, transform_indices = @transform_6, window_bounds = array<i64: 1, 128>}, {pipeline_mode = #tpu.pipeline_mode<synchronous>, transform_indices = @transform_7, window_bounds = array<i64: 128, 128>}, {pipeline_mode = #tpu.pipeline_mode<synchronous>, transform_indices = @transform_8, window_bounds = array<i64: 1, 128>}, {pipeline_mode = #tpu.pipeline_mode<synchronous>, transform_indices = @transform_9, window_bounds = array<i64: 1152, 256>}, {pipeline_mode = #tpu.pipeline_mode<synchronous>, transform_indices = @transform_10, window_bounds = array<i64: 1, 256>}, {transform_indices = @transform_11, window_bounds = array<i64: 1, 392, 128>}, {transform_indices = @transform_12, window_bounds = array<i64: 1, 392, 128>}, {transform_indices = @transform_13, window_bounds = array<i64: 1, 344, 128>}, {transform_indices = @transform_14, window_bounds = array<i64: 1, 144, 128>}, {transform_indices = @transform_15, window_bounds = array<i64: 1, 152, 128>}, {transform_indices = @transform_16, window_bounds = array<i64: 1, 96, 256>}]} {
    %cst = arith.constant 0.000000e+00 : f32
    %0 = vector.broadcast %cst : f32 to vector<392x128xf32>
    %c0 = arith.constant 0 : index
    %c0_0 = arith.constant 0 : index
    %c0_1 = arith.constant 0 : index
    %1 = vector.load %arg12[%c0, %c0_0, %c0_1] : memref<1x392x128xf32, #tpu.memory_space<vmem>>, vector<1x392x128xf32>
    %2 = vector.shape_cast %1 : vector<1x392x128xf32> to vector<392x128xf32>
    %3 = vector.shape_cast %0 : vector<392x128xf32> to vector<1x392x128xf32>
    tpu.vector_store %arg12[%c0, %c0_0, %c0_1], %3 {strides = array<i32>} : memref<1x392x128xf32, #tpu.memory_space<vmem>>, vector<1x392x128xf32>,
    %cst_2 = arith.constant 0.000000e+00 : f32
    %4 = vector.broadcast %cst_2 : f32 to vector<392x128xf32>
    %c0_3 = arith.constant 0 : index
    %c0_4 = arith.constant 0 : index
    %c0_5 = arith.constant 0 : index
    %5 = vector.load %arg13[%c0_3, %c0_4, %c0_5] : memref<1x392x128xf32, #tpu.memory_space<vmem>>, vector<1x392x128xf32>
    %6 = vector.shape_cast %5 : vector<1x392x128xf32> to vector<392x128xf32>
    %7 = vector.shape_cast %4 : vector<392x128xf32> to vector<1x392x128xf32>
    tpu.vector_store %arg13[%c0_3, %c0_4, %c0_5], %7 {strides = array<i32>} : memref<1x392x128xf32, #tpu.memory_space<vmem>>, vector<1x392x128xf32>,
    %cst_6 = arith.constant 0.000000e+00 : f32
    %8 = vector.broadcast %cst_6 : f32 to vector<344x128xf32>
    %c0_7 = arith.constant 0 : index
    %c0_8 = arith.constant 0 : index
    %c0_9 = arith.constant 0 : index
    %9 = vector.load %arg14[%c0_7, %c0_8, %c0_9] : memref<1x344x128xf32, #tpu.memory_space<vmem>>, vector<1x344x128xf32>
    %10 = vector.shape_cast %9 : vector<1x344x128xf32> to vector<344x128xf32>
    %11 = vector.shape_cast %8 : vector<344x128xf32> to vector<1x344x128xf32>
    tpu.vector_store %arg14[%c0_7, %c0_8, %c0_9], %11 {strides = array<i32>} : memref<1x344x128xf32, #tpu.memory_space<vmem>>, vector<1x344x128xf32>,
    %cst_10 = arith.constant 0.000000e+00 : f32
    %12 = vector.broadcast %cst_10 : f32 to vector<144x128xf32>
    %c0_11 = arith.constant 0 : index
    %c0_12 = arith.constant 0 : index
    %c0_13 = arith.constant 0 : index
    %13 = vector.load %arg15[%c0_11, %c0_12, %c0_13] : memref<1x144x128xf32, #tpu.memory_space<vmem>>, vector<1x144x128xf32>
    %14 = vector.shape_cast %13 : vector<1x144x128xf32> to vector<144x128xf32>
    %15 = vector.shape_cast %12 : vector<144x128xf32> to vector<1x144x128xf32>
    tpu.vector_store %arg15[%c0_11, %c0_12, %c0_13], %15 {strides = array<i32>} : memref<1x144x128xf32, #tpu.memory_space<vmem>>, vector<1x144x128xf32>,
    %cst_14 = arith.constant 0.000000e+00 : f32
    %16 = vector.broadcast %cst_14 : f32 to vector<152x128xf32>
    %c0_15 = arith.constant 0 : index
    %c0_16 = arith.constant 0 : index
    %c0_17 = arith.constant 0 : index
    %17 = vector.load %arg16[%c0_15, %c0_16, %c0_17] : memref<1x152x128xf32, #tpu.memory_space<vmem>>, vector<1x152x128xf32>
    %18 = vector.shape_cast %17 : vector<1x152x128xf32> to vector<152x128xf32>
    %19 = vector.shape_cast %16 : vector<152x128xf32> to vector<1x152x128xf32>
    tpu.vector_store %arg16[%c0_15, %c0_16, %c0_17], %19 {strides = array<i32>} : memref<1x152x128xf32, #tpu.memory_space<vmem>>, vector<1x152x128xf32>,
    %cst_18 = arith.constant 0.000000e+00 : f32
    %20 = vector.broadcast %cst_18 : f32 to vector<96x256xf32>
    %c0_19 = arith.constant 0 : index
    %c0_20 = arith.constant 0 : index
    %c0_21 = arith.constant 0 : index
    %21 = vector.load %arg17[%c0_19, %c0_20, %c0_21] : memref<1x96x256xf32, #tpu.memory_space<vmem>>, vector<1x96x256xf32>
    %22 = vector.shape_cast %21 : vector<1x96x256xf32> to vector<96x256xf32>
    %23 = vector.shape_cast %20 : vector<96x256xf32> to vector<1x96x256xf32>
    tpu.vector_store %arg17[%c0_19, %c0_20, %c0_21], %23 {strides = array<i32>} : memref<1x96x256xf32, #tpu.memory_space<vmem>>, vector<1x96x256xf32>,
    %24 = tpu.iota {dimensions = array<i32: 0>} : vector<384x128xi32>
    %c24_i32 = arith.constant 24 : i32
    %c0_i32 = arith.constant 0 : i32
    %25 = arith.cmpi eq, %c24_i32, %c0_i32 : i32
    %c1_i32 = arith.constant 1 : i32
    %26 = arith.select %25, %c1_i32, %c24_i32 : i32
    %27 = vector.broadcast %26 : i32 to vector<384x128xi32>
    %28 = arith.remsi %24, %27 : vector<384x128xi32>
    %c0_i32_22 = arith.constant 0 : i32
    %29 = vector.broadcast %c0_i32_22 : i32 to vector<384x128xi32>
    %30 = arith.cmpi ne, %28, %29 : vector<384x128xi32>
    %c0_i32_23 = arith.constant 0 : i32
    %31 = vector.broadcast %c0_i32_23 : i32 to vector<384x128xi32>
    %32 = arith.cmpi slt, %28, %31 : vector<384x128xi32>
    %c0_i32_24 = arith.constant 0 : i32
    %33 = arith.cmpi slt, %26, %c0_i32_24 : i32
    %34 = vector.broadcast %33 : i1 to vector<384x128xi1>
    %35 = vector.broadcast %34 : vector<384x128xi1> to vector<384x128xi1>
    %36 = arith.xori %32, %35 : vector<384x128xi1>
    %37 = arith.andi %36, %30 : vector<384x128xi1>
    %38 = vector.broadcast %26 : i32 to vector<384x128xi32>
    %39 = arith.addi %28, %38 : vector<384x128xi32>
    %40 = arith.select %37, %39, %28 : vector<384x128xi1>, vector<384x128xi32>
    %c16_i32 = arith.constant 16 : i32
    %41 = vector.broadcast %c16_i32 : i32 to vector<384x128xi32>
    %42 = arith.cmpi slt, %40, %41 : vector<384x128xi32>
    %c0_25 = arith.constant 0 : index
    %c0_26 = arith.constant 0 : index
    %c0_27 = arith.constant 0 : index
    %43 = vector.load %arg1[%c0_25, %c0_26, %c0_27] : memref<1x416x128xf32, #tpu.memory_space<vmem>>, vector<1x384x128xf32>
    %44 = vector.shape_cast %43 : vector<1x384x128xf32> to vector<384x128xf32>
    %c0_28 = arith.constant 0 : index
    %c1 = arith.constant 1 : index
    %c0_29 = arith.constant 0 : index
    %45 = vector.load %arg1[%c0_28, %c1, %c0_29] : memref<1x416x128xf32, #tpu.memory_space<vmem>>, vector<1x384x128xf32>
    %46 = vector.shape_cast %45 : vector<1x384x128xf32> to vector<384x128xf32>
    %c0_30 = arith.constant 0 : index
    %c24 = arith.constant 24 : index
    %c0_31 = arith.constant 0 : index
    %47 = vector.load %arg1[%c0_30, %c24, %c0_31] : memref<1x416x128xf32, #tpu.memory_space<vmem>>, vector<1x384x128xf32>
    %48 = vector.shape_cast %47 : vector<1x384x128xf32> to vector<384x128xf32>
    %c0_32 = arith.constant 0 : index
    %c25 = arith.constant 25 : index
    %c0_33 = arith.constant 0 : index
    %49 = vector.load %arg1[%c0_32, %c25, %c0_33] : memref<1x416x128xf32, #tpu.memory_space<vmem>>, vector<1x384x128xf32>
    %50 = vector.shape_cast %49 : vector<1x384x128xf32> to vector<384x128xf32>
    %51 = tpu.concatenate %44, %46, %48, %50 in 1 : vector<384x128xf32>, vector<384x128xf32>, vector<384x128xf32>, vector<384x128xf32> -> vector<384x512xf32>
    %c0_34 = arith.constant 0 : index
    %c0_35 = arith.constant 0 : index
    %52 = vector.load %arg2[%c0_34, %c0_35] : memref<512x128xf32, #tpu.memory_space<vmem>>, vector<512x128xf32>
    %cst_36 = arith.constant dense<0.000000e+00> : vector<384x128xf32>
    %53 = tpu.matmul %51, %52, %cst_36 {dimension_numbers = #tpu.dot_dimension_numbers<[1], [0], [0], [1], [0, 0, 1, 1], [], []>} : vector<384x512xf32>, vector<512x128xf32>, vector<384x128xf32> -> vector<384x128xf32>
    %c0_37 = arith.constant 0 : index
    %c0_38 = arith.constant 0 : index
    %54 = vector.load %arg3[%c0_37, %c0_38] : memref<1x128xf32, #tpu.memory_space<vmem>>, vector<1x128xf32>
    %55 = vector.broadcast %54 : vector<1x128xf32> to vector<384x128xf32>
    %56 = arith.addf %53, %55 : vector<384x128xf32>
    %cst_39 = arith.constant 0.000000e+00 : f32
    %57 = vector.broadcast %cst_39 : f32 to vector<384x128xf32>
    %58 = arith.maximumf %56, %57 : vector<384x128xf32>
    %c0_i32_40 = arith.constant 0 : i32
    %59 = arith.sitofp %c0_i32_40 : i32 to f32
    %60 = vector.broadcast %59 : f32 to vector<384x128xf32>
    %61 = arith.select %42, %58, %60 : vector<384x128xi1>, vector<384x128xf32>
    %c0_41 = arith.constant 0 : index
    %c0_42 = arith.constant 0 : index
    %c0_43 = arith.constant 0 : index
    %62 = vector.load %arg12[%c0_41, %c0_42, %c0_43] : memref<1x392x128xf32, #tpu.memory_space<vmem>>, vector<1x384x128xf32>
    %63 = vector.shape_cast %62 : vector<1x384x128xf32> to vector<384x128xf32>
    %64 = vector.shape_cast %61 : vector<384x128xf32> to vector<1x384x128xf32>
    tpu.vector_store %arg12[%c0_41, %c0_42, %c0_43], %64 {strides = array<i32>} : memref<1x392x128xf32, #tpu.memory_space<vmem>>, vector<1x384x128xf32>,
    %65 = tpu.iota {dimensions = array<i32: 0>} : vector<336x128xi32>
    %c24_i32_44 = arith.constant 24 : i32
    %c0_i32_45 = arith.constant 0 : i32
    %66 = arith.cmpi eq, %c24_i32_44, %c0_i32_45 : i32
    %c1_i32_46 = arith.constant 1 : i32
    %67 = arith.select %66, %c1_i32_46, %c24_i32_44 : i32
    %68 = vector.broadcast %67 : i32 to vector<336x128xi32>
    %69 = arith.remsi %65, %68 : vector<336x128xi32>
    %c0_i32_47 = arith.constant 0 : i32
    %70 = vector.broadcast %c0_i32_47 : i32 to vector<336x128xi32>
    %71 = arith.cmpi ne, %69, %70 : vector<336x128xi32>
    %c0_i32_48 = arith.constant 0 : i32
    %72 = vector.broadcast %c0_i32_48 : i32 to vector<336x128xi32>
    %73 = arith.cmpi slt, %69, %72 : vector<336x128xi32>
    %c0_i32_49 = arith.constant 0 : i32
    %74 = arith.cmpi slt, %67, %c0_i32_49 : i32
    %75 = vector.broadcast %74 : i1 to vector<336x128xi1>
    %76 = vector.broadcast %75 : vector<336x128xi1> to vector<336x128xi1>
    %77 = arith.xori %73, %76 : vector<336x128xi1>
    %78 = arith.andi %77, %71 : vector<336x128xi1>
    %79 = vector.broadcast %67 : i32 to vector<336x128xi32>
    %80 = arith.addi %69, %79 : vector<336x128xi32>
    %81 = arith.select %78, %80, %69 : vector<336x128xi1>, vector<336x128xi32>
    %c14_i32 = arith.constant 14 : i32
    %82 = vector.broadcast %c14_i32 : i32 to vector<336x128xi32>
    %83 = arith.cmpi slt, %81, %82 : vector<336x128xi32>
    %c0_50 = arith.constant 0 : index
    %c0_51 = arith.constant 0 : index
    %c0_52 = arith.constant 0 : index
    %84 = vector.load %arg12[%c0_50, %c0_51, %c0_52] : memref<1x392x128xf32, #tpu.memory_space<vmem>>, vector<1x336x128xf32>
    %85 = vector.shape_cast %84 : vector<1x336x128xf32> to vector<336x128xf32>
    %c0_53 = arith.constant 0 : index
    %c1_54 = arith.constant 1 : index
    %c0_55 = arith.constant 0 : index
    %86 = vector.load %arg12[%c0_53, %c1_54, %c0_55] : memref<1x392x128xf32, #tpu.memory_space<vmem>>, vector<1x336x128xf32>
    %87 = vector.shape_cast %86 : vector<1x336x128xf32> to vector<336x128xf32>
    %c0_56 = arith.constant 0 : index
    %c2 = arith.constant 2 : index
    %c0_57 = arith.constant 0 : index
    %88 = vector.load %arg12[%c0_56, %c2, %c0_57] : memref<1x392x128xf32, #tpu.memory_space<vmem>>, vector<1x336x128xf32>
    %89 = vector.shape_cast %88 : vector<1x336x128xf32> to vector<336x128xf32>
    %c0_58 = arith.constant 0 : index
    %c24_59 = arith.constant 24 : index
    %c0_60 = arith.constant 0 : index
    %90 = vector.load %arg12[%c0_58, %c24_59, %c0_60] : memref<1x392x128xf32, #tpu.memory_space<vmem>>, vector<1x336x128xf32>
    %91 = vector.shape_cast %90 : vector<1x336x128xf32> to vector<336x128xf32>
    %c0_61 = arith.constant 0 : index
    %c25_62 = arith.constant 25 : index
    %c0_63 = arith.constant 0 : index
    %92 = vector.load %arg12[%c0_61, %c25_62, %c0_63] : memref<1x392x128xf32, #tpu.memory_space<vmem>>, vector<1x336x128xf32>
    %93 = vector.shape_cast %92 : vector<1x336x128xf32> to vector<336x128xf32>
    %c0_64 = arith.constant 0 : index
    %c26 = arith.constant 26 : index
    %c0_65 = arith.constant 0 : index
    %94 = vector.load %arg12[%c0_64, %c26, %c0_65] : memref<1x392x128xf32, #tpu.memory_space<vmem>>, vector<1x336x128xf32>
    %95 = vector.shape_cast %94 : vector<1x336x128xf32> to vector<336x128xf32>
    %c0_66 = arith.constant 0 : index
    %c48 = arith.constant 48 : index
    %c0_67 = arith.constant 0 : index
    %96 = vector.load %arg12[%c0_66, %c48, %c0_67] : memref<1x392x128xf32, #tpu.memory_space<vmem>>, vector<1x336x128xf32>
    %97 = vector.shape_cast %96 : vector<1x336x128xf32> to vector<336x128xf32>
    %c0_68 = arith.constant 0 : index
    %c49 = arith.constant 49 : index
    %c0_69 = arith.constant 0 : index
    %98 = vector.load %arg12[%c0_68, %c49, %c0_69] : memref<1x392x128xf32, #tpu.memory_space<vmem>>, vector<1x336x128xf32>
    %99 = vector.shape_cast %98 : vector<1x336x128xf32> to vector<336x128xf32>
    %c0_70 = arith.constant 0 : index
    %c50 = arith.constant 50 : index
    %c0_71 = arith.constant 0 : index
    %100 = vector.load %arg12[%c0_70, %c50, %c0_71] : memref<1x392x128xf32, #tpu.memory_space<vmem>>, vector<1x336x128xf32>
    %101 = vector.shape_cast %100 : vector<1x336x128xf32> to vector<336x128xf32>
    %102 = tpu.concatenate %85, %87, %89, %91, %93, %95, %97, %99, %101 in 1 : vector<336x128xf32>, vector<336x128xf32>, vector<336x128xf32>, vector<336x128xf32>, vector<336x128xf32>, vector<336x128xf32>, vector<336x128xf32>, vector<336x128xf32>, vector<336x128xf32> -> vector<336x1152xf32>
    %c0_72 = arith.constant 0 : index
    %c0_73 = arith.constant 0 : index
    %103 = vector.load %arg4[%c0_72, %c0_73] : memref<1152x128xf32, #tpu.memory_space<vmem>>, vector<1152x128xf32>
    %cst_74 = arith.constant dense<0.000000e+00> : vector<336x128xf32>
    %104 = tpu.matmul %102, %103, %cst_74 {dimension_numbers = #tpu.dot_dimension_numbers<[1], [0], [0], [1], [0, 0, 1, 1], [], []>} : vector<336x1152xf32>, vector<1152x128xf32>, vector<336x128xf32> -> vector<336x128xf32>
    %c0_75 = arith.constant 0 : index
    %c0_76 = arith.constant 0 : index
    %105 = vector.load %arg5[%c0_75, %c0_76] : memref<1x128xf32, #tpu.memory_space<vmem>>, vector<1x128xf32>
    %106 = vector.broadcast %105 : vector<1x128xf32> to vector<336x128xf32>
    %107 = arith.addf %104, %106 : vector<336x128xf32>
    %cst_77 = arith.constant 0.000000e+00 : f32
    %108 = vector.broadcast %cst_77 : f32 to vector<336x128xf32>
    %109 = arith.maximumf %107, %108 : vector<336x128xf32>
    %c0_i32_78 = arith.constant 0 : i32
    %110 = arith.sitofp %c0_i32_78 : i32 to f32
    %111 = vector.broadcast %110 : f32 to vector<336x128xf32>
    %112 = arith.select %83, %109, %111 : vector<336x128xi1>, vector<336x128xf32>
    %c0_79 = arith.constant 0 : index
    %c25_80 = arith.constant 25 : index
    %c0_81 = arith.constant 0 : index
    %113 = vector.load %arg13[%c0_79, %c25_80, %c0_81] : memref<1x392x128xf32, #tpu.memory_space<vmem>>, vector<1x336x128xf32>
    %114 = vector.shape_cast %113 : vector<1x336x128xf32> to vector<336x128xf32>
    %115 = vector.shape_cast %112 : vector<336x128xf32> to vector<1x336x128xf32>
    tpu.vector_store %arg13[%c0_79, %c25_80, %c0_81], %115 {strides = array<i32>} : memref<1x392x128xf32, #tpu.memory_space<vmem>>, vector<1x336x128xf32>,
    %116 = tpu.iota {dimensions = array<i32: 0>} : vector<336x128xi32>
    %c24_i32_82 = arith.constant 24 : i32
    %c0_i32_83 = arith.constant 0 : i32
    %117 = arith.cmpi eq, %c24_i32_82, %c0_i32_83 : i32
    %c1_i32_84 = arith.constant 1 : i32
    %118 = arith.select %117, %c1_i32_84, %c24_i32_82 : i32
    %119 = vector.broadcast %118 : i32 to vector<336x128xi32>
    %120 = arith.remsi %116, %119 : vector<336x128xi32>
    %c0_i32_85 = arith.constant 0 : i32
    %121 = vector.broadcast %c0_i32_85 : i32 to vector<336x128xi32>
    %122 = arith.cmpi ne, %120, %121 : vector<336x128xi32>
    %c0_i32_86 = arith.constant 0 : i32
    %123 = vector.broadcast %c0_i32_86 : i32 to vector<336x128xi32>
    %124 = arith.cmpi slt, %120, %123 : vector<336x128xi32>
    %c0_i32_87 = arith.constant 0 : i32
    %125 = arith.cmpi slt, %118, %c0_i32_87 : i32
    %126 = vector.broadcast %125 : i1 to vector<336x128xi1>
    %127 = vector.broadcast %126 : vector<336x128xi1> to vector<336x128xi1>
    %128 = arith.xori %124, %127 : vector<336x128xi1>
    %129 = arith.andi %128, %122 : vector<336x128xi1>
    %130 = vector.broadcast %118 : i32 to vector<336x128xi32>
    %131 = arith.addi %120, %130 : vector<336x128xi32>
    %132 = arith.select %129, %131, %120 : vector<336x128xi1>, vector<336x128xi32>
    %c14_i32_88 = arith.constant 14 : i32
    %133 = vector.broadcast %c14_i32_88 : i32 to vector<336x128xi32>
    %134 = arith.cmpi slt, %132, %133 : vector<336x128xi32>
    %c0_89 = arith.constant 0 : index
    %c0_90 = arith.constant 0 : index
    %c0_91 = arith.constant 0 : index
    %135 = vector.load %arg13[%c0_89, %c0_90, %c0_91] : memref<1x392x128xf32, #tpu.memory_space<vmem>>, vector<1x336x128xf32>
    %136 = vector.shape_cast %135 : vector<1x336x128xf32> to vector<336x128xf32>
    %c0_92 = arith.constant 0 : index
    %c1_93 = arith.constant 1 : index
    %c0_94 = arith.constant 0 : index
    %137 = vector.load %arg13[%c0_92, %c1_93, %c0_94] : memref<1x392x128xf32, #tpu.memory_space<vmem>>, vector<1x336x128xf32>
    %138 = vector.shape_cast %137 : vector<1x336x128xf32> to vector<336x128xf32>
    %c0_95 = arith.constant 0 : index
    %c2_96 = arith.constant 2 : index
    %c0_97 = arith.constant 0 : index
    %139 = vector.load %arg13[%c0_95, %c2_96, %c0_97] : memref<1x392x128xf32, #tpu.memory_space<vmem>>, vector<1x336x128xf32>
    %140 = vector.shape_cast %139 : vector<1x336x128xf32> to vector<336x128xf32>
    %c0_98 = arith.constant 0 : index
    %c24_99 = arith.constant 24 : index
    %c0_100 = arith.constant 0 : index
    %141 = vector.load %arg13[%c0_98, %c24_99, %c0_100] : memref<1x392x128xf32, #tpu.memory_space<vmem>>, vector<1x336x128xf32>
    %142 = vector.shape_cast %141 : vector<1x336x128xf32> to vector<336x128xf32>
    %c0_101 = arith.constant 0 : index
    %c25_102 = arith.constant 25 : index
    %c0_103 = arith.constant 0 : index
    %143 = vector.load %arg13[%c0_101, %c25_102, %c0_103] : memref<1x392x128xf32, #tpu.memory_space<vmem>>, vector<1x336x128xf32>
    %144 = vector.shape_cast %143 : vector<1x336x128xf32> to vector<336x128xf32>
    %c0_104 = arith.constant 0 : index
    %c26_105 = arith.constant 26 : index
    %c0_106 = arith.constant 0 : index
    %145 = vector.load %arg13[%c0_104, %c26_105, %c0_106] : memref<1x392x128xf32, #tpu.memory_space<vmem>>, vector<1x336x128xf32>
    %146 = vector.shape_cast %145 : vector<1x336x128xf32> to vector<336x128xf32>
    %c0_107 = arith.constant 0 : index
    %c48_108 = arith.constant 48 : index
    %c0_109 = arith.constant 0 : index
    %147 = vector.load %arg13[%c0_107, %c48_108, %c0_109] : memref<1x392x128xf32, #tpu.memory_space<vmem>>, vector<1x336x128xf32>
    %148 = vector.shape_cast %147 : vector<1x336x128xf32> to vector<336x128xf32>
    %c0_110 = arith.constant 0 : index
    %c49_111 = arith.constant 49 : index
    %c0_112 = arith.constant 0 : index
    %149 = vector.load %arg13[%c0_110, %c49_111, %c0_112] : memref<1x392x128xf32, #tpu.memory_space<vmem>>, vector<1x336x128xf32>
    %150 = vector.shape_cast %149 : vector<1x336x128xf32> to vector<336x128xf32>
    %c0_113 = arith.constant 0 : index
    %c50_114 = arith.constant 50 : index
    %c0_115 = arith.constant 0 : index
    %151 = vector.load %arg13[%c0_113, %c50_114, %c0_115] : memref<1x392x128xf32, #tpu.memory_space<vmem>>, vector<1x336x128xf32>
    %152 = vector.shape_cast %151 : vector<1x336x128xf32> to vector<336x128xf32>
    %153 = tpu.concatenate %136, %138, %140, %142, %144, %146, %148, %150, %152 in 1 : vector<336x128xf32>, vector<336x128xf32>, vector<336x128xf32>, vector<336x128xf32>, vector<336x128xf32>, vector<336x128xf32>, vector<336x128xf32>, vector<336x128xf32>, vector<336x128xf32> -> vector<336x1152xf32>
    %c0_116 = arith.constant 0 : index
    %c0_117 = arith.constant 0 : index
    %154 = vector.load %arg6[%c0_116, %c0_117] : memref<1152x128xf32, #tpu.memory_space<vmem>>, vector<1152x128xf32>
    %cst_118 = arith.constant dense<0.000000e+00> : vector<336x128xf32>
    %155 = tpu.matmul %153, %154, %cst_118 {dimension_numbers = #tpu.dot_dimension_numbers<[1], [0], [0], [1], [0, 0, 1, 1], [], []>} : vector<336x1152xf32>, vector<1152x128xf32>, vector<336x128xf32> -> vector<336x128xf32>
    %c0_119 = arith.constant 0 : index
    %c0_120 = arith.constant 0 : index
    %156 = vector.load %arg7[%c0_119, %c0_120] : memref<1x128xf32, #tpu.memory_space<vmem>>, vector<1x128xf32>
    %157 = vector.broadcast %156 : vector<1x128xf32> to vector<336x128xf32>
    %158 = arith.addf %155, %157 : vector<336x128xf32>
    %cst_121 = arith.constant 0.000000e+00 : f32
    %159 = vector.broadcast %cst_121 : f32 to vector<336x128xf32>
    %160 = arith.maximumf %158, %159 : vector<336x128xf32>
    %c0_i32_122 = arith.constant 0 : i32
    %161 = arith.sitofp %c0_i32_122 : i32 to f32
    %162 = vector.broadcast %161 : f32 to vector<336x128xf32>
    %163 = arith.select %134, %160, %162 : vector<336x128xi1>, vector<336x128xf32>
    %c0_123 = arith.constant 0 : index
    %c0_124 = arith.constant 0 : index
    %c0_125 = arith.constant 0 : index
    %164 = vector.load %arg14[%c0_123, %c0_124, %c0_125] : memref<1x344x128xf32, #tpu.memory_space<vmem>>, vector<1x336x128xf32>
    %165 = vector.shape_cast %164 : vector<1x336x128xf32> to vector<336x128xf32>
    %166 = vector.shape_cast %163 : vector<336x128xf32> to vector<1x336x128xf32>
    tpu.vector_store %arg14[%c0_123, %c0_124, %c0_125], %166 {strides = array<i32>} : memref<1x344x128xf32, #tpu.memory_space<vmem>>, vector<1x336x128xf32>,
    %167 = tpu.iota {dimensions = array<i32: 0>} : vector<144x128xi32>
    %c24_i32_126 = arith.constant 24 : i32
    %c0_i32_127 = arith.constant 0 : i32
    %168 = arith.cmpi eq, %c24_i32_126, %c0_i32_127 : i32
    %c1_i32_128 = arith.constant 1 : i32
    %169 = arith.select %168, %c1_i32_128, %c24_i32_126 : i32
    %170 = vector.broadcast %169 : i32 to vector<144x128xi32>
    %171 = arith.remsi %167, %170 : vector<144x128xi32>
    %c0_i32_129 = arith.constant 0 : i32
    %172 = vector.broadcast %c0_i32_129 : i32 to vector<144x128xi32>
    %173 = arith.cmpi ne, %171, %172 : vector<144x128xi32>
    %c0_i32_130 = arith.constant 0 : i32
    %174 = vector.broadcast %c0_i32_130 : i32 to vector<144x128xi32>
    %175 = arith.cmpi slt, %171, %174 : vector<144x128xi32>
    %c0_i32_131 = arith.constant 0 : i32
    %176 = arith.cmpi slt, %169, %c0_i32_131 : i32
    %177 = vector.broadcast %176 : i1 to vector<144x128xi1>
    %178 = vector.broadcast %177 : vector<144x128xi1> to vector<144x128xi1>
    %179 = arith.xori %175, %178 : vector<144x128xi1>
    %180 = arith.andi %179, %173 : vector<144x128xi1>
    %181 = vector.broadcast %169 : i32 to vector<144x128xi32>
    %182 = arith.addi %171, %181 : vector<144x128xi32>
    %183 = arith.select %180, %182, %171 : vector<144x128xi1>, vector<144x128xi32>
    %c6_i32 = arith.constant 6 : i32
    %184 = vector.broadcast %c6_i32 : i32 to vector<144x128xi32>
    %185 = arith.cmpi slt, %183, %184 : vector<144x128xi32>
    %c0_132 = arith.constant 0 : index
    %c0_133 = arith.constant 0 : index
    %c0_134 = arith.constant 0 : index
    %186 = tpu.strided_load %arg14[%c0_132, %c0_133, %c0_134] {strides = array<i32: 1, 2, 1>} : memref<1x344x128xf32, #tpu.memory_space<vmem>>, vector<1x144x128xf32>
    %187 = vector.shape_cast %186 : vector<1x144x128xf32> to vector<144x128xf32>
    %c0_135 = arith.constant 0 : index
    %c1_136 = arith.constant 1 : index
    %c0_137 = arith.constant 0 : index
    %188 = tpu.strided_load %arg14[%c0_135, %c1_136, %c0_137] {strides = array<i32: 1, 2, 1>} : memref<1x344x128xf32, #tpu.memory_space<vmem>>, vector<1x144x128xf32>
    %189 = vector.shape_cast %188 : vector<1x144x128xf32> to vector<144x128xf32>
    %190 = arith.maximumf %187, %189 : vector<144x128xf32>
    %c0_138 = arith.constant 0 : index
    %c2_139 = arith.constant 2 : index
    %c0_140 = arith.constant 0 : index
    %191 = tpu.strided_load %arg14[%c0_138, %c2_139, %c0_140] {strides = array<i32: 1, 2, 1>} : memref<1x344x128xf32, #tpu.memory_space<vmem>>, vector<1x144x128xf32>
    %192 = vector.shape_cast %191 : vector<1x144x128xf32> to vector<144x128xf32>
    %193 = arith.maximumf %190, %192 : vector<144x128xf32>
    %c0_141 = arith.constant 0 : index
    %c24_142 = arith.constant 24 : index
    %c0_143 = arith.constant 0 : index
    %194 = tpu.strided_load %arg14[%c0_141, %c24_142, %c0_143] {strides = array<i32: 1, 2, 1>} : memref<1x344x128xf32, #tpu.memory_space<vmem>>, vector<1x144x128xf32>
    %195 = vector.shape_cast %194 : vector<1x144x128xf32> to vector<144x128xf32>
    %196 = arith.maximumf %193, %195 : vector<144x128xf32>
    %c0_144 = arith.constant 0 : index
    %c25_145 = arith.constant 25 : index
    %c0_146 = arith.constant 0 : index
    %197 = tpu.strided_load %arg14[%c0_144, %c25_145, %c0_146] {strides = array<i32: 1, 2, 1>} : memref<1x344x128xf32, #tpu.memory_space<vmem>>, vector<1x144x128xf32>
    %198 = vector.shape_cast %197 : vector<1x144x128xf32> to vector<144x128xf32>
    %199 = arith.maximumf %196, %198 : vector<144x128xf32>
    %c0_147 = arith.constant 0 : index
    %c26_148 = arith.constant 26 : index
    %c0_149 = arith.constant 0 : index
    %200 = tpu.strided_load %arg14[%c0_147, %c26_148, %c0_149] {strides = array<i32: 1, 2, 1>} : memref<1x344x128xf32, #tpu.memory_space<vmem>>, vector<1x144x128xf32>
    %201 = vector.shape_cast %200 : vector<1x144x128xf32> to vector<144x128xf32>
    %202 = arith.maximumf %199, %201 : vector<144x128xf32>
    %c0_150 = arith.constant 0 : index
    %c48_151 = arith.constant 48 : index
    %c0_152 = arith.constant 0 : index
    %203 = tpu.strided_load %arg14[%c0_150, %c48_151, %c0_152] {strides = array<i32: 1, 2, 1>} : memref<1x344x128xf32, #tpu.memory_space<vmem>>, vector<1x144x128xf32>
    %204 = vector.shape_cast %203 : vector<1x144x128xf32> to vector<144x128xf32>
    %205 = arith.maximumf %202, %204 : vector<144x128xf32>
    %c0_153 = arith.constant 0 : index
    %c49_154 = arith.constant 49 : index
    %c0_155 = arith.constant 0 : index
    %206 = tpu.strided_load %arg14[%c0_153, %c49_154, %c0_155] {strides = array<i32: 1, 2, 1>} : memref<1x344x128xf32, #tpu.memory_space<vmem>>, vector<1x144x128xf32>
    %207 = vector.shape_cast %206 : vector<1x144x128xf32> to vector<144x128xf32>
    %208 = arith.maximumf %205, %207 : vector<144x128xf32>
    %c0_156 = arith.constant 0 : index
    %c50_157 = arith.constant 50 : index
    %c0_158 = arith.constant 0 : index
    %209 = tpu.strided_load %arg14[%c0_156, %c50_157, %c0_158] {strides = array<i32: 1, 2, 1>} : memref<1x344x128xf32, #tpu.memory_space<vmem>>, vector<1x144x128xf32>
    %210 = vector.shape_cast %209 : vector<1x144x128xf32> to vector<144x128xf32>
    %211 = arith.maximumf %208, %210 : vector<144x128xf32>
    %c0_i32_159 = arith.constant 0 : i32
    %212 = arith.sitofp %c0_i32_159 : i32 to f32
    %213 = vector.broadcast %212 : f32 to vector<144x128xf32>
    %214 = arith.select %185, %211, %213 : vector<144x128xi1>, vector<144x128xf32>
    %c0_160 = arith.constant 0 : index
    %c0_161 = arith.constant 0 : index
    %c0_162 = arith.constant 0 : index
    %215 = vector.load %arg15[%c0_160, %c0_161, %c0_162] : memref<1x144x128xf32, #tpu.memory_space<vmem>>, vector<1x144x128xf32>
    %216 = vector.shape_cast %215 : vector<1x144x128xf32> to vector<144x128xf32>
    %217 = vector.shape_cast %214 : vector<144x128xf32> to vector<1x144x128xf32>
    tpu.vector_store %arg15[%c0_160, %c0_161, %c0_162], %217 {strides = array<i32>} : memref<1x144x128xf32, #tpu.memory_space<vmem>>, vector<1x144x128xf32>,
    %218 = tpu.iota {dimensions = array<i32: 0>} : vector<144x128xi32>
    %c24_i32_163 = arith.constant 24 : i32
    %c0_i32_164 = arith.constant 0 : i32
    %219 = arith.cmpi eq, %c24_i32_163, %c0_i32_164 : i32
    %c1_i32_165 = arith.constant 1 : i32
    %220 = arith.select %219, %c1_i32_165, %c24_i32_163 : i32
    %221 = vector.broadcast %220 : i32 to vector<144x128xi32>
    %222 = arith.remsi %218, %221 : vector<144x128xi32>
    %c0_i32_166 = arith.constant 0 : i32
    %223 = vector.broadcast %c0_i32_166 : i32 to vector<144x128xi32>
    %224 = arith.cmpi ne, %222, %223 : vector<144x128xi32>
    %c0_i32_167 = arith.constant 0 : i32
    %225 = vector.broadcast %c0_i32_167 : i32 to vector<144x128xi32>
    %226 = arith.cmpi slt, %222, %225 : vector<144x128xi32>
    %c0_i32_168 = arith.constant 0 : i32
    %227 = arith.cmpi slt, %220, %c0_i32_168 : i32
    %228 = vector.broadcast %227 : i1 to vector<144x128xi1>
    %229 = vector.broadcast %228 : vector<144x128xi1> to vector<144x128xi1>
    %230 = arith.xori %226, %229 : vector<144x128xi1>
    %231 = arith.andi %230, %224 : vector<144x128xi1>
    %232 = vector.broadcast %220 : i32 to vector<144x128xi32>
    %233 = arith.addi %222, %232 : vector<144x128xi32>
    %234 = arith.select %231, %233, %222 : vector<144x128xi1>, vector<144x128xi32>
    %c6_i32_169 = arith.constant 6 : i32
    %235 = vector.broadcast %c6_i32_169 : i32 to vector<144x128xi32>
    %236 = arith.cmpi slt, %234, %235 : vector<144x128xi32>
    %c0_170 = arith.constant 0 : index
    %c0_171 = arith.constant 0 : index
    %c0_172 = arith.constant 0 : index
    %237 = vector.load %arg15[%c0_170, %c0_171, %c0_172] : memref<1x144x128xf32, #tpu.memory_space<vmem>>, vector<1x144x128xf32>
    %238 = vector.shape_cast %237 : vector<1x144x128xf32> to vector<144x128xf32>
    %c0_173 = arith.constant 0 : index
    %c0_174 = arith.constant 0 : index
    %239 = vector.load %arg8[%c0_173, %c0_174] : memref<128x128xf32, #tpu.memory_space<vmem>>, vector<128x128xf32>
    %cst_175 = arith.constant dense<0.000000e+00> : vector<144x128xf32>
    %240 = tpu.matmul %238, %239, %cst_175 {dimension_numbers = #tpu.dot_dimension_numbers<[1], [0], [0], [1], [0, 0, 1, 1], [], []>} : vector<144x128xf32>, vector<128x128xf32>, vector<144x128xf32> -> vector<144x128xf32>
    %c0_176 = arith.constant 0 : index
    %c0_177 = arith.constant 0 : index
    %241 = vector.load %arg9[%c0_176, %c0_177] : memref<1x128xf32, #tpu.memory_space<vmem>>, vector<1x128xf32>
    %242 = vector.broadcast %241 : vector<1x128xf32> to vector<144x128xf32>
    %243 = arith.addf %240, %242 : vector<144x128xf32>
    %cst_178 = arith.constant 0.000000e+00 : f32
    %244 = vector.broadcast %cst_178 : f32 to vector<144x128xf32>
    %245 = arith.maximumf %243, %244 : vector<144x128xf32>
    %c0_i32_179 = arith.constant 0 : i32
    %246 = arith.sitofp %c0_i32_179 : i32 to f32
    %247 = vector.broadcast %246 : f32 to vector<144x128xf32>
    %248 = arith.select %236, %245, %247 : vector<144x128xi1>, vector<144x128xf32>
    %c0_180 = arith.constant 0 : index
    %c0_181 = arith.constant 0 : index
    %c0_182 = arith.constant 0 : index
    %249 = vector.load %arg16[%c0_180, %c0_181, %c0_182] : memref<1x152x128xf32, #tpu.memory_space<vmem>>, vector<1x144x128xf32>
    %250 = vector.shape_cast %249 : vector<1x144x128xf32> to vector<144x128xf32>
    %251 = vector.shape_cast %248 : vector<144x128xf32> to vector<1x144x128xf32>
    tpu.vector_store %arg16[%c0_180, %c0_181, %c0_182], %251 {strides = array<i32>} : memref<1x152x128xf32, #tpu.memory_space<vmem>>, vector<1x144x128xf32>,
    %252 = tpu.iota {dimensions = array<i32: 0>} : vector<96x256xi32>
    %c24_i32_183 = arith.constant 24 : i32
    %c0_i32_184 = arith.constant 0 : i32
    %253 = arith.cmpi eq, %c24_i32_183, %c0_i32_184 : i32
    %c1_i32_185 = arith.constant 1 : i32
    %254 = arith.select %253, %c1_i32_185, %c24_i32_183 : i32
    %255 = vector.broadcast %254 : i32 to vector<96x256xi32>
    %256 = arith.remsi %252, %255 : vector<96x256xi32>
    %c0_i32_186 = arith.constant 0 : i32
    %257 = vector.broadcast %c0_i32_186 : i32 to vector<96x256xi32>
    %258 = arith.cmpi ne, %256, %257 : vector<96x256xi32>
    %c0_i32_187 = arith.constant 0 : i32
    %259 = vector.broadcast %c0_i32_187 : i32 to vector<96x256xi32>
    %260 = arith.cmpi slt, %256, %259 : vector<96x256xi32>
    %c0_i32_188 = arith.constant 0 : i32
    %261 = arith.cmpi slt, %254, %c0_i32_188 : i32
    %262 = vector.broadcast %261 : i1 to vector<96x256xi1>
    %263 = vector.broadcast %262 : vector<96x256xi1> to vector<96x256xi1>
    %264 = arith.xori %260, %263 : vector<96x256xi1>
    %265 = arith.andi %264, %258 : vector<96x256xi1>
    %266 = vector.broadcast %254 : i32 to vector<96x256xi32>
    %267 = arith.addi %256, %266 : vector<96x256xi32>
    %268 = arith.select %265, %267, %256 : vector<96x256xi1>, vector<96x256xi32>
    %c4_i32 = arith.constant 4 : i32
    %269 = vector.broadcast %c4_i32 : i32 to vector<96x256xi32>
    %270 = arith.cmpi slt, %268, %269 : vector<96x256xi32>
    %c0_189 = arith.constant 0 : index
    %c0_190 = arith.constant 0 : index
    %c0_191 = arith.constant 0 : index
    %271 = vector.load %arg16[%c0_189, %c0_190, %c0_191] : memref<1x152x128xf32, #tpu.memory_space<vmem>>, vector<1x96x128xf32>
    %272 = vector.shape_cast %271 : vector<1x96x128xf32> to vector<96x128xf32>
    %c0_192 = arith.constant 0 : index
    %c1_193 = arith.constant 1 : index
    %c0_194 = arith.constant 0 : index
    %273 = vector.load %arg16[%c0_192, %c1_193, %c0_194] : memref<1x152x128xf32, #tpu.memory_space<vmem>>, vector<1x96x128xf32>
    %274 = vector.shape_cast %273 : vector<1x96x128xf32> to vector<96x128xf32>
    %c0_195 = arith.constant 0 : index
    %c2_196 = arith.constant 2 : index
    %c0_197 = arith.constant 0 : index
    %275 = vector.load %arg16[%c0_195, %c2_196, %c0_197] : memref<1x152x128xf32, #tpu.memory_space<vmem>>, vector<1x96x128xf32>
    %276 = vector.shape_cast %275 : vector<1x96x128xf32> to vector<96x128xf32>
    %c0_198 = arith.constant 0 : index
    %c24_199 = arith.constant 24 : index
    %c0_200 = arith.constant 0 : index
    %277 = vector.load %arg16[%c0_198, %c24_199, %c0_200] : memref<1x152x128xf32, #tpu.memory_space<vmem>>, vector<1x96x128xf32>
    %278 = vector.shape_cast %277 : vector<1x96x128xf32> to vector<96x128xf32>
    %c0_201 = arith.constant 0 : index
    %c25_202 = arith.constant 25 : index
    %c0_203 = arith.constant 0 : index
    %279 = vector.load %arg16[%c0_201, %c25_202, %c0_203] : memref<1x152x128xf32, #tpu.memory_space<vmem>>, vector<1x96x128xf32>
    %280 = vector.shape_cast %279 : vector<1x96x128xf32> to vector<96x128xf32>
    %c0_204 = arith.constant 0 : index
    %c26_205 = arith.constant 26 : index
    %c0_206 = arith.constant 0 : index
    %281 = vector.load %arg16[%c0_204, %c26_205, %c0_206] : memref<1x152x128xf32, #tpu.memory_space<vmem>>, vector<1x96x128xf32>
    %282 = vector.shape_cast %281 : vector<1x96x128xf32> to vector<96x128xf32>
    %c0_207 = arith.constant 0 : index
    %c48_208 = arith.constant 48 : index
    %c0_209 = arith.constant 0 : index
    %283 = vector.load %arg16[%c0_207, %c48_208, %c0_209] : memref<1x152x128xf32, #tpu.memory_space<vmem>>, vector<1x96x128xf32>
    %284 = vector.shape_cast %283 : vector<1x96x128xf32> to vector<96x128xf32>
    %c0_210 = arith.constant 0 : index
    %c49_211 = arith.constant 49 : index
    %c0_212 = arith.constant 0 : index
    %285 = vector.load %arg16[%c0_210, %c49_211, %c0_212] : memref<1x152x128xf32, #tpu.memory_space<vmem>>, vector<1x96x128xf32>
    %286 = vector.shape_cast %285 : vector<1x96x128xf32> to vector<96x128xf32>
    %c0_213 = arith.constant 0 : index
    %c50_214 = arith.constant 50 : index
    %c0_215 = arith.constant 0 : index
    %287 = vector.load %arg16[%c0_213, %c50_214, %c0_215] : memref<1x152x128xf32, #tpu.memory_space<vmem>>, vector<1x96x128xf32>
    %288 = vector.shape_cast %287 : vector<1x96x128xf32> to vector<96x128xf32>
    %289 = tpu.concatenate %272, %274, %276, %278, %280, %282, %284, %286, %288 in 1 : vector<96x128xf32>, vector<96x128xf32>, vector<96x128xf32>, vector<96x128xf32>, vector<96x128xf32>, vector<96x128xf32>, vector<96x128xf32>, vector<96x128xf32>, vector<96x128xf32> -> vector<96x1152xf32>
    %c0_216 = arith.constant 0 : index
    %c0_217 = arith.constant 0 : index
    %290 = vector.load %arg10[%c0_216, %c0_217] : memref<1152x256xf32, #tpu.memory_space<vmem>>, vector<1152x256xf32>
    %cst_218 = arith.constant dense<0.000000e+00> : vector<96x256xf32>
    %291 = tpu.matmul %289, %290, %cst_218 {dimension_numbers = #tpu.dot_dimension_numbers<[1], [0], [0], [1], [0, 0, 1, 1], [], []>} : vector<96x1152xf32>, vector<1152x256xf32>, vector<96x256xf32> -> vector<96x256xf32>
    %c0_219 = arith.constant 0 : index
    %c0_220 = arith.constant 0 : index
    %292 = vector.load %arg11[%c0_219, %c0_220] : memref<1x256xf32, #tpu.memory_space<vmem>>, vector<1x256xf32>
    %293 = vector.broadcast %292 : vector<1x256xf32> to vector<96x256xf32>
    %294 = arith.addf %291, %293 : vector<96x256xf32>
    %cst_221 = arith.constant 0.000000e+00 : f32
    %295 = vector.broadcast %cst_221 : f32 to vector<96x256xf32>
    %296 = arith.maximumf %294, %295 : vector<96x256xf32>
    %c0_i32_222 = arith.constant 0 : i32
    %297 = arith.sitofp %c0_i32_222 : i32 to f32
    %298 = vector.broadcast %297 : f32 to vector<96x256xf32>
    %299 = arith.select %270, %296, %298 : vector<96x256xi1>, vector<96x256xf32>
    %c0_223 = arith.constant 0 : index
    %c0_224 = arith.constant 0 : index
    %c0_225 = arith.constant 0 : index
    %300 = vector.load %arg17[%c0_223, %c0_224, %c0_225] : memref<1x96x256xf32, #tpu.memory_space<vmem>>, vector<1x96x256xf32>
    %301 = vector.shape_cast %300 : vector<1x96x256xf32> to vector<96x256xf32>
    %302 = vector.shape_cast %299 : vector<96x256xf32> to vector<1x96x256xf32>
    tpu.vector_store %arg17[%c0_223, %c0_224, %c0_225], %302 {strides = array<i32>} : memref<1x96x256xf32, #tpu.memory_space<vmem>>, vector<1x96x256xf32>,
    return
  }
  func.func @transform_0(%arg0: i32) -> (i32, i32, i32) {
    %c0_i32 = arith.constant 0 : i32
    %c0_i32_0 = arith.constant 0 : i32
    %c0_i32_1 = arith.constant 0 : i32
    return %arg0, %c0_i32, %c0_i32_0 : i32, i32, i32
  }
  func.func @transform_1(%arg0: i32) -> (i32, i32) {
    %c0_i32 = arith.constant 0 : i32
    %c0_i32_0 = arith.constant 0 : i32
    %c0_i32_1 = arith.constant 0 : i32
    return %c0_i32, %c0_i32_0 : i32, i32
  }
  func.func @transform_2(%arg0: i32) -> (i32, i32) {
    %c0_i32 = arith.constant 0 : i32
    %c0_i32_0 = arith.constant 0 : i32
    %c0_i32_1 = arith.constant 0 : i32
    return %c0_i32, %c0_i32_0 : i32, i32
  }
  func.func @transform_3(%arg0: i32) -> (i32, i32) {
    %c0_i32 = arith.constant 0 : i32
    %c0_i32_0 = arith.constant 0 : i32
    %c0_i32_1 = arith.constant 0 : i32
    return %c0_i32, %c0_i32_0 : i32, i32
  }
  func.func @transform_4(%arg0: i32) -> (i32, i32) {
    %c0_i32 = arith.constant 0 : i32
    %c0_i32_0 = arith.constant 0 : i32
    %c0_i32_1 = arith.constant 0 : i32
    return %c0_i32, %c0_i32_0 : i32, i32
  }
  func.func @transform_5(%arg0: i32) -> (i32, i32) {
    %c0_i32 = arith.constant 0 : i32
    %c0_i32_0 = arith.constant 0 : i32
    %c0_i32_1 = arith.constant 0 : i32
    return %c0_i32, %c0_i32_0 : i32, i32
  }
  func.func @transform_6(%arg0: i32) -> (i32, i32) {
    %c0_i32 = arith.constant 0 : i32
    %c0_i32_0 = arith.constant 0 : i32
    %c0_i32_1 = arith.constant 0 : i32
    return %c0_i32, %c0_i32_0 : i32, i32
  }
  func.func @transform_7(%arg0: i32) -> (i32, i32) {
    %c0_i32 = arith.constant 0 : i32
    %c0_i32_0 = arith.constant 0 : i32
    %c0_i32_1 = arith.constant 0 : i32
    return %c0_i32, %c0_i32_0 : i32, i32
  }
  func.func @transform_8(%arg0: i32) -> (i32, i32) {
    %c0_i32 = arith.constant 0 : i32
    %c0_i32_0 = arith.constant 0 : i32
    %c0_i32_1 = arith.constant 0 : i32
    return %c0_i32, %c0_i32_0 : i32, i32
  }
  func.func @transform_9(%arg0: i32) -> (i32, i32) {
    %c0_i32 = arith.constant 0 : i32
    %c0_i32_0 = arith.constant 0 : i32
    %c0_i32_1 = arith.constant 0 : i32
    return %c0_i32, %c0_i32_0 : i32, i32
  }
  func.func @transform_10(%arg0: i32) -> (i32, i32) {
    %c0_i32 = arith.constant 0 : i32
    %c0_i32_0 = arith.constant 0 : i32
    %c0_i32_1 = arith.constant 0 : i32
    return %c0_i32, %c0_i32_0 : i32, i32
  }
  func.func @transform_11(%arg0: i32) -> (i32, i32, i32) {
    %c0_i32 = arith.constant 0 : i32
    %c0_i32_0 = arith.constant 0 : i32
    %c0_i32_1 = arith.constant 0 : i32
    return %arg0, %c0_i32, %c0_i32_0 : i32, i32, i32
  }
  func.func @transform_12(%arg0: i32) -> (i32, i32, i32) {
    %c0_i32 = arith.constant 0 : i32
    %c0_i32_0 = arith.constant 0 : i32
    %c0_i32_1 = arith.constant 0 : i32
    return %arg0, %c0_i32, %c0_i32_0 : i32, i32, i32
  }
  func.func @transform_13(%arg0: i32) -> (i32, i32, i32) {
    %c0_i32 = arith.constant 0 : i32
    %c0_i32_0 = arith.constant 0 : i32
    %c0_i32_1 = arith.constant 0 : i32
    return %arg0, %c0_i32, %c0_i32_0 : i32, i32, i32
  }
  func.func @transform_14(%arg0: i32) -> (i32, i32, i32) {
    %c0_i32 = arith.constant 0 : i32
    %c0_i32_0 = arith.constant 0 : i32
    %c0_i32_1 = arith.constant 0 : i32
    return %arg0, %c0_i32, %c0_i32_0 : i32, i32, i32
  }
  func.func @transform_15(%arg0: i32) -> (i32, i32, i32) {
    %c0_i32 = arith.constant 0 : i32
    %c0_i32_0 = arith.constant 0 : i32
    %c0_i32_1 = arith.constant 0 : i32
    return %arg0, %c0_i32, %c0_i32_0 : i32, i32, i32
  }
  func.func @transform_16(%arg0: i32) -> (i32, i32, i32) {
    %c0_i32 = arith.constant 0 : i32
    %c0_i32_0 = arith.constant 0 : i32
    %c0_i32_1 = arith.constant 0 : i32
    return %arg0, %c0_i32, %c0_i32_0 : i32, i32, i32
  }
}

</mosaic_0001>

<bundles_post_ra>
// kernel: _forward_impl.1
= control target key start
LH: loop header
LB: loop body
LE: loop exit
PB: predicated region body
PF: predicated region fallthrough
CT: control target
= control target key end

     0   :  { %s11075_s21 = smov 0   ;;  %s18351_s0 = inlined_call_operand.vmem [shape: f32[2,416,128], index: 0, kind: input, shape index: {}]   ;;  %s18352_s1 = inlined_call_operand.vmem [shape: f32[512,128], index: 1, kind: input, shape index: {}]   ;;  %s18353_s2 = inlined_call_operand.vmem [shape: f32[1,128], index: 2, kind: input, shape index: {}]   ;;  %s18354_s3 = inlined_call_operand.vmem [shape: f32[1152,128], index: 3, kind: input, shape index: {}]   ;;  %s18355_s4 = inlined_call_operand.vmem [shape: f32[1,128], index: 4, kind: input, shape index: {}]   ;;  %s18356_s5 = inlined_call_operand.vmem [shape: f32[1152,128], index: 5, kind: input, shape index: {}]   ;;  %s18357_s6 = inlined_call_operand.vmem [shape: f32[1,128], index: 6, kind: input, shape index: {}]   ;;  %s18358_s7 = inlined_call_operand.vmem [shape: f32[128,128], index: 7, kind: input, shape index: {}]   ;;  %s18359_s8 = inlined_call_operand.vmem [shape: f32[1,128], index: 8, kind: input, shape index: {}]   ;;  %s18360_s9 = inlined_call_operand.vmem [shape: f32[1152,256], index: 9, kind: input, shape index: {}]   ;;  %s18361_s10 = inlined_call_operand.vmem [shape: f32[1,256], index: 10, kind: input, shape index: {}]   ;;  %s18362_s11 = inlined_call_operand.vmem [shape: f32[2,392,128], index: 11, kind: output, shape index: {0}]   ;;  %s18363_s12 = inlined_call_operand.vmem [shape: f32[2,392,128], index: 12, kind: output, shape index: {1}]   ;;  %s18364_s13 = inlined_call_operand.vmem [shape: f32[2,344,128], index: 13, kind: output, shape index: {2}]   ;;  %s18365_s14 = inlined_call_operand.vmem [shape: f32[2,144,128], index: 14, kind: output, shape index: {3}]   ;;  %s18366_s15 = inlined_call_operand.vmem [shape: f32[2,152,128], index: 15, kind: output, shape index: {4}]   ;;  %s18367_s16 = inlined_call_operand.vmem [shape: f32[2,96,256], index: 16, kind: output, shape index: {5}]  }
   0x1   :  { %18653 = sst [smem:[#allocation101_spill]] %s18351_s0 }
   0x2 LB: > { %s8235_s22 = sadd.s32 4294967295, %s10986_s21   ;;  %p8239_p0 = scmp.ge.s32.totalorder %s10986_s21, 1  ;;  %s10986_s21 = sphi %s11075_s21, %s27_s21  }
   0x3   : > { %p473_p1 = scmp.lt.s32.totalorder %s10986_s21, 3 }
   0x5   : > { %p474_p2 = pnand %p8239_p0, %p473_p1 }
   0x7   : > { %477 = sbr.rel (%p474_p2) target bundleno = 2762 (0xaca), region = 64 }
   0xe   : > { %v1752_v0 = vld [vmem:[%s18352_s1] sm:$0xff]  ;;  %v1753_v1 = vld [vmem:[%s18352_s1 + $0x8] sm:$0xff]  ;;  %v1754_v2 = vld [vmem:[%s18352_s1 + $0x10] sm:$0xff]  ;;  %p548_p3 = scmp.lt.s32.totalorder %s8235_s22, 1  ;;  %v18368_v3 = vmov 0.0|0.0   ;;  %s18654_s25 = sld [smem:[#allocation101_spill]] }
   0xf   : > { %8768 = vmatprep.subr.bf16.mxu0 %v18368_v3  ;;  %v8769_v4 = vpack.c.bf16 %v1753_v1, %v1752_v0  ;;  %v1755_v5 = vld [vmem:[%s18352_s1 + $0x18] sm:$0xff]  ;;  %8864 = vmatprep.subr.bf16.mxu1 %v18368_v3  ;;  %v1756_v7 = vld [vmem:[%s18352_s1 + $0x20] sm:$0xff]  ;;  %v1757_v8 = vld [vmem:[%s18352_s1 + $0x28] sm:$0xff] }
  0x10   : > { %s19225_s22 = smov (!%p548_p3, %s8235_s22), 1  ;;  %v8772_v6 = vpack.c.bf16 %v1755_v5, %v1754_v2  ;;  %v8775_v9 = vpack.c.bf16 %v1757_v8, %v1756_v7  ;;  %v1758_v10 = vld [vmem:[%s18352_s1 + $0x30] sm:$0xff]  ;;  %v1759_v11 = vld [vmem:[%s18352_s1 + $0x38] sm:$0xff]  ;;  %v1760_v14 = vld [vmem:[%s18352_s1 + $0x40] sm:$0xff] }
  0x11   : > { %8770 = vmatpush1.bf16.msra.mxu0 %v8769_v4  ;;  %s10484_s20 = smul.u32 416, %s19225_s22  ;;  %v8778_v13 = vpack.c.bf16 %v1759_v11, %v1758_v10  ;;  %v1761_v15 = vld [vmem:[%s18352_s1 + $0x48] sm:$0xff]  ;;  %v1762_v17 = vld [vmem:[%s18352_s1 + $0x50] sm:$0xff]  ;;  %v1763_v18 = vld [vmem:[%s18352_s1 + $0x58] sm:$0xff] }
  0x12   : > { %8771 = vmatprep.subr.bf16.mxu0 %v18368_v3  ;;  %v8781_v16 = vpack.c.bf16 %v1761_v15, %v1760_v14  ;;  %v8784_v19 = vpack.c.bf16 %v1763_v18, %v1762_v17  ;;  %v1764_v20 = vld [vmem:[%s18352_s1 + $0x60] sm:$0xff]  ;;  %v1765_v21 = vld [vmem:[%s18352_s1 + $0x68] sm:$0xff]  ;;  %v1766_v23 = vld [vmem:[%s18352_s1 + $0x70] sm:$0xff]  ;;  %s10485_s0 = smul.u32 392, %s19225_s22 }
  0x13   : > { %v8787_v22 = vpack.c.bf16 %v1765_v21, %v1764_v20  ;;  %v1767_v24 = vld [vmem:[%s18352_s1 + $0x78] sm:$0xff]  ;;  %v1768_v26 = vld [vmem:[%s18352_s1 + $0x80] sm:$0xff]  ;;  %v1769_v27 = vld [vmem:[%s18352_s1 + $0x88] sm:$0xff]  ;;  %s10486_s17 = smul.u32 344, %s19225_s22 }
  0x14   : > { %s11110_s26 = scalar_lea.vmem %s18654_s25, %s10484_s20  ;;  %v8790_v25 = vpack.c.bf16 %v1767_v24, %v1766_v23  ;;  %v8793_v28 = vpack.c.bf16 %v1769_v27, %v1768_v26  ;;  %v1770_v29 = vld [vmem:[%s18352_s1 + $0x90] sm:$0xff]  ;;  %v1771_v30 = vld [vmem:[%s18352_s1 + $0x98] sm:$0xff]  ;;  %v1772_v32 = vld [vmem:[%s18352_s1 + $0xa0] sm:$0xff]  ;;  %s11759_s27 = scalar_lea.vmem %s18363_s12, %s10485_s0 }
  0x15   : > { %8773 = vmatpush1.bf16.msra.mxu0 %v8772_v6  ;;  %v1698_v12 = vld [vmem:[%s11110_s26 + $0x1] sm:$0xff]  ;;  %v8796_v31 = vpack.c.bf16 %v1771_v30, %v1770_v29  ;;  %v1774_v35 = vld [vmem:[%s18352_s1 + $0xb0] sm:$0xff]  ;;  %v1775_v36 = vld [vmem:[%s18352_s1 + $0xb8] sm:$0xff]  ;;  %s11764_s30 = scalar_lea.vmem %s18362_s11, %s10485_s0  ;;  %s11769_s20 = scalar_lea.vmem %s18364_s13, %s10486_s17 }
  0x16   : > { %8774 = vmatprep.subr.bf16.mxu0 %v18368_v3  ;;  %1887 = vmatprep.mubr.f32.mxu0 %v1698_v12  ;;  %v1773_v33 = vld [vmem:[%s18352_s1 + $0xa8] sm:$0xff]  ;;  %v8802_v37 = vpack.c.bf16 %v1775_v36, %v1774_v35  ;;  %v1776_v38 = vld [vmem:[%s18352_s1 + $0xc0] sm:$0xff]  ;;  %v1778_v41 = vld [vmem:[%s18352_s1 + $0xd0] sm:$0xff]  ;;  %s10488_s0 = smul.u32 152, %s19225_s22 }
  0x17   : > { %v8799_v34 = vpack.c.bf16 %v1773_v33, %v1772_v32  ;;  %v1777_v39 = vld [vmem:[%s18352_s1 + $0xc8] sm:$0xff]  ;;  %v1779_v42 = vld [vmem:[%s18352_s1 + $0xd8] sm:$0xff]  ;;  %v1780_v44 = vld [vmem:[%s18352_s1 + $0xe0] sm:$0xff]  ;;  %s10489_s25 = smul.u32 192, %s19225_s22 }
  0x18   : > { %v8805_v40 = vpack.c.bf16 %v1777_v39, %v1776_v38  ;;  %v8808_v43 = vpack.c.bf16 %v1779_v42, %v1778_v41  ;;  %v1781_v45 = vld [vmem:[%s18352_s1 + $0xe8] sm:$0xff]  ;;  %v1782_v47 = vld [vmem:[%s18352_s1 + $0xf0] sm:$0xff]  ;;  %v1783_v48 = vld [vmem:[%s18352_s1 + $0xf8] sm:$0xff]  ;;  %s16646_s24 = scalar_lea.vmem %s18366_s15, %s10488_s0 }
  0x19   : > { %8776 = vmatpush1.bf16.msra.mxu0 %v8775_v9  ;;  %v8811_v46 = vpack.c.bf16 %v1781_v45, %v1780_v44  ;;  %v8814_v49 = vpack.c.bf16 %v1783_v48, %v1782_v47  ;;  %v1784_v50 = vld [vmem:[%s18352_s1 + $0x100] sm:$0xff]  ;;  %v1785_v51 = vld [vmem:[%s18352_s1 + $0x108] sm:$0xff]  ;;  %v1786_v55 = vld [vmem:[%s18352_s1 + $0x110] sm:$0xff]  ;;  %s18289_s17 = scalar_lea.vmem %s18367_s16, %s10489_s25 }
  0x1a   : > { %8777 = vmatprep.subr.bf16.mxu0 %v18368_v3  ;;  %v1650_v52 = vld [vmem:[%s11110_s26] sm:$0xff]  ;;  %v8817_v53 = vpack.c.bf16 %v1785_v51, %v1784_v50  ;;  %v1699_v54 = vld [vmem:[%s11110_s26 + $0x9] sm:$0xff]  ;;  %v1787_v56 = vld [vmem:[%s18352_s1 + $0x118] sm:$0xff] }
  0x1b   : > { %v1651_v57 = vld [vmem:[%s11110_s26 + $0x8] sm:$0xff]  ;;  %v8820_v58 = vpack.c.bf16 %v1787_v56, %v1786_v55  ;;  %v1700_v59 = vld [vmem:[%s11110_s26 + $0x11] sm:$0xff]  ;;  %v1788_v60 = vld [vmem:[%s18352_s1 + $0x120] sm:$0xff] }
  0x1c   : > { %v1789_v61 = vld [vmem:[%s18352_s1 + $0x128] sm:$0xff]  ;;  %v1652_v62 = vld [vmem:[%s11110_s26 + $0x10] sm:$0xff]  ;;  %v11231_v0 = vld [vmem:[%s11110_s26 + $0x19] sm:$0xff] }
  0x1d   : > { %8779 = vmatpush1.bf16.msra.mxu0 %v8778_v13  ;;  %v8823_v63 = vpack.c.bf16 %v1789_v61, %v1788_v60  ;;  %v1790_v1 = vld [vmem:[%s18352_s1 + $0x130] sm:$0xff]  ;;  %v1791_v2 = vld [vmem:[%s18352_s1 + $0x138] sm:$0xff]  ;;  %v11245_v6 = vld [vmem:[%s11110_s26 + $0x21] sm:$0xff] }
  0x1e   : > { %8780 = vmatprep.subr.bf16.mxu0 %v18368_v3  ;;  %v11242_v4 = vld [vmem:[%s11110_s26 + $0x18] sm:$0xff]  ;;  %v8826_v5 = vpack.c.bf16 %v1791_v2, %v1790_v1  ;;  %v1792_v7 = vld [vmem:[%s18352_s1 + $0x140] sm:$0xff]  ;;  %v1793_v8 = vld [vmem:[%s18352_s1 + $0x148] sm:$0xff] }
  0x1f   : > { %v11257_v9 = vld [vmem:[%s11110_s26 + $0x20] sm:$0xff]  ;;  %v8829_v10 = vpack.c.bf16 %v1793_v8, %v1792_v7  ;;  %v11260_v11 = vld [vmem:[%s11110_s26 + $0x29] sm:$0xff]  ;;  %v1795_v13 = vld [vmem:[%s18352_s1 + $0x158] sm:$0xff] }
  0x20   : > { %v1794_v12 = vld [vmem:[%s18352_s1 + $0x150] sm:$0xff]  ;;  %v11272_v14 = vld [vmem:[%s11110_s26 + $0x28] sm:$0xff]  ;;  %v1796_v17 = vld [vmem:[%s18352_s1 + $0x160] sm:$0xff] }
  0x21   : > { %8782 = vmatpush1.bf16.msra.mxu0 %v8781_v16  ;;  %v8832_v15 = vpack.c.bf16 %v1795_v13, %v1794_v12  ;;  %v11275_v16 = vld [vmem:[%s11110_s26 + $0x31] sm:$0xff]  ;;  %v1797_v18 = vld [vmem:[%s18352_s1 + $0x168] sm:$0xff]  ;;  %v11290_v21 = vld [vmem:[%s11110_s26 + $0x39] sm:$0xff] }
  0x22   : > { %8783 = vmatprep.subr.bf16.mxu0 %v18368_v3  ;;  %v8835_v20 = vpack.c.bf16 %v1797_v18, %v1796_v17  ;;  %v1799_v23 = vld [vmem:[%s18352_s1 + $0x178] sm:$0xff]  ;;  %v11305_v26 = vld [vmem:[%s11110_s26 + $0x41] sm:$0xff]  ;;  %v1802_v32 = vld [vmem:[%s18352_s1 + $0x190] sm:$0xff] }
  0x23   : > { %v11302_v24 = vld [vmem:[%s11110_s26 + $0x38] sm:$0xff]  ;;  %v1800_v27 = vld [vmem:[%s18352_s1 + $0x180] sm:$0xff]  ;;  %v1805_v38 = vld [vmem:[%s18352_s1 + $0x1a8] sm:$0xff] }
  0x24   : > { %v11317_v29 = vld [vmem:[%s11110_s26 + $0x40] sm:$0xff]  ;;  %v1803_v33 = vld [vmem:[%s18352_s1 + $0x198] sm:$0xff]  ;;  %v11347_v39 = vld [vmem:[%s11110_s26 + $0x50] sm:$0xff] }
  0x25   : > { %8785 = vmatpush1.bf16.msra.mxu0 %v8784_v19  ;;  %v11287_v19 = vld [vmem:[%s11110_s26 + $0x30] sm:$0xff]  ;;  %v8844_v35 = vpack.c.bf16 %v1803_v33, %v1802_v32  ;;  %v11350_v41 = vld [vmem:[%s11110_s26 + $0x59] sm:$0xff]  ;;  %v1809_v48 = vld [vmem:[%s18352_s1 + $0x1c8] sm:$0xff] }
  0x26   : > { %8786 = vmatprep.subr.bf16.mxu0 %v18368_v3  ;;  %v11335_v36 = vld [vmem:[%s11110_s26 + $0x51] sm:$0xff]  ;;  %v1808_v47 = vld [vmem:[%s18352_s1 + $0x1c0] sm:$0xff]  ;;  %v11380_v51 = vld [vmem:[%s11110_s26 + $0x69] sm:$0xff] }
  0x27   : > { %v1806_v42 = vld [vmem:[%s18352_s1 + $0x1b0] sm:$0xff]  ;;  %v11362_v44 = vld [vmem:[%s11110_s26 + $0x58] sm:$0xff]  ;;  %v8853_v50 = vpack.c.bf16 %v1809_v48, %v1808_v47  ;;  %v11431_v7 = vld [vmem:[%s11110_s26 + $0x80] sm:$0xff] }
  0x28   : > { %v11395_v56 = vld [vmem:[%s11110_s26 + $0x71] sm:$0xff]  ;;  %v11410_v61 = vld [vmem:[%s11110_s26 + $0x79] sm:$0xff]  ;;  %v11434_v8 = vld [vmem:[%s11110_s26 + $0x89] sm:$0xff] }
  0x29   : > { %8788 = vmatpush1.bf16.msra.mxu0 %v8787_v22  ;;  %v1798_v22 = vld [vmem:[%s18352_s1 + $0x170] sm:$0xff]  ;;  %v11422_v1 = vld [vmem:[%s11110_s26 + $0x78] sm:$0xff]  ;;  %v11458_v18 = vld [vmem:[%s11110_s26 + $0xa1] sm:$0xff] }
  0x2a   : > { %8789 = vmatprep.subr.bf16.mxu0 %v18368_v3  ;;  %v11442_v12 = vld [vmem:[%s11110_s26 + $0x91] sm:$0xff]  ;;  %v11490_v32 = vld [vmem:[%s11110_s26 + $0xc1] sm:$0xff]  ;;  %v11530_v48 = vld [vmem:[%s11110_s26 + $0xe9] sm:$0xff] }
  0x2b   : > { %v11447_v13 = vld [vmem:[%s11110_s26 + $0x90] sm:$0xff]  ;;  %v11455_v17 = vld [vmem:[%s11110_s26 + $0x98] sm:$0xff]  ;;  %v11495_v33 = vld [vmem:[%s11110_s26 + $0xc0] sm:$0xff] }
  0x2c   : > { %v11527_v47 = vld [vmem:[%s11110_s26 + $0xe0] sm:$0xff] }
  0x2d   : > { %8791 = vmatpush1.bf16.msra.mxu0 %v8790_v25  ;;  %v8838_v25 = vpack.c.bf16 %v1799_v23, %v1798_v22  ;;  %v11466_v22 = vld [vmem:[%s11110_s26 + $0xa9] sm:$0xff] }
  0x2e   : > { %8792 = vmatprep.subr.bf16.mxu0 %v18368_v3  ;;  %v11471_v23 = vld [vmem:[%s11110_s26 + $0xa8] sm:$0xff] }
  0x31   : > { %8794 = vmatpush1.bf16.msra.mxu0 %v8793_v28  ;;  %v1801_v28 = vld [vmem:[%s18352_s1 + $0x188] sm:$0xff] }
  0x32   : > { %8795 = vmatprep.subr.bf16.mxu0 %v18368_v3  ;;  %v8841_v30 = vpack.c.bf16 %v1801_v28, %v1800_v27  ;;  %v11479_v27 = vld [vmem:[%s11110_s26 + $0xb0] sm:$0xff]  ;;  %v11482_v28 = vld [vmem:[%s11110_s26 + $0xb9] sm:$0xff] }
  0x35   : > { %8797 = vmatpush1.bf16.msra.mxu0 %v8796_v31  ;;  %v11320_v31 = vld [vmem:[%s11110_s26 + $0x49] sm:$0xff] }
  0x36   : > { %8798 = vmatprep.subr.bf16.mxu0 %v18368_v3 }
  0x39   : > { %8800 = vmatpush1.bf16.msra.mxu0 %v8799_v34  ;;  %v11332_v34 = vld [vmem:[%s11110_s26 + $0x48] sm:$0xff] }
  0x3a   : > { %8801 = vmatprep.subr.bf16.mxu0 %v18368_v3 }
  0x3d   : > { %8803 = vmatpush1.bf16.msra.mxu0 %v8802_v37  ;;  %v1804_v37 = vld [vmem:[%s18352_s1 + $0x1a0] sm:$0xff] }
  0x3e   : > { %8804 = vmatprep.subr.bf16.mxu0 %v18368_v3 }
  0x41   : > { %8806 = vmatpush1.bf16.msra.mxu0 %v8805_v40  ;;  %v8847_v40 = vpack.c.bf16 %v1805_v38, %v1804_v37  ;;  %v11503_v37 = vld [vmem:[%s11110_s26 + $0xc8] sm:$0xff]  ;;  %v11506_v38 = vld [vmem:[%s11110_s26 + $0xd1] sm:$0xff] }
  0x42   : > { %8807 = vmatprep.subr.bf16.mxu0 %v18368_v3 }
  0x45   : > { %8809 = vmatpush1.bf16.msra.mxu0 %v8808_v43  ;;  %v1807_v43 = vld [vmem:[%s18352_s1 + $0x1b8] sm:$0xff] }
  0x46   : > { %8810 = vmatprep.subr.bf16.mxu0 %v18368_v3  ;;  %v8850_v45 = vpack.c.bf16 %v1807_v43, %v1806_v42  ;;  %v11514_v42 = vld [vmem:[%s11110_s26 + $0xd9] sm:$0xff] }
  0x47   : > { %v11519_v43 = vld [vmem:[%s11110_s26 + $0xd8] sm:$0xff] }
  0x49   : > { %8812 = vmatpush1.bf16.msra.mxu0 %v8811_v46  ;;  %v11365_v46 = vld [vmem:[%s11110_s26 + $0x61] sm:$0xff] }
  0x4a   : > { %8813 = vmatprep.subr.bf16.mxu0 %v18368_v3 }
  0x4d   : > { %8815 = vmatpush1.bf16.msra.mxu0 %v8814_v49  ;;  %v11377_v49 = vld [vmem:[%s11110_s26 + $0x60] sm:$0xff] }
  0x4e   : > { %8816 = vmatprep.subr.bf16.mxu0 %v18368_v3 }
  0x50   : > { %1888 = vmatmul.mubr.f32.vlgmr.msra.gmra.mrb[0].mxu0 %v1650_v52  ;;  %v1810_v52 = vld [vmem:[%s18352_s1 + $0x1d0] sm:$0xff] }
  0x51   : > { %8818 = vmatpush1.bf16.msra.mxu0 %v8817_v53  ;;  %1892 = vmatprep.mubr.f32.mxu0 %v1699_v54  ;;  %v1811_v53 = vld [vmem:[%s18352_s1 + $0x1d8] sm:$0xff]  ;;  %v11392_v54 = vld [vmem:[%s11110_s26 + $0x68] sm:$0xff] }
  0x52   : > { %8819 = vmatprep.subr.bf16.mxu0 %v18368_v3  ;;  %v8856_v55 = vpack.c.bf16 %v1811_v53, %v1810_v52  ;;  %v11538_v52 = vld [vmem:[%s11110_s26 + $0xf1] sm:$0xff] }
  0x53   : > { %v11543_v53 = vld [vmem:[%s11110_s26 + $0xf0] sm:$0xff] }
  0x54   : > { %1893 = vmatmul.mubr.f32.gmra.mrb[2].mxu0 %v1651_v57  ;;  %v1812_v57 = vld [vmem:[%s18352_s1 + $0x1e0] sm:$0xff] }
  0x55   : > { %1897 = vmatprep.mubr.f32.mxu0 %v1700_v59  ;;  %8821 = vmatpush1.bf16.msra.mxu0 %v8820_v58  ;;  %v1813_v58 = vld [vmem:[%s18352_s1 + $0x1e8] sm:$0xff]  ;;  %v11407_v59 = vld [vmem:[%s11110_s26 + $0x70] sm:$0xff] }
  0x56   : > { %8822 = vmatprep.subr.bf16.mxu0 %v18368_v3  ;;  %v8859_v60 = vpack.c.bf16 %v1813_v58, %v1812_v57  ;;  %v11551_v57 = vld [vmem:[%s11110_s26 + $0xf8] sm:$0xff]  ;;  %v11554_v58 = vld [vmem:[%s11110_s26 + $0x101] sm:$0xff] }
  0x57   : > { %18655 = vst [vmem:[#allocation2_spill] sm:$0xff] %v11551_v57  ;;  %18656 = vst [vmem:[#allocation3_spill] sm:$0xff] %v11554_v58 }
  0x58   : > { %1898 = vmatmul.mubr.f32.gmra.mrb[4].mxu0 %v1652_v62  ;;  %v1814_v62 = vld [vmem:[%s18352_s1 + $0x1f0] sm:$0xff] }
  0x59   : > { %1902 = vmatprep.mubr.f32.mxu0 %v11231_v0  ;;  %8824 = vmatpush1.bf16.msra.mxu0 %v8823_v63  ;;  %v1815_v63 = vld [vmem:[%s18352_s1 + $0x1f8] sm:$0xff] }
  0x5a   : > { %8825 = vmatprep.subr.bf16.mxu0 %v18368_v3  ;;  %v8862_v2 = vpack.c.bf16 %v1815_v63, %v1814_v62  ;;  %v11562_v62 = vld [vmem:[%s11110_s26 + $0x109] sm:$0xff] }
  0x5b   : > { %18658 = vst [vmem:[#allocation5_spill] sm:$0xff] %v11562_v62  ;;  %v11567_v63 = vld [vmem:[%s11110_s26 + $0x108] sm:$0xff] }
  0x5c   : > { %1903 = vmatmul.mubr.f32.gmra.mrb[6].mxu0 %v11242_v4  ;;  %18659 = vst [vmem:[#allocation6_spill] sm:$0xff] %v11567_v63 }
  0x5d   : > { %1907 = vmatprep.mubr.f32.mxu0 %v11245_v6  ;;  %8827 = vmatpush1.bf16.msra.mxu0 %v8826_v5  ;;  %v11425_v5 = vld [vmem:[%s11110_s26 + $0x81] sm:$0xff] }
  0x5e   : > { %8828 = vmatprep.subr.bf16.mxu0 %v18368_v3 }
  0x60   : > { %1908 = vmatmul.mubr.f32.gmra.mrb[8].mxu0 %v11257_v9 }
  0x61   : > { %1912 = vmatprep.mubr.f32.mxu0 %v11260_v11  ;;  %8830 = vmatpush1.bf16.msra.mxu0 %v8829_v10  ;;  %v11439_v10 = vld [vmem:[%s11110_s26 + $0x88] sm:$0xff] }
  0x62   : > { %8831 = vmatprep.subr.bf16.mxu0 %v18368_v3 }
  0x64   : > { %1913 = vmatmul.mubr.f32.gmra.mrb[10].mxu0 %v11272_v14 }
  0x65   : > { %1917 = vmatprep.mubr.f32.mxu0 %v11275_v16  ;;  %8833 = vmatpush1.bf16.msra.mxu0 %v8832_v15  ;;  %v11450_v15 = vld [vmem:[%s11110_s26 + $0x99] sm:$0xff] }
  0x66   : > { %8834 = vmatprep.subr.bf16.mxu0 %v18368_v3 }
  0x68   : > { %1918 = vmatmul.mubr.f32.gmra.mrb[12].mxu0 %v11287_v19 }
  0x69   : > { %1922 = vmatprep.mubr.f32.mxu0 %v11290_v21  ;;  %8836 = vmatpush1.bf16.msra.mxu0 %v8835_v20  ;;  %v11463_v20 = vld [vmem:[%s11110_s26 + $0xa0] sm:$0xff] }
  0x6a   : > { %8837 = vmatprep.subr.bf16.mxu0 %v18368_v3 }
  0x6c   : > { %1923 = vmatmul.mubr.f32.gmra.mrb[14].mxu0 %v11302_v24 }
  0x6d   : > { %1927 = vmatprep.mubr.f32.mxu0 %v11305_v26  ;;  %8839 = vmatpush1.bf16.msra.mxu0 %v8838_v25  ;;  %v11474_v25 = vld [vmem:[%s11110_s26 + $0xb1] sm:$0xff] }
  0x6e   : > { %8840 = vmatprep.subr.bf16.mxu0 %v18368_v3 }
  0x70   : > { %1928 = vmatmul.mubr.f32.gmra.mrb[16].mxu0 %v11317_v29 }
  0x71   : > { %1932 = vmatprep.mubr.f32.mxu0 %v11320_v31  ;;  %8842 = vmatpush1.bf16.msra.mxu0 %v8841_v30  ;;  %v11487_v30 = vld [vmem:[%s11110_s26 + $0xb8] sm:$0xff] }
  0x72   : > { %8843 = vmatprep.subr.bf16.mxu0 %v18368_v3 }
  0x74   : > { %1933 = vmatmul.mubr.f32.gmra.mrb[18].mxu0 %v11332_v34 }
  0x75   : > { %1937 = vmatprep.mubr.f32.mxu0 %v11335_v36  ;;  %8845 = vmatpush1.bf16.msra.mxu0 %v8844_v35  ;;  %v11498_v35 = vld [vmem:[%s11110_s26 + $0xc9] sm:$0xff] }
  0x76   : > { %8846 = vmatprep.subr.bf16.mxu0 %v18368_v3 }
  0x78   : > { %1938 = vmatmul.mubr.f32.gmra.mrb[20].mxu0 %v11347_v39 }
  0x79   : > { %1942 = vmatprep.mubr.f32.mxu0 %v11350_v41  ;;  %8848 = vmatpush1.bf16.msra.mxu0 %v8847_v40  ;;  %v11511_v40 = vld [vmem:[%s11110_s26 + $0xd0] sm:$0xff] }
  0x7a   : > { %8849 = vmatprep.subr.bf16.mxu0 %v18368_v3 }
  0x7c   : > { %1943 = vmatmul.mubr.f32.gmra.mrb[22].mxu0 %v11362_v44 }
  0x7d   : > { %1947 = vmatprep.mubr.f32.mxu0 %v11365_v46  ;;  %8851 = vmatpush1.bf16.msra.mxu0 %v8850_v45  ;;  %v11522_v45 = vld [vmem:[%s11110_s26 + $0xe1] sm:$0xff] }
  0x7e   : > { %8852 = vmatprep.subr.bf16.mxu0 %v18368_v3 }
  0x80   : > { %1948 = vmatmul.mubr.f32.gmra.mrb[24].mxu0 %v11377_v49 }
  0x81   : > { %1952 = vmatprep.mubr.f32.mxu0 %v11380_v51  ;;  %8854 = vmatpush1.bf16.msra.mxu0 %v8853_v50  ;;  %v11535_v50 = vld [vmem:[%s11110_s26 + $0xe8] sm:$0xff] }
  0x82   : > { %8855 = vmatprep.subr.bf16.mxu0 %v18368_v3 }
  0x84   : > { %1953 = vmatmul.mubr.f32.gmra.mrb[26].mxu0 %v11392_v54 }
  0x85   : > { %1957 = vmatprep.mubr.f32.mxu0 %v11395_v56  ;;  %8857 = vmatpush1.bf16.msra.mxu0 %v8856_v55  ;;  %v11546_v55 = vld [vmem:[%s11110_s26 + $0xf9] sm:$0xff] }
  0x86   : > { %8858 = vmatprep.subr.bf16.mxu0 %v18368_v3 }
  0x88   : > { %1958 = vmatmul.mubr.f32.gmra.mrb[28].mxu0 %v11407_v59 }
  0x89   : > { %1962 = vmatprep.mubr.f32.mxu0 %v11410_v61  ;;  %8860 = vmatpush1.bf16.msra.mxu0 %v8859_v60  ;;  %v11559_v60 = vld [vmem:[%s11110_s26 + $0x100] sm:$0xff] }
  0x8a   : > { %8861 = vmatprep.subr.bf16.mxu0 %v18368_v3  ;;  %18657 = vst [vmem:[#allocation4_spill] sm:$0xff] %v11559_v60  ;;  %v11575_v3 = vld [vmem:[%s11110_s26 + $0x110] sm:$0xff] }
  0x8b   : > { %18661 = vst [vmem:[#allocation8_spill] sm:$0xff] %v11575_v3 }
  0x8c   : > { %1963 = vmatmul.mubr.f32.gmra.mrb[30].mxu0 %v11422_v1 }
  0x8d   : > { %1967 = vmatprep.mubr.f32.mxu0 %v11425_v5  ;;  %8863 = vmatpush1.bf16.msra.mxu0 %v8862_v2  ;;  %v11570_v2 = vld [vmem:[%s11110_s26 + $0x111] sm:$0xff] }
  0x8e   : > { %18660 = vst [vmem:[#allocation7_spill] sm:$0xff] %v11570_v2 }
  0x90   : > { %1968 = vmatmul.mubr.f32.gmra.mrb[32].mxu0 %v11431_v7 }
  0x91   : > { %1972 = vmatprep.mubr.f32.mxu0 %v11434_v8 }
  0x94   : > { %1973 = vmatmul.mubr.f32.gmra.mrb[34].mxu0 %v11439_v10 }
  0x95   : > { %1977 = vmatprep.mubr.f32.mxu0 %v11442_v12 }
  0x98   : > { %1978 = vmatmul.mubr.f32.gmra.mrb[36].mxu0 %v11447_v13 }
  0x99   : > { %1982 = vmatprep.mubr.f32.mxu0 %v11450_v15 }
  0x9c   : > { %1983 = vmatmul.mubr.f32.gmra.mrb[38].mxu0 %v11455_v17 }
  0x9d   : > { %1987 = vmatprep.mubr.f32.mxu0 %v11458_v18 }
  0xa0   : > { %1988 = vmatmul.mubr.f32.gmra.mrb[40].mxu0 %v11463_v20 }
  0xa1   : > { %1992 = vmatprep.mubr.f32.mxu0 %v11466_v22 }
  0xa4   : > { %1993 = vmatmul.mubr.f32.gmra.mrb[42].mxu0 %v11471_v23 }
  0xa5   : > { %1997 = vmatprep.mubr.f32.mxu0 %v11474_v25 }
  0xa8   : > { %1998 = vmatmul.mubr.f32.gmra.mrb[44].mxu0 %v11479_v27 }
  0xa9   : > { %2002 = vmatprep.mubr.f32.mxu0 %v11482_v28 }
  0xac   : > { %2003 = vmatmul.mubr.f32.gmra.mrb[46].mxu0 %v11487_v30 }
  0xad   : > { %2007 = vmatprep.mubr.f32.mxu0 %v11490_v32 }
  0xb0   : > { %2008 = vmatmul.mubr.f32.gmra.mrb[48].mxu0 %v11495_v33 }
  0xb1   : > { %2012 = vmatprep.mubr.f32.mxu0 %v11498_v35 }
  0xb4   : > { %2013 = vmatmul.mubr.f32.gmra.mrb[50].mxu0 %v11503_v37 }
  0xb5   : > { %2017 = vmatprep.mubr.f32.mxu0 %v11506_v38 }
  0xb8   : > { %2018 = vmatmul.mubr.f32.gmra.mrb[52].mxu0 %v11511_v40 }
  0xb9   : > { %2022 = vmatprep.mubr.f32.mxu0 %v11514_v42 }
  0xbc   : > { %2023 = vmatmul.mubr.f32.gmra.mrb[54].mxu0 %v11519_v43 }
  0xbd   : > { %2027 = vmatprep.mubr.f32.mxu0 %v11522_v45 }
  0xc0   : > { %2028 = vmatmul.mubr.f32.gmra.mrb[56].mxu0 %v11527_v47 }
  0xc1   : > { %2032 = vmatprep.mubr.f32.mxu0 %v11530_v48 }
  0xc4   : > { %2033 = vmatmul.mubr.f32.gmra.mrb[58].mxu0 %v11535_v50 }
  0xc5   : > { %2037 = vmatprep.mubr.f32.mxu0 %v11538_v52 }
  0xc8   : > { %2038 = vmatmul.mubr.f32.gmra.mrb[60].mxu0 %v11543_v53 }
  0xc9   : > { %2042 = vmatprep.mubr.f32.mxu0 %v11546_v55 }
  0xcc   : > { %2043 = vmatmul.mubr.f32.gmra.mrb[62].mxu0 %v11551_v57  ;;  %v11671_v57 = vld [vmem:[%s11110_s26 + $0x170] sm:$0xff] }
  0xcd   : > { %2047 = vmatprep.mubr.f32.mxu0 %v11554_v58  ;;  %v11578_v58 = vld [vmem:[%s11110_s26 + $0x119] sm:$0xff] }
  0xce   : > { %18662 = vst [vmem:[#allocation9_spill] sm:$0xff] %v11578_v58 }
  0xd0   : > { %2048 = vmatmul.mubr.f32.gmra.mrb[64].mxu0 %v11559_v60  ;;  %v11586_v60 = vld [vmem:[%s11110_s26 + $0x121] sm:$0xff] }
  0xd1   : > { %2052 = vmatprep.mubr.f32.mxu0 %v11562_v62  ;;  %v11583_v62 = vld [vmem:[%s11110_s26 + $0x118] sm:$0xff]  ;;  %18664 = vst [vmem:[#allocation11_spill] sm:$0xff] %v11586_v60 }
  0xd2   : > { %18663 = vst [vmem:[#allocation10_spill] sm:$0xff] %v11583_v62 }
  0xd4   : > { %2053 = vmatmul.mubr.f32.gmra.mrb[66].mxu0 %v11567_v63  ;;  %v11594_v63 = vld [vmem:[%s11110_s26 + $0x129] sm:$0xff] }
  0xd5   : > { %2057 = vmatprep.mubr.f32.mxu0 %v11570_v2  ;;  %v11591_v2 = vld [vmem:[%s11110_s26 + $0x120] sm:$0xff]  ;;  %18666 = vst [vmem:[#allocation13_spill] sm:$0xff] %v11594_v63 }
  0xd6   : > { %18665 = vst [vmem:[#allocation12_spill] sm:$0xff] %v11591_v2 }
  0xd8   : > { %2058 = vmatmul.mubr.f32.gmra.mrb[68].mxu0 %v11575_v3  ;;  %v11602_v3 = vld [vmem:[%s11110_s26 + $0x131] sm:$0xff] }
  0xd9   : > { %2062 = vmatprep.mubr.f32.mxu0 %v11578_v58  ;;  %v11599_v58 = vld [vmem:[%s11110_s26 + $0x128] sm:$0xff]  ;;  %18668 = vst [vmem:[#allocation15_spill] sm:$0xff] %v11602_v3 }
  0xda   : > { %18667 = vst [vmem:[#allocation14_spill] sm:$0xff] %v11599_v58 }
  0xdc   : > { %2063 = vmatmul.mubr.f32.gmra.mrb[70].mxu0 %v11583_v62  ;;  %v11610_v62 = vld [vmem:[%s11110_s26 + $0x139] sm:$0xff] }
  0xdd   : > { %2067 = vmatprep.mubr.f32.mxu0 %v11586_v60  ;;  %v11607_v60 = vld [vmem:[%s11110_s26 + $0x130] sm:$0xff]  ;;  %18670 = vst [vmem:[#allocation17_spill] sm:$0xff] %v11610_v62 }
  0xde   : > { %18669 = vst [vmem:[#allocation16_spill] sm:$0xff] %v11607_v60 }
  0xe0   : > { %2068 = vmatmul.mubr.f32.gmra.mrb[72].mxu0 %v11591_v2  ;;  %v11618_v2 = vld [vmem:[%s11110_s26 + $0x141] sm:$0xff] }
  0xe1   : > { %2072 = vmatprep.mubr.f32.mxu0 %v11594_v63  ;;  %v11615_v63 = vld [vmem:[%s11110_s26 + $0x138] sm:$0xff]  ;;  %18672 = vst [vmem:[#allocation19_spill] sm:$0xff] %v11618_v2 }
  0xe2   : > { %18671 = vst [vmem:[#allocation18_spill] sm:$0xff] %v11615_v63 }
  0xe4   : > { %2073 = vmatmul.mubr.f32.gmra.mrb[74].mxu0 %v11599_v58  ;;  %v11626_v58 = vld [vmem:[%s11110_s26 + $0x149] sm:$0xff] }
  0xe5   : > { %2077 = vmatprep.mubr.f32.mxu0 %v11602_v3  ;;  %v11623_v3 = vld [vmem:[%s11110_s26 + $0x140] sm:$0xff]  ;;  %18674 = vst [vmem:[#allocation21_spill] sm:$0xff] %v11626_v58 }
  0xe6   : > { %18673 = vst [vmem:[#allocation20_spill] sm:$0xff] %v11623_v3 }
  0xe8   : > { %2078 = vmatmul.mubr.f32.gmra.mrb[76].mxu0 %v11607_v60  ;;  %v11634_v60 = vld [vmem:[%s11110_s26 + $0x151] sm:$0xff] }
  0xe9   : > { %2082 = vmatprep.mubr.f32.mxu0 %v11610_v62  ;;  %v11631_v62 = vld [vmem:[%s11110_s26 + $0x148] sm:$0xff]  ;;  %18676 = vst [vmem:[#allocation23_spill] sm:$0xff] %v11634_v60 }
  0xea   : > { %18675 = vst [vmem:[#allocation22_spill] sm:$0xff] %v11631_v62 }
  0xec   : > { %2083 = vmatmul.mubr.f32.gmra.mrb[78].mxu0 %v11615_v63  ;;  %v11642_v63 = vld [vmem:[%s11110_s26 + $0x159] sm:$0xff] }
  0xed   : > { %2087 = vmatprep.mubr.f32.mxu0 %v11618_v2  ;;  %v11639_v2 = vld [vmem:[%s11110_s26 + $0x150] sm:$0xff]  ;;  %18678 = vst [vmem:[#allocation25_spill] sm:$0xff] %v11642_v63 }
  0xee   : > { %18677 = vst [vmem:[#allocation24_spill] sm:$0xff] %v11639_v2 }
  0xf0   : > { %2088 = vmatmul.mubr.f32.gmra.mrb[80].mxu0 %v11623_v3  ;;  %v11650_v3 = vld [vmem:[%s11110_s26 + $0x161] sm:$0xff] }
  0xf1   : > { %2092 = vmatprep.mubr.f32.mxu0 %v11626_v58  ;;  %v11647_v58 = vld [vmem:[%s11110_s26 + $0x158] sm:$0xff]  ;;  %18680 = vst [vmem:[#allocation27_spill] sm:$0xff] %v11650_v3 }
  0xf2   : > { %18679 = vst [vmem:[#allocation26_spill] sm:$0xff] %v11647_v58 }
  0xf4   : > { %2093 = vmatmul.mubr.f32.gmra.mrb[82].mxu0 %v11631_v62  ;;  %v11658_v62 = vld [vmem:[%s11110_s26 + $0x169] sm:$0xff] }
  0xf5   : > { %2097 = vmatprep.mubr.f32.mxu0 %v11634_v60  ;;  %v11655_v60 = vld [vmem:[%s11110_s26 + $0x160] sm:$0xff] }
  0xf8   : > { %2098 = vmatmul.mubr.f32.gmra.mrb[84].mxu0 %v11639_v2  ;;  %v11663_v2 = vld [vmem:[%s11110_s26 + $0x168] sm:$0xff] }
  0xf9   : > { %2102 = vmatprep.mubr.f32.mxu0 %v11642_v63  ;;  %v11666_v63 = vld [vmem:[%s11110_s26 + $0x171] sm:$0xff] }
  0xfc   : > { %2103 = vmatmul.mubr.f32.gmra.mrb[86].mxu0 %v11647_v58  ;;  %v11674_v58 = vld [vmem:[%s11110_s26 + $0x179] sm:$0xff] }
  0xfd   : > { %2107 = vmatprep.mubr.f32.mxu0 %v11650_v3  ;;  %v11679_v3 = vld [vmem:[%s11110_s26 + $0x178] sm:$0xff] }
 0x100   : > { %2108 = vmatmul.mubr.f32.gmra.mrb[88].mxu0 %v11655_v60 }
 0x101   : > { %2112 = vmatprep.mubr.f32.mxu0 %v11658_v62 }
 0x104   : > { %2113 = vmatmul.mubr.f32.gmra.mrb[90].mxu0 %v11663_v2 }
 0x105   : > { %2117 = vmatprep.mubr.f32.mxu0 %v11666_v63 }
 0x108   : > { %2118 = vmatmul.mubr.f32.gmra.mrb[92].mxu0 %v11671_v57 }
 0x109   : > { %2122 = vmatprep.mubr.f32.mxu0 %v11674_v58 }
 0x10c   : > { %2123 = vmatmul.mubr.f32.gmra.mrb[94].mxu0 %v11679_v3 }
 0x10d   : > { %2192 = vmatprep.mubr.f32.mxu0 %v11231_v0  ;;  %v2763_v0 = vld [vmem:[%s18354_s3] sm:$0xff] }
 0x110   : > { %2193 = vmatmul.mubr.f32.vlgmr.msra.gmra.mrb[0].mxu0 %v11242_v4  ;;  %v2764_v4 = vld [vmem:[%s18354_s3 + $0x8] sm:$0xff] }
 0x111   : > { %2197 = vmatprep.mubr.f32.mxu0 %v11245_v6  ;;  %v8865_v6 = vpack.c.bf16 %v2764_v4, %v2763_v0 }
 0x113   : > { %8866 = vmatpush1.bf16.msra.mxu1 %v8865_v6  ;;  %v2793_v6 = vld [vmem:[%s18354_s3 + $0xf0] sm:$0xff] }
 0x114   : > { %2198 = vmatmul.mubr.f32.gmra.mrb[2].mxu0 %v11257_v9  ;;  %v18681_v9 = vmov 0.0|0.0  }
 0x115   : > { %2202 = vmatprep.mubr.f32.mxu0 %v11260_v11  ;;  %8867 = vmatprep.subr.bf16.mxu1 %v18681_v9  ;;  %v2765_v11 = vld [vmem:[%s18354_s3 + $0x10] sm:$0xff] }
 0x118   : > { %2203 = vmatmul.mubr.f32.gmra.mrb[4].mxu0 %v11272_v14  ;;  %v2766_v14 = vld [vmem:[%s18354_s3 + $0x18] sm:$0xff] }
 0x119   : > { %2207 = vmatprep.mubr.f32.mxu0 %v11275_v16  ;;  %v8868_v16 = vpack.c.bf16 %v2766_v14, %v2765_v11  ;;  %v2893_v14 = vld [vmem:[%s18354_s3 + $0x410] sm:$0xff] }
 0x11b   : > { %8869 = vmatpush1.bf16.msra.mxu1 %v8868_v16 }
 0x11c   : > { %2208 = vmatmul.mubr.f32.gmra.mrb[6].mxu0 %v11287_v19  ;;  %8870 = vmatprep.subr.bf16.mxu1 %v18681_v9  ;;  %v2767_v19 = vld [vmem:[%s18354_s3 + $0x20] sm:$0xff] }
 0x11d   : > { %2212 = vmatprep.mubr.f32.mxu0 %v11290_v21  ;;  %v2768_v21 = vld [vmem:[%s18354_s3 + $0x28] sm:$0xff] }
 0x120   : > { %2213 = vmatmul.mubr.f32.gmra.mrb[8].mxu0 %v11302_v24  ;;  %v8871_v24 = vpack.c.bf16 %v2768_v21, %v2767_v19  ;;  %v2896_v19 = vld [vmem:[%s18354_s3 + $0x428] sm:$0xff] }
 0x121   : > { %2217 = vmatprep.mubr.f32.mxu0 %v11305_v26  ;;  %v2769_v26 = vld [vmem:[%s18354_s3 + $0x30] sm:$0xff] }
 0x122   : > { %8872 = vmatpush1.bf16.msra.mxu1 %v8871_v24 }
 0x123   : > { %8873 = vmatprep.subr.bf16.mxu1 %v18681_v9 }
 0x124   : > { %2218 = vmatmul.mubr.f32.gmra.mrb[10].mxu0 %v11317_v29  ;;  %v2770_v29 = vld [vmem:[%s18354_s3 + $0x38] sm:$0xff] }
 0x125   : > { %2222 = vmatprep.mubr.f32.mxu0 %v11320_v31  ;;  %v8874_v31 = vpack.c.bf16 %v2770_v29, %v2769_v26  ;;  %v18682_v26 = vld [vmem:[#allocation2_spill] sm:$0xff] }
 0x127   : > { %8875 = vmatpush1.bf16.msra.mxu1 %v8874_v31  ;;  %v18683_v31 = vld [vmem:[#allocation3_spill] sm:$0xff] }
 0x128   : > { %2223 = vmatmul.mubr.f32.gmra.mrb[12].mxu0 %v11332_v34  ;;  %8876 = vmatprep.subr.bf16.mxu1 %v18681_v9  ;;  %v2771_v34 = vld [vmem:[%s18354_s3 + $0x40] sm:$0xff] }
 0x129   : > { %2227 = vmatprep.mubr.f32.mxu0 %v11335_v36  ;;  %v2772_v36 = vld [vmem:[%s18354_s3 + $0x48] sm:$0xff] }
 0x12c   : > { %2228 = vmatmul.mubr.f32.gmra.mrb[14].mxu0 %v11347_v39  ;;  %v8877_v39 = vpack.c.bf16 %v2772_v36, %v2771_v34  ;;  %v18684_v36 = vld [vmem:[#allocation4_spill] sm:$0xff] }
 0x12d   : > { %2232 = vmatprep.mubr.f32.mxu0 %v11350_v41  ;;  %v2773_v41 = vld [vmem:[%s18354_s3 + $0x50] sm:$0xff] }
 0x12e   : > { %8878 = vmatpush1.bf16.msra.mxu1 %v8877_v39  ;;  %v18685_v39 = vld [vmem:[#allocation5_spill] sm:$0xff] }
 0x12f   : > { %8879 = vmatprep.subr.bf16.mxu1 %v18681_v9 }
 0x130   : > { %2233 = vmatmul.mubr.f32.gmra.mrb[16].mxu0 %v11362_v44  ;;  %v2774_v44 = vld [vmem:[%s18354_s3 + $0x58] sm:$0xff] }
 0x131   : > { %2237 = vmatprep.mubr.f32.mxu0 %v11365_v46  ;;  %v8880_v46 = vpack.c.bf16 %v2774_v44, %v2773_v41  ;;  %v2903_v41 = vld [vmem:[%s18354_s3 + $0x460] sm:$0xff]  ;;  %v2904_v44 = vld [vmem:[%s18354_s3 + $0x468] sm:$0xff] }
 0x133   : > { %8881 = vmatpush1.bf16.msra.mxu1 %v8880_v46  ;;  %v9080_v46 = vpack.c.bf16 %v2904_v44, %v2903_v41 }
 0x134   : > { %2238 = vmatmul.mubr.f32.gmra.mrb[18].mxu0 %v11377_v49  ;;  %8882 = vmatprep.subr.bf16.mxu1 %v18681_v9  ;;  %v2775_v49 = vld [vmem:[%s18354_s3 + $0x60] sm:$0xff] }
 0x135   : > { %2242 = vmatprep.mubr.f32.mxu0 %v11380_v51  ;;  %v2776_v51 = vld [vmem:[%s18354_s3 + $0x68] sm:$0xff] }
 0x138   : > { %2243 = vmatmul.mubr.f32.gmra.mrb[20].mxu0 %v11392_v54  ;;  %v11782_v54 = vld [vmem:[%s18354_s3 + $0x70] sm:$0xff] }
 0x139   : > { %2247 = vmatprep.mubr.f32.mxu0 %v11395_v56  ;;  %v8883_v56 = vpack.c.bf16 %v2776_v51, %v2775_v49  ;;  %v18686_v49 = vld [vmem:[#allocation6_spill] sm:$0xff]  ;;  %v18687_v51 = vld [vmem:[#allocation7_spill] sm:$0xff] }
 0x13b   : > { %8884 = vmatpush1.bf16.msra.mxu1 %v8883_v56  ;;  %v2906_v56 = vld [vmem:[%s18354_s3 + $0x478] sm:$0xff] }
 0x13c   : > { %2248 = vmatmul.mubr.f32.gmra.mrb[22].mxu0 %v11407_v59  ;;  %v2778_v59 = vld [vmem:[%s18354_s3 + $0x78] sm:$0xff]  ;;  %8885 = vmatprep.subr.bf16.mxu1 %v18681_v9 }
 0x13d   : > { %2252 = vmatprep.mubr.f32.mxu0 %v11410_v61  ;;  %v10989_v61 = vmov 0.0  }
 0x13e   : > { %631 = vst [vmem:[%s11764_s30 + $0x180] sm:$0xff] %v10989_v61  ;;  %632 = vst [vmem:[%s11759_s27] sm:$0xff] %v10989_v61 }
 0x13f   : > { %633 = vst [vmem:[%s11759_s27 + $0x8] sm:$0xff] %v10989_v61  ;;  %634 = vst [vmem:[%s11759_s27 + $0x10] sm:$0xff] %v10989_v61 }
 0x140   : > { %2253 = vmatmul.mubr.f32.gmra.mrb[24].mxu0 %v11422_v1  ;;  %635 = vst [vmem:[%s11759_s27 + $0x18] sm:$0xff] %v10989_v61  ;;  %636 = vst [vmem:[%s11759_s27 + $0x20] sm:$0xff] %v10989_v61  ;;  %v8886_v1 = vpack.c.bf16 %v2778_v59, %v11782_v54  ;;  %v2905_v54 = vld [vmem:[%s18354_s3 + $0x470] sm:$0xff] }
 0x141   : > { %2257 = vmatprep.mubr.f32.mxu0 %v11425_v5  ;;  %637 = vst [vmem:[%s11759_s27 + $0x28] sm:$0xff] %v10989_v61  ;;  %638 = vst [vmem:[%s11759_s27 + $0x30] sm:$0xff] %v10989_v61  ;;  %v2779_v5 = vld [vmem:[%s18354_s3 + $0x80] sm:$0xff]  ;;  %v18688_v59 = vld [vmem:[#allocation8_spill] sm:$0xff] }
 0x142   : > { %639 = vst [vmem:[%s11759_s27 + $0x38] sm:$0xff] %v10989_v61  ;;  %640 = vst [vmem:[%s11759_s27 + $0x40] sm:$0xff] %v10989_v61  ;;  %8887 = vmatpush1.bf16.msra.mxu1 %v8886_v1  ;;  %v18689_v1 = vld [vmem:[#allocation9_spill] sm:$0xff] }
 0x143   : > { %641 = vst [vmem:[%s11759_s27 + $0x48] sm:$0xff] %v10989_v61  ;;  %642 = vst [vmem:[%s11759_s27 + $0x50] sm:$0xff] %v10989_v61  ;;  %8888 = vmatprep.subr.bf16.mxu1 %v18681_v9 }
 0x144   : > { %2258 = vmatmul.mubr.f32.gmra.mrb[26].mxu0 %v11431_v7  ;;  %643 = vst [vmem:[%s11759_s27 + $0x58] sm:$0xff] %v10989_v61  ;;  %644 = vst [vmem:[%s11759_s27 + $0x60] sm:$0xff] %v10989_v61  ;;  %v2780_v7 = vld [vmem:[%s18354_s3 + $0x88] sm:$0xff] }
 0x145   : > { %2262 = vmatprep.mubr.f32.mxu0 %v11434_v8  ;;  %645 = vst [vmem:[%s11759_s27 + $0x68] sm:$0xff] %v10989_v61  ;;  %646 = vst [vmem:[%s11759_s27 + $0x70] sm:$0xff] %v10989_v61  ;;  %v8889_v8 = vpack.c.bf16 %v2780_v7, %v2779_v5  ;;  %v18690_v5 = vld [vmem:[#allocation10_spill] sm:$0xff]  ;;  %v18691_v7 = vld [vmem:[#allocation11_spill] sm:$0xff] }
 0x146   : > { %647 = vst [vmem:[%s11759_s27 + $0x78] sm:$0xff] %v10989_v61  ;;  %648 = vst [vmem:[%s11759_s27 + $0x80] sm:$0xff] %v10989_v61 }
 0x147   : > { %649 = vst [vmem:[%s11759_s27 + $0x88] sm:$0xff] %v10989_v61  ;;  %650 = vst [vmem:[%s11759_s27 + $0x90] sm:$0xff] %v10989_v61  ;;  %8890 = vmatpush1.bf16.msra.mxu1 %v8889_v8  ;;  %v18692_v8 = vld [vmem:[#allocation12_spill] sm:$0xff] }
 0x148   : > { %2263 = vmatmul.mubr.f32.gmra.mrb[28].mxu0 %v11439_v10  ;;  %651 = vst [vmem:[%s11759_s27 + $0x98] sm:$0xff] %v10989_v61  ;;  %652 = vst [vmem:[%s11759_s27 + $0xa0] sm:$0xff] %v10989_v61  ;;  %v2781_v10 = vld [vmem:[%s18354_s3 + $0x90] sm:$0xff]  ;;  %8891 = vmatprep.subr.bf16.mxu1 %v18681_v9 }
 0x149   : > { %2267 = vmatprep.mubr.f32.mxu0 %v11442_v12  ;;  %653 = vst [vmem:[%s11759_s27 + $0xa8] sm:$0xff] %v10989_v61  ;;  %654 = vst [vmem:[%s11759_s27 + $0xb0] sm:$0xff] %v10989_v61  ;;  %v2782_v12 = vld [vmem:[%s18354_s3 + $0x98] sm:$0xff] }
 0x14a   : > { %655 = vst [vmem:[%s11759_s27 + $0xb8] sm:$0xff] %v10989_v61  ;;  %656 = vst [vmem:[%s11759_s27 + $0xc0] sm:$0xff] %v10989_v61 }
 0x14b   : > { %657 = vst [vmem:[%s11759_s27 + $0xc8] sm:$0xff] %v10989_v61  ;;  %658 = vst [vmem:[%s11759_s27 + $0xd0] sm:$0xff] %v10989_v61 }
 0x14c   : > { %2268 = vmatmul.mubr.f32.gmra.mrb[30].mxu0 %v11447_v13  ;;  %659 = vst [vmem:[%s11759_s27 + $0xd8] sm:$0xff] %v10989_v61  ;;  %660 = vst [vmem:[%s11759_s27 + $0xe0] sm:$0xff] %v10989_v61  ;;  %v8892_v13 = vpack.c.bf16 %v2782_v12, %v2781_v10  ;;  %v18693_v10 = vld [vmem:[#allocation13_spill] sm:$0xff]  ;;  %v18694_v12 = vld [vmem:[#allocation14_spill] sm:$0xff] }
 0x14d   : > { %2272 = vmatprep.mubr.f32.mxu0 %v11450_v15  ;;  %661 = vst [vmem:[%s11759_s27 + $0xe8] sm:$0xff] %v10989_v61  ;;  %662 = vst [vmem:[%s11759_s27 + $0xf0] sm:$0xff] %v10989_v61  ;;  %v2783_v15 = vld [vmem:[%s18354_s3 + $0xa0] sm:$0xff] }
 0x14e   : > { %663 = vst [vmem:[%s11759_s27 + $0xf8] sm:$0xff] %v10989_v61  ;;  %664 = vst [vmem:[%s11759_s27 + $0x100] sm:$0xff] %v10989_v61  ;;  %8893 = vmatpush1.bf16.msra.mxu1 %v8892_v13  ;;  %v18695_v13 = vld [vmem:[#allocation15_spill] sm:$0xff] }
 0x14f   : > { %665 = vst [vmem:[%s11759_s27 + $0x108] sm:$0xff] %v10989_v61  ;;  %666 = vst [vmem:[%s11759_s27 + $0x110] sm:$0xff] %v10989_v61  ;;  %8894 = vmatprep.subr.bf16.mxu1 %v18681_v9 }
 0x150   : > { %667 = vst [vmem:[%s11759_s27 + $0x118] sm:$0xff] %v10989_v61  ;;  %668 = vst [vmem:[%s11759_s27 + $0x120] sm:$0xff] %v10989_v61  ;;  %2273 = vmatmul.mubr.f32.gmra.mrb[32].mxu0 %v11455_v17  ;;  %v2784_v17 = vld [vmem:[%s18354_s3 + $0xa8] sm:$0xff] }
 0x151   : > { %669 = vst [vmem:[%s11759_s27 + $0x128] sm:$0xff] %v10989_v61  ;;  %670 = vst [vmem:[%s11759_s27 + $0x130] sm:$0xff] %v10989_v61  ;;  %2277 = vmatprep.mubr.f32.mxu0 %v11458_v18  ;;  %v8895_v18 = vpack.c.bf16 %v2784_v17, %v2783_v15  ;;  %v18696_v15 = vld [vmem:[#allocation16_spill] sm:$0xff]  ;;  %v18697_v17 = vld [vmem:[#allocation17_spill] sm:$0xff] }
 0x152   : > { %671 = vst [vmem:[%s11759_s27 + $0x138] sm:$0xff] %v10989_v61  ;;  %672 = vst [vmem:[%s11759_s27 + $0x140] sm:$0xff] %v10989_v61 }
 0x153   : > { %673 = vst [vmem:[%s11759_s27 + $0x148] sm:$0xff] %v10989_v61  ;;  %674 = vst [vmem:[%s11759_s27 + $0x150] sm:$0xff] %v10989_v61  ;;  %8896 = vmatpush1.bf16.msra.mxu1 %v8895_v18  ;;  %v18698_v18 = vld [vmem:[#allocation18_spill] sm:$0xff] }
 0x154   : > { %675 = vst [vmem:[%s11759_s27 + $0x158] sm:$0xff] %v10989_v61  ;;  %676 = vst [vmem:[%s11759_s27 + $0x160] sm:$0xff] %v10989_v61  ;;  %2278 = vmatmul.mubr.f32.gmra.mrb[34].mxu0 %v11463_v20  ;;  %8897 = vmatprep.subr.bf16.mxu1 %v18681_v9  ;;  %v2785_v20 = vld [vmem:[%s18354_s3 + $0xb0] sm:$0xff] }
 0x155   : > { %677 = vst [vmem:[%s11759_s27 + $0x168] sm:$0xff] %v10989_v61  ;;  %678 = vst [vmem:[%s11759_s27 + $0x170] sm:$0xff] %v10989_v61  ;;  %2282 = vmatprep.mubr.f32.mxu0 %v11466_v22  ;;  %v2786_v22 = vld [vmem:[%s18354_s3 + $0xb8] sm:$0xff] }
 0x156   : > { %679 = vst [vmem:[%s11759_s27 + $0x178] sm:$0xff] %v10989_v61  ;;  %680 = vst [vmem:[%s11759_s27 + $0x180] sm:$0xff] %v10989_v61 }
 0x157   : > { %723 = vst [vmem:[%s11769_s20 + $0x150] sm:$0xff] %v10989_v61  ;;  %v9084_v61 = vpack.c.bf16 %v2906_v56, %v2905_v54 }
 0x158   : > { %2283 = vmatmul.mubr.f32.gmra.mrb[36].mxu0 %v11471_v23  ;;  %v8898_v23 = vpack.c.bf16 %v2786_v22, %v2785_v20  ;;  %v18699_v20 = vld [vmem:[#allocation19_spill] sm:$0xff]  ;;  %v18700_v22 = vld [vmem:[#allocation20_spill] sm:$0xff] }
 0x159   : > { %2287 = vmatprep.mubr.f32.mxu0 %v11474_v25  ;;  %v2787_v25 = vld [vmem:[%s18354_s3 + $0xc0] sm:$0xff] }
 0x15a   : > { %8899 = vmatpush1.bf16.msra.mxu1 %v8898_v23  ;;  %v18701_v23 = vld [vmem:[#allocation21_spill] sm:$0xff] }
 0x15b   : > { %8900 = vmatprep.subr.bf16.mxu1 %v18681_v9 }
 0x15c   : > { %2288 = vmatmul.mubr.f32.gmra.mrb[38].mxu0 %v11479_v27  ;;  %v2788_v27 = vld [vmem:[%s18354_s3 + $0xc8] sm:$0xff] }
 0x15d   : > { %2292 = vmatprep.mubr.f32.mxu0 %v11482_v28  ;;  %v8901_v28 = vpack.c.bf16 %v2788_v27, %v2787_v25  ;;  %v18702_v25 = vld [vmem:[#allocation22_spill] sm:$0xff]  ;;  %v18703_v27 = vld [vmem:[#allocation23_spill] sm:$0xff] }
 0x15f   : > { %8902 = vmatpush1.bf16.msra.mxu1 %v8901_v28  ;;  %v18704_v28 = vld [vmem:[#allocation24_spill] sm:$0xff] }
 0x160   : > { %2293 = vmatmul.mubr.f32.gmra.mrb[40].mxu0 %v11487_v30  ;;  %8903 = vmatprep.subr.bf16.mxu1 %v18681_v9  ;;  %v2789_v30 = vld [vmem:[%s18354_s3 + $0xd0] sm:$0xff] }
 0x161   : > { %2297 = vmatprep.mubr.f32.mxu0 %v11490_v32  ;;  %v2790_v32 = vld [vmem:[%s18354_s3 + $0xd8] sm:$0xff] }
 0x164   : > { %2298 = vmatmul.mubr.f32.gmra.mrb[42].mxu0 %v11495_v33  ;;  %v8904_v33 = vpack.c.bf16 %v2790_v32, %v2789_v30  ;;  %v18705_v30 = vld [vmem:[#allocation25_spill] sm:$0xff]  ;;  %v18706_v32 = vld [vmem:[#allocation26_spill] sm:$0xff] }
 0x165   : > { %2302 = vmatprep.mubr.f32.mxu0 %v11498_v35  ;;  %v2791_v35 = vld [vmem:[%s18354_s3 + $0xe0] sm:$0xff] }
 0x166   : > { %8905 = vmatpush1.bf16.msra.mxu1 %v8904_v33  ;;  %v18707_v33 = vld [vmem:[#allocation27_spill] sm:$0xff] }
 0x167   : > { %8906 = vmatprep.subr.bf16.mxu1 %v18681_v9 }
 0x168   : > { %2303 = vmatmul.mubr.f32.gmra.mrb[44].mxu0 %v11503_v37  ;;  %v2792_v37 = vld [vmem:[%s18354_s3 + $0xe8] sm:$0xff] }
 0x169   : > { %2307 = vmatprep.mubr.f32.mxu0 %v11506_v38  ;;  %v8907_v0 = vpack.c.bf16 %v2792_v37, %v2791_v35  ;;  %v2891_v38 = vld [vmem:[%s18354_s3 + $0x400] sm:$0xff]  ;;  %v785_v35 = vlaneseq }
 0x16a   : > { %v1749_v37 = vld [vmem:[%s11110_s26 + $0x181] sm:$0xff] }
 0x16b   : > { %8908 = vmatpush1.bf16.msra.mxu1 %v8907_v0  ;;  %v1746_v0 = vld [vmem:[%s11110_s26 + $0x180] sm:$0xff] }
 0x16c   : > { %2308 = vmatmul.mubr.f32.gmra.mrb[46].mxu0 %v11511_v40  ;;  %v2892_v40 = vld [vmem:[%s18354_s3 + $0x408] sm:$0xff]  ;;  %8909 = vmatprep.subr.bf16.mxu1 %v18681_v9 }
 0x16d   : > { %2312 = vmatprep.mubr.f32.mxu0 %v11514_v42  ;;  %v9056_v4 = vpack.c.bf16 %v2892_v40, %v2891_v38  ;;  %v2794_v42 = vld [vmem:[%s18354_s3 + $0xf8] sm:$0xff]  ;;  %v1750_v38 = vld [vmem:[%s11110_s26 + $0x189] sm:$0xff] }
 0x16e   : > { %v8910_v11 = vpack.c.bf16 %v2794_v42, %v2793_v6 }
 0x16f   : > { %9057 = vmatprep.subr.bf16.mxu0 %v9056_v4 }
 0x170   : > { %2313 = vmatmul.mubr.f32.gmra.mrb[48].mxu0 %v11519_v43  ;;  %v2894_v43 = vld [vmem:[%s18354_s3 + $0x418] sm:$0xff]  ;;  %8911 = vmatpush1.bf16.msra.mxu1 %v8910_v11 }
 0x171   : > { %2317 = vmatprep.mubr.f32.mxu0 %v11522_v45  ;;  %9059 = vmatpush3.bf16.msra.mxu0 %v9056_v4  ;;  %v9060_v16 = vpack.c.bf16 %v2894_v43, %v2893_v14  ;;  %v2895_v45 = vld [vmem:[%s18354_s3 + $0x420] sm:$0xff] }
 0x172   : > { %8912 = vmatprep.subr.bf16.mxu1 %v18681_v9  ;;  %v9064_v21 = vpack.c.bf16 %v2896_v19, %v2895_v45 }
 0x173   : > { %9061 = vmatprep.subr.bf16.mxu0 %v9060_v16 }
 0x174   : > { %2318 = vmatmul.mubr.f32.gmra.mrb[50].mxu0 %v11527_v47  ;;  %v2897_v47 = vld [vmem:[%s18354_s3 + $0x430] sm:$0xff] }
 0x175   : > { %2322 = vmatprep.mubr.f32.mxu0 %v11530_v48  ;;  %9063 = vmatpush3.bf16.msra.mxu0 %v9060_v16  ;;  %v2898_v48 = vld [vmem:[%s18354_s3 + $0x438] sm:$0xff] }
 0x176   : > { %9065 = vmatprep.subr.bf16.mxu0 %v9064_v21  ;;  %v9068_v24 = vpack.c.bf16 %v2898_v48, %v2897_v47 }
 0x178   : > { %2323 = vmatmul.mubr.f32.gmra.mrb[52].mxu0 %v11535_v50  ;;  %v2899_v50 = vld [vmem:[%s18354_s3 + $0x440] sm:$0xff] }
 0x179   : > { %2327 = vmatprep.mubr.f32.mxu0 %v11538_v52  ;;  %9067 = vmatpush3.bf16.msra.mxu0 %v9064_v21  ;;  %v2900_v52 = vld [vmem:[%s18354_s3 + $0x448] sm:$0xff] }
 0x17a   : > { %9069 = vmatprep.subr.bf16.mxu0 %v9068_v24  ;;  %v9072_v29 = vpack.c.bf16 %v2900_v52, %v2899_v50 }
 0x17c   : > { %2328 = vmatmul.mubr.f32.gmra.mrb[54].mxu0 %v11543_v53  ;;  %v2901_v53 = vld [vmem:[%s18354_s3 + $0x450] sm:$0xff] }
 0x17d   : > { %2332 = vmatprep.mubr.f32.mxu0 %v11546_v55  ;;  %9071 = vmatpush3.bf16.msra.mxu0 %v9068_v24  ;;  %v2902_v55 = vld [vmem:[%s18354_s3 + $0x458] sm:$0xff] }
 0x17e   : > { %9073 = vmatprep.subr.bf16.mxu0 %v9072_v29  ;;  %v9076_v34 = vpack.c.bf16 %v2902_v55, %v2901_v53 }
 0x180   : > { %2333 = vmatmul.mubr.f32.gmra.mrb[56].mxu0 %v18682_v26 }
 0x181   : > { %2337 = vmatprep.mubr.f32.mxu0 %v18683_v31  ;;  %9075 = vmatpush3.bf16.msra.mxu0 %v9072_v29 }
 0x182   : > { %9077 = vmatprep.subr.bf16.mxu0 %v9076_v34 }
 0x184   : > { %2338 = vmatmul.mubr.f32.gmra.mrb[58].mxu0 %v18684_v36 }
 0x185   : > { %2342 = vmatprep.mubr.f32.mxu0 %v18685_v39  ;;  %9079 = vmatpush3.bf16.msra.mxu0 %v9076_v34 }
 0x186   : > { %9081 = vmatprep.subr.bf16.mxu0 %v9080_v46 }
 0x188   : > { %2343 = vmatmul.mubr.f32.gmra.mrb[60].mxu0 %v18686_v49 }
 0x189   : > { %2347 = vmatprep.mubr.f32.mxu0 %v18687_v51  ;;  %9083 = vmatpush3.bf16.msra.mxu0 %v9080_v46 }
 0x18a   : > { %9085 = vmatprep.subr.bf16.mxu0 %v9084_v61 }
 0x18c   : > { %2348 = vmatmul.mubr.f32.gmra.mrb[62].mxu0 %v18688_v59 }
 0x18d   : > { %2352 = vmatprep.mubr.f32.mxu0 %v18689_v1  ;;  %9087 = vmatpush3.bf16.msra.mxu0 %v9084_v61 }
 0x18e   : > { %9088 = vmatprep.subr.bf16.mxu0 %v18681_v9 }
 0x190   : > { %2353 = vmatmul.mubr.f32.gmra.mrb[64].mxu0 %v18690_v5 }
 0x191   : > { %2357 = vmatprep.mubr.f32.mxu0 %v18691_v7 }
 0x194   : > { %2358 = vmatmul.mubr.f32.gmra.mrb[66].mxu0 %v18692_v8  ;;  %v12064_v8 = vld [vmem:[%s18353_s2] ss:$0 sm:$0xff] }
 0x195   : > { %2362 = vmatprep.mubr.f32.mxu0 %v18693_v10 }
 0x198   : > { %2363 = vmatmul.mubr.f32.gmra.mrb[68].mxu0 %v18694_v12 }
 0x199   : > { %2367 = vmatprep.mubr.f32.mxu0 %v18695_v13 }
 0x19c   : > { %2368 = vmatmul.mubr.f32.gmra.mrb[70].mxu0 %v18696_v15 }
 0x19d   : > { %2372 = vmatprep.mubr.f32.mxu0 %v18697_v17 }
 0x1a0   : > { %2373 = vmatmul.mubr.f32.gmra.mrb[72].mxu0 %v18698_v18 }
 0x1a1   : > { %2377 = vmatprep.mubr.f32.mxu0 %v18699_v20 }
 0x1a4   : > { %2378 = vmatmul.mubr.f32.gmra.mrb[74].mxu0 %v18700_v22 }
 0x1a5   : > { %2382 = vmatprep.mubr.f32.mxu0 %v18701_v23 }
 0x1a8   : > { %2383 = vmatmul.mubr.f32.gmra.mrb[76].mxu0 %v18702_v25 }
 0x1a9   : > { %2387 = vmatprep.mubr.f32.mxu0 %v18703_v27 }
 0x1ac   : > { %2388 = vmatmul.mubr.f32.gmra.mrb[78].mxu0 %v18704_v28 }
 0x1ad   : > { %2392 = vmatprep.mubr.f32.mxu0 %v18705_v30 }
 0x1b0   : > { %2393 = vmatmul.mubr.f32.gmra.mrb[80].mxu0 %v18706_v32 }
 0x1b1   : > { %2397 = vmatprep.mubr.f32.mxu0 %v18707_v33 }
 0x1b4   : > { %2398 = vmatmul.mubr.f32.gmra.mrb[82].mxu0 %v11655_v60  ;;  %v12006_v60 = vshrl.u32 %v785_v35, 7 }
 0x1b5   : > { %2402 = vmatprep.mubr.f32.mxu0 %v11658_v62 }
 0x1b6   : > { %18708 = vst [vmem:[#allocation2_spill] sm:$0xff] %v12006_v60  ;;  %v787_v62 = vadd.s32 8, %v12006_v60  ;;  %v788_v6 = vadd.s32 16, %v12006_v60  ;;  %v789_v11 = vadd.s32 24, %v12006_v60  ;;  %v790_v45 = vadd.s32 32, %v12006_v60 }
 0x1b7   : > { %v12036_v26 = vadd.s32 40, %v12006_v60  ;;  %v12039_v29 = vadd.s32 48, %v12006_v60  ;;  %v12052_v46 = vadd.s32 56, %v12006_v60  ;;  %v12070_v13 = vadd.s32 64, %v12006_v60 }
 0x1b8   : > { %2403 = vmatmul.mubr.f32.gmra.mrb[84].mxu0 %v11663_v2  ;;  %v1747_v2 = vld [vmem:[%s11110_s26 + $0x188] sm:$0xff]  ;;  %v12016_v40 = vmul.u32.u64.low 2863311531, %v787_v62  ;;  %v12017_v4 = vmul.u32.u64.high 2863311531, %v787_v62, %v12016_v40  ;;  %v12024_v43 = vmul.u32.u64.low 2863311531, %v788_v6  ;;  %v12025_v16 = vmul.u32.u64.high 2863311531, %v788_v6, %v12024_v43 }
 0x1b9   : > { %2407 = vmatprep.mubr.f32.mxu0 %v11666_v63  ;;  %v12028_v21 = vmul.u32.u64.low 2863311531, %v789_v11  ;;  %v12029_v47 = vmul.u32.u64.high 2863311531, %v789_v11, %v12028_v21  ;;  %v12031_v24 = vmul.u32.u64.low 2863311531, %v790_v45  ;;  %v12032_v50 = vmul.u32.u64.high 2863311531, %v790_v45, %v12031_v24 }
 0x1ba   : > { %v851_v14 = vshrl.u32 %v12017_v4, 4  ;;  %v862_v53 = vshrl.u32 %v12025_v16, 4  ;;  %v12043_v55 = vmul.u32.u64.low 2863311531, %v12036_v26  ;;  %v12044_v34 = vmul.u32.u64.high 2863311531, %v12036_v26, %v12043_v55 }
 0x1bb   : > { %v873_v36 = vshrl.u32 %v12029_v47, 4  ;;  %v12048_v39 = vmul.u32.u64.low 2863311531, %v12039_v29  ;;  %v12049_v41 = vmul.u32.u64.high 2863311531, %v12039_v29, %v12048_v39  ;;  %v884_v49 = vshrl.u32 %v12032_v50, 4 }
 0x1bc   : > { %2408 = vmatmul.mubr.f32.gmra.mrb[86].mxu0 %v11671_v57  ;;  %v12012_v63 = vmul.u32.u64.low 2863311531, %v12006_v60  ;;  %v12013_v57 = vmul.u32.u64.high 2863311531, %v12006_v60, %v12012_v63  ;;  %v852_v48 = vmul.u32 24, %v851_v14  ;;  %v895_v12 = vshrl.u32 %v12044_v34, 4 }
 0x1bd   : > { %2412 = vmatprep.mubr.f32.mxu0 %v11674_v58  ;;  %v1751_v58 = vld [vmem:[%s11110_s26 + $0x191] sm:$0xff]  ;;  %v863_v44 = vmul.u32 24, %v862_v53  ;;  %v874_v56 = vmul.u32 24, %v873_v36  ;;  %v906_v17 = vshrl.u32 %v12049_v41, 4  ;;  %v12074_v20 = vadd.s32 72, %v12006_v60 }
 0x1be   : > { %v840_v42 = vshrl.u32 %v12013_v57, 4  ;;  %v853_v31 = vsub.s32 %v787_v62, %v852_v48  ;;  %v12056_v61 = vmul.u32.u64.low 2863311531, %v12052_v46  ;;  %v12057_v1 = vmul.u32.u64.high 2863311531, %v12052_v46, %v12056_v61 }
 0x1bf   : > { %v864_v59 = vsub.s32 %v788_v6, %v863_v44  ;;  %v885_v5 = vmul.u32 24, %v884_v49  ;;  %v875_v15 = vsub.s32 %v789_v11, %v874_v56  ;;  %v896_v28 = vmul.u32 24, %v895_v12  ;;  %v2795_v44 = vld [vmem:[%s18354_s3 + $0x100] sm:$0xff] }
 0x1c0   : > { %2413 = vmatmul.mubr.f32.gmra.mrb[88].mxu0 %v11679_v3  ;;  %v1748_v3 = vld [vmem:[%s11110_s26 + $0x190] sm:$0xff]  ;;  %v841_v19 = vmul.u32 24, %v840_v42  ;;  %vm1363_vm2 = vcmp.ne.s32.totalorder %v853_v31, 0  ;;  %vm1411_vm3 = vcmp.lt.s32.totalorder %v853_v31, 0  ;;  %v1507_v54 = vadd.s32 24, %v853_v31 }
 0x1c1   : > { %2417 = vmatprep.mubr.f32.mxu0 %v1749_v37  ;;  %vm1459_vm5 = vmand %vm1411_vm3, %vm1363_vm2  ;;  %vm1364_vm6 = vcmp.ne.s32.totalorder %v864_v59, 0  ;;  %vm1412_vm7 = vcmp.lt.s32.totalorder %v864_v59, 0  ;;  %v886_v25 = vsub.s32 %v790_v45, %v885_v5  ;;  %v1508_v27 = vadd.s32 24, %v864_v59 }
 0x1c2   : > { %v842_v52 = vsub.s32 %v12006_v60, %v841_v19  ;;  %v12066_v10 = vsel %vm1459_vm5, %v1507_v54, %v853_v31  ;;  %v12082_v30 = vmul.u32.u64.low 2863311531, %v12070_v13  ;;  %v12083_v32 = vmul.u32.u64.high 2863311531, %v12070_v13, %v12082_v30  ;;  %vm1460_vm10 = vmand %vm1412_vm7, %vm1364_vm6 }
 0x1c3   : > { %18710 = vst [vmem:[#allocation4_spill] sm:$0xff] %v12066_v10  ;;  %vm1603_vm9 = vcmp.lt.s32.totalorder %v12066_v10, 16  ;;  %vm1365_vm11 = vcmp.ne.s32.totalorder %v875_v15, 0  ;;  %v907_v35 = vmul.u32 24, %v906_v17  ;;  %v12087_v37 = vadd.s32 80, %v12006_v60  ;;  %v2797_v30 = vld [vmem:[%s18354_s3 + $0x110] sm:$0xff] }
 0x1c4   : > { %2418 = vmatmul.mubr.f32.gmra.mrb[90].mxu0 %v1746_v0  ;;  %vm1362_vm0 = vcmp.ne.s32.totalorder %v842_v52, 0  ;;  %vm1410_vm1 = vcmp.lt.s32.totalorder %v842_v52, 0  ;;  %v1506_v51 = vadd.s32 24, %v842_v52  ;;  %vm1413_vm12 = vcmp.lt.s32.totalorder %v875_v15, 0 }
 0x1c5   : > { %2422 = vmatprep.mubr.f32.mxu0 %v1750_v38  ;;  %vm1458_vm4 = vmand %vm1410_vm1, %vm1362_vm0  ;;  %v917_v38 = vshrl.u32 %v12057_v1, 4  ;;  %vm1366_vm13 = vcmp.ne.s32.totalorder %v886_v25, 0  ;;  %vm1414_vm14 = vcmp.lt.s32.totalorder %v886_v25, 0  ;;  %v12102_v40 = vsel %vm1460_vm10, %v1508_v27, %v864_v59 }
 0x1c6   : > { %v12059_v7 = vsel %vm1458_vm4, %v1506_v51, %v842_v52  ;;  %18711 = vst [vmem:[#allocation5_spill] sm:$0xff] %v12102_v40  ;;  %v1509_v4 = vadd.s32 24, %v875_v15  ;;  %v897_v6 = vsub.s32 %v12036_v26, %v896_v28  ;;  %vm1461_vm15 = vmand %vm1413_vm12, %vm1365_vm11  ;;  %v908_v11 = vsub.s32 %v12039_v29, %v907_v35 }
 0x1c7   : > { %18709 = vst [vmem:[#allocation3_spill] sm:$0xff] %v12059_v7  ;;  %vm1602_vm8 = vcmp.lt.s32.totalorder %v12059_v7, 16  ;;  %v12110_v14 = vmul.u32.u64.low 2863311531, %v12087_v37  ;;  %v12111_v43 = vmul.u32.u64.high 2863311531, %v12087_v37, %v12110_v14  ;;  %vm1462_vm0 = vmand %vm1414_vm14, %vm1366_vm13  ;;  %v918_v45 = vmul.u32 24, %v917_v38 }
 0x1c8   : > { %2423 = vmatmul.mubr.f32.gmra.mrb[92].mxu0 %v1747_v2  ;;  %v12091_v62 = vmul.u32.u64.low 2863311531, %v12074_v20  ;;  %v12092_v2 = vmul.u32.u64.high 2863311531, %v12074_v20, %v12091_v62  ;;  %vm1604_vm1 = vcmp.lt.s32.totalorder %v12102_v40, 16  ;;  %v12122_v48 = vadd.s32 88, %v12006_v60 }
 0x1c9   : > { %2427 = vmatprep.mubr.f32.mxu0 %v1751_v58  ;;  %v12125_v24 = vsel %vm1461_vm15, %v1509_v4, %v875_v15  ;;  %vm1367_vm2 = vcmp.ne.s32.totalorder %v897_v6, 0  ;;  %vm1415_vm3 = vcmp.lt.s32.totalorder %v897_v6, 0  ;;  %v928_v50 = vshrl.u32 %v12083_v32, 4  ;;  %v2798_v32 = vld [vmem:[%s18354_s3 + $0x118] sm:$0xff] }
 0x1ca   : > { %18712 = vst [vmem:[#allocation6_spill] sm:$0xff] %v12125_v24  ;;  %vm1368_vm4 = vcmp.ne.s32.totalorder %v908_v11, 0  ;;  %vm1416_vm5 = vcmp.lt.s32.totalorder %v908_v11, 0  ;;  %v1511_v31 = vadd.s32 24, %v897_v6  ;;  %v1512_v53 = vadd.s32 24, %v908_v11  ;;  %vm1463_vm6 = vmand %vm1415_vm3, %vm1367_vm2 }
 0x1cb   : > { %v12132_v55 = vsub.s32 %v12052_v46, %v918_v45  ;;  %v939_v34 = vshrl.u32 %v12092_v2, 4  ;;  %v2796_v46 = vld [vmem:[%s18354_s3 + $0x108] sm:$0xff]  ;;  %v12151_v49 = vmul.u32.u64.low 2863311531, %v12122_v48  ;;  %v12152_v51 = vmul.u32.u64.high 2863311531, %v12122_v48, %v12151_v49  ;;  %vm1464_vm10 = vmand %vm1416_vm5, %vm1368_vm4 }
 0x1cc   : > { %2428 = vmatmul.mubr.f32.gmra.mrb[94].mxu0 %v1748_v3  ;;  %v1510_v3 = vadd.s32 24, %v886_v25  ;;  %vm1605_vm7 = vcmp.lt.s32.totalorder %v12125_v24, 16  ;;  %v929_v54 = vmul.u32 24, %v928_v50  ;;  %v12159_v56 = vadd.s32 96, %v12006_v60 }
 0x1cd   : > { %v950_v61 = vshrl.u32 %v12111_v43, 4  ;;  %v12164_v1 = vadd.s32 104, %v12006_v60  ;;  %v12167_v12 = vsel %vm1463_vm6, %v1511_v31, %v897_v6  ;;  %v8913_v15 = vpack.c.bf16 %v2796_v46, %v2795_v44  ;;  %v2799_v43 = vld [vmem:[%s18354_s3 + $0x120] sm:$0xff]  ;;  %v2801_v44 = vld [vmem:[%s18354_s3 + $0x130] sm:$0xff]  ;;  %v2802_v46 = vld [vmem:[%s18354_s3 + $0x138] sm:$0xff] }
 0x1ce   : > { %v12129_v26 = vsel %vm1462_vm0, %v1510_v3, %v886_v25  ;;  %18714 = vst [vmem:[#allocation8_spill] sm:$0xff] %v12167_v12  ;;  %v940_v17 = vmul.u32 24, %v939_v34  ;;  %v12177_v28 = vsel %vm1464_vm10, %v1512_v53, %v908_v11  ;;  %vm1369_vm12 = vcmp.ne.s32.totalorder %v12132_v55, 0 }
 0x1cf   : > { %18713 = vst [vmem:[#allocation7_spill] sm:$0xff] %v12129_v26  ;;  %vm1606_vm11 = vcmp.lt.s32.totalorder %v12129_v26, 16  ;;  %18715 = vst [vmem:[#allocation9_spill] sm:$0xff] %v12177_v28  ;;  %vm1417_vm13 = vcmp.lt.s32.totalorder %v12132_v55, 0  ;;  %v12189_v35 = vsub.s32 %v12070_v13, %v929_v54  ;;  %v951_v2 = vmul.u32 24, %v950_v61 }
 0x1d0   : > { %v1513_v13 = vadd.s32 24, %v12132_v55  ;;  %v8916_v3 = vpack.c.bf16 %v2798_v32, %v2797_v30  ;;  %v12206_v6 = vsub.s32 %v12074_v20, %v940_v17  ;;  %v2800_v20 = vld [vmem:[%s18354_s3 + $0x128] sm:$0xff]  ;;  %vm1608_vm14 = vcmp.lt.s32.totalorder %v12177_v28, 16  ;;  %vm12231_vm15 = vmand %vm1417_vm13, %vm1369_vm12 }
 0x1d1   : > { %vm1370_vm0 = vcmp.ne.s32.totalorder %v12189_v35, 0  ;;  %vm1418_vm2 = vcmp.lt.s32.totalorder %v12189_v35, 0  ;;  %v12246_v50 = vsub.s32 %v12087_v37, %v951_v2  ;;  %v1514_v31 = vadd.s32 24, %v12189_v35  ;;  %v2803_v2 = vld [vmem:[%s18354_s3 + $0x140] sm:$0xff] }
 0x1d2   : > { %vm1371_vm3 = vcmp.ne.s32.totalorder %v12206_v6, 0  ;;  %vm1419_vm4 = vcmp.lt.s32.totalorder %v12206_v6, 0  ;;  %v12286_v61 = vadd.s32 120, %v12006_v60 }
 0x1d3   : > { %vm1372_vm5 = vcmp.ne.s32.totalorder %v12246_v50, 0  ;;  %vm1420_vm6 = vcmp.lt.s32.totalorder %v12246_v50, 0  ;;  %vm12301_vm12 = vmand %vm1419_vm4, %vm1371_vm3 }
 0x1e3   : > { %v2194_v18 = vpop.f32.mrb[0].mxu0 }
 0x1e4   : > { %v12078_v22 = vadd.f32 %v12064_v8, %v2194_v18  ;;  %v2196_v23 = vpop.f32.mrb[1].mxu0 }
 0x1e6   : > { %v2433_v33 = vmax.f32 %v12078_v22, 0.0 }
 0x1e7   : > { %v2199_v0 = vpop.f32.mrb[2].mxu0 }
 0x1e8   : > { %v2481_v63 = vsel %vm1602_vm8, %v2433_v33, 0.0  ;;  %v12099_v57 = vadd.f32 %v12064_v8, %v2199_v0  ;;  %v2201_v58 = vpop.f32.mrb[3].mxu0  ;;  %v12192_v0 = vmul.u32.u64.low 2863311531, %v12159_v56  ;;  %v12193_v38 = vmul.u32.u64.high 2863311531, %v12159_v56, %v12192_v0 }
 0x1e9   : > { %2529 = vst [vmem:[%s11764_s30] sm:$0xff] %v2481_v63  ;;  %v12201_v63 = vmul.u32.u64.low 2863311531, %v12164_v1  ;;  %v12202_v58 = vmul.u32.u64.high 2863311531, %v12164_v1, %v12201_v63 }
 0x1ea   : > { %v2434_v42 = vmax.f32 %v12099_v57, 0.0  ;;  %v8919_v57 = vpack.c.bf16 %v2800_v20, %v2799_v43  ;;  %v972_v49 = vshrl.u32 %v12193_v38, 4  ;;  %v1516_v38 = vadd.s32 24, %v12246_v50  ;;  %v2804_v63 = vld [vmem:[%s18354_s3 + $0x148] sm:$0xff] }
 0x1eb   : > { %v2204_v16 = vpop.f32.mrb[4].mxu0  ;;  %v8925_v43 = vpack.c.bf16 %v2804_v63, %v2803_v2 }
 0x1ec   : > { %v2482_v19 = vsel %vm1603_vm9, %v2434_v42, 0.0  ;;  %v12119_v21 = vadd.f32 %v12064_v8, %v2204_v16  ;;  %v2206_v47 = vpop.f32.mrb[5].mxu0  ;;  %v961_v16 = vshrl.u32 %v12152_v51, 4 }
 0x1ed   : > { %2530 = vst [vmem:[%s11764_s30 + $0x8] sm:$0xff] %v2482_v19  ;;  %v12236_v19 = vadd.s32 112, %v12006_v60 }
 0x1ee   : > { %v2435_v52 = vmax.f32 %v12119_v21, 0.0  ;;  %v1515_v21 = vadd.s32 24, %v12206_v6 }
 0x1ef   : > { %v2209_v29 = vpop.f32.mrb[6].mxu0  ;;  %v12282_v51 = vmul.u32.u64.low 2863311531, %v12236_v19  ;;  %v12283_v54 = vmul.u32.u64.high 2863311531, %v12236_v19, %v12282_v51 }
 0x1f0   : > { %v2483_v36 = vsel %vm1604_vm1, %v2435_v52, 0.0  ;;  %v12140_v39 = vadd.f32 %v12064_v8, %v2209_v29  ;;  %v2211_v41 = vpop.f32.mrb[7].mxu0  ;;  %v12363_v45 = vsel %vm12301_vm12, %v1515_v21, %v12206_v6  ;;  %v2807_v51 = vld [vmem:[%s18354_s3 + $0x160] sm:$0xff]  ;;  %v12429_v21 = vadd.s32 144, %v12006_v60 }
 0x1f1   : > { %2531 = vst [vmem:[%s11764_s30 + $0x10] sm:$0xff] %v2483_v36  ;;  %v12262_v36 = vsel %vm12231_vm15, %v1513_v13, %v12132_v55  ;;  %v962_v41 = vmul.u32 24, %v961_v16  ;;  %18726 = vst [vmem:[#allocation12_spill] sm:$0xff] %v12363_v45 }
 0x1f2   : > { %v2436_v59 = vmax.f32 %v12140_v39, 0.0  ;;  %18718 = vst [vmem:[#allocation10_spill] sm:$0xff] %v12262_v36  ;;  %vm1609_vm10 = vcmp.lt.s32.totalorder %v12262_v36, 16 }
 0x1f3   : > { %v2214_v5 = vpop.f32.mrb[8].mxu0 }
 0x1f4   : > { %v2484_v18 = vsel %vm1605_vm7, %v2436_v59, 0.0  ;;  %v12174_v23 = vadd.f32 %v12064_v8, %v2214_v5  ;;  %v2216_v25 = vpop.f32.mrb[9].mxu0  ;;  %v2661_v27 = vld [vmem:[%s11764_s30 + $0x1] sm:$0xff] }
 0x1f5   : > { %2532 = vst [vmem:[%s11764_s30 + $0x18] sm:$0xff] %v2484_v18  ;;  %2978 = vmatprep.mubr.f32.mxu1 %v2661_v27 }
 0x1f6   : > { %v2437_v62 = vmax.f32 %v12174_v23, 0.0  ;;  %10814 = vmatmul.mubr.msk.f32.vlgmr.msra.gmra.mrb[0].mxu1 %vm1602_vm8, %v2433_v33  ;;  %vm1607_vm8 = vcmp.lt.s32.totalorder %v12167_v12, 16 }
 0x1f7   : > { %v2219_v4 = vpop.f32.mrb[10].mxu0  ;;  %8914 = vmatpush1.bf16.msra.mxu1 %v8913_v15  ;;  %v983_v15 = vshrl.u32 %v12202_v58, 4  ;;  %v12337_v58 = vsub.s32 %v12122_v48, %v962_v41 }
 0x1f8   : > { %v2485_v22 = vsel %vm1606_vm11, %v2437_v62, 0.0  ;;  %v12213_v33 = vadd.f32 %v12064_v8, %v2219_v4  ;;  %v2221_v11 = vpop.f32.mrb[11].mxu0  ;;  %v2662_v14 = vld [vmem:[%s11764_s30 + $0x9] sm:$0xff]  ;;  %8915 = vmatprep.subr.bf16.mxu1 %v18681_v9  ;;  %v973_v4 = vmul.u32 24, %v972_v49 }
 0x1f9   : > { %2533 = vst [vmem:[%s11764_s30 + $0x20] sm:$0xff] %v2485_v22  ;;  %2983 = vmatprep.mubr.f32.mxu1 %v2662_v14  ;;  %v984_v11 = vmul.u32 24, %v983_v15  ;;  %v12349_v14 = vadd.s32 128, %v12006_v60  ;;  %vm1421_vm15 = vcmp.lt.s32.totalorder %v12337_v58, 0  ;;  %v1517_v49 = vadd.s32 24, %v12337_v58 }
 0x1fa   : > { %v2438_v47 = vmax.f32 %v12213_v33, 0.0  ;;  %10815 = vmatmul.mubr.msk.f32.gmra.mrb[2].mxu1 %vm1603_vm9, %v2434_v42  ;;  %vm12276_vm9 = vmand %vm1418_vm2, %vm1370_vm0  ;;  %v12381_v6 = vsub.s32 %v12159_v56, %v973_v4  ;;  %vm1611_vm0 = vcmp.lt.s32.totalorder %v12363_v45, 16  ;;  %v2809_v33 = vld [vmem:[%s18354_s3 + $0x170] sm:$0xff] }
 0x1fb   : > { %v2224_v29 = vpop.f32.mrb[12].mxu0  ;;  %8917 = vmatpush1.bf16.msra.mxu1 %v8916_v3  ;;  %v12317_v0 = vsel %vm12276_vm9, %v1514_v31, %v12189_v35  ;;  %v12340_v13 = vmul.u32.u64.low 2863311531, %v12286_v61  ;;  %v12341_v3 = vmul.u32.u64.high 2863311531, %v12286_v61, %v12340_v13  ;;  %v2805_v31 = vld [vmem:[%s18354_s3 + $0x150] sm:$0xff] }
 0x1fc   : > { %v2486_v42 = vsel %vm1607_vm8, %v2438_v47, 0.0  ;;  %v12256_v53 = vadd.f32 %v12064_v8, %v2224_v29  ;;  %v2226_v37 = vpop.f32.mrb[13].mxu0  ;;  %v2663_v34 = vld [vmem:[%s11764_s30 + $0x11] sm:$0xff]  ;;  %8918 = vmatprep.subr.bf16.mxu1 %v18681_v9  ;;  %18723 = vst [vmem:[#allocation11_spill] sm:$0xff] %v12317_v0  ;;  %vm1610_vm13 = vcmp.lt.s32.totalorder %v12317_v0, 16  ;;  %vm1374_vm3 = vcmp.ne.s32.totalorder %v12381_v6, 0 }
 0x1fd   : > { %2534 = vst [vmem:[%s11764_s30 + $0x28] sm:$0xff] %v2486_v42  ;;  %2988 = vmatprep.mubr.f32.mxu1 %v2663_v34  ;;  %v12390_v37 = vsub.s32 %v12164_v1, %v984_v11  ;;  %v12393_v34 = vmul.u32.u64.low 2863311531, %v12349_v14  ;;  %v12394_v41 = vmul.u32.u64.high 2863311531, %v12349_v14, %v12393_v34  ;;  %v1005_v18 = vshrl.u32 %v12341_v3, 4 }
 0x1fe   : > { %v2439_v5 = vmax.f32 %v12256_v53, 0.0  ;;  %10816 = vmatmul.mubr.msk.f32.gmra.mrb[4].mxu1 %vm1604_vm1, %v2435_v52  ;;  %v8922_v52 = vpack.c.bf16 %v2802_v46, %v2801_v44  ;;  %vm12332_vm1 = vmand %vm1420_vm6, %vm1372_vm5  ;;  %v12399_v44 = vadd.s32 136, %v12006_v60  ;;  %vm1422_vm4 = vcmp.lt.s32.totalorder %v12381_v6, 0 }
 0x1ff   : > { %v2229_v17 = vpop.f32.mrb[14].mxu0  ;;  %8920 = vmatpush1.bf16.msra.mxu1 %v8919_v57  ;;  %v12368_v29 = vsel %vm12332_vm1, %v1516_v38, %v12246_v50  ;;  %v2806_v57 = vld [vmem:[%s18354_s3 + $0x158] sm:$0xff]  ;;  %v994_v50 = vshrl.u32 %v12283_v54, 4  ;;  %v2808_v54 = vld [vmem:[%s18354_s3 + $0x168] sm:$0xff]  ;;  %vm1375_vm9 = vcmp.ne.s32.totalorder %v12390_v37, 0  ;;  %vm1423_vm5 = vcmp.lt.s32.totalorder %v12390_v37, 0 }
 0x200   : > { %v2487_v25 = vsel %vm1608_vm14, %v2439_v5, 0.0  ;;  %v12311_v27 = vadd.f32 %v12064_v8, %v2229_v17  ;;  %v2231_v30 = vpop.f32.mrb[15].mxu0  ;;  %v2664_v32 = vld [vmem:[%s11764_s30 + $0x19] sm:$0xff]  ;;  %8921 = vmatprep.subr.bf16.mxu1 %v18681_v9  ;;  %18727 = vst [vmem:[#allocation13_spill] sm:$0xff] %v12368_v29  ;;  %vm1612_vm2 = vcmp.lt.s32.totalorder %v12368_v29, 16  ;;  %v8928_v23 = vpack.c.bf16 %v2806_v57, %v2805_v31  ;;  %vm12491_vm6 = vmand %vm1423_vm5, %vm1375_vm9 }
 0x201   : > { %2535 = vst [vmem:[%s11764_s30 + $0x30] sm:$0xff] %v2487_v25  ;;  %2993 = vmatprep.mubr.f32.mxu1 %v2664_v32  ;;  %v995_v17 = vmul.u32 24, %v994_v50  ;;  %v1518_v25 = vadd.s32 24, %v12381_v6  ;;  %v12441_v32 = vmul.u32.u64.low 2863311531, %v12399_v44  ;;  %v12442_v38 = vmul.u32.u64.high 2863311531, %v12399_v44, %v12441_v32 }
 0x202   : > { %v2440_v22 = vmax.f32 %v12311_v27, 0.0  ;;  %10817 = vmatmul.mubr.msk.f32.gmra.mrb[6].mxu1 %vm1605_vm7, %v2436_v59  ;;  %vm1373_vm7 = vcmp.ne.s32.totalorder %v12337_v58, 0  ;;  %v8931_v2 = vpack.c.bf16 %v2808_v54, %v2807_v51  ;;  %v1519_v11 = vadd.s32 24, %v12390_v37  ;;  %v2813_v27 = vld [vmem:[%s18354_s3 + $0x190] sm:$0xff] }
 0x203   : > { %v2234_v48 = vpop.f32.mrb[16].mxu0  ;;  %8923 = vmatpush1.bf16.msra.mxu1 %v8922_v52  ;;  %v1016_v57 = vshrl.u32 %v12394_v41, 4  ;;  %v12497_v50 = vadd.s32 152, %v12006_v60 }
 0x204   : > { %v2488_v20 = vsel %vm1609_vm10, %v2440_v22, 0.0  ;;  %v12357_v39 = vadd.f32 %v12064_v8, %v2234_v48  ;;  %v2236_v16 = vpop.f32.mrb[17].mxu0  ;;  %v2665_v59 = vld [vmem:[%s11764_s30 + $0x21] sm:$0xff]  ;;  %8924 = vmatprep.subr.bf16.mxu1 %v18681_v9  ;;  %v2810_v48 = vld [vmem:[%s18354_s3 + $0x178] sm:$0xff]  ;;  %v12525_v51 = vsel %vm12491_vm6, %v1519_v11, %v12390_v37  ;;  %v12575_v11 = vadd.s32 168, %v12006_v60 }
 0x205   : > { %2536 = vst [vmem:[%s11764_s30 + $0x38] sm:$0xff] %v2488_v20  ;;  %2998 = vmatprep.mubr.f32.mxu1 %v2665_v59  ;;  %v1006_v20 = vmul.u32 24, %v1005_v18  ;;  %v12479_v16 = vmul.u32.u64.low 2863311531, %v12429_v21  ;;  %v12480_v59 = vmul.u32.u64.high 2863311531, %v12429_v21, %v12479_v16  ;;  %v8934_v53 = vpack.c.bf16 %v2810_v48, %v2809_v33  ;;  %18736 = vst [vmem:[#allocation16_spill] sm:$0xff] %v12525_v51 }
 0x206   : > { %v2441_v42 = vmax.f32 %v12357_v39, 0.0  ;;  %10818 = vmatmul.mubr.msk.f32.gmra.mrb[8].mxu1 %vm1606_vm11, %v2437_v62  ;;  %vm12422_vm11 = vmand %vm1421_vm15, %vm1373_vm7  ;;  %v1017_v15 = vmul.u32 24, %v1016_v57  ;;  %vm1615_vm7 = vcmp.lt.s32.totalorder %v12525_v51, 16  ;;  %v2815_v39 = vld [vmem:[%s18354_s3 + $0x1a0] sm:$0xff] }
 0x207   : > { %v2239_v56 = vpop.f32.mrb[18].mxu0  ;;  %8926 = vmatpush1.bf16.msra.mxu1 %v8925_v43  ;;  %v12459_v3 = vsel %vm12422_vm11, %v1517_v49, %v12337_v58  ;;  %v12476_v58 = vsub.s32 %v12236_v19, %v995_v17  ;;  %v2812_v49 = vld [vmem:[%s18354_s3 + $0x188] sm:$0xff]  ;;  %v12538_v37 = vmul.u32.u64.low 2863311531, %v12497_v50  ;;  %v12539_v17 = vmul.u32.u64.high 2863311531, %v12497_v50, %v12538_v37 }
 0x208   : > { %v2489_v1 = vsel %vm1610_vm13, %v2441_v42, 0.0  ;;  %v12406_v62 = vadd.f32 %v12064_v8, %v2239_v56  ;;  %v2241_v46 = vpop.f32.mrb[19].mxu0  ;;  %v2666_v55 = vld [vmem:[%s11764_s30 + $0x29] sm:$0xff]  ;;  %8927 = vmatprep.subr.bf16.mxu1 %v18681_v9  ;;  %18730 = vst [vmem:[#allocation14_spill] sm:$0xff] %v12459_v3  ;;  %v12585_v43 = vsub.s32 %v12349_v14, %v1017_v15  ;;  %v12627_v37 = vadd.s32 176, %v12006_v60 }
 0x209   : > { %2537 = vst [vmem:[%s11764_s30 + $0x40] sm:$0xff] %v2489_v1  ;;  %3003 = vmatprep.mubr.f32.mxu1 %v2666_v55  ;;  %vm1376_vm12 = vcmp.ne.s32.totalorder %v12476_v58, 0  ;;  %vm1424_vm1 = vcmp.lt.s32.totalorder %v12476_v58, 0 }
 0x20a   : > { %v2442_v52 = vmax.f32 %v12406_v62, 0.0  ;;  %10819 = vmatmul.mubr.msk.f32.gmra.mrb[10].mxu1 %vm1607_vm8, %v2438_v47  ;;  %vm12471_vm8 = vmand %vm1422_vm4, %vm1374_vm3  ;;  %vm1378_vm4 = vcmp.ne.s32.totalorder %v12585_v43, 0  ;;  %vm1426_vm9 = vcmp.lt.s32.totalorder %v12585_v43, 0  ;;  %v2817_v62 = vld [vmem:[%s18354_s3 + $0x1b0] sm:$0xff] }
 0x20b   : > { %v2244_v30 = vpop.f32.mrb[20].mxu0  ;;  %8929 = vmatpush1.bf16.msra.mxu1 %v8928_v23  ;;  %v12515_v55 = vsel %vm12471_vm8, %v1518_v25, %v12381_v6  ;;  %v12530_v6 = vsub.s32 %v12286_v61, %v1006_v20  ;;  %v1027_v25 = vshrl.u32 %v12442_v38, 4  ;;  %vm12569_vm15 = vmand %vm1424_vm1, %vm1376_vm12 }
 0x20c   : > { %v2490_v47 = vsel %vm1611_vm0, %v2442_v52, 0.0  ;;  %v12452_v63 = vadd.f32 %v12064_v8, %v2244_v30  ;;  %v2246_v35 = vpop.f32.mrb[21].mxu0  ;;  %v2667_v4 = vld [vmem:[%s11764_s30 + $0x31] sm:$0xff]  ;;  %8930 = vmatprep.subr.bf16.mxu1 %v18681_v9  ;;  %18735 = vst [vmem:[#allocation15_spill] sm:$0xff] %v12515_v55  ;;  %v12543_v30 = vadd.s32 160, %v12006_v60  ;;  %vm12680_vm5 = vmand %vm1426_vm9, %vm1378_vm4 }
 0x20d   : > { %v2709_v13 = vld [vmem:[%s11764_s30 + $0x32] sm:$0xff]  ;;  %2538 = vst [vmem:[%s11764_s30 + $0x48] sm:$0xff] %v2490_v47  ;;  %3008 = vmatprep.mubr.f32.mxu1 %v2667_v4  ;;  %v1520_v47 = vadd.s32 24, %v12476_v58  ;;  %vm1377_vm11 = vcmp.ne.s32.totalorder %v12530_v6, 0  ;;  %vm1425_vm3 = vcmp.lt.s32.totalorder %v12530_v6, 0  ;;  %v1028_v16 = vmul.u32 24, %v1027_v25 }
 0x20e   : > { %8551 = vmatprep.mubr.f32.mxu0 %v2709_v13  ;;  %v2443_v31 = vmax.f32 %v12452_v63, 0.0  ;;  %10820 = vmatmul.mubr.msk.f32.gmra.mrb[12].mxu1 %vm1608_vm14, %v2439_v5  ;;  %v2811_v5 = vld [vmem:[%s18354_s3 + $0x180] sm:$0xff]  ;;  %vm1613_vm14 = vcmp.lt.s32.totalorder %v12459_v3, 16  ;;  %v2814_v35 = vld [vmem:[%s18354_s3 + $0x198] sm:$0xff]  ;;  %v1038_v13 = vshrl.u32 %v12480_v59, 4  ;;  %v1049_v25 = vshrl.u32 %v12539_v17, 4 }
 0x20f   : > { %v2249_v34 = vpop.f32.mrb[22].mxu0  ;;  %8932 = vmatpush1.bf16.msra.mxu1 %v8931_v2  ;;  %v8937_v61 = vpack.c.bf16 %v2812_v49, %v2811_v5  ;;  %v12588_v59 = vmul.u32.u64.low 2863311531, %v12543_v30  ;;  %v12589_v19 = vmul.u32.u64.high 2863311531, %v12543_v30, %v12588_v59  ;;  %v8940_v57 = vpack.c.bf16 %v2814_v35, %v2813_v27 }
 0x210   : > { %v2491_v56 = vsel %vm1612_vm2, %v2443_v31, 0.0  ;;  %v12508_v23 = vadd.f32 %v12064_v8, %v2249_v34  ;;  %v2251_v41 = vpop.f32.mrb[23].mxu0  ;;  %v2668_v1 = vld [vmem:[%s11764_s30 + $0x39] sm:$0xff]  ;;  %8933 = vmatprep.subr.bf16.mxu1 %v18681_v9  ;;  %v12623_v49 = vmul.u32.u64.low 2863311531, %v12575_v11  ;;  %v12624_v15 = vmul.u32.u64.high 2863311531, %v12575_v11, %v12623_v49 }
 0x211   : > { %v2710_v46 = vld [vmem:[%s11764_s30 + $0x3a] sm:$0xff]  ;;  %2539 = vst [vmem:[%s11764_s30 + $0x50] sm:$0xff] %v2491_v56  ;;  %3013 = vmatprep.mubr.f32.mxu1 %v2668_v1  ;;  %v12606_v56 = vsel %vm12569_vm15, %v1520_v47, %v12476_v58  ;;  %v1521_v41 = vadd.s32 24, %v12530_v6  ;;  %v2816_v1 = vld [vmem:[%s18354_s3 + $0x1a8] sm:$0xff]  ;;  %v1039_v58 = vmul.u32 24, %v1038_v13  ;;  %v12638_v27 = vsub.s32 %v12399_v44, %v1028_v16 }
 0x212   : > { %8552 = vmatmul.mubr.f32.vlgmr.msra.gmra.mrb[96].mxu0 %v2710_v46  ;;  %v2444_v54 = vmax.f32 %v12508_v23, 0.0  ;;  %10821 = vmatmul.mubr.msk.f32.gmra.mrb[14].mxu1 %vm1609_vm10, %v2440_v22  ;;  %vm1614_vm10 = vcmp.lt.s32.totalorder %v12515_v55, 16  ;;  %18739 = vst [vmem:[#allocation17_spill] sm:$0xff] %v12606_v56  ;;  %v2818_v47 = vld [vmem:[%s18354_s3 + $0x1b8] sm:$0xff]  ;;  %v1522_v35 = vadd.s32 24, %v12585_v43  ;;  %v1050_v16 = vmul.u32 24, %v1049_v25 }
 0x213   : > { %v2254_v18 = vpop.f32.mrb[24].mxu0  ;;  %8935 = vmatpush1.bf16.msra.mxu1 %v8934_v53  ;;  %v12665_v4 = vsub.s32 %v12429_v21, %v1039_v58  ;;  %v12685_v59 = vadd.s32 184, %v12006_v60  ;;  %vm1379_vm8 = vcmp.ne.s32.totalorder %v12638_v27, 0  ;;  %vm1427_vm6 = vcmp.lt.s32.totalorder %v12638_v27, 0 }
 0x214   : > { %v2492_v22 = vsel %vm1613_vm14, %v2444_v54, 0.0  ;;  %v12553_v32 = vadd.f32 %v12064_v8, %v2254_v18  ;;  %v2256_v2 = vpop.f32.mrb[25].mxu0  ;;  %v2669_v33 = vld [vmem:[%s11764_s30 + $0x41] sm:$0xff]  ;;  %8936 = vmatprep.subr.bf16.mxu1 %v18681_v9  ;;  %v1060_v63 = vshrl.u32 %v12589_v19, 4  ;;  %v1523_v46 = vadd.s32 24, %v12638_v27  ;;  %vm12725_vm1 = vmand %vm1427_vm6, %vm1379_vm8 }
 0x215   : > { %v2711_v38 = vld [vmem:[%s11764_s30 + $0x42] sm:$0xff]  ;;  %2540 = vst [vmem:[%s11764_s30 + $0x58] sm:$0xff] %v2492_v22  ;;  %3018 = vmatprep.mubr.f32.mxu1 %v2669_v33  ;;  %v8943_v22 = vpack.c.bf16 %v2816_v1, %v2815_v39  ;;  %v12711_v1 = vsel %vm12680_vm5, %v1522_v35, %v12585_v43  ;;  %vm1380_vm12 = vcmp.ne.s32.totalorder %v12665_v4, 0  ;;  %v1071_v58 = vshrl.u32 %v12624_v15, 4  ;;  %v2822_v35 = vld [vmem:[%s18354_s3 + $0x1d8] sm:$0xff] }
 0x216   : > { %8554 = vmatprep.mubr.f32.mxu0 %v2711_v38  ;;  %v2445_v48 = vmax.f32 %v12553_v32, 0.0  ;;  %10822 = vmatmul.mubr.msk.f32.gmra.mrb[16].mxu1 %vm1610_vm13, %v2441_v42  ;;  %vm12618_vm13 = vmand %vm1425_vm3, %vm1377_vm11  ;;  %v2819_v39 = vld [vmem:[%s18354_s3 + $0x1c0] sm:$0xff]  ;;  %v2820_v19 = vld [vmem:[%s18354_s3 + $0x1c8] sm:$0xff]  ;;  %18745 = vst [vmem:[#allocation19_spill] sm:$0xff] %v12711_v1  ;;  %v12730_v25 = vsub.s32 %v12497_v50, %v1050_v16  ;;  %vm1618_vm15 = vcmp.lt.s32.totalorder %v12711_v1, 16  ;;  %v1524_v21 = vadd.s32 24, %v12665_v4 }
 0x217   : > { %v2259_v20 = vpop.f32.mrb[26].mxu0  ;;  %8938 = vmatpush1.bf16.msra.mxu1 %v8937_v61  ;;  %v12656_v38 = vsel %vm12618_vm13, %v1521_v41, %v12530_v6  ;;  %v1072_v16 = vmul.u32 24, %v1071_v58  ;;  %v12781_v32 = vadd.s32 200, %v12006_v60  ;;  %v2824_v58 = vld [vmem:[%s18354_s3 + $0x1e8] sm:$0xff] }
 0x218   : > { %v2493_v42 = vsel %vm1614_vm10, %v2445_v48, 0.0  ;;  %v12599_v14 = vadd.f32 %v12064_v8, %v2259_v20  ;;  %v2261_v34 = vpop.f32.mrb[27].mxu0  ;;  %v2670_v53 = vld [vmem:[%s11764_s30 + $0x49] sm:$0xff]  ;;  %8939 = vmatprep.subr.bf16.mxu1 %v18681_v9  ;;  %18742 = vst [vmem:[#allocation18_spill] sm:$0xff] %v12656_v38  ;;  %v12668_v13 = vmul.u32.u64.low 2863311531, %v12627_v37  ;;  %v12669_v20 = vmul.u32.u64.high 2863311531, %v12627_v37, %v12668_v13 }
 0x219   : > { %v2712_v5 = vld [vmem:[%s11764_s30 + $0x4a] sm:$0xff]  ;;  %2541 = vst [vmem:[%s11764_s30 + $0x60] sm:$0xff] %v2493_v42  ;;  %3023 = vmatprep.mubr.f32.mxu1 %v2670_v53  ;;  %v12761_v13 = vsel %vm12725_vm1, %v1523_v46, %v12638_v27  ;;  %vm1381_vm3 = vcmp.ne.s32.totalorder %v12730_v25, 0  ;;  %vm1429_vm13 = vcmp.lt.s32.totalorder %v12730_v25, 0 }
 0x21a   : > { %8555 = vmatmul.mubr.f32.gmra.mrb[98].mxu0 %v2712_v5  ;;  %v2446_v18 = vmax.f32 %v12599_v14, 0.0  ;;  %10823 = vmatmul.mubr.msk.f32.gmra.mrb[18].mxu1 %vm1611_vm0, %v2442_v52  ;;  %vm1616_vm0 = vcmp.lt.s32.totalorder %v12606_v56, 16  ;;  %18748 = vst [vmem:[#allocation20_spill] sm:$0xff] %v12761_v13  ;;  %vm12826_vm4 = vmand %vm1429_vm13, %vm1381_vm3  ;;  %v12837_v14 = vadd.s32 208, %v12006_v60 }
 0x21b   : > { %v2264_v61 = vpop.f32.mrb[28].mxu0  ;;  %8941 = vmatpush1.bf16.msra.mxu1 %v8940_v57 }
 0x21c   : > { %v2494_v52 = vsel %vm1615_vm7, %v2446_v18, 0.0  ;;  %v12649_v17 = vadd.f32 %v12064_v8, %v2264_v61  ;;  %v2266_v2 = vpop.f32.mrb[29].mxu0  ;;  %v2671_v33 = vld [vmem:[%s11764_s30 + $0x51] sm:$0xff]  ;;  %8942 = vmatprep.subr.bf16.mxu1 %v18681_v9  ;;  %v12733_v15 = vmul.u32.u64.low 2863311531, %v12685_v59  ;;  %v12734_v61 = vmul.u32.u64.high 2863311531, %v12685_v59, %v12733_v15 }
 0x21d   : > { %v2713_v44 = vld [vmem:[%s11764_s30 + $0x52] sm:$0xff]  ;;  %2542 = vst [vmem:[%s11764_s30 + $0x68] sm:$0xff] %v2494_v52  ;;  %3028 = vmatprep.mubr.f32.mxu1 %v2671_v33  ;;  %v1525_v15 = vadd.s32 24, %v12730_v25 }
 0x21e   : > { %8557 = vmatprep.mubr.f32.mxu0 %v2713_v44  ;;  %v2447_v6 = vmax.f32 %v12649_v17, 0.0  ;;  %10824 = vmatmul.mubr.msk.f32.gmra.mrb[20].mxu1 %vm1612_vm2, %v2443_v31  ;;  %v8946_v31 = vpack.c.bf16 %v2818_v47, %v2817_v62  ;;  %vm1617_vm2 = vcmp.lt.s32.totalorder %v12656_v38, 16  ;;  %v8949_v62 = vpack.c.bf16 %v2820_v19, %v2819_v39  ;;  %v2821_v52 = vld [vmem:[%s18354_s3 + $0x1d0] sm:$0xff] }
 0x21f   : > { %v2269_v57 = vpop.f32.mrb[30].mxu0  ;;  %8944 = vmatpush1.bf16.msra.mxu1 %v8943_v22  ;;  %v12738_v22 = vadd.s32 192, %v12006_v60  ;;  %v12861_v27 = vsel %vm12826_vm4, %v1525_v15, %v12730_v25 }
 0x220   : > { %v2495_v42 = vsel %vm1616_vm0, %v2447_v6, 0.0  ;;  %v12699_v34 = vadd.f32 %v12064_v8, %v2269_v57  ;;  %v2271_v53 = vpop.f32.mrb[31].mxu0  ;;  %v2672_v5 = vld [vmem:[%s11764_s30 + $0x59] sm:$0xff]  ;;  %8945 = vmatprep.subr.bf16.mxu1 %v18681_v9  ;;  %v1082_v57 = vshrl.u32 %v12669_v20, 4  ;;  %18754 = vst [vmem:[#allocation22_spill] sm:$0xff] %v12861_v27 }
 0x221   : > { %v2714_v41 = vld [vmem:[%s11764_s30 + $0x5a] sm:$0xff]  ;;  %2543 = vst [vmem:[%s11764_s30 + $0x70] sm:$0xff] %v2495_v42  ;;  %3033 = vmatprep.mubr.f32.mxu1 %v2672_v5  ;;  %v8952_v42 = vpack.c.bf16 %v2822_v35, %v2821_v52 }
 0x222   : > { %8558 = vmatmul.mubr.f32.gmra.mrb[100].mxu0 %v2714_v41  ;;  %v2448_v49 = vmax.f32 %v12699_v34, 0.0  ;;  %10825 = vmatmul.mubr.msk.f32.gmra.mrb[22].mxu1 %vm1613_vm14, %v2444_v54  ;;  %vm1428_vm14 = vcmp.lt.s32.totalorder %v12665_v4, 0  ;;  %v1061_v54 = vmul.u32 24, %v1060_v63  ;;  %v2823_v53 = vld [vmem:[%s18354_s3 + $0x1e0] sm:$0xff]  ;;  %v12923_v34 = vadd.s32 224, %v12006_v60 }
 0x223   : > { %v2274_v23 = vpop.f32.mrb[32].mxu0  ;;  %8947 = vmatpush1.bf16.msra.mxu1 %v8946_v31  ;;  %vm12774_vm11 = vmand %vm1428_vm14, %vm1380_vm12  ;;  %v12787_v31 = vmul.u32.u64.low 2863311531, %v12738_v22  ;;  %v12788_v39 = vmul.u32.u64.high 2863311531, %v12738_v22, %v12787_v31 }
 0x224   : > { %v2496_v50 = vsel %vm1617_vm2, %v2448_v49, 0.0  ;;  %v12749_v2 = vadd.f32 %v12064_v8, %v2274_v23  ;;  %v2276_v33 = vpop.f32.mrb[33].mxu0  ;;  %v2673_v44 = vld [vmem:[%s11764_s30 + $0x61] sm:$0xff]  ;;  %8948 = vmatprep.subr.bf16.mxu1 %v18681_v9  ;;  %v12811_v43 = vsel %vm12774_vm11, %v1524_v21, %v12665_v4  ;;  %v12815_v23 = vsub.s32 %v12575_v11, %v1072_v16 }
 0x225   : > { %v2715_v47 = vld [vmem:[%s11764_s30 + $0x62] sm:$0xff]  ;;  %2544 = vst [vmem:[%s11764_s30 + $0x78] sm:$0xff] %v2496_v50  ;;  %3038 = vmatprep.mubr.f32.mxu1 %v2673_v44  ;;  %18751 = vst [vmem:[#allocation21_spill] sm:$0xff] %v12811_v43  ;;  %v1093_v11 = vshrl.u32 %v12734_v61, 4  ;;  %v12832_v52 = vmul.u32.u64.low 2863311531, %v12781_v32  ;;  %v12833_v50 = vmul.u32.u64.high 2863311531, %v12781_v32, %v12832_v52 }
 0x226   : > { %8560 = vmatprep.mubr.f32.mxu0 %v2715_v47  ;;  %v2449_v63 = vmax.f32 %v12749_v2, 0.0  ;;  %10826 = vmatmul.mubr.msk.f32.gmra.mrb[24].mxu1 %vm1614_vm10, %v2445_v48  ;;  %v12784_v48 = vsub.s32 %v12543_v30, %v1061_v54  ;;  %vm1619_vm10 = vcmp.lt.s32.totalorder %v12761_v13, 16  ;;  %v1083_v54 = vmul.u32 24, %v1082_v57  ;;  %v2825_v44 = vld [vmem:[%s18354_s3 + $0x1f0] sm:$0xff]  ;;  %v2826_v57 = vld [vmem:[%s18354_s3 + $0x1f8] sm:$0xff] }
 0x227   : > { %v2279_v20 = vpop.f32.mrb[34].mxu0  ;;  %8950 = vmatpush1.bf16.msra.mxu1 %v8949_v62  ;;  %vm1620_vm5 = vcmp.lt.s32.totalorder %v12811_v43, 16  ;;  %vm1383_vm8 = vcmp.ne.s32.totalorder %v12815_v23, 0  ;;  %vm1431_vm6 = vcmp.lt.s32.totalorder %v12815_v23, 0  ;;  %v1094_v25 = vmul.u32 24, %v1093_v11 }
 0x228   : > { %v2497_v5 = vsel %vm1618_vm15, %v2449_v63, 0.0  ;;  %v12799_v30 = vadd.f32 %v12064_v8, %v2279_v20  ;;  %v2281_v41 = vpop.f32.mrb[35].mxu0  ;;  %v2674_v19 = vld [vmem:[%s11764_s30 + $0x69] sm:$0xff]  ;;  %8951 = vmatprep.subr.bf16.mxu1 %v18681_v9  ;;  %vm1382_vm9 = vcmp.ne.s32.totalorder %v12784_v48, 0  ;;  %v1526_v20 = vadd.s32 24, %v12784_v48  ;;  %vm12917_vm1 = vmand %vm1431_vm6, %vm1383_vm8 }
 0x229   : > { %v2716_v46 = vld [vmem:[%s11764_s30 + $0x6a] sm:$0xff]  ;;  %2545 = vst [vmem:[%s11764_s30 + $0x80] sm:$0xff] %v2497_v5  ;;  %3043 = vmatprep.mubr.f32.mxu1 %v2674_v19  ;;  %v12883_v17 = vmul.u32.u64.low 2863311531, %v12837_v14  ;;  %v12884_v41 = vmul.u32.u64.high 2863311531, %v12837_v14, %v12883_v17  ;;  %v1104_v4 = vshrl.u32 %v12788_v39, 4  ;;  %v1527_v11 = vadd.s32 24, %v12815_v23 }
 0x22a   : > { %8561 = vmatmul.mubr.f32.gmra.mrb[102].mxu0 %v2716_v46  ;;  %v2450_v62 = vmax.f32 %v12799_v30, 0.0  ;;  %10827 = vmatmul.mubr.msk.f32.gmra.mrb[26].mxu1 %vm1615_vm7, %v2446_v18  ;;  %v8955_v18 = vpack.c.bf16 %v2824_v58, %v2823_v53  ;;  %vm1430_vm7 = vcmp.lt.s32.totalorder %v12784_v48, 0  ;;  %v13595_v43 = vadd.s32 360, %v12006_v60 }
 0x22b   : > { %v2284_v33 = vpop.f32.mrb[36].mxu0  ;;  %8953 = vmatpush1.bf16.msra.mxu1 %v8952_v42  ;;  %v12872_v42 = vsub.s32 %v12627_v37, %v1083_v54  ;;  %vm12878_vm12 = vmand %vm1430_vm7, %vm1382_vm9  ;;  %v8958_v37 = vpack.c.bf16 %v2826_v57, %v2825_v44  ;;  %v12958_v5 = vmul.u32.u64.low 2863311531, %v12923_v34  ;;  %v12959_v17 = vmul.u32.u64.high 2863311531, %v12923_v34, %v12958_v5 }
 0x22c   : > { %v2498_v61 = vsel %vm1619_vm10, %v2450_v62, 0.0  ;;  %v12847_v47 = vadd.f32 %v12064_v8, %v2284_v33  ;;  %v2286_v35 = vpop.f32.mrb[37].mxu0  ;;  %v2675_v21 = vld [vmem:[%s11764_s30 + $0x71] sm:$0xff]  ;;  %8954 = vmatprep.subr.bf16.mxu1 %v18681_v9  ;;  %v12911_v39 = vsel %vm12878_vm12, %v1526_v20, %v12784_v48  ;;  %v12927_v48 = vsub.s32 %v12685_v59, %v1094_v25 }
 0x22d   : > { %v2717_v16 = vld [vmem:[%s11764_s30 + $0x72] sm:$0xff]  ;;  %2546 = vst [vmem:[%s11764_s30 + $0x88] sm:$0xff] %v2498_v61  ;;  %3048 = vmatprep.mubr.f32.mxu1 %v2675_v21  ;;  %18757 = vst [vmem:[#allocation23_spill] sm:$0xff] %v12911_v39  ;;  %vm1432_vm14 = vcmp.lt.s32.totalorder %v12872_v42, 0  ;;  %v1105_v59 = vmul.u32 24, %v1104_v4  ;;  %vm1622_vm11 = vcmp.lt.s32.totalorder %v12911_v39, 16  ;;  %v12949_v20 = vsel %vm12917_vm1, %v1527_v11, %v12815_v23 }
 0x22e   : > { %8563 = vmatprep.mubr.f32.mxu0 %v2717_v16  ;;  %v2451_v31 = vmax.f32 %v12847_v47, 0.0  ;;  %10828 = vmatmul.mubr.msk.f32.gmra.mrb[28].mxu1 %vm1616_vm0, %v2447_v6  ;;  %v12887_v6 = vadd.s32 216, %v12006_v60  ;;  %vm1621_vm0 = vcmp.lt.s32.totalorder %v12861_v27, 16  ;;  %18760 = vst [vmem:[#allocation24_spill] sm:$0xff] %v12949_v20  ;;  %vm1385_vm13 = vcmp.ne.s32.totalorder %v12927_v48, 0 }
 0x22f   : > { %v2289_v53 = vpop.f32.mrb[38].mxu0  ;;  %8956 = vmatpush1.bf16.msra.mxu1 %v8955_v18  ;;  %v1115_v18 = vshrl.u32 %v12833_v50, 4  ;;  %v1126_v2 = vshrl.u32 %v12884_v41, 4  ;;  %v1106_v41 = vsub.s32 %v12738_v22, %v1105_v59  ;;  %vm1623_vm4 = vcmp.lt.s32.totalorder %v12949_v20, 16 }
 0x230   : > { %v2499_v19 = vsel %vm1620_vm5, %v2451_v31, 0.0  ;;  %v12894_v46 = vadd.f32 %v12064_v8, %v2289_v53  ;;  %v2291_v58 = vpop.f32.mrb[39].mxu0  ;;  %v2676_v15 = vld [vmem:[%s11764_s30 + $0x79] sm:$0xff]  ;;  %8957 = vmatprep.subr.bf16.mxu1 %v18681_v9  ;;  %v12930_v44 = vmul.u32.u64.low 2863311531, %v12887_v6  ;;  %v12931_v61 = vmul.u32.u64.high 2863311531, %v12887_v6, %v12930_v44 }
 0x231   : > { %v2718_v54 = vld [vmem:[%s11764_s30 + $0x7a] sm:$0xff]  ;;  %2547 = vst [vmem:[%s11764_s30 + $0x90] sm:$0xff] %v2499_v19  ;;  %3053 = vmatprep.mubr.f32.mxu1 %v2676_v15  ;;  %v1116_v53 = vmul.u32 24, %v1115_v18  ;;  %v12970_v19 = vadd.s32 232, %v12006_v60  ;;  %v12991_v33 = vadd.s32 240, %v12006_v60  ;;  %v1127_v30 = vmul.u32 24, %v1126_v2 }
 0x232   : > { %8564 = vmatmul.mubr.f32.gmra.mrb[104].mxu0 %v2718_v54  ;;  %v2452_v52 = vmax.f32 %v12894_v46, 0.0  ;;  %10829 = vmatmul.mubr.msk.f32.gmra.mrb[30].mxu1 %vm1617_vm2, %v2448_v49  ;;  %vm1384_vm2 = vcmp.ne.s32.totalorder %v12872_v42, 0  ;;  %v12979_v58 = vld [vmem:[%s18353_s2] ss:$0 sm:$0xff]  ;;  %vm1434_vm7 = vcmp.lt.s32.totalorder %v1106_v41, 0  ;;  %v1530_v2 = vadd.s32 24, %v1106_v41 }
 0x233   : > { %v2294_v49 = vpop.f32.mrb[40].mxu0  ;;  %8959 = vmatpush1.bf16.msra.mxu1 %v8958_v37  ;;  %vm12963_vm3 = vmand %vm1432_vm14, %vm1384_vm2  ;;  %v13005_v44 = vsub.s32 %v12781_v32, %v1116_v53  ;;  %v13051_v47 = vsub.s32 %v12837_v14, %v1127_v30 }
 0x234   : > { %v2500_v35 = vsel %vm1621_vm0, %v2452_v52, 0.0  ;;  %v12938_v50 = vadd.f32 %v12064_v8, %v2294_v49  ;;  %v2296_v21 = vpop.f32.mrb[41].mxu0  ;;  %v2677_v16 = vld [vmem:[%s11764_s30 + $0x81] sm:$0xff]  ;;  %8960 = vmatprep.subr.bf16.mxu1 %v18681_v9  ;;  %v1528_v8 = vadd.s32 24, %v12872_v42  ;;  %v1529_v49 = vadd.s32 24, %v12927_v48 }
 0x235   : > { %v2719_v57 = vld [vmem:[%s11764_s30 + $0x82] sm:$0xff]  ;;  %2548 = vst [vmem:[%s11764_s30 + $0x98] sm:$0xff] %v2500_v35  ;;  %3058 = vmatprep.mubr.f32.mxu1 %v2677_v16  ;;  %vm1387_vm12 = vcmp.ne.s32.totalorder %v13005_v44, 0  ;;  %vm1435_vm1 = vcmp.lt.s32.totalorder %v13005_v44, 0  ;;  %v13063_v21 = vadd.s32 248, %v12006_v60  ;;  %v1531_v14 = vadd.s32 24, %v13005_v44 }
 0x236   : > { %8566 = vmatprep.mubr.f32.mxu0 %v2719_v57  ;;  %v2453_v25 = vmax.f32 %v12938_v50, 0.0  ;;  %10830 = vmatmul.mubr.msk.f32.gmra.mrb[32].mxu1 %vm1618_vm15, %v2449_v63  ;;  %vm1433_vm15 = vcmp.lt.s32.totalorder %v12927_v48, 0  ;;  %v13001_v22 = vsel %vm12963_vm3, %v1528_v8, %v12872_v42  ;;  %vm13081_vm2 = vmand %vm1435_vm1, %vm1387_vm12  ;;  %vm1436_vm14 = vcmp.lt.s32.totalorder %v13051_v47, 0 }
 0x237   : > { %v2299_v37 = vpop.f32.mrb[42].mxu0  ;;  %18763 = vst [vmem:[#allocation25_spill] sm:$0xff] %v13001_v22  ;;  %vm13009_vm9 = vmand %vm1433_vm15, %vm1385_vm13  ;;  %v13015_v16 = vmul.u32.u64.low 2863311531, %v12970_v19  ;;  %v13016_v57 = vmul.u32.u64.high 2863311531, %v12970_v19, %v13015_v16  ;;  %vm1624_vm8 = vcmp.lt.s32.totalorder %v13001_v22, 16 }
 0x238   : > { %v2501_v63 = vsel %vm1622_vm11, %v2453_v25, 0.0  ;;  %v12982_v15 = vadd.f32 %v12979_v58, %v2299_v37  ;;  %v2301_v54 = vpop.f32.mrb[43].mxu0  ;;  %v2678_v4 = vld [vmem:[%s11764_s30 + $0x89] sm:$0xff]  ;;  %v13041_v23 = vsel %vm13009_vm9, %v1529_v49, %v12927_v48 }
 0x239   : > { %v2720_v11 = vld [vmem:[%s11764_s30 + $0x8a] sm:$0xff]  ;;  %2549 = vst [vmem:[%s11764_s30 + $0xa0] sm:$0xff] %v2501_v63  ;;  %3063 = vmatprep.mubr.f32.mxu1 %v2678_v4  ;;  %18766 = vst [vmem:[#allocation26_spill] sm:$0xff] %v13041_v23  ;;  %v1148_v63 = vshrl.u32 %v12959_v17, 4 }
 0x23a   : > { %8567 = vmatmul.mubr.f32.gmra.mrb[106].mxu0 %v2720_v11  ;;  %v2454_v18 = vmax.f32 %v12982_v15, 0.0  ;;  %10831 = vmatmul.mubr.msk.f32.gmra.mrb[34].mxu1 %vm1619_vm10, %v2450_v62  ;;  %v1137_v62 = vshrl.u32 %v12931_v61, 4  ;;  %vm1386_vm10 = vcmp.ne.s32.totalorder %v1106_v41, 0 }
 0x23b   : > { %v2304_v35 = vpop.f32.mrb[44].mxu0  ;;  %v13030_v61 = vmul.u32.u64.low 2863311531, %v12991_v33  ;;  %v13031_v5 = vmul.u32.u64.high 2863311531, %v12991_v33, %v13030_v61  ;;  %vm13044_vm6 = vmand %vm1434_vm7, %vm1386_vm10 }
 0x23c   : > { %v2502_v32 = vsel %vm1623_vm4, %v2454_v18, 0.0  ;;  %v13023_v42 = vadd.f32 %v12979_v58, %v2304_v35  ;;  %v2306_v59 = vpop.f32.mrb[45].mxu0  ;;  %v2679_v8 = vld [vmem:[%s11764_s30 + $0x91] sm:$0xff] }
 0x23d   : > { %v2721_v53 = vld [vmem:[%s11764_s30 + $0x92] sm:$0xff]  ;;  %2550 = vst [vmem:[%s11764_s30 + $0xa8] sm:$0xff] %v2502_v32  ;;  %3068 = vmatprep.mubr.f32.mxu1 %v2679_v8  ;;  %v1149_v32 = vmul.u32 24, %v1148_v63  ;;  %v13086_v59 = vadd.s32 256, %v12006_v60 }
 0x23e   : > { %8569 = vmatprep.mubr.f32.mxu0 %v2721_v53  ;;  %v2455_v37 = vmax.f32 %v13023_v42, 0.0  ;;  %10832 = vmatmul.mubr.msk.f32.gmra.mrb[36].mxu1 %vm1620_vm5, %v2451_v31  ;;  %v1138_v31 = vmul.u32 24, %v1137_v62  ;;  %vm1625_vm5 = vcmp.lt.s32.totalorder %v13041_v23, 16  ;;  %v13075_v62 = vsel %vm13044_vm6, %v1530_v2, %v1106_v41 }
 0x23f   : > { %v2309_v54 = vpop.f32.mrb[46].mxu0  ;;  %18769 = vst [vmem:[#allocation27_spill] sm:$0xff] %v13075_v62  ;;  %v1159_v41 = vshrl.u32 %v13016_v57, 4  ;;  %vm1626_vm3 = vcmp.lt.s32.totalorder %v13075_v62, 16  ;;  %v1532_v57 = vadd.s32 24, %v13051_v47  ;;  %v13213_v42 = vadd.s32 280, %v12006_v60 }
 0x240   : > { %v2503_v48 = vsel %vm1624_vm8, %v2455_v37, 0.0  ;;  %v13058_v17 = vadd.f32 %v12979_v58, %v2309_v54  ;;  %v2311_v11 = vpop.f32.mrb[47].mxu0  ;;  %v2680_v49 = vld [vmem:[%s11764_s30 + $0x99] sm:$0xff]  ;;  %v13102_v54 = vmul.u32.u64.low 2863311531, %v13063_v21  ;;  %v13103_v4 = vmul.u32.u64.high 2863311531, %v13063_v21, %v13102_v54 }
 0x241   : > { %v2722_v35 = vld [vmem:[%s11764_s30 + $0x9a] sm:$0xff]  ;;  %2551 = vst [vmem:[%s11764_s30 + $0xb0] sm:$0xff] %v2503_v48  ;;  %3073 = vmatprep.mubr.f32.mxu1 %v2680_v49  ;;  %v13120_v11 = vsub.s32 %v12923_v34, %v1149_v32  ;;  %v1160_v50 = vmul.u32 24, %v1159_v41  ;;  %v13166_v54 = vadd.s32 272, %v12006_v60 }
 0x242   : > { %8570 = vmatmul.mubr.f32.gmra.mrb[108].mxu0 %v2722_v35  ;;  %v2456_v30 = vmax.f32 %v13058_v17, 0.0  ;;  %10833 = vmatmul.mubr.msk.f32.gmra.mrb[38].mxu1 %vm1621_vm0, %v2452_v52  ;;  %vm1388_vm0 = vcmp.ne.s32.totalorder %v13051_v47, 0  ;;  %v1139_v52 = vsub.s32 %v12887_v6, %v1138_v31  ;;  %v13110_v6 = vsel %vm13081_vm2, %v1531_v14, %v13005_v44 }
 0x243   : > { %v2314_v46 = vpop.f32.mrb[48].mxu0  ;;  %18772 = vst [vmem:[#allocation28_spill] sm:$0xff] %v13110_v6  ;;  %v1170_v31 = vshrl.u32 %v13031_v5, 4  ;;  %v13123_v44 = vmul.u32.u64.low 2863311531, %v13086_v59  ;;  %v13124_v49 = vmul.u32.u64.high 2863311531, %v13086_v59, %v13123_v44  ;;  %vm13130_vm13 = vmand %vm1436_vm14, %vm1388_vm0  ;;  %vm1390_vm7 = vcmp.ne.s32.totalorder %v13120_v11, 0 }
 0x244   : > { %v2504_v8 = vsel %vm1625_vm5, %v2456_v30, 0.0  ;;  %v13097_v53 = vadd.f32 %v12979_v58, %v2314_v46  ;;  %v2316_v61 = vpop.f32.mrb[49].mxu0  ;;  %v2681_v2 = vld [vmem:[%s11764_s30 + $0xa1] sm:$0xff]  ;;  %vm1389_vm15 = vcmp.ne.s32.totalorder %v1139_v52, 0  ;;  %vm1437_vm9 = vcmp.lt.s32.totalorder %v1139_v52, 0 }
 0x245   : > { %v2723_v63 = vld [vmem:[%s11764_s30 + $0xa2] sm:$0xff]  ;;  %2552 = vst [vmem:[%s11764_s30 + $0xb8] sm:$0xff] %v2504_v8  ;;  %3078 = vmatprep.mubr.f32.mxu1 %v2681_v2  ;;  %v1533_v41 = vadd.s32 24, %v1139_v52  ;;  %v1171_v8 = vmul.u32 24, %v1170_v31  ;;  %v13156_v2 = vsel %vm13130_vm13, %v1532_v57, %v13051_v47  ;;  %vm13160_vm10 = vmand %vm1437_vm9, %vm1389_vm15  ;;  %vm1438_vm6 = vcmp.lt.s32.totalorder %v13120_v11, 0 }
 0x246   : > { %8572 = vmatprep.mubr.f32.mxu0 %v2723_v63  ;;  %v2457_v48 = vmax.f32 %v13097_v53, 0.0  ;;  %10834 = vmatmul.mubr.msk.f32.gmra.mrb[40].mxu1 %vm1622_vm11, %v2453_v25  ;;  %v13135_v25 = vadd.s32 264, %v12006_v60  ;;  %vm1627_vm11 = vcmp.lt.s32.totalorder %v13110_v6, 16  ;;  %18775 = vst [vmem:[#allocation29_spill] sm:$0xff] %v13156_v2  ;;  %vm13203_vm12 = vmand %vm1438_vm6, %vm1390_vm7 }
 0x247   : > { %v2319_v35 = vpop.f32.mrb[50].mxu0 }
 0x248   : > { %v2505_v34 = vsel %vm1626_vm3, %v2457_v48, 0.0  ;;  %v13142_v14 = vadd.f32 %v12979_v58, %v2319_v35  ;;  %v2321_v16 = vpop.f32.mrb[51].mxu0  ;;  %v2682_v32 = vld [vmem:[%s11764_s30 + $0xa9] sm:$0xff]  ;;  %v13171_v31 = vmul.u32.u64.low 2863311531, %v13135_v25  ;;  %v13172_v47 = vmul.u32.u64.high 2863311531, %v13135_v25, %v13171_v31 }
 0x249   : > { %v2724_v46 = vld [vmem:[%s11764_s30 + $0xaa] sm:$0xff]  ;;  %2553 = vst [vmem:[%s11764_s30 + $0xc0] sm:$0xff] %v2505_v34  ;;  %3083 = vmatprep.mubr.f32.mxu1 %v2682_v32  ;;  %v1181_v16 = vshrl.u32 %v13103_v4, 4  ;;  %v13192_v32 = vsub.s32 %v12991_v33, %v1171_v8  ;;  %v1192_v4 = vshrl.u32 %v13124_v49, 4 }
 0x24a   : > { %8573 = vmatmul.mubr.f32.gmra.mrb[110].mxu0 %v2724_v46  ;;  %v2458_v61 = vmax.f32 %v13142_v14, 0.0  ;;  %10835 = vmatmul.mubr.msk.f32.gmra.mrb[42].mxu1 %vm1623_vm4, %v2454_v18  ;;  %v1161_v18 = vsub.s32 %v12970_v19, %v1160_v50  ;;  %vm1628_vm4 = vcmp.lt.s32.totalorder %v13156_v2, 16  ;;  %v13188_v19 = vsel %vm13160_vm10, %v1533_v41, %v1139_v52 }
 0x24b   : > { %v2324_v15 = vpop.f32.mrb[52].mxu0  ;;  %18778 = vst [vmem:[#allocation30_spill] sm:$0xff] %v13188_v19  ;;  %v1534_v50 = vadd.s32 24, %v13120_v11  ;;  %v13209_v33 = vmul.u32.u64.low 2863311531, %v13166_v54  ;;  %v13210_v41 = vmul.u32.u64.high 2863311531, %v13166_v54, %v13209_v33  ;;  %vm1629_vm2 = vcmp.lt.s32.totalorder %v13188_v19, 16 }
 0x24c   : > { %v2506_v57 = vsel %vm1627_vm11, %v2458_v61, 0.0  ;;  %v13179_v44 = vadd.f32 %v12979_v58, %v2324_v15  ;;  %v2326_v35 = vpop.f32.mrb[53].mxu0  ;;  %v2683_v5 = vld [vmem:[%s11764_s30 + $0xb1] sm:$0xff]  ;;  %vm1391_vm1 = vcmp.ne.s32.totalorder %v1161_v18, 0  ;;  %vm1392_vm0 = vcmp.ne.s32.totalorder %v13192_v32, 0 }
 0x24d   : > { %v2725_v34 = vld [vmem:[%s11764_s30 + $0xb2] sm:$0xff]  ;;  %2554 = vst [vmem:[%s11764_s30 + $0xc8] sm:$0xff] %v2506_v57  ;;  %3088 = vmatprep.mubr.f32.mxu1 %v2683_v5  ;;  %v1182_v57 = vmul.u32 24, %v1181_v16  ;;  %v13229_v35 = vsel %vm13203_vm12, %v1534_v50, %v13120_v11  ;;  %v1535_v5 = vadd.s32 24, %v1161_v18  ;;  %vm1440_vm14 = vcmp.lt.s32.totalorder %v13192_v32, 0 }
 0x24e   : > { %8575 = vmatprep.mubr.f32.mxu0 %v2725_v34  ;;  %v2459_v46 = vmax.f32 %v13179_v44, 0.0  ;;  %10836 = vmatmul.mubr.msk.f32.gmra.mrb[44].mxu1 %vm1624_vm8, %v2455_v37  ;;  %vm1439_vm8 = vcmp.lt.s32.totalorder %v1161_v18, 0  ;;  %18781 = vst [vmem:[#allocation31_spill] sm:$0xff] %v13229_v35  ;;  %v1193_v16 = vmul.u32 24, %v1192_v4  ;;  %v1203_v50 = vshrl.u32 %v13172_v47, 4  ;;  %vm13278_vm15 = vmand %vm1440_vm14, %vm1392_vm0 }
 0x24f   : > { %v2329_v8 = vpop.f32.mrb[54].mxu0  ;;  %vm13240_vm13 = vmand %vm1439_vm8, %vm1391_vm1  ;;  %v13246_v17 = vmul.u32.u64.low 2863311531, %v13213_v42  ;;  %v13247_v52 = vmul.u32.u64.high 2863311531, %v13213_v42, %v13246_v17  ;;  %v1183_v47 = vsub.s32 %v13063_v21, %v1182_v57  ;;  %v1214_v53 = vshrl.u32 %v13210_v41, 4 }
 0x250   : > { %v2507_v37 = vsel %vm1628_vm4, %v2459_v46, 0.0  ;;  %v13220_v63 = vadd.f32 %v12979_v58, %v2329_v8  ;;  %v2331_v15 = vpop.f32.mrb[55].mxu0  ;;  %v2684_v31 = vld [vmem:[%s11764_s30 + $0xb9] sm:$0xff]  ;;  %v13272_v21 = vsel %vm13240_vm13, %v1535_v5, %v1161_v18  ;;  %v13291_v18 = vadd.s32 296, %v12006_v60 }
 0x251   : > { %v2726_v49 = vld [vmem:[%s11764_s30 + $0xba] sm:$0xff]  ;;  %2555 = vst [vmem:[%s11764_s30 + $0xd0] sm:$0xff] %v2507_v37  ;;  %3093 = vmatprep.mubr.f32.mxu1 %v2684_v31  ;;  %18784 = vst [vmem:[#allocation32_spill] sm:$0xff] %v13272_v21  ;;  %vm1441_vm9 = vcmp.lt.s32.totalorder %v1183_v47, 0  ;;  %vm1631_vm10 = vcmp.lt.s32.totalorder %v13272_v21, 16 }
 0x252   : > { %8576 = vmatmul.mubr.f32.gmra.mrb[112].mxu0 %v2726_v49  ;;  %v2460_v34 = vmax.f32 %v13220_v63, 0.0  ;;  %10837 = vmatmul.mubr.msk.f32.gmra.mrb[46].mxu1 %vm1625_vm5, %v2456_v30  ;;  %v13250_v30 = vadd.s32 288, %v12006_v60  ;;  %vm1630_vm5 = vcmp.lt.s32.totalorder %v13229_v35, 16  ;;  %v1536_v49 = vadd.s32 24, %v13192_v32 }
 0x253   : > { %v2334_v33 = vpop.f32.mrb[56].mxu0  ;;  %v13323_v14 = vmul.u32.u64.low 2863311531, %v13291_v18  ;;  %v13324_v57 = vmul.u32.u64.high 2863311531, %v13291_v18, %v13323_v14 }
 0x254   : > { %v2508_v4 = vsel %vm1629_vm2, %v2460_v34, 0.0  ;;  %v13257_v8 = vadd.f32 %v12979_v58, %v2334_v33  ;;  %v2336_v37 = vpop.f32.mrb[57].mxu0  ;;  %v2685_v15 = vld [vmem:[%s11764_s30 + $0xc1] sm:$0xff]  ;;  %v13283_v33 = vsub.s32 %v13086_v59, %v1193_v16  ;;  %v13305_v41 = vsel %vm13278_vm15, %v1536_v49, %v13192_v32 }
 0x255   : > { %v2727_v31 = vld [vmem:[%s11764_s30 + $0xc2] sm:$0xff]  ;;  %2556 = vst [vmem:[%s11764_s30 + $0xd8] sm:$0xff] %v2508_v4  ;;  %3098 = vmatprep.mubr.f32.mxu1 %v2685_v15  ;;  %v13287_v11 = vmul.u32.u64.low 2863311531, %v13250_v30  ;;  %v13288_v37 = vmul.u32.u64.high 2863311531, %v13250_v30, %v13287_v11  ;;  %18787 = vst [vmem:[#allocation33_spill] sm:$0xff] %v13305_v41  ;;  %v1225_v49 = vshrl.u32 %v13247_v52, 4 }
 0x256   : > { %8578 = vmatprep.mubr.f32.mxu0 %v2727_v31  ;;  %v18396_v17 = vmax.f32 %v13257_v8, 0.0  ;;  %10838 = vmatmul.mubr.msk.f32.gmra.mrb[48].mxu1 %vm1626_vm3, %v2457_v48  ;;  %v1204_v48 = vmul.u32 24, %v1203_v50  ;;  %vm1393_vm3 = vcmp.ne.s32.totalorder %v1183_v47, 0  ;;  %vm1394_vm7 = vcmp.ne.s32.totalorder %v13283_v33, 0 }
 0x257   : > { %v2339_v4 = vpop.f32.mrb[58].mxu0  ;;  %v1215_v11 = vmul.u32 24, %v1214_v53  ;;  %vm13314_vm6 = vmand %vm1441_vm9, %vm1393_vm3  ;;  %vm1632_vm12 = vcmp.lt.s32.totalorder %v13305_v41, 16  ;;  %v13339_v52 = vadd.s32 312, %v12006_v60  ;;  %v1538_v14 = vadd.s32 24, %v13283_v33 }
 0x258   : > { %v2509_v5 = vsel %vm1630_vm5, %v18396_v17, 0.0  ;;  %v9661_v15 = vadd.f32 %v12979_v58, %v2339_v4  ;;  %v2341_v59 = vpop.f32.mrb[59].mxu0  ;;  %v2686_v16 = vld [vmem:[%s11764_s30 + $0xc9] sm:$0xff]  ;;  %v1537_v4 = vadd.s32 24, %v1183_v47  ;;  %v13319_v32 = vsub.s32 %v13135_v25, %v1204_v48 }
 0x259   : > { %v2728_v31 = vld [vmem:[%s11764_s30 + $0xca] sm:$0xff]  ;;  %2557 = vst [vmem:[%s11764_s30 + $0xe0] sm:$0xff] %v2509_v5  ;;  %3103 = vmatprep.mubr.f32.mxu1 %v2686_v16  ;;  %v13334_v25 = vadd.s32 304, %v12006_v60  ;;  %v1226_v44 = vmul.u32 24, %v1225_v49 }
 0x25a   : > { %8579 = vmatmul.mubr.f32.gmra.mrb[114].mxu0 %v2728_v31  ;;  %v13307_v50 = vmax.f32 %v9661_v15, 0.0  ;;  %10839 = vmatmul.mubr.msk.f32.gmra.mrb[50].mxu1 %vm1627_vm11, %v2458_v61  ;;  %vm1442_vm11 = vcmp.lt.s32.totalorder %v13283_v33, 0  ;;  %vm1395_vm8 = vcmp.ne.s32.totalorder %v13319_v32, 0 }
 0x25b   : > { %v2344_v5 = vpop.f32.mrb[60].mxu0  ;;  %vm13357_vm1 = vmand %vm1442_vm11, %vm1394_vm7 }
 0x25c   : > { %v2510_v61 = vsel %vm1631_vm10, %v13307_v50, 0.0  ;;  %v9662_v53 = vadd.f32 %v12979_v58, %v2344_v5  ;;  %v2346_v15 = vpop.f32.mrb[61].mxu0  ;;  %v2687_v16 = vld [vmem:[%s11764_s30 + $0xd1] sm:$0xff]  ;;  %v13349_v5 = vsel %vm13314_vm6, %v1537_v4, %v1183_v47 }
 0x25d   : > { %v2729_v31 = vld [vmem:[%s11764_s30 + $0xd2] sm:$0xff]  ;;  %2558 = vst [vmem:[%s11764_s30 + $0xe8] sm:$0xff] %v2510_v61  ;;  %3108 = vmatprep.mubr.f32.mxu1 %v2687_v16  ;;  %18790 = vst [vmem:[#allocation34_spill] sm:$0xff] %v13349_v5  ;;  %v13353_v61 = vsub.s32 %v13166_v54, %v1215_v11  ;;  %vm1633_vm0 = vcmp.lt.s32.totalorder %v13349_v5, 16 }
 0x25e   : > { %8581 = vmatprep.mubr.f32.mxu0 %v2729_v31  ;;  %v13341_v48 = vmax.f32 %v9662_v53, 0.0  ;;  %10840 = vmatmul.mubr.msk.f32.gmra.mrb[52].mxu1 %vm1628_vm4, %v2459_v46  ;;  %vm1443_vm4 = vcmp.lt.s32.totalorder %v13319_v32, 0  ;;  %v1236_v46 = vshrl.u32 %v13288_v37, 4 }
 0x25f   : > { %v2349_v15 = vpop.f32.mrb[62].mxu0  ;;  %v13373_v16 = vmul.u32.u64.low 2863311531, %v13334_v25  ;;  %v13374_v31 = vmul.u32.u64.high 2863311531, %v13334_v25, %v13373_v16  ;;  %v13380_v37 = vmul.u32.u64.low 2863311531, %v13339_v52  ;;  %v13381_v49 = vmul.u32.u64.high 2863311531, %v13339_v52, %v13380_v37  ;;  %vm13403_vm13 = vmand %vm1443_vm4, %vm1395_vm8 }
 0x260   : > { %v2511_v47 = vsel %vm1632_vm12, %v13341_v48, 0.0  ;;  %v9663_v54 = vadd.f32 %v12979_v58, %v2349_v15  ;;  %v2351_v4 = vpop.f32.mrb[63].mxu0  ;;  %v2688_v11 = vld [vmem:[%s11764_s30 + $0xd9] sm:$0xff]  ;;  %v13384_v15 = vadd.s32 320, %v12006_v60  ;;  %vm1396_vm14 = vcmp.ne.s32.totalorder %v13353_v61, 0 }
 0x261   : > { %v13370_v59 = vld [vmem:[%s11764_s30 + $0xda] sm:$0xff]  ;;  %2559 = vst [vmem:[%s11764_s30 + $0xf0] sm:$0xff] %v2511_v47  ;;  %3113 = vmatprep.mubr.f32.mxu1 %v2688_v11  ;;  %v13395_v47 = vsel %vm13357_vm1, %v1538_v14, %v13283_v33  ;;  %v1539_v11 = vadd.s32 24, %v13319_v32  ;;  %v1237_v53 = vmul.u32 24, %v1236_v46  ;;  %v1247_v33 = vshrl.u32 %v13324_v57, 4 }
 0x262   : > { %8582 = vmatmul.mubr.f32.gmra.mrb[116].mxu0 %v13370_v59  ;;  %v13386_v4 = vmax.f32 %v9663_v54, 0.0  ;;  %10841 = vmatmul.mubr.msk.f32.gmra.mrb[54].mxu1 %vm1629_vm2, %v2460_v34  ;;  %18793 = vst [vmem:[#allocation35_spill] sm:$0xff] %v13395_v47  ;;  %vm1444_vm2 = vcmp.lt.s32.totalorder %v13353_v61, 0  ;;  %v1227_v34 = vsub.s32 %v13213_v42, %v1226_v44  ;;  %vm1634_vm15 = vcmp.lt.s32.totalorder %v13395_v47, 16 }
 0x263   : > { %v2354_v16 = vpop.f32.mrb[64].mxu0  ;;  %v1540_v42 = vadd.s32 24, %v13353_v61  ;;  %v13423_v57 = vmul.u32.u64.low 2863311531, %v13384_v15  ;;  %v13424_v44 = vmul.u32.u64.high 2863311531, %v13384_v15, %v13423_v57  ;;  %vm13441_vm3 = vmand %vm1444_vm2, %vm1396_vm14  ;;  %v1258_v2 = vshrl.u32 %v13374_v31, 4 }
 0x264   : > { %v2512_v14 = vsel %vm1633_vm0, %v13386_v4, 0.0  ;;  %v9664_v54 = vadd.f32 %v12979_v58, %v2354_v16  ;;  %v2356_v37 = vpop.f32.mrb[65].mxu0  ;;  %v2689_v17 = vld [vmem:[%s11764_s30 + $0xe1] sm:$0xff]  ;;  %v18796_v16 = vmax.f32 %v13257_v8, 0.0  ;;  %vm1397_vm9 = vcmp.ne.s32.totalorder %v1227_v34, 0 }
 0x265   : > { %v13416_v19 = vld [vmem:[%s11764_s30 + $0xe2] sm:$0xff]  ;;  %2560 = vst [vmem:[%s11764_s30 + $0xf8] sm:$0xff] %v2512_v14  ;;  %3118 = vmatprep.mubr.f32.mxu1 %v2689_v17  ;;  %v13435_v17 = vsel %vm13403_vm13, %v1539_v11, %v13319_v32  ;;  %vm1445_vm7 = vcmp.lt.s32.totalorder %v1227_v34, 0  ;;  %v1238_v37 = vsub.s32 %v13250_v30, %v1237_v53  ;;  %v1248_v57 = vmul.u32 24, %v1247_v33 }
 0x266   : > { %8584 = vmatprep.mubr.f32.mxu0 %v13416_v19  ;;  %v13426_v46 = vmax.f32 %v9664_v54, 0.0  ;;  %10842 = vmatmul.mubr.msk.f32.gmra.mrb[56].mxu1 %vm1630_vm5, %v18796_v16  ;;  %18797 = vst [vmem:[#allocation36_spill] sm:$0xff] %v13435_v17  ;;  %v13446_v54 = vadd.s32 328, %v12006_v60  ;;  %vm1635_vm5 = vcmp.lt.s32.totalorder %v13435_v17, 16  ;;  %v13464_v30 = vsel %vm13441_vm3, %v1540_v42, %v13353_v61  ;;  %vm13474_vm6 = vmand %vm1445_vm7, %vm1397_vm9 }
 0x267   : > { %v2359_v8 = vpop.f32.mrb[66].mxu0  ;;  %18800 = vst [vmem:[#allocation37_spill] sm:$0xff] %v13464_v30  ;;  %v1541_v53 = vadd.s32 24, %v1227_v34  ;;  %v1269_v33 = vshrl.u32 %v13381_v49, 4  ;;  %vm1398_vm11 = vcmp.ne.s32.totalorder %v1238_v37, 0  ;;  %vm1446_vm1 = vcmp.lt.s32.totalorder %v1238_v37, 0 }
 0x268   : > { %v2513_v32 = vsel %vm1634_vm15, %v13426_v46, 0.0  ;;  %v9665_v11 = vadd.f32 %v12979_v58, %v2359_v8  ;;  %v2361_v63 = vpop.f32.mrb[67].mxu0  ;;  %v2690_v16 = vld [vmem:[%s11764_s30 + $0xe9] sm:$0xff]  ;;  %v13479_v61 = vmul.u32.u64.low 2863311531, %v13446_v54  ;;  %v13480_v42 = vmul.u32.u64.high 2863311531, %v13446_v54, %v13479_v61  ;;  %vm13509_vm4 = vmand %vm1446_vm1, %vm1398_vm11 }
 0x269   : > { %v13455_v35 = vld [vmem:[%s11764_s30 + $0xea] sm:$0xff]  ;;  %2561 = vst [vmem:[%s11764_s30 + $0x100] sm:$0xff] %v2513_v32  ;;  %3123 = vmatprep.mubr.f32.mxu1 %v2690_v16  ;;  %v1249_v49 = vsub.s32 %v13291_v18, %v1248_v57  ;;  %v13484_v32 = vadd.s32 336, %v12006_v60  ;;  %vm1636_vm8 = vcmp.lt.s32.totalorder %v13464_v30, 16  ;;  %v1259_v61 = vmul.u32 24, %v1258_v2 }
 0x26a   : > { %8585 = vmatmul.mubr.f32.gmra.mrb[118].mxu0 %v13455_v35  ;;  %v13467_v8 = vmax.f32 %v9665_v11, 0.0  ;;  %10843 = vmatmul.mubr.msk.f32.gmra.mrb[58].mxu1 %vm1631_vm10, %v13307_v50  ;;  %v13499_v18 = vsel %vm13474_vm6, %v1541_v53, %v1227_v34  ;;  %v1542_v57 = vadd.s32 24, %v1238_v37  ;;  %v1270_v23 = vmul.u32 24, %v1269_v33  ;;  %v14569_v30 = vld [vmem:[%s11764_s30 + $0x89] sm:$0xff] }
 0x26b   : > { %v2364_v14 = vpop.f32.mrb[68].mxu0  ;;  %18803 = vst [vmem:[#allocation38_spill] sm:$0xff] %v13499_v18  ;;  %v1280_v22 = vshrl.u32 %v13424_v44, 4  ;;  %v13514_v2 = vadd.s32 344, %v12006_v60  ;;  %vm1399_vm14 = vcmp.ne.s32.totalorder %v1249_v49, 0  ;;  %vm1447_vm13 = vcmp.lt.s32.totalorder %v1249_v49, 0 }
 0x26c   : > { %v2514_v11 = vsel %vm1635_vm5, %v13467_v8, 0.0  ;;  %v9666_v63 = vadd.f32 %v12979_v58, %v2364_v14  ;;  %v2366_v16 = vpop.f32.mrb[69].mxu0  ;;  %v2691_v6 = vld [vmem:[%s11764_s30 + $0xf1] sm:$0xff]  ;;  %v13517_v44 = vmul.u32.u64.low 2863311531, %v13484_v32  ;;  %v13518_v53 = vmul.u32.u64.high 2863311531, %v13484_v32, %v13517_v44  ;;  %vm13546_vm3 = vmand %vm1447_vm13, %vm1399_vm14  ;;  %v14634_v17 = vld [vmem:[%s11764_s30 + $0xe9] sm:$0xff] }
 0x26d   : > { %v13493_v62 = vld [vmem:[%s11764_s30 + $0xf2] sm:$0xff]  ;;  %2562 = vst [vmem:[%s11764_s30 + $0x108] sm:$0xff] %v2514_v11  ;;  %3128 = vmatprep.mubr.f32.mxu1 %v2691_v6  ;;  %vm18441_vm2 = vcmp.lt.s32.totalorder %v13499_v18, 16  ;;  %v1260_v20 = vsub.s32 %v13334_v25, %v1259_v61  ;;  %v13534_v44 = vsel %vm13509_vm4, %v1542_v57, %v1238_v37  ;;  %v1543_v39 = vadd.s32 24, %v1249_v49 }
 0x26e   : > { %8587 = vmatprep.mubr.f32.mxu0 %v13493_v62  ;;  %v13502_v14 = vmax.f32 %v9666_v63, 0.0  ;;  %10844 = vmatmul.mubr.msk.f32.gmra.mrb[60].mxu1 %vm1632_vm12, %v13341_v48  ;;  %18806 = vst [vmem:[#allocation39_spill] sm:$0xff] %v13534_v44  ;;  %v13537_v27 = vsub.s32 %v13339_v52, %v1270_v23  ;;  %v1291_v37 = vshrl.u32 %v13480_v42, 4  ;;  %vm18448_vm6 = vcmp.lt.s32.totalorder %v13534_v44, 16 }
 0x26f   : > { %v2369_v34 = vpop.f32.mrb[70].mxu0  ;;  %v13552_v61 = vmul.u32.u64.low 2863311531, %v13514_v2  ;;  %v13553_v23 = vmul.u32.u64.high 2863311531, %v13514_v2, %v13552_v61  ;;  %vm1400_vm9 = vcmp.ne.s32.totalorder %v1260_v20, 0  ;;  %vm1448_vm7 = vcmp.lt.s32.totalorder %v1260_v20, 0 }
 0x270   : > { %v2515_v33 = vsel %vm1636_vm8, %v13502_v14, 0.0  ;;  %v9667_v31 = vadd.f32 %v12979_v58, %v2369_v34  ;;  %v2371_v11 = vpop.f32.mrb[71].mxu0  ;;  %v2692_v63 = vld [vmem:[%s11764_s30 + $0xf9] sm:$0xff]  ;;  %v1281_v34 = vmul.u32 24, %v1280_v22  ;;  %v13556_v22 = vadd.s32 352, %v12006_v60  ;;  %vm13585_vm4 = vmand %vm1448_vm7, %vm1400_vm9 }
 0x271   : > { %v13527_v16 = vld [vmem:[%s11764_s30 + $0xfa] sm:$0xff]  ;;  %2563 = vst [vmem:[%s11764_s30 + $0x110] sm:$0xff] %v2515_v33  ;;  %3133 = vmatprep.mubr.f32.mxu1 %v2692_v63  ;;  %v13571_v42 = vsel %vm13546_vm3, %v1543_v39, %v1249_v49  ;;  %v1544_v61 = vadd.s32 24, %v1260_v20  ;;  %vm1401_vm11 = vcmp.ne.s32.totalorder %v13537_v27, 0  ;;  %vm1449_vm1 = vcmp.lt.s32.totalorder %v13537_v27, 0 }
 0x272   : > { %8588 = vmatmul.mubr.f32.gmra.mrb[120].mxu0 %v13527_v16  ;;  %v13539_v11 = vmax.f32 %v9667_v31, 0.0  ;;  %10845 = vmatmul.mubr.msk.f32.gmra.mrb[62].mxu1 %vm1633_vm0, %v13386_v4  ;;  %18809 = vst [vmem:[#allocation40_spill] sm:$0xff] %v13571_v42  ;;  %v1292_v25 = vmul.u32 24, %v1291_v37  ;;  %vm18453_vm14 = vcmp.lt.s32.totalorder %v13571_v42, 16  ;;  %vm13622_vm13 = vmand %vm1449_vm1, %vm1401_vm11  ;;  %v14644_v47 = vld [vmem:[%s11764_s30 + $0xf9] sm:$0xff] }
 0x273   : > { %v2374_v52 = vpop.f32.mrb[72].mxu0 }
 0x274   : > { %v2516_v57 = vsel %vm18441_vm2, %v13539_v11, 0.0  ;;  %v9668_v6 = vadd.f32 %v12979_v58, %v2374_v52  ;;  %v2376_v33 = vpop.f32.mrb[73].mxu0  ;;  %v2693_v31 = vld [vmem:[%s11764_s30 + $0x101] sm:$0xff] }
 0x275   : > { %v13564_v63 = vld [vmem:[%s11764_s30 + $0x102] sm:$0xff]  ;;  %2564 = vst [vmem:[%s11764_s30 + $0x118] sm:$0xff] %v2516_v57  ;;  %3138 = vmatprep.mubr.f32.mxu1 %v2693_v31  ;;  %v13581_v57 = vsub.s32 %v13384_v15, %v1281_v34  ;;  %v13591_v33 = vmul.u32.u64.low 2863311531, %v13556_v22  ;;  %v13592_v31 = vmul.u32.u64.high 2863311531, %v13556_v22, %v13591_v33 }
 0x276   : > { %8590 = vmatprep.mubr.f32.mxu0 %v13564_v63  ;;  %v13574_v52 = vmax.f32 %v9668_v6, 0.0  ;;  %10846 = vmatmul.mubr.msk.f32.gmra.mrb[64].mxu1 %vm1634_vm15, %v13426_v46  ;;  %v1302_v6 = vshrl.u32 %v13518_v53, 4  ;;  %v1545_v53 = vadd.s32 24, %v13537_v27 }
 0x277   : > { %v2379_v39 = vpop.f32.mrb[74].mxu0  ;;  %vm1402_vm3 = vcmp.ne.s32.totalorder %v13581_v57, 0  ;;  %vm1450_vm9 = vcmp.lt.s32.totalorder %v13581_v57, 0 }
 0x278   : > { %v2517_v15 = vsel %vm18448_vm6, %v13574_v52, 0.0  ;;  %v9669_v34 = vadd.f32 %v12979_v58, %v2379_v39  ;;  %v2381_v37 = vpop.f32.mrb[75].mxu0  ;;  %v2694_v13 = vld [vmem:[%s11764_s30 + $0x109] sm:$0xff]  ;;  %v13616_v39 = vsel %vm13585_vm4, %v1544_v61, %v1260_v20  ;;  %v1303_v49 = vmul.u32 24, %v1302_v6  ;;  %vm13664_vm1 = vmand %vm1450_vm9, %vm1402_vm3 }
 0x279   : > { %v13603_v1 = vld [vmem:[%s11764_s30 + $0x10a] sm:$0xff]  ;;  %2565 = vst [vmem:[%s11764_s30 + $0x120] sm:$0xff] %v2517_v15  ;;  %3143 = vmatprep.mubr.f32.mxu1 %v2694_v13  ;;  %18812 = vst [vmem:[#allocation41_spill] sm:$0xff] %v13616_v39  ;;  %v13627_v15 = vsub.s32 %v13446_v54, %v1292_v25  ;;  %v13632_v20 = vmul.u32.u64.low 2863311531, %v13595_v43  ;;  %v13633_v61 = vmul.u32.u64.high 2863311531, %v13595_v43, %v13632_v20  ;;  %vm18462_vm7 = vcmp.lt.s32.totalorder %v13616_v39, 16 }
 0x27a   : > { %8591 = vmatmul.mubr.f32.gmra.mrb[122].mxu0 %v13603_v1  ;;  %v13609_v33 = vmax.f32 %v9669_v34, 0.0  ;;  %10847 = vmatmul.mubr.msk.f32.gmra.mrb[66].mxu1 %vm1635_vm5, %v13467_v8  ;;  %v1313_v34 = vshrl.u32 %v13553_v23, 4  ;;  %v13645_v23 = vadd.s32 368, %v12006_v60  ;;  %v13653_v25 = vsel %vm13622_vm13, %v1545_v53, %v13537_v27  ;;  %v14654_v5 = vld [vmem:[%s11764_s30 + $0x109] sm:$0xff] }
 0x27b   : > { %v2384_v37 = vpop.f32.mrb[76].mxu0  ;;  %18815 = vst [vmem:[#allocation42_spill] sm:$0xff] %v13653_v25  ;;  %vm1403_vm11 = vcmp.ne.s32.totalorder %v13627_v15, 0  ;;  %vm1451_vm4 = vcmp.lt.s32.totalorder %v13627_v15, 0  ;;  %v1324_v27 = vshrl.u32 %v13592_v31, 4  ;;  %v13674_v53 = vadd.s32 376, %v12006_v60 }
 0x27c   : > { %v2518_v38 = vsel %vm18453_vm14, %v13609_v33, 0.0  ;;  %v9670_v56 = vadd.f32 %v12979_v58, %v2384_v37  ;;  %v2386_v51 = vpop.f32.mrb[77].mxu0  ;;  %v2695_v55 = vld [vmem:[%s11764_s30 + $0x111] sm:$0xff]  ;;  %v13685_v45 = vmul.u32.u64.low 2863311531, %v13645_v23  ;;  %v13686_v0 = vmul.u32.u64.high 2863311531, %v13645_v23, %v13685_v45  ;;  %vm13709_vm3 = vmand %vm1451_vm4, %vm1403_vm11 }
 0x27d   : > { %v13641_v54 = vld [vmem:[%s11764_s30 + $0x112] sm:$0xff]  ;;  %2566 = vst [vmem:[%s11764_s30 + $0x128] sm:$0xff] %v2518_v38  ;;  %3148 = vmatprep.mubr.f32.mxu1 %v2695_v55  ;;  %v1546_v38 = vadd.s32 24, %v13581_v57  ;;  %v1314_v55 = vmul.u32 24, %v1313_v34  ;;  %vm18461_vm13 = vcmp.lt.s32.totalorder %v13653_v25, 16  ;;  %v1547_v45 = vadd.s32 24, %v13627_v15 }
 0x27e   : > { %8593 = vmatprep.mubr.f32.mxu0 %v13641_v54  ;;  %v13655_v51 = vmax.f32 %v9670_v56, 0.0  ;;  %10848 = vmatmul.mubr.msk.f32.gmra.mrb[68].mxu1 %vm1636_vm8, %v13502_v14  ;;  %v13670_v56 = vsub.s32 %v13484_v32, %v1303_v49  ;;  %v1335_v13 = vshrl.u32 %v13633_v61, 4  ;;  %v1346_v12 = vshrl.u32 %v13686_v0, 4 }
 0x27f   : > { %v2389_v6 = vpop.f32.mrb[78].mxu0  ;;  %v13699_v31 = vsel %vm13664_vm1, %v1546_v38, %v13581_v57  ;;  %v13703_v49 = vsub.s32 %v13514_v2, %v1314_v55  ;;  %v13715_v57 = vmul.u32.u64.low 2863311531, %v13674_v53  ;;  %v13716_v38 = vmul.u32.u64.high 2863311531, %v13674_v53, %v13715_v57 }
 0x280   : > { %v2519_v34 = vsel %vm18462_vm7, %v13655_v51, 0.0  ;;  %v9671_v37 = vadd.f32 %v12979_v58, %v2389_v6  ;;  %v2391_v20 = vpop.f32.mrb[79].mxu0  ;;  %v2696_v3 = vld [vmem:[%s11764_s30 + $0x119] sm:$0xff]  ;;  %18818 = vst [vmem:[#allocation43_spill] sm:$0xff] %v13699_v31  ;;  %vm1404_vm9 = vcmp.ne.s32.totalorder %v13670_v56, 0  ;;  %vm1452_vm11 = vcmp.lt.s32.totalorder %v13670_v56, 0 }
 0x281   : > { %v13682_v29 = vld [vmem:[%s11764_s30 + $0x11a] sm:$0xff]  ;;  %2567 = vst [vmem:[%s11764_s30 + $0x130] sm:$0xff] %v2519_v34  ;;  %3153 = vmatprep.mubr.f32.mxu1 %v2696_v3  ;;  %v1325_v34 = vmul.u32 24, %v1324_v27  ;;  %vm1642_vm1 = vcmp.lt.s32.totalorder %v13699_v31, 16  ;;  %v13742_v27 = vsel %vm13709_vm3, %v1547_v45, %v13627_v15  ;;  %vm13745_vm4 = vmand %vm1452_vm11, %vm1404_vm9  ;;  %vm1453_vm3 = vcmp.lt.s32.totalorder %v13703_v49, 0 }
 0x282   : > { %8594 = vmatmul.mubr.f32.gmra.mrb[124].mxu0 %v13682_v29  ;;  %v13691_v32 = vmax.f32 %v9671_v37, 0.0  ;;  %10849 = vmatmul.mubr.msk.f32.gmra.mrb[70].mxu1 %vm18441_vm2, %v13539_v11  ;;  %18822 = vst [vmem:[#allocation45_spill] sm:$0xff] %v13742_v27  ;;  %vm1405_vm2 = vcmp.ne.s32.totalorder %v13703_v49, 0  ;;  %vm1643_vm9 = vcmp.lt.s32.totalorder %v13742_v27, 16  ;;  %v1347_v24 = vmul.u32 24, %v1346_v12  ;;  %v14485_v27 = vld [vmem:[%s11764_s30 + $0x59] sm:$0xff] }
 0x283   : > { %v2394_v3 = vpop.f32.mrb[80].mxu0  ;;  %vm13780_vm11 = vmand %vm1453_vm3, %vm1405_vm2  ;;  %v14497_v31 = vld [vmem:[%s11764_s30 + $0x61] sm:$0xff] }
 0x284   : > { %v2520_v2 = vsel %vm18461_vm13, %v13691_v32, 0.0  ;;  %v9672_v55 = vadd.f32 %v12979_v58, %v2394_v3  ;;  %v2396_v37 = vpop.f32.mrb[81].mxu0  ;;  %v13723_v20 = vld [vmem:[%s11764_s30 + $0x121] sm:$0xff]  ;;  %v1548_v3 = vadd.s32 24, %v13670_v56  ;;  %v1348_v10 = vsub.s32 %v13645_v23, %v1347_v24 }
 0x285   : > { %18821 = vst [vmem:[#allocation44_spill] sm:$0xff] %v13723_v20  ;;  %v13726_v60 = vld [vmem:[%s11764_s30 + $0x122] sm:$0xff]  ;;  %2568 = vst [vmem:[%s11764_s30 + $0x138] sm:$0xff] %v2520_v2  ;;  %3158 = vmatprep.mubr.f32.mxu1 %v13723_v20  ;;  %v1336_v37 = vmul.u32 24, %v1335_v13  ;;  %v10685_v41 = vld [vmem:[%s11764_s30 + $0x11a] sm:$0xff] }
 0x286   : > { %8596 = vmatprep.mubr.f32.mxu0 %v13726_v60  ;;  %v13734_v61 = vmax.f32 %v9672_v55, 0.0  ;;  %10850 = vmatmul.mubr.msk.f32.gmra.mrb[72].mxu1 %vm18448_vm6, %v13574_v52  ;;  %v13751_v55 = vsub.s32 %v13556_v22, %v1325_v34  ;;  %v1596_v0 = vsel %vm13745_vm4, %v1548_v3, %v13670_v56 }
 0x287   : > { %v2399_v57 = vpop.f32.mrb[82].mxu0  ;;  %vm13803_vm4 = vcmp.lt.s32.totalorder %v1596_v0, 16 }
 0x288   : > { %v2521_v36 = vsel %vm1642_vm1, %v13734_v61, 0.0  ;;  %v9673_v15 = vadd.f32 %v12979_v58, %v2399_v57  ;;  %v2401_v45 = vpop.f32.mrb[83].mxu0  ;;  %v13758_v6 = vld [vmem:[%s11764_s30 + $0x129] sm:$0xff]  ;;  %vm1406_vm6 = vcmp.ne.s32.totalorder %v13751_v55, 0  ;;  %v13786_v57 = vsub.s32 %v13595_v43, %v1336_v37  ;;  %v2862_v43 = vld [vmem:[%s18354_s3 + $0x318] sm:$0xff] }
 0x289   : > { %18825 = vst [vmem:[#allocation46_spill] sm:$0xff] %v13758_v6  ;;  %v13761_v28 = vld [vmem:[%s11764_s30 + $0x12a] sm:$0xff]  ;;  %2569 = vst [vmem:[%s11764_s30 + $0x140] sm:$0xff] %v2521_v36  ;;  %3163 = vmatprep.mubr.f32.mxu1 %v13758_v6  ;;  %v1549_v36 = vadd.s32 24, %v13703_v49  ;;  %vm1454_vm2 = vcmp.lt.s32.totalorder %v13751_v55, 0  ;;  %v1550_v37 = vadd.s32 24, %v13751_v55 }
 0x28a   : > { %8597 = vmatmul.mubr.f32.gmra.mrb[126].mxu0 %v13761_v28  ;;  %v13769_v22 = vmax.f32 %v9673_v15, 0.0  ;;  %10851 = vmatmul.mubr.msk.f32.gmra.mrb[74].mxu1 %vm18453_vm14, %v13609_v33  ;;  %v1357_v15 = vshrl.u32 %v13716_v38, 4  ;;  %vm13819_vm3 = vmand %vm1454_vm2, %vm1406_vm6  ;;  %vm1407_vm14 = vcmp.ne.s32.totalorder %v13786_v57, 0  ;;  %vm1455_vm6 = vcmp.lt.s32.totalorder %v13786_v57, 0 }
 0x28b   : > { %v2404_v34 = vpop.f32.mrb[84].mxu0  ;;  %v1597_v12 = vsel %vm13780_vm11, %v1549_v36, %v13703_v49  ;;  %v1598_v24 = vsel %vm13819_vm3, %v1550_v37, %v13751_v55  ;;  %v1551_v23 = vadd.s32 24, %v13786_v57  ;;  %vm13856_vm2 = vmand %vm1455_vm6, %vm1407_vm14  ;;  %v10597_v55 = vld [vmem:[%s18353_s2] ss:$0 sm:$0xff]  ;;  %vm1408_vm14 = vcmp.ne.s32.totalorder %v1348_v10, 0 }
 0x28c   : > { %v2522_v56 = vsel %vm1643_vm9, %v13769_v22, 0.0  ;;  %v13793_v3 = vadd.f32 %v12979_v58, %v2404_v34  ;;  %v2406_v2 = vpop.f32.mrb[85].mxu0  ;;  %v13796_v45 = vld [vmem:[%s11764_s30 + $0x131] sm:$0xff]  ;;  %vm13840_vm11 = vcmp.lt.s32.totalorder %v1597_v12, 16  ;;  %vm1456_vm3 = vcmp.lt.s32.totalorder %v1348_v10, 0 }
 0x28d   : > { %18828 = vst [vmem:[#allocation47_spill] sm:$0xff] %v13796_v45  ;;  %v13799_v26 = vld [vmem:[%s11764_s30 + $0x132] sm:$0xff]  ;;  %2570 = vst [vmem:[%s11764_s30 + $0x148] sm:$0xff] %v2522_v56  ;;  %3168 = vmatprep.mubr.f32.mxu1 %v13796_v45  ;;  %v1358_v56 = vmul.u32 24, %v1357_v15  ;;  %vm13879_vm6 = vcmp.lt.s32.totalorder %v1598_v24, 16  ;;  %v2828_v45 = vld [vmem:[%s18354_s3 + $0x208] sm:$0xff] }
 0x28e   : > { %8599 = vmatprep.mubr.f32.mxu0 %v13799_v26  ;;  %v18458_v38 = vmax.f32 %v13793_v3, 0.0  ;;  %10852 = vmatmul.mubr.msk.f32.gmra.mrb[76].mxu1 %vm18462_vm7, %v13655_v51  ;;  %v10645_v15 = vld [vmem:[%s11764_s30 + $0x19] sm:$0xff] }
 0x28f   : > { %v2409_v0 = vpop.f32.mrb[86].mxu0 }
 0x290   : > { %v2523_v2 = vsel %vm13803_vm4, %v18458_v38, 0.0  ;;  %v13829_v13 = vadd.f32 %v12979_v58, %v2409_v0  ;;  %v2411_v49 = vpop.f32.mrb[87].mxu0  ;;  %v13832_v36 = vld [vmem:[%s11764_s30 + $0x139] sm:$0xff] }
 0x291   : > { %18833 = vst [vmem:[#allocation48_spill] sm:$0xff] %v13832_v36  ;;  %v13835_v40 = vld [vmem:[%s11764_s30 + $0x13a] sm:$0xff]  ;;  %2571 = vst [vmem:[%s11764_s30 + $0x150] sm:$0xff] %v2523_v2  ;;  %3173 = vmatprep.mubr.f32.mxu1 %v13832_v36  ;;  %v13861_v2 = vsub.s32 %v13674_v53, %v1358_v56  ;;  %v18839_v53 = vmov 0 }
 0x292   : > { %8600 = vmatmul.mubr.f32.gmra.mrb[128].mxu0 %v13835_v40  ;;  %v18463_v58 = vmax.f32 %v13829_v13, 0.0  ;;  %10853 = vmatmul.mubr.msk.f32.gmra.mrb[78].mxu1 %vm18461_vm13, %v13691_v32  ;;  %v18840_v53 = vsel %vm13879_vm6, 4294967295, %v18839_v53  ;;  %vm13892_vm13 = vmand %vm1456_vm3, %vm1408_vm14 }
 0x293   : > { %v2414_v12 = vpop.f32.mrb[88].mxu0  ;;  %18841 = vst [vmem:[#allocation50_spill] sm:$0xff] %v18840_v53  ;;  %vm1409_vm7 = vcmp.ne.s32.totalorder %v13861_v2, 0 }
 0x294   : > { %v2524_v49 = vsel %vm13840_vm11, %v18463_v58, 0.0  ;;  %v13870_v37 = vadd.f32 %v10597_v55, %v2414_v12  ;;  %v2416_v34 = vpop.f32.mrb[89].mxu0  ;;  %v13873_v38 = vld [vmem:[%s11764_s30 + $0x141] sm:$0xff]  ;;  %v1599_v12 = vsel %vm13856_vm2, %v1551_v23, %v13786_v57  ;;  %vm1457_vm2 = vcmp.lt.s32.totalorder %v13861_v2, 0 }
 0x295   : > { %18838 = vst [vmem:[#allocation49_spill] sm:$0xff] %v13873_v38  ;;  %v13876_v7 = vld [vmem:[%s11764_s30 + $0x142] sm:$0xff]  ;;  %2572 = vst [vmem:[%s11764_s30 + $0x158] sm:$0xff] %v2524_v49  ;;  %3178 = vmatprep.mubr.f32.mxu1 %v13873_v38  ;;  %v1552_v49 = vadd.s32 24, %v1348_v10  ;;  %vm1647_vm14 = vcmp.lt.s32.totalorder %v1599_v12, 16 }
 0x296   : > { %8602 = vmatprep.mubr.f32.mxu0 %v13876_v7  ;;  %v18467_v56 = vmax.f32 %v13870_v37, 0.0  ;;  %10854 = vmatmul.mubr.msk.f32.gmra.mrb[80].mxu1 %vm1642_vm1, %v13734_v61  ;;  %v2827_v58 = vld [vmem:[%s18354_s3 + $0x200] sm:$0xff]  ;;  %vm13926_vm3 = vmand %vm1457_vm2, %vm1409_vm7  ;;  %v10600_v12 = vld [vmem:[%s11764_s30 + $0x28] sm:$0xff] }
 0x297   : > { %v2419_v24 = vpop.f32.mrb[90].mxu0  ;;  %v2703_v34 = vld [vmem:[%s11764_s30 + $0x2] sm:$0xff] }
 0x298   : > { %v2525_v38 = vsel %vm13879_vm6, %v18467_v56, 0.0  ;;  %v9677_v0 = vadd.f32 %v10597_v55, %v2419_v24  ;;  %v2421_v57 = vpop.f32.mrb[91].mxu0  ;;  %v13905_v23 = vld [vmem:[%s11764_s30 + $0x149] sm:$0xff]  ;;  %v1553_v56 = vadd.s32 24, %v13861_v2 }
 0x299   : > { %18844 = vst [vmem:[#allocation51_spill] sm:$0xff] %v13905_v23  ;;  %v13908_v36 = vld [vmem:[%s11764_s30 + $0x14a] sm:$0xff]  ;;  %2573 = vst [vmem:[%s11764_s30 + $0x160] sm:$0xff] %v2525_v38  ;;  %3183 = vmatprep.mubr.f32.mxu1 %v13905_v23  ;;  %v1600_v57 = vsel %vm13892_vm13, %v1552_v49, %v1348_v10  ;;  %v10598_v38 = vld [vmem:[%s11764_s30 + $0x18] sm:$0xff] }
 0x29a   : > { %18845 = vst [vmem:[#allocation52_spill] sm:$0xff] %v13908_v36  ;;  %8603 = vmatmul.mubr.f32.gmra.mrb[130].mxu0 %v13908_v36  ;;  %v2478_v24 = vmax.f32 %v9677_v0, 0.0  ;;  %10855 = vmatmul.mubr.msk.f32.gmra.mrb[82].mxu1 %vm1643_vm9, %v13769_v22  ;;  %v8961_v0 = vpack.c.bf16 %v2828_v45, %v2827_v58  ;;  %v2829_v10 = vld [vmem:[%s18354_s3 + $0x210] sm:$0xff]  ;;  %v2830_v49 = vld [vmem:[%s18354_s3 + $0x218] sm:$0xff]  ;;  %vm1648_vm7 = vcmp.lt.s32.totalorder %v1600_v57, 16  ;;  %v10599_v58 = vld [vmem:[%s11764_s30 + $0x20] sm:$0xff] }
 0x29b   : > { %v2424_v6 = vpop.f32.mrb[92].mxu0  ;;  %3253 = vmatprep.mubr.f32.mxu1 %v10598_v38 }
 0x29c   : > { %v2526_v23 = vsel %vm1647_vm14, %v2478_v24, 0.0  ;;  %v9678_v20 = vadd.f32 %v10597_v55, %v2424_v6  ;;  %v2426_v36 = vpop.f32.mrb[93].mxu0  ;;  %v13931_v53 = vld [vmem:[%s11764_s30 + $0x152] sm:$0xff]  ;;  %v1601_v6 = vsel %vm13926_vm3, %v1553_v56, %v13861_v2  ;;  %v8964_v24 = vpack.c.bf16 %v2830_v49, %v2829_v10  ;;  %v2832_v2 = vld [vmem:[%s18354_s3 + $0x228] sm:$0xff] }
 0x29d   : > { %18848 = vst [vmem:[#allocation53_spill] sm:$0xff] %v13931_v53  ;;  %2574 = vst [vmem:[%s11764_s30 + $0x168] sm:$0xff] %v2526_v23  ;;  %8605 = vmatprep.mubr.f32.mxu0 %v13931_v53  ;;  %vm1649_vm13 = vcmp.lt.s32.totalorder %v1601_v6, 16  ;;  %v2705_v6 = vld [vmem:[%s11764_s30 + $0x12] sm:$0xff] }
 0x29e   : > { %v2479_v45 = vmax.f32 %v9678_v20, 0.0  ;;  %3254 = vmatmul.mubr.f32.vlgmr.msra.gmra.mrb[0].mxu1 %v2703_v34  ;;  %v2831_v20 = vld [vmem:[%s18354_s3 + $0x220] sm:$0xff]  ;;  %v2833_v34 = vld [vmem:[%s18354_s3 + $0x230] sm:$0xff] }
 0x29f   : > { %v2429_v36 = vpop.f32.mrb[94].mxu0  ;;  %3258 = vmatprep.mubr.f32.mxu1 %v10599_v58  ;;  %8962 = vmatpush1.bf16.msra.mxu1 %v8961_v0  ;;  %v8967_v0 = vpack.c.bf16 %v2832_v2, %v2831_v20  ;;  %v13990_v20 = vld [vmem:[%s11764_s30 + $0x38] sm:$0xff] }
 0x2a0   : > { %v2527_v38 = vsel %vm1648_vm7, %v2479_v45, 0.0  ;;  %v9679_v23 = vadd.f32 %v10597_v55, %v2429_v36  ;;  %v2431_v57 = vpop.f32.mrb[95].mxu0  ;;  %v13947_v53 = vld [vmem:[%s11764_s30 + $0x15a] sm:$0xff]  ;;  %8963 = vmatprep.subr.bf16.mxu1 %v18681_v9  ;;  %v2704_v55 = vld [vmem:[%s11764_s30 + $0xa] sm:$0xff]  ;;  %18852 = vst [vmem:[#allocation57_spill] sm:$0xff] %v13990_v20 }
 0x2a1   : > { %18849 = vst [vmem:[#allocation54_spill] sm:$0xff] %v13947_v53  ;;  %2575 = vst [vmem:[%s11764_s30 + $0x170] sm:$0xff] %v2527_v38  ;;  %8606 = vmatmul.mubr.f32.gmra.mrb[132].mxu0 %v13947_v53  ;;  %v2834_v45 = vld [vmem:[%s18354_s3 + $0x238] sm:$0xff]  ;;  %v13974_v36 = vld [vmem:[%s11764_s30 + $0x30] sm:$0xff] }
 0x2a2   : > { %v2480_v56 = vmax.f32 %v9679_v23, 0.0  ;;  %3259 = vmatmul.mubr.f32.gmra.mrb[2].mxu1 %v2704_v55  ;;  %18851 = vst [vmem:[#allocation56_spill] sm:$0xff] %v13974_v36  ;;  %v8970_v58 = vpack.c.bf16 %v2834_v45, %v2833_v34  ;;  %v2835_v38 = vld [vmem:[%s18354_s3 + $0x240] sm:$0xff]  ;;  %v2836_v23 = vld [vmem:[%s18354_s3 + $0x248] sm:$0xff]  ;;  %v2837_v55 = vld [vmem:[%s18354_s3 + $0x250] sm:$0xff] }
 0x2a3   : > { %3263 = vmatprep.mubr.f32.mxu1 %v10600_v12  ;;  %8965 = vmatpush1.bf16.msra.mxu1 %v8964_v24  ;;  %v13986_v57 = vld [vmem:[%s11764_s30 + $0x1a] sm:$0xff]  ;;  %v8973_v2 = vpack.c.bf16 %v2836_v23, %v2835_v38  ;;  %v14022_v38 = vld [vmem:[%s11764_s30 + $0x48] sm:$0xff] }
 0x2a4   : > { %v2528_v10 = vsel %vm1649_vm13, %v2480_v56, 0.0  ;;  %v13961_v49 = vld [vmem:[%s11764_s30 + $0x162] sm:$0xff]  ;;  %8966 = vmatprep.subr.bf16.mxu1 %v18681_v9  ;;  %18854 = vst [vmem:[#allocation59_spill] sm:$0xff] %v14022_v38 }
 0x2a5   : > { %18850 = vst [vmem:[#allocation55_spill] sm:$0xff] %v13961_v49  ;;  %2576 = vst [vmem:[%s11764_s30 + $0x178] sm:$0xff] %v2528_v10  ;;  %8608 = vmatprep.mubr.f32.mxu0 %v13961_v49  ;;  %v14003_v10 = vld [vmem:[%s11764_s30 + $0x22] sm:$0xff]  ;;  %v14112_v49 = vld [vmem:[%s11764_s30 + $0x78] sm:$0xff] }
 0x2a6   : > { %3264 = vmatmul.mubr.f32.gmra.mrb[4].mxu1 %v2705_v6  ;;  %v14007_v34 = vld [vmem:[%s11764_s30 + $0x40] sm:$0xff]  ;;  %18860 = vst [vmem:[#allocation65_spill] sm:$0xff] %v14112_v49 }
 0x2a7   : > { %3268 = vmatprep.mubr.f32.mxu1 %v13974_v36  ;;  %8968 = vmatpush1.bf16.msra.mxu1 %v8967_v0  ;;  %v2838_v0 = vld [vmem:[%s18354_s3 + $0x258] sm:$0xff]  ;;  %18853 = vst [vmem:[#allocation58_spill] sm:$0xff] %v14007_v34  ;;  %v2839_v6 = vld [vmem:[%s18354_s3 + $0x260] sm:$0xff]  ;;  %v14097_v36 = vld [vmem:[%s11764_s30 + $0x70] sm:$0xff] }
 0x2a8   : > { %v2760_v24 = vld [vmem:[%s11764_s30 + $0x16a] sm:$0xff]  ;;  %8969 = vmatprep.subr.bf16.mxu1 %v18681_v9  ;;  %v8976_v45 = vpack.c.bf16 %v2838_v0, %v2837_v55  ;;  %v2842_v55 = vld [vmem:[%s18354_s3 + $0x278] sm:$0xff]  ;;  %18859 = vst [vmem:[#allocation64_spill] sm:$0xff] %v14097_v36  ;;  %v14127_v53 = vld [vmem:[%s11764_s30 + $0x80] sm:$0xff] }
 0x2a9   : > { %8609 = vmatmul.mubr.f32.gmra.mrb[134].mxu0 %v2760_v24  ;;  %v14018_v24 = vld [vmem:[%s11764_s30 + $0x2a] sm:$0xff]  ;;  %18862 = vst [vmem:[#allocation67_spill] sm:$0xff] %v14127_v53 }
 0x2aa   : > { %3269 = vmatmul.mubr.f32.gmra.mrb[6].mxu1 %v13986_v57 }
 0x2ab   : > { %3273 = vmatprep.mubr.f32.mxu1 %v13990_v20  ;;  %8971 = vmatpush1.bf16.msra.mxu1 %v8970_v58  ;;  %v2840_v58 = vld [vmem:[%s18354_s3 + $0x268] sm:$0xff] }
 0x2ac   : > { %v2761_v56 = vld [vmem:[%s11764_s30 + $0x172] sm:$0xff]  ;;  %v2762_v12 = vld [vmem:[%s11764_s30 + $0x17a] sm:$0xff]  ;;  %8972 = vmatprep.subr.bf16.mxu1 %v18681_v9  ;;  %v8979_v23 = vpack.c.bf16 %v2840_v58, %v2839_v6  ;;  %v2844_v6 = vld [vmem:[%s18354_s3 + $0x288] sm:$0xff] }
 0x2ad   : > { %8611 = vmatprep.mubr.f32.mxu0 %v2761_v56  ;;  %v14033_v56 = vld [vmem:[%s11764_s30 + $0x32] sm:$0xff]  ;;  %v14048_v58 = vld [vmem:[%s11764_s30 + $0x3a] sm:$0xff]  ;;  %v14082_v20 = vld [vmem:[%s11764_s30 + $0x68] sm:$0xff] }
 0x2ae   : > { %3274 = vmatmul.mubr.f32.gmra.mrb[8].mxu1 %v14003_v10  ;;  %8612 = vmatmul.mubr.f32.gmra.mrb[136].mxu0 %v2762_v12  ;;  %v14037_v12 = vld [vmem:[%s11764_s30 + $0x50] sm:$0xff]  ;;  %18858 = vst [vmem:[#allocation63_spill] sm:$0xff] %v14082_v20 }
 0x2af   : > { %3278 = vmatprep.mubr.f32.mxu1 %v14007_v34  ;;  %8974 = vmatpush1.bf16.msra.mxu1 %v8973_v2  ;;  %v2841_v2 = vld [vmem:[%s18354_s3 + $0x270] sm:$0xff]  ;;  %18855 = vst [vmem:[#allocation60_spill] sm:$0xff] %v14037_v12  ;;  %v14067_v34 = vld [vmem:[%s11764_s30 + $0x60] sm:$0xff] }
 0x2b0   : > { %8975 = vmatprep.subr.bf16.mxu1 %v18681_v9  ;;  %v8982_v0 = vpack.c.bf16 %v2842_v55, %v2841_v2  ;;  %v2845_v2 = vld [vmem:[%s18354_s3 + $0x290] sm:$0xff]  ;;  %v2846_v55 = vld [vmem:[%s18354_s3 + $0x298] sm:$0xff]  ;;  %18857 = vst [vmem:[#allocation62_spill] sm:$0xff] %v14067_v34 }
 0x2b2   : > { %3279 = vmatmul.mubr.f32.gmra.mrb[10].mxu1 %v14018_v24 }
 0x2b3   : > { %3283 = vmatprep.mubr.f32.mxu1 %v14022_v38  ;;  %8977 = vmatpush1.bf16.msra.mxu1 %v8976_v45  ;;  %v2843_v45 = vld [vmem:[%s18354_s3 + $0x280] sm:$0xff]  ;;  %v14052_v38 = vld [vmem:[%s11764_s30 + $0x58] sm:$0xff] }
 0x2b4   : > { %8978 = vmatprep.subr.bf16.mxu1 %v18681_v9  ;;  %18856 = vst [vmem:[#allocation61_spill] sm:$0xff] %v14052_v38 }
 0x2b6   : > { %3284 = vmatmul.mubr.f32.gmra.mrb[12].mxu1 %v14033_v56 }
 0x2b7   : > { %3288 = vmatprep.mubr.f32.mxu1 %v14037_v12  ;;  %8980 = vmatpush1.bf16.msra.mxu1 %v8979_v23  ;;  %v8985_v23 = vpack.c.bf16 %v2844_v6, %v2843_v45  ;;  %v14063_v12 = vld [vmem:[%s11764_s30 + $0x42] sm:$0xff] }
 0x2b8   : > { %8981 = vmatprep.subr.bf16.mxu1 %v18681_v9  ;;  %v2847_v45 = vld [vmem:[%s18354_s3 + $0x2a0] sm:$0xff]  ;;  %v2848_v6 = vld [vmem:[%s18354_s3 + $0x2a8] sm:$0xff] }
 0x2ba   : > { %3289 = vmatmul.mubr.f32.gmra.mrb[14].mxu1 %v14048_v58 }
 0x2bb   : > { %3293 = vmatprep.mubr.f32.mxu1 %v14052_v38  ;;  %8983 = vmatpush1.bf16.msra.mxu1 %v8982_v0  ;;  %v8988_v0 = vpack.c.bf16 %v2846_v55, %v2845_v2  ;;  %v14078_v38 = vld [vmem:[%s11764_s30 + $0x4a] sm:$0xff]  ;;  %v2850_v55 = vld [vmem:[%s18354_s3 + $0x2b8] sm:$0xff] }
 0x2bc   : > { %8984 = vmatprep.subr.bf16.mxu1 %v18681_v9  ;;  %v2849_v2 = vld [vmem:[%s18354_s3 + $0x2b0] sm:$0xff] }
 0x2be   : > { %3294 = vmatmul.mubr.f32.gmra.mrb[16].mxu1 %v14063_v12 }
 0x2bf   : > { %3298 = vmatprep.mubr.f32.mxu1 %v14067_v34  ;;  %8986 = vmatpush1.bf16.msra.mxu1 %v8985_v23  ;;  %v8991_v23 = vpack.c.bf16 %v2848_v6, %v2847_v45  ;;  %v14093_v34 = vld [vmem:[%s11764_s30 + $0x52] sm:$0xff]  ;;  %v2851_v45 = vld [vmem:[%s18354_s3 + $0x2c0] sm:$0xff]  ;;  %v2852_v6 = vld [vmem:[%s18354_s3 + $0x2c8] sm:$0xff] }
 0x2c0   : > { %8987 = vmatprep.subr.bf16.mxu1 %v18681_v9 }
 0x2c2   : > { %3299 = vmatmul.mubr.f32.gmra.mrb[18].mxu1 %v14078_v38 }
 0x2c3   : > { %3303 = vmatprep.mubr.f32.mxu1 %v14082_v20  ;;  %8989 = vmatpush1.bf16.msra.mxu1 %v8988_v0  ;;  %v8994_v0 = vpack.c.bf16 %v2850_v55, %v2849_v2  ;;  %v14108_v20 = vld [vmem:[%s11764_s30 + $0x5a] sm:$0xff]  ;;  %v2853_v2 = vld [vmem:[%s18354_s3 + $0x2d0] sm:$0xff] }
 0x2c4   : > { %8990 = vmatprep.subr.bf16.mxu1 %v18681_v9  ;;  %v2854_v55 = vld [vmem:[%s18354_s3 + $0x2d8] sm:$0xff] }
 0x2c6   : > { %3304 = vmatmul.mubr.f32.gmra.mrb[20].mxu1 %v14093_v34 }
 0x2c7   : > { %3308 = vmatprep.mubr.f32.mxu1 %v14097_v36  ;;  %8992 = vmatpush1.bf16.msra.mxu1 %v8991_v23  ;;  %v8997_v23 = vpack.c.bf16 %v2852_v6, %v2851_v45  ;;  %v14123_v36 = vld [vmem:[%s11764_s30 + $0x62] sm:$0xff] }
 0x2c8   : > { %8993 = vmatprep.subr.bf16.mxu1 %v18681_v9  ;;  %18861 = vst [vmem:[#allocation66_spill] sm:$0xff] %v14123_v36  ;;  %v2855_v45 = vld [vmem:[%s18354_s3 + $0x2e0] sm:$0xff]  ;;  %v2856_v6 = vld [vmem:[%s18354_s3 + $0x2e8] sm:$0xff] }
 0x2ca   : > { %3309 = vmatmul.mubr.f32.gmra.mrb[22].mxu1 %v14108_v20 }
 0x2cb   : > { %3313 = vmatprep.mubr.f32.mxu1 %v14112_v49  ;;  %8995 = vmatpush1.bf16.msra.mxu1 %v8994_v0  ;;  %v9000_v0 = vpack.c.bf16 %v2854_v55, %v2853_v2  ;;  %v14138_v49 = vld [vmem:[%s11764_s30 + $0x6a] sm:$0xff]  ;;  %v2858_v55 = vld [vmem:[%s18354_s3 + $0x2f8] sm:$0xff] }
 0x2cc   : > { %8996 = vmatprep.subr.bf16.mxu1 %v18681_v9  ;;  %v2857_v2 = vld [vmem:[%s18354_s3 + $0x2f0] sm:$0xff] }
 0x2ce   : > { %3314 = vmatmul.mubr.f32.gmra.mrb[24].mxu1 %v14123_v36  ;;  %v14142_v36 = vld [vmem:[%s11764_s30 + $0x88] sm:$0xff] }
 0x2cf   : > { %3318 = vmatprep.mubr.f32.mxu1 %v14127_v53  ;;  %8998 = vmatpush1.bf16.msra.mxu1 %v8997_v23  ;;  %18863 = vst [vmem:[#allocation68_spill] sm:$0xff] %v14142_v36  ;;  %v9003_v23 = vpack.c.bf16 %v2856_v6, %v2855_v45  ;;  %v14153_v53 = vld [vmem:[%s11764_s30 + $0x72] sm:$0xff]  ;;  %v14162_v45 = vld [vmem:[%s11764_s30 + $0x7a] sm:$0xff] }
 0x2d0   : > { %8999 = vmatprep.subr.bf16.mxu1 %v18681_v9  ;;  %18865 = vst [vmem:[#allocation70_spill] sm:$0xff] %v14162_v45  ;;  %v14166_v6 = vld [vmem:[%s11764_s30 + $0x98] sm:$0xff] }
 0x2d1   : > { %18866 = vst [vmem:[#allocation71_spill] sm:$0xff] %v14166_v6 }
 0x2d2   : > { %3319 = vmatmul.mubr.f32.gmra.mrb[26].mxu1 %v14138_v49 }
 0x2d3   : > { %3323 = vmatprep.mubr.f32.mxu1 %v14142_v36  ;;  %9001 = vmatpush1.bf16.msra.mxu1 %v9000_v0  ;;  %v14157_v36 = vld [vmem:[%s11764_s30 + $0x90] sm:$0xff]  ;;  %v9006_v0 = vpack.c.bf16 %v2858_v55, %v2857_v2  ;;  %v14183_v55 = vld [vmem:[%s11764_s30 + $0xa8] sm:$0xff] }
 0x2d4   : > { %9002 = vmatprep.subr.bf16.mxu1 %v18681_v9  ;;  %18864 = vst [vmem:[#allocation69_spill] sm:$0xff] %v14157_v36  ;;  %v14179_v2 = vld [vmem:[%s11764_s30 + $0x8a] sm:$0xff]  ;;  %18870 = vst [vmem:[#allocation75_spill] sm:$0xff] %v14183_v55 }
 0x2d5   : > { %18869 = vst [vmem:[#allocation74_spill] sm:$0xff] %v14179_v2 }
 0x2d6   : > { %3324 = vmatmul.mubr.f32.gmra.mrb[28].mxu1 %v14153_v53 }
 0x2d7   : > { %3328 = vmatprep.mubr.f32.mxu1 %v14157_v36  ;;  %9004 = vmatpush1.bf16.msra.mxu1 %v9003_v23  ;;  %v14171_v36 = vld [vmem:[%s11764_s30 + $0x82] sm:$0xff] }
 0x2d8   : > { %9005 = vmatprep.subr.bf16.mxu1 %v18681_v9  ;;  %18867 = vst [vmem:[#allocation72_spill] sm:$0xff] %v14171_v36  ;;  %v14175_v23 = vld [vmem:[%s11764_s30 + $0xa0] sm:$0xff] }
 0x2d9   : > { %18868 = vst [vmem:[#allocation73_spill] sm:$0xff] %v14175_v23 }
 0x2da   : > { %3329 = vmatmul.mubr.f32.gmra.mrb[30].mxu1 %v14162_v45  ;;  %v14243_v45 = vld [vmem:[%s11764_s30 + $0xd8] sm:$0xff] }
 0x2db   : > { %3333 = vmatprep.mubr.f32.mxu1 %v14166_v6  ;;  %9007 = vmatpush1.bf16.msra.mxu1 %v9006_v0  ;;  %18887 = vst [vmem:[#allocation92_spill] sm:$0xff] %v14243_v45 }
 0x2dc   : > { %9008 = vmatprep.subr.bf16.mxu1 %v18681_v9 }
 0x2de   : > { %3334 = vmatmul.mubr.f32.gmra.mrb[32].mxu1 %v14171_v36  ;;  %v14191_v36 = vld [vmem:[%s11764_s30 + $0x92] sm:$0xff] }
 0x2df   : > { %3338 = vmatprep.mubr.f32.mxu1 %v14175_v23  ;;  %18873 = vst [vmem:[#allocation78_spill] sm:$0xff] %v14191_v36  ;;  %v14195_v23 = vld [vmem:[%s11764_s30 + $0xb0] sm:$0xff] }
 0x2e0   : > { %18874 = vst [vmem:[#allocation79_spill] sm:$0xff] %v14195_v23 }
 0x2e2   : > { %3339 = vmatmul.mubr.f32.gmra.mrb[34].mxu1 %v14179_v2  ;;  %v14199_v2 = vld [vmem:[%s11764_s30 + $0x9a] sm:$0xff] }
 0x2e3   : > { %3343 = vmatprep.mubr.f32.mxu1 %v14183_v55  ;;  %18875 = vst [vmem:[#allocation80_spill] sm:$0xff] %v14199_v2  ;;  %v14203_v55 = vld [vmem:[%s11764_s30 + $0xb8] sm:$0xff] }
 0x2e4   : > { %18876 = vst [vmem:[#allocation81_spill] sm:$0xff] %v14203_v55 }
 0x2e5   : > { %v14186_v0 = vpop.f32.mrb[96].mxu0 }
 0x2e6   : > { %18871 = vst [vmem:[#allocation76_spill] sm:$0xff] %v14186_v0  ;;  %v14188_v6 = vpop.f32.mrb[97].mxu0  ;;  %3344 = vmatmul.mubr.f32.gmra.mrb[36].mxu1 %v14191_v36  ;;  %v14211_v36 = vld [vmem:[%s11764_s30 + $0xa2] sm:$0xff] }
 0x2e7   : > { %18872 = vst [vmem:[#allocation77_spill] sm:$0xff] %v14188_v6  ;;  %3348 = vmatprep.mubr.f32.mxu1 %v14195_v23  ;;  %18879 = vst [vmem:[#allocation84_spill] sm:$0xff] %v14211_v36  ;;  %v14215_v23 = vld [vmem:[%s11764_s30 + $0xc0] sm:$0xff] }
 0x2e8   : > { %18880 = vst [vmem:[#allocation85_spill] sm:$0xff] %v14215_v23 }
 0x2ea   : > { %3349 = vmatmul.mubr.f32.gmra.mrb[38].mxu1 %v14199_v2  ;;  %v14219_v2 = vld [vmem:[%s11764_s30 + $0xaa] sm:$0xff] }
 0x2eb   : > { %3353 = vmatprep.mubr.f32.mxu1 %v14203_v55  ;;  %18881 = vst [vmem:[#allocation86_spill] sm:$0xff] %v14219_v2  ;;  %v14223_v55 = vld [vmem:[%s11764_s30 + $0xc8] sm:$0xff] }
 0x2ec   : > { %18882 = vst [vmem:[#allocation87_spill] sm:$0xff] %v14223_v55 }
 0x2ed   : > { %v14206_v0 = vpop.f32.mrb[98].mxu0 }
 0x2ee   : > { %18877 = vst [vmem:[#allocation82_spill] sm:$0xff] %v14206_v0  ;;  %v14208_v6 = vpop.f32.mrb[99].mxu0  ;;  %3354 = vmatmul.mubr.f32.gmra.mrb[40].mxu1 %v14211_v36  ;;  %v14231_v36 = vld [vmem:[%s11764_s30 + $0xb2] sm:$0xff] }
 0x2ef   : > { %18878 = vst [vmem:[#allocation83_spill] sm:$0xff] %v14208_v6  ;;  %3358 = vmatprep.mubr.f32.mxu1 %v14215_v23  ;;  %18885 = vst [vmem:[#allocation90_spill] sm:$0xff] %v14231_v36  ;;  %v14235_v23 = vld [vmem:[%s11764_s30 + $0xd0] sm:$0xff] }
 0x2f0   : > { %18886 = vst [vmem:[#allocation91_spill] sm:$0xff] %v14235_v23 }
 0x2f2   : > { %3359 = vmatmul.mubr.f32.gmra.mrb[42].mxu1 %v14219_v2  ;;  %v14239_v2 = vld [vmem:[%s11764_s30 + $0xba] sm:$0xff] }
 0x2f3   : > { %3363 = vmatprep.mubr.f32.mxu1 %v14223_v55  ;;  %v14251_v55 = vld [vmem:[%s11764_s30 + $0xc2] sm:$0xff] }
 0x2f5   : > { %v14226_v0 = vpop.f32.mrb[100].mxu0 }
 0x2f6   : > { %18883 = vst [vmem:[#allocation88_spill] sm:$0xff] %v14226_v0  ;;  %v14228_v6 = vpop.f32.mrb[101].mxu0  ;;  %3364 = vmatmul.mubr.f32.gmra.mrb[44].mxu1 %v14231_v36  ;;  %v14255_v36 = vld [vmem:[%s11764_s30 + $0xe0] sm:$0xff] }
 0x2f7   : > { %18884 = vst [vmem:[#allocation89_spill] sm:$0xff] %v14228_v6  ;;  %3368 = vmatprep.mubr.f32.mxu1 %v14235_v23  ;;  %v14259_v23 = vld [vmem:[%s11764_s30 + $0xca] sm:$0xff] }
 0x2fa   : > { %3369 = vmatmul.mubr.f32.gmra.mrb[46].mxu1 %v14239_v2 }
 0x2fb   : > { %3373 = vmatprep.mubr.f32.mxu1 %v14243_v45 }
 0x2fd   : > { %v14246_v0 = vpop.f32.mrb[102].mxu0 }
 0x2fe   : > { %18888 = vst [vmem:[#allocation93_spill] sm:$0xff] %v14246_v0  ;;  %v14248_v6 = vpop.f32.mrb[103].mxu0  ;;  %3374 = vmatmul.mubr.f32.gmra.mrb[48].mxu1 %v14251_v55 }
 0x2ff   : > { %18889 = vst [vmem:[#allocation94_spill] sm:$0xff] %v14248_v6  ;;  %3378 = vmatprep.mubr.f32.mxu1 %v14255_v36  ;;  %v14270_v6 = vld [vmem:[%s11764_s30 + $0xd2] sm:$0xff] }
 0x302   : > { %3379 = vmatmul.mubr.f32.gmra.mrb[50].mxu1 %v14259_v23 }
 0x303   : > { %10856 = vmatprep.mubr.msk.f32.mxu1 %vm1631_vm10, %v13307_v50  ;;  %vm18890_vm10 = vcmp.lt.s32.totalorder %v13499_v18, 16  ;;  %v14541_v18 = vld [vmem:[%s11764_s30 + $0x79] sm:$0xff] }
 0x305   : > { %v14265_v45 = vpop.f32.mrb[104].mxu0 }
 0x306   : > { %v14267_v0 = vpop.f32.mrb[105].mxu0  ;;  %3384 = vmatmul.mubr.f32.gmra.mrb[52].mxu1 %v14270_v6 }
 0x307   : > { %10857 = vmatprep.mubr.msk.f32.mxu1 %vm1632_vm12, %v13341_v48  ;;  %vm18891_vm12 = vcmp.lt.s32.totalorder %v13534_v44, 16 }
 0x30a   : > { %3389 = vmatmul.mubr.f32.gmra.mrb[54].mxu1 %v13370_v59 }
 0x30b   : > { %10858 = vmatprep.mubr.msk.f32.mxu1 %vm1633_vm0, %v13386_v4  ;;  %vm18892_vm0 = vcmp.lt.s32.totalorder %v13571_v42, 16  ;;  %v18908_v42 = vld [vmem:[#allocation70_spill] sm:$0xff] }
 0x30d   : > { %v14280_v21 = vpop.f32.mrb[106].mxu0 }
 0x30e   : > { %v14282_v50 = vpop.f32.mrb[107].mxu0  ;;  %3394 = vmatmul.mubr.f32.gmra.mrb[56].mxu1 %v13416_v19 }
 0x30f   : > { %10859 = vmatprep.mubr.msk.f32.mxu1 %vm1634_vm15, %v13426_v46  ;;  %vm18893_vm15 = vcmp.lt.s32.totalorder %v13616_v39, 16  ;;  %v14513_v39 = vld [vmem:[%s11764_s30 + $0x69] sm:$0xff] }
 0x312   : > { %3399 = vmatmul.mubr.f32.gmra.mrb[58].mxu1 %v13455_v35 }
 0x313   : > { %10860 = vmatprep.mubr.msk.f32.mxu1 %vm1635_vm5, %v13467_v8  ;;  %vm18894_vm5 = vcmp.lt.s32.totalorder %v13653_v25, 16 }
 0x315   : > { %v14292_v48 = vpop.f32.mrb[108].mxu0 }
 0x316   : > { %v14294_v59 = vpop.f32.mrb[109].mxu0  ;;  %3404 = vmatmul.mubr.f32.gmra.mrb[60].mxu1 %v13493_v62 }
 0x317   : > { %10861 = vmatprep.mubr.msk.f32.mxu1 %vm1636_vm8, %v13502_v14  ;;  %v18895_v14 = vmax.f32 %v13793_v3, 0.0  ;;  %v2861_v3 = vld [vmem:[%s18354_s3 + $0x310] sm:$0xff] }
 0x31a   : > { %3409 = vmatmul.mubr.f32.gmra.mrb[62].mxu1 %v13527_v16  ;;  %v18896_v16 = vmax.f32 %v13829_v13, 0.0 }
 0x31b   : > { %10862 = vmatprep.mubr.msk.f32.mxu1 %vm18890_vm10, %v13539_v11 }
 0x31d   : > { %v14304_v19 = vpop.f32.mrb[110].mxu0 }
 0x31e   : > { %v14306_v35 = vpop.f32.mrb[111].mxu0  ;;  %3414 = vmatmul.mubr.f32.gmra.mrb[64].mxu1 %v13564_v63 }
 0x31f   : > { %10863 = vmatprep.mubr.msk.f32.mxu1 %vm18891_vm12, %v13574_v52  ;;  %v18897_v52 = vmax.f32 %v13870_v37, 0.0  ;;  %v9012_v37 = vpack.c.bf16 %v2862_v43, %v2861_v3  ;;  %v2867_v3 = vld [vmem:[%s18354_s3 + $0x340] sm:$0xff]  ;;  %v2868_v43 = vld [vmem:[%s18354_s3 + $0x348] sm:$0xff] }
 0x322   : > { %3419 = vmatmul.mubr.f32.gmra.mrb[66].mxu1 %v13603_v1 }
 0x323   : > { %10864 = vmatprep.mubr.msk.f32.mxu1 %vm18892_vm0, %v13609_v33  ;;  %v2865_v33 = vld [vmem:[%s18354_s3 + $0x330] sm:$0xff] }
 0x325   : > { %v14316_v62 = vpop.f32.mrb[112].mxu0 }
 0x326   : > { %v14318_v4 = vpop.f32.mrb[113].mxu0  ;;  %3424 = vmatmul.mubr.f32.gmra.mrb[68].mxu1 %v13641_v54  ;;  %v2859_v54 = vld [vmem:[%s18354_s3 + $0x300] sm:$0xff] }
 0x327   : > { %10865 = vmatprep.mubr.msk.f32.mxu1 %vm18893_vm15, %v13655_v51  ;;  %v2860_v51 = vld [vmem:[%s18354_s3 + $0x308] sm:$0xff] }
 0x32a   : > { %3429 = vmatmul.mubr.f32.gmra.mrb[70].mxu1 %v13682_v29 }
 0x32b   : > { %10866 = vmatprep.mubr.msk.f32.mxu1 %vm18894_vm5, %v13691_v32  ;;  %v18899_v32 = vld [vmem:[#allocation52_spill] sm:$0xff] }
 0x32d   : > { %v14328_v1 = vpop.f32.mrb[114].mxu0 }
 0x32e   : > { %v14330_v46 = vpop.f32.mrb[115].mxu0  ;;  %3434 = vmatmul.mubr.f32.gmra.mrb[72].mxu1 %v13726_v60 }
 0x32f   : > { %10867 = vmatprep.mubr.msk.f32.mxu1 %vm1642_vm1, %v13734_v61  ;;  %v9009_v61 = vpack.c.bf16 %v2860_v51, %v2859_v54  ;;  %v2866_v54 = vld [vmem:[%s18354_s3 + $0x338] sm:$0xff] }
 0x332   : > { %3439 = vmatmul.mubr.f32.gmra.mrb[74].mxu1 %v13761_v28 }
 0x333   : > { %10868 = vmatprep.mubr.msk.f32.mxu1 %vm1643_vm9, %v13769_v22 }
 0x335   : > { %v14340_v29 = vpop.f32.mrb[116].mxu0 }
 0x336   : > { %v14342_v8 = vpop.f32.mrb[117].mxu0  ;;  %3444 = vmatmul.mubr.f32.gmra.mrb[76].mxu1 %v13799_v26 }
 0x337   : > { %10869 = vmatprep.mubr.msk.f32.mxu1 %vm13803_vm4, %v18895_v14  ;;  %v2864_v14 = vld [vmem:[%s18354_s3 + $0x328] sm:$0xff] }
 0x33a   : > { %3449 = vmatmul.mubr.f32.gmra.mrb[78].mxu1 %v13835_v40 }
 0x33b   : > { %10870 = vmatprep.mubr.msk.f32.mxu1 %vm13840_vm11, %v18896_v16  ;;  %v10646_v16 = vld [vmem:[%s11764_s30 + $0x21] sm:$0xff] }
 0x33d   : > { %v14354_v11 = vpop.f32.mrb[118].mxu0 }
 0x33e   : > { %v14356_v63 = vpop.f32.mrb[119].mxu0  ;;  %3454 = vmatmul.mubr.f32.gmra.mrb[80].mxu1 %v13876_v7 }
 0x33f   : > { %10871 = vmatprep.mubr.msk.f32.mxu1 %vm13879_vm6, %v18897_v52 }
 0x342   : > { %3459 = vmatmul.mubr.f32.gmra.mrb[82].mxu1 %v18899_v32 }
 0x343   : > { %3528 = vmatprep.mubr.f32.mxu1 %v13986_v57  ;;  %v2863_v57 = vld [vmem:[%s18354_s3 + $0x320] sm:$0xff] }
 0x345   : > { %v14371_v22 = vpop.f32.mrb[120].mxu0 }
 0x346   : > { %v14379_v13 = vpop.f32.mrb[121].mxu0  ;;  %3529 = vmatmul.mubr.f32.vlgmr.msra.gmra.mrb[0].mxu1 %v10645_v15  ;;  %v14413_v15 = vld [vmem:[%s11764_s30 + $0x31] sm:$0xff] }
 0x347   : > { %3533 = vmatprep.mubr.f32.mxu1 %v14003_v10  ;;  %9010 = vmatpush1.bf16.msra.mxu1 %v9009_v61  ;;  %v9015_v10 = vpack.c.bf16 %v2864_v14, %v2863_v57  ;;  %v10647_v61 = vld [vmem:[%s11764_s30 + $0x29] sm:$0xff]  ;;  %v2870_v14 = vld [vmem:[%s18354_s3 + $0x358] sm:$0xff] }
 0x348   : > { %9011 = vmatprep.subr.bf16.mxu1 %v18681_v9  ;;  %v2869_v57 = vld [vmem:[%s18354_s3 + $0x350] sm:$0xff] }
 0x34a   : > { %3534 = vmatmul.mubr.f32.gmra.mrb[2].mxu1 %v10646_v16 }
 0x34b   : > { %3538 = vmatprep.mubr.f32.mxu1 %v14018_v24  ;;  %9013 = vmatpush1.bf16.msra.mxu1 %v9012_v37  ;;  %v9018_v24 = vpack.c.bf16 %v2866_v54, %v2865_v33  ;;  %v2871_v33 = vld [vmem:[%s18354_s3 + $0x360] sm:$0xff]  ;;  %v2872_v54 = vld [vmem:[%s18354_s3 + $0x368] sm:$0xff] }
 0x34c   : > { %9014 = vmatprep.subr.bf16.mxu1 %v18681_v9 }
 0x34d   : > { %v14392_v52 = vpop.f32.mrb[122].mxu0 }
 0x34e   : > { %v14401_v51 = vpop.f32.mrb[123].mxu0  ;;  %3539 = vmatmul.mubr.f32.gmra.mrb[4].mxu1 %v10647_v61  ;;  %v14441_v61 = vld [vmem:[%s11764_s30 + $0x41] sm:$0xff] }
 0x34f   : > { %3543 = vmatprep.mubr.f32.mxu1 %v14033_v56  ;;  %9016 = vmatpush1.bf16.msra.mxu1 %v9015_v10  ;;  %v9021_v56 = vpack.c.bf16 %v2868_v43, %v2867_v3  ;;  %v14429_v10 = vld [vmem:[%s11764_s30 + $0x39] sm:$0xff]  ;;  %v2873_v3 = vld [vmem:[%s18354_s3 + $0x370] sm:$0xff] }
 0x350   : > { %9017 = vmatprep.subr.bf16.mxu1 %v18681_v9  ;;  %v2874_v43 = vld [vmem:[%s18354_s3 + $0x378] sm:$0xff] }
 0x352   : > { %3544 = vmatmul.mubr.f32.gmra.mrb[6].mxu1 %v14413_v15 }
 0x353   : > { %3548 = vmatprep.mubr.f32.mxu1 %v14048_v58  ;;  %9019 = vmatpush1.bf16.msra.mxu1 %v9018_v24  ;;  %v9024_v58 = vpack.c.bf16 %v2870_v14, %v2869_v57  ;;  %v14457_v57 = vld [vmem:[%s11764_s30 + $0x49] sm:$0xff]  ;;  %v2875_v14 = vld [vmem:[%s18354_s3 + $0x380] sm:$0xff] }
 0x354   : > { %9020 = vmatprep.subr.bf16.mxu1 %v18681_v9 }
 0x355   : > { %v14417_v37 = vpop.f32.mrb[124].mxu0 }
 0x356   : > { %18900 = vst [vmem:[#allocation50_spill] sm:$0xff] %v14417_v37  ;;  %v14426_v16 = vpop.f32.mrb[125].mxu0  ;;  %3549 = vmatmul.mubr.f32.gmra.mrb[8].mxu1 %v14429_v10  ;;  %v18926_v37 = vld [vmem:[#allocation49_spill] sm:$0xff] }
 0x357   : > { %3553 = vmatprep.mubr.f32.mxu1 %v14063_v12  ;;  %9022 = vmatpush1.bf16.msra.mxu1 %v9021_v56  ;;  %v9027_v12 = vpack.c.bf16 %v2872_v54, %v2871_v33  ;;  %v14469_v33 = vld [vmem:[%s11764_s30 + $0x51] sm:$0xff] }
 0x358   : > { %9023 = vmatprep.subr.bf16.mxu1 %v18681_v9 }
 0x35a   : > { %3554 = vmatmul.mubr.f32.gmra.mrb[10].mxu1 %v14441_v61 }
 0x35b   : > { %3558 = vmatprep.mubr.f32.mxu1 %v14078_v38  ;;  %9025 = vmatpush1.bf16.msra.mxu1 %v9024_v58  ;;  %v9030_v38 = vpack.c.bf16 %v2874_v43, %v2873_v3  ;;  %v2876_v58 = vld [vmem:[%s18354_s3 + $0x388] sm:$0xff]  ;;  %v2878_v3 = vld [vmem:[%s18354_s3 + $0x398] sm:$0xff] }
 0x35c   : > { %9026 = vmatprep.subr.bf16.mxu1 %v18681_v9 }
 0x35d   : > { %v14445_v24 = vpop.f32.mrb[126].mxu0 }
 0x35e   : > { %18901 = vst [vmem:[#allocation52_spill] sm:$0xff] %v14445_v24  ;;  %v14454_v56 = vpop.f32.mrb[127].mxu0  ;;  %3559 = vmatmul.mubr.f32.gmra.mrb[12].mxu1 %v14457_v57  ;;  %v10683_v24 = vld [vmem:[%s11764_s30 + $0x112] sm:$0xff] }
 0x35f   : > { %18902 = vst [vmem:[#allocation95_spill] sm:$0xff] %v14454_v56  ;;  %3563 = vmatprep.mubr.f32.mxu1 %v14093_v34  ;;  %9028 = vmatpush1.bf16.msra.mxu1 %v9027_v12  ;;  %v9033_v34 = vpack.c.bf16 %v2876_v58, %v2875_v14  ;;  %v2877_v12 = vld [vmem:[%s18354_s3 + $0x390] sm:$0xff]  ;;  %v2879_v14 = vld [vmem:[%s18354_s3 + $0x3a0] sm:$0xff]  ;;  %v2880_v58 = vld [vmem:[%s18354_s3 + $0x3a8] sm:$0xff] }
 0x360   : > { %9029 = vmatprep.subr.bf16.mxu1 %v18681_v9  ;;  %v18923_v56 = vld [vmem:[#allocation46_spill] sm:$0xff] }
 0x362   : > { %3564 = vmatmul.mubr.f32.gmra.mrb[14].mxu1 %v14469_v33 }
 0x363   : > { %3568 = vmatprep.mubr.f32.mxu1 %v14108_v20  ;;  %9031 = vmatpush1.bf16.msra.mxu1 %v9030_v38  ;;  %v18905_v20 = vld [vmem:[#allocation66_spill] sm:$0xff]  ;;  %v9036_v38 = vpack.c.bf16 %v2878_v3, %v2877_v12  ;;  %v2881_v3 = vld [vmem:[%s18354_s3 + $0x3b0] sm:$0xff] }
 0x364   : > { %9032 = vmatprep.subr.bf16.mxu1 %v18681_v9 }
 0x365   : > { %v14473_v54 = vpop.f32.mrb[128].mxu0 }
 0x366   : > { %18903 = vst [vmem:[#allocation96_spill] sm:$0xff] %v14473_v54  ;;  %v14482_v43 = vpop.f32.mrb[129].mxu0  ;;  %3569 = vmatmul.mubr.f32.gmra.mrb[16].mxu1 %v14485_v27  ;;  %v14639_v54 = vld [vmem:[%s11764_s30 + $0xf1] sm:$0xff] }
 0x367   : > { %18904 = vst [vmem:[#allocation97_spill] sm:$0xff] %v14482_v43  ;;  %3573 = vmatprep.mubr.f32.mxu1 %v18905_v20  ;;  %9034 = vmatpush1.bf16.msra.mxu1 %v9033_v34  ;;  %v9039_v34 = vpack.c.bf16 %v2880_v58, %v2879_v14  ;;  %v2882_v20 = vld [vmem:[%s18354_s3 + $0x3b8] sm:$0xff]  ;;  %v2884_v14 = vld [vmem:[%s18354_s3 + $0x3c8] sm:$0xff] }
 0x368   : > { %9035 = vmatprep.subr.bf16.mxu1 %v18681_v9  ;;  %v14525_v58 = vld [vmem:[%s11764_s30 + $0x71] sm:$0xff]  ;;  %v14649_v43 = vld [vmem:[%s11764_s30 + $0x101] sm:$0xff] }
 0x36a   : > { %3574 = vmatmul.mubr.f32.gmra.mrb[18].mxu1 %v14497_v31 }
 0x36b   : > { %3578 = vmatprep.mubr.f32.mxu1 %v14138_v49  ;;  %9037 = vmatpush1.bf16.msra.mxu1 %v9036_v38  ;;  %v9042_v49 = vpack.c.bf16 %v2882_v20, %v2881_v3  ;;  %v2883_v38 = vld [vmem:[%s18354_s3 + $0x3c0] sm:$0xff]  ;;  %v2885_v3 = vld [vmem:[%s18354_s3 + $0x3d0] sm:$0xff]  ;;  %v2886_v20 = vld [vmem:[%s18354_s3 + $0x3d8] sm:$0xff] }
 0x36c   : > { %9038 = vmatprep.subr.bf16.mxu1 %v18681_v9 }
 0x36d   : > { %v14501_v12 = vpop.f32.mrb[130].mxu0 }
 0x36e   : > { %18906 = vst [vmem:[#allocation66_spill] sm:$0xff] %v14501_v12  ;;  %v14510_v25 = vpop.f32.mrb[131].mxu0  ;;  %3579 = vmatmul.mubr.f32.gmra.mrb[20].mxu1 %v14513_v39 }
 0x36f   : > { %18907 = vst [vmem:[#allocation98_spill] sm:$0xff] %v14510_v25  ;;  %3583 = vmatprep.mubr.f32.mxu1 %v14153_v53  ;;  %9040 = vmatpush1.bf16.msra.mxu1 %v9039_v34  ;;  %v9045_v53 = vpack.c.bf16 %v2884_v14, %v2883_v38  ;;  %v2887_v38 = vld [vmem:[%s18354_s3 + $0x3e0] sm:$0xff]  ;;  %v2888_v14 = vld [vmem:[%s18354_s3 + $0x3e8] sm:$0xff] }
 0x370   : > { %9041 = vmatprep.subr.bf16.mxu1 %v18681_v9  ;;  %v14629_v25 = vld [vmem:[%s11764_s30 + $0xe1] sm:$0xff] }
 0x372   : > { %3584 = vmatmul.mubr.f32.gmra.mrb[22].mxu1 %v14525_v58 }
 0x373   : > { %3588 = vmatprep.mubr.f32.mxu1 %v18908_v42  ;;  %9043 = vmatpush1.bf16.msra.mxu1 %v9042_v49  ;;  %v18911_v42 = vld [vmem:[#allocation72_spill] sm:$0xff]  ;;  %v9048_v49 = vpack.c.bf16 %v2886_v20, %v2885_v3 }
 0x374   : > { %v14529_v34 = vpop.f32.mrb[132].mxu0  ;;  %9044 = vmatprep.subr.bf16.mxu1 %v18681_v9  ;;  %v2889_v20 = vld [vmem:[%s18354_s3 + $0x3f0] sm:$0xff] }
 0x375   : > { %18909 = vst [vmem:[#allocation70_spill] sm:$0xff] %v14529_v34  ;;  %v14538_v44 = vpop.f32.mrb[133].mxu0  ;;  %v14553_v34 = vld [vmem:[%s11764_s30 + $0x81] sm:$0xff] }
 0x376   : > { %18910 = vst [vmem:[#allocation99_spill] sm:$0xff] %v14538_v44  ;;  %3589 = vmatmul.mubr.f32.gmra.mrb[24].mxu1 %v14541_v18  ;;  %v18912_v44 = vld [vmem:[#allocation74_spill] sm:$0xff] }
 0x377   : > { %3593 = vmatprep.mubr.f32.mxu1 %v18911_v42  ;;  %9046 = vmatpush1.bf16.msra.mxu1 %v9045_v53  ;;  %v9051_v53 = vpack.c.bf16 %v2888_v14, %v2887_v38  ;;  %v2890_v42 = vld [vmem:[%s18354_s3 + $0x3f8] sm:$0xff] }
 0x378   : > { %9047 = vmatprep.subr.bf16.mxu1 %v18681_v9  ;;  %v14577_v14 = vld [vmem:[%s11764_s30 + $0x91] sm:$0xff] }
 0x37a   : > { %3594 = vmatmul.mubr.f32.gmra.mrb[26].mxu1 %v14553_v34 }
 0x37b   : > { %3598 = vmatprep.mubr.f32.mxu1 %v18912_v44  ;;  %9049 = vmatpush1.bf16.msra.mxu1 %v9048_v49  ;;  %v18915_v44 = vld [vmem:[#allocation78_spill] sm:$0xff]  ;;  %v9054_v49 = vpack.c.bf16 %v2890_v42, %v2889_v20 }
 0x37c   : > { %v14557_v3 = vpop.f32.mrb[134].mxu0  ;;  %9050 = vmatprep.subr.bf16.mxu1 %v18681_v9  ;;  %v14589_v20 = vld [vmem:[%s11764_s30 + $0xa1] sm:$0xff] }
 0x37d   : > { %18913 = vst [vmem:[#allocation72_spill] sm:$0xff] %v14557_v3  ;;  %v14566_v12 = vpop.f32.mrb[135].mxu0  ;;  %v18920_v42 = vld [vmem:[#allocation86_spill] sm:$0xff] }
 0x37e   : > { %18914 = vst [vmem:[#allocation74_spill] sm:$0xff] %v14566_v12  ;;  %3599 = vmatmul.mubr.f32.gmra.mrb[28].mxu1 %v14569_v30  ;;  %v18918_v12 = vld [vmem:[#allocation80_spill] sm:$0xff] }
 0x37f   : > { %3603 = vmatprep.mubr.f32.mxu1 %v18915_v44  ;;  %9052 = vmatpush1.bf16.msra.mxu1 %v9051_v53  ;;  %v14584_v44 = vld [vmem:[%s11764_s30 + $0x99] sm:$0xff]  ;;  %v18919_v53 = vld [vmem:[#allocation84_spill] sm:$0xff] }
 0x380   : > { %9053 = vmatprep.subr.bf16.mxu1 %v18681_v9 }
 0x381   : > { %v14574_v38 = vpop.f32.mrb[136].mxu0 }
 0x382   : > { %18916 = vst [vmem:[#allocation78_spill] sm:$0xff] %v14574_v38  ;;  %3604 = vmatmul.mubr.f32.gmra.mrb[30].mxu1 %v14577_v14  ;;  %v14580_v3 = vpop.f32.mrb[137].mxu0  ;;  %v14594_v38 = vld [vmem:[%s11764_s30 + $0xa9] sm:$0xff] }
 0x383   : > { %18917 = vst [vmem:[#allocation100_spill] sm:$0xff] %v14580_v3  ;;  %3608 = vmatprep.mubr.f32.mxu1 %v18918_v12  ;;  %9055 = vmatpush1.bf16.msra.mxu1 %v9054_v49  ;;  %v18921_v12 = vld [vmem:[#allocation90_spill] sm:$0xff]  ;;  %v14599_v49 = vld [vmem:[%s11764_s30 + $0xb1] sm:$0xff] }
 0x384   : > { %v14624_v3 = vld [vmem:[%s11764_s30 + $0xd9] sm:$0xff] }
 0x386   : > { %3609 = vmatmul.mubr.f32.gmra.mrb[32].mxu1 %v14584_v44 }
 0x387   : > { %3613 = vmatprep.mubr.f32.mxu1 %v18919_v53  ;;  %v14604_v53 = vld [vmem:[%s11764_s30 + $0xb9] sm:$0xff] }
 0x38a   : > { %3614 = vmatmul.mubr.f32.gmra.mrb[34].mxu1 %v14589_v20 }
 0x38b   : > { %3618 = vmatprep.mubr.f32.mxu1 %v18920_v42  ;;  %v14609_v42 = vld [vmem:[%s11764_s30 + $0xc1] sm:$0xff] }
 0x38e   : > { %3619 = vmatmul.mubr.f32.gmra.mrb[36].mxu1 %v14594_v38 }
 0x38f   : > { %3623 = vmatprep.mubr.f32.mxu1 %v18921_v12  ;;  %v14614_v12 = vld [vmem:[%s11764_s30 + $0xc9] sm:$0xff] }
 0x392   : > { %3624 = vmatmul.mubr.f32.gmra.mrb[38].mxu1 %v14599_v49 }
 0x393   : > { %3628 = vmatprep.mubr.f32.mxu1 %v14239_v2  ;;  %v14619_v2 = vld [vmem:[%s11764_s30 + $0xd1] sm:$0xff] }
 0x396   : > { %3629 = vmatmul.mubr.f32.gmra.mrb[40].mxu1 %v14604_v53 }
 0x397   : > { %3633 = vmatprep.mubr.f32.mxu1 %v14251_v55  ;;  %v10669_v55 = vld [vmem:[%s11764_s30 + $0xda] sm:$0xff] }
 0x39a   : > { %3634 = vmatmul.mubr.f32.gmra.mrb[42].mxu1 %v14609_v42 }
 0x39b   : > { %3638 = vmatprep.mubr.f32.mxu1 %v14259_v23  ;;  %v10671_v23 = vld [vmem:[%s11764_s30 + $0xe2] sm:$0xff] }
 0x39e   : > { %3639 = vmatmul.mubr.f32.gmra.mrb[44].mxu1 %v14614_v12 }
 0x39f   : > { %3643 = vmatprep.mubr.f32.mxu1 %v14270_v6  ;;  %v10673_v6 = vld [vmem:[%s11764_s30 + $0xea] sm:$0xff] }
 0x3a2   : > { %3644 = vmatmul.mubr.f32.gmra.mrb[46].mxu1 %v14619_v2 }
 0x3a3   : > { %3648 = vmatprep.mubr.f32.mxu1 %v10669_v55  ;;  %v10675_v55 = vld [vmem:[%s11764_s30 + $0xf2] sm:$0xff] }
 0x3a6   : > { %3649 = vmatmul.mubr.f32.gmra.mrb[48].mxu1 %v14624_v3 }
 0x3a7   : > { %3653 = vmatprep.mubr.f32.mxu1 %v10671_v23  ;;  %v10677_v23 = vld [vmem:[%s11764_s30 + $0xfa] sm:$0xff] }
 0x3aa   : > { %3654 = vmatmul.mubr.f32.gmra.mrb[50].mxu1 %v14629_v25 }
 0x3ab   : > { %3658 = vmatprep.mubr.f32.mxu1 %v10673_v6  ;;  %v10679_v6 = vld [vmem:[%s11764_s30 + $0x102] sm:$0xff] }
 0x3ae   : > { %3659 = vmatmul.mubr.f32.gmra.mrb[52].mxu1 %v14634_v17 }
 0x3af   : > { %3663 = vmatprep.mubr.f32.mxu1 %v10675_v55  ;;  %v10681_v55 = vld [vmem:[%s11764_s30 + $0x10a] sm:$0xff] }
 0x3b2   : > { %3664 = vmatmul.mubr.f32.gmra.mrb[54].mxu1 %v14639_v54 }
 0x3b3   : > { %3668 = vmatprep.mubr.f32.mxu1 %v10677_v23  ;;  %v14659_v23 = vld [vmem:[%s11764_s30 + $0x111] sm:$0xff] }
 0x3b6   : > { %3669 = vmatmul.mubr.f32.gmra.mrb[56].mxu1 %v14644_v47 }
 0x3b7   : > { %3673 = vmatprep.mubr.f32.mxu1 %v10679_v6  ;;  %v14664_v6 = vld [vmem:[%s11764_s30 + $0x119] sm:$0xff] }
 0x3ba   : > { %3674 = vmatmul.mubr.f32.gmra.mrb[58].mxu1 %v14649_v43 }
 0x3bb   : > { %3678 = vmatprep.mubr.f32.mxu1 %v10681_v55  ;;  %v18922_v55 = vld [vmem:[#allocation44_spill] sm:$0xff] }
 0x3be   : > { %3679 = vmatmul.mubr.f32.gmra.mrb[60].mxu1 %v14654_v5 }
 0x3bf   : > { %3683 = vmatprep.mubr.f32.mxu1 %v10683_v24  ;;  %v18924_v24 = vld [vmem:[#allocation47_spill] sm:$0xff] }
 0x3c2   : > { %3684 = vmatmul.mubr.f32.gmra.mrb[62].mxu1 %v14659_v23 }
 0x3c3   : > { %3688 = vmatprep.mubr.f32.mxu1 %v10685_v41  ;;  %v18925_v41 = vld [vmem:[#allocation48_spill] sm:$0xff] }
 0x3c6   : > { %3689 = vmatmul.mubr.f32.gmra.mrb[64].mxu1 %v14664_v6 }
 0x3c7   : > { %3693 = vmatprep.mubr.f32.mxu1 %v13726_v60  ;;  %v18927_v60 = vld [vmem:[#allocation51_spill] sm:$0xff] }
 0x3ca   : > { %3694 = vmatmul.mubr.f32.gmra.mrb[66].mxu1 %v18922_v55  ;;  %v14686_v55 = vld [vmem:[%s11764_s30 + $0x159] sm:$0xff] }
 0x3cb   : > { %3698 = vmatprep.mubr.f32.mxu1 %v13761_v28  ;;  %v18928_v28 = vld [vmem:[#allocation53_spill] sm:$0xff] }
 0x3ce   : > { %3699 = vmatmul.mubr.f32.gmra.mrb[68].mxu1 %v18923_v56  ;;  %v14681_v56 = vld [vmem:[%s11764_s30 + $0x151] sm:$0xff] }
 0x3cf   : > { %3703 = vmatprep.mubr.f32.mxu1 %v13799_v26  ;;  %v18929_v26 = vld [vmem:[#allocation54_spill] sm:$0xff] }
 0x3d2   : > { %3704 = vmatmul.mubr.f32.gmra.mrb[70].mxu1 %v18924_v24  ;;  %v4559_v24 = vld [vmem:[%s18356_s5] sm:$0xff] }
 0x3d3   : > { %3708 = vmatprep.mubr.f32.mxu1 %v13835_v40  ;;  %v18930_v40 = vld [vmem:[#allocation55_spill] sm:$0xff] }
 0x3d6   : > { %3709 = vmatmul.mubr.f32.gmra.mrb[72].mxu1 %v18925_v41  ;;  %v4560_v41 = vld [vmem:[%s18356_s5 + $0x8] sm:$0xff] }
 0x3d7   : > { %3713 = vmatprep.mubr.f32.mxu1 %v13876_v7  ;;  %v14691_v7 = vld [vmem:[%s11764_s30 + $0x161] sm:$0xff] }
 0x3da   : > { %3714 = vmatmul.mubr.f32.gmra.mrb[74].mxu1 %v18926_v37  ;;  %v18932_v37 = vld [vmem:[#allocation57_spill] sm:$0xff] }
 0x3db   : > { %3718 = vmatprep.mubr.f32.mxu1 %v18899_v32  ;;  %v18931_v32 = vld [vmem:[#allocation56_spill] sm:$0xff] }
 0x3de   : > { %3719 = vmatmul.mubr.f32.gmra.mrb[76].mxu1 %v18927_v60  ;;  %v9089_v60 = vpack.c.bf16 %v4560_v41, %v4559_v24  ;;  %v18936_v24 = vld [vmem:[#allocation61_spill] sm:$0xff] }
 0x3df   : > { %3723 = vmatprep.mubr.f32.mxu1 %v18928_v28  ;;  %v18933_v28 = vld [vmem:[#allocation58_spill] sm:$0xff]  ;;  %v4566_v41 = vld [vmem:[%s18356_s5 + $0x38] sm:$0xff] }
 0x3e0   : > { %9090 = vmatpush1.bf16.msra.mxu0 %v9089_v60 }
 0x3e1   : > { %9091 = vmatprep.subr.bf16.mxu0 %v18681_v9 }
 0x3e2   : > { %3724 = vmatmul.mubr.f32.gmra.mrb[78].mxu1 %v14681_v56 }
 0x3e3   : > { %3728 = vmatprep.mubr.f32.mxu1 %v18929_v26  ;;  %v18934_v26 = vld [vmem:[#allocation59_spill] sm:$0xff] }
 0x3e6   : > { %3729 = vmatmul.mubr.f32.gmra.mrb[80].mxu1 %v14686_v55 }
 0x3e7   : > { %3733 = vmatprep.mubr.f32.mxu1 %v18930_v40  ;;  %v18935_v40 = vld [vmem:[#allocation60_spill] sm:$0xff] }
 0x3ea   : > { %3734 = vmatmul.mubr.f32.gmra.mrb[82].mxu1 %v14691_v7 }
 0x3eb   : > { %3803 = vmatprep.mubr.f32.mxu1 %v14413_v15  ;;  %v4561_v15 = vld [vmem:[%s18356_s5 + $0x10] sm:$0xff] }
 0x3ee   : > { %3804 = vmatmul.mubr.f32.vlgmr.msra.gmra.mrb[0].mxu1 %v18931_v32  ;;  %v4564_v32 = vld [vmem:[%s18356_s5 + $0x28] sm:$0xff] }
 0x3ef   : > { %3808 = vmatprep.mubr.f32.mxu1 %v14429_v10  ;;  %v4562_v10 = vld [vmem:[%s18356_s5 + $0x18] sm:$0xff] }
 0x3f2   : > { %3809 = vmatmul.mubr.f32.gmra.mrb[2].mxu1 %v18932_v37 }
 0x3f3   : > { %3813 = vmatprep.mubr.f32.mxu1 %v14441_v61  ;;  %v9092_v61 = vpack.c.bf16 %v4562_v10, %v4561_v15  ;;  %v18938_v10 = vld [vmem:[#allocation63_spill] sm:$0xff] }
 0x3f5   : > { %9093 = vmatpush1.bf16.msra.mxu0 %v9092_v61  ;;  %v18939_v61 = vld [vmem:[#allocation64_spill] sm:$0xff] }
 0x3f6   : > { %3814 = vmatmul.mubr.f32.gmra.mrb[4].mxu1 %v18933_v28  ;;  %9094 = vmatprep.subr.bf16.mxu0 %v18681_v9  ;;  %v18937_v28 = vld [vmem:[#allocation62_spill] sm:$0xff] }
 0x3f7   : > { %3818 = vmatprep.mubr.f32.mxu1 %v14457_v57  ;;  %v4563_v57 = vld [vmem:[%s18356_s5 + $0x20] sm:$0xff] }
 0x3f8   : > { %v9095_v37 = vpack.c.bf16 %v4564_v32, %v4563_v57  ;;  %v18940_v57 = vld [vmem:[#allocation65_spill] sm:$0xff]  ;;  %v4572_v32 = vld [vmem:[%s18356_s5 + $0x68] sm:$0xff] }
 0x3fa   : > { %3819 = vmatmul.mubr.f32.gmra.mrb[6].mxu1 %v18934_v26  ;;  %9096 = vmatpush1.bf16.msra.mxu0 %v9095_v37  ;;  %v4570_v26 = vld [vmem:[%s18356_s5 + $0x58] sm:$0xff]  ;;  %v4573_v37 = vld [vmem:[%s18356_s5 + $0x70] sm:$0xff] }
 0x3fb   : > { %3823 = vmatprep.mubr.f32.mxu1 %v14469_v33  ;;  %9097 = vmatprep.subr.bf16.mxu0 %v18681_v9  ;;  %v4565_v33 = vld [vmem:[%s18356_s5 + $0x30] sm:$0xff] }
 0x3fc   : > { %v9098_v60 = vpack.c.bf16 %v4566_v41, %v4565_v33  ;;  %v18941_v41 = vld [vmem:[#allocation67_spill] sm:$0xff] }
 0x3fe   : > { %3824 = vmatmul.mubr.f32.gmra.mrb[8].mxu1 %v18935_v40  ;;  %9099 = vmatpush1.bf16.msra.mxu0 %v9098_v60  ;;  %v4575_v60 = vld [vmem:[%s18356_s5 + $0x80] sm:$0xff] }
 0x3ff   : > { %3828 = vmatprep.mubr.f32.mxu1 %v14485_v27  ;;  %9100 = vmatprep.subr.bf16.mxu0 %v18681_v9  ;;  %v4568_v27 = vld [vmem:[%s18356_s5 + $0x48] sm:$0xff] }
 0x402   : > { %3829 = vmatmul.mubr.f32.gmra.mrb[10].mxu1 %v18936_v24  ;;  %v4574_v24 = vld [vmem:[%s18356_s5 + $0x78] sm:$0xff] }
 0x403   : > { %3833 = vmatprep.mubr.f32.mxu1 %v14497_v31  ;;  %v4567_v31 = vld [vmem:[%s18356_s5 + $0x40] sm:$0xff]  ;;  %v9110_v33 = vpack.c.bf16 %v4574_v24, %v4573_v37  ;;  %v4584_v37 = vld [vmem:[%s18356_s5 + $0xc8] sm:$0xff] }
 0x404   : > { %v9101_v15 = vpack.c.bf16 %v4568_v27, %v4567_v31  ;;  %v18942_v31 = vld [vmem:[#allocation68_spill] sm:$0xff]  ;;  %v18946_v24 = vld [vmem:[#allocation75_spill] sm:$0xff] }
 0x405   : > { %v4577_v27 = vld [vmem:[%s18356_s5 + $0x90] sm:$0xff] }
 0x406   : > { %3834 = vmatmul.mubr.f32.gmra.mrb[12].mxu1 %v18937_v28  ;;  %9102 = vmatpush1.bf16.msra.mxu0 %v9101_v15  ;;  %v4576_v28 = vld [vmem:[%s18356_s5 + $0x88] sm:$0xff]  ;;  %v4578_v15 = vld [vmem:[%s18356_s5 + $0x98] sm:$0xff] }
 0x407   : > { %3838 = vmatprep.mubr.f32.mxu1 %v14513_v39  ;;  %9103 = vmatprep.subr.bf16.mxu0 %v18681_v9  ;;  %v4569_v39 = vld [vmem:[%s18356_s5 + $0x50] sm:$0xff] }
 0x408   : > { %v9104_v40 = vpack.c.bf16 %v4570_v26, %v4569_v39  ;;  %v4580_v39 = vld [vmem:[%s18356_s5 + $0xa8] sm:$0xff] }
 0x40a   : > { %3839 = vmatmul.mubr.f32.gmra.mrb[14].mxu1 %v18938_v10  ;;  %9105 = vmatpush1.bf16.msra.mxu0 %v9104_v40  ;;  %v9116_v10 = vpack.c.bf16 %v4578_v15, %v4577_v27  ;;  %v18944_v40 = vld [vmem:[#allocation71_spill] sm:$0xff] }
 0x40b   : > { %3843 = vmatprep.mubr.f32.mxu1 %v14525_v58  ;;  %9106 = vmatprep.subr.bf16.mxu0 %v18681_v9  ;;  %v4571_v58 = vld [vmem:[%s18356_s5 + $0x60] sm:$0xff]  ;;  %v18950_v27 = vld [vmem:[#allocation87_spill] sm:$0xff] }
 0x40e   : > { %3844 = vmatmul.mubr.f32.gmra.mrb[16].mxu1 %v18939_v61  ;;  %v18943_v61 = vld [vmem:[#allocation69_spill] sm:$0xff] }
 0x40f   : > { %3848 = vmatprep.mubr.f32.mxu1 %v14541_v18  ;;  %v9107_v18 = vpack.c.bf16 %v4572_v32, %v4571_v58  ;;  %v18945_v32 = vld [vmem:[#allocation73_spill] sm:$0xff] }
 0x411   : > { %9108 = vmatpush1.bf16.msra.mxu0 %v9107_v18 }
 0x412   : > { %3849 = vmatmul.mubr.f32.gmra.mrb[18].mxu1 %v18940_v57  ;;  %9109 = vmatprep.subr.bf16.mxu0 %v18681_v9  ;;  %v4582_v57 = vld [vmem:[%s18356_s5 + $0xb8] sm:$0xff] }
 0x413   : > { %3853 = vmatprep.mubr.f32.mxu1 %v14553_v34  ;;  %v9113_v34 = vpack.c.bf16 %v4576_v28, %v4575_v60  ;;  %v18947_v60 = vld [vmem:[#allocation79_spill] sm:$0xff] }
 0x414   : > { %v4588_v28 = vld [vmem:[%s18356_s5 + $0xe8] sm:$0xff] }
 0x415   : > { %9111 = vmatpush1.bf16.msra.mxu0 %v9110_v33  ;;  %v4586_v33 = vld [vmem:[%s18356_s5 + $0xd8] sm:$0xff] }
 0x416   : > { %3854 = vmatmul.mubr.f32.gmra.mrb[20].mxu1 %v18941_v41  ;;  %9112 = vmatprep.subr.bf16.mxu0 %v18681_v9 }
 0x417   : > { %3858 = vmatprep.mubr.f32.mxu1 %v14569_v30  ;;  %v4579_v30 = vld [vmem:[%s18356_s5 + $0xa0] sm:$0xff] }
 0x418   : > { %v9119_v26 = vpack.c.bf16 %v4580_v39, %v4579_v30  ;;  %v4687_v30 = vld [vmem:[%s18356_s5 + $0x400] sm:$0xff]  ;;  %v4458_v39 = vld [vmem:[%s11759_s27 + $0x9] sm:$0xff] }
 0x419   : > { %9114 = vmatpush1.bf16.msra.mxu0 %v9113_v34 }
 0x41a   : > { %3859 = vmatmul.mubr.f32.gmra.mrb[22].mxu1 %v18942_v31  ;;  %9115 = vmatprep.subr.bf16.mxu0 %v18681_v9  ;;  %v18948_v31 = vld [vmem:[#allocation81_spill] sm:$0xff] }
 0x41b   : > { %3863 = vmatprep.mubr.f32.mxu1 %v14577_v14  ;;  %v4581_v14 = vld [vmem:[%s18356_s5 + $0xb0] sm:$0xff] }
 0x41c   : > { %v9122_v58 = vpack.c.bf16 %v4582_v57, %v4581_v14  ;;  %v4459_v14 = vld [vmem:[%s11759_s27 + $0x11] sm:$0xff] }
 0x41d   : > { %9117 = vmatpush1.bf16.msra.mxu0 %v9116_v10  ;;  %v18951_v10 = vld [vmem:[#allocation91_spill] sm:$0xff] }
 0x41e   : > { %3864 = vmatmul.mubr.f32.gmra.mrb[24].mxu1 %v18943_v61  ;;  %9118 = vmatprep.subr.bf16.mxu0 %v18681_v9  ;;  %v18952_v61 = vld [vmem:[#allocation92_spill] sm:$0xff] }
 0x41f   : > { %3868 = vmatprep.mubr.f32.mxu1 %v14584_v44  ;;  %v4583_v44 = vld [vmem:[%s18356_s5 + $0xc0] sm:$0xff] }
 0x420   : > { %v9125_v18 = vpack.c.bf16 %v4584_v37, %v4583_v44  ;;  %v4591_v44 = vld [vmem:[%s18356_s5 + $0x100] sm:$0xff]  ;;  %v4592_v37 = vld [vmem:[%s18356_s5 + $0x108] sm:$0xff] }
 0x421   : > { %9120 = vmatpush1.bf16.msra.mxu0 %v9119_v26 }
 0x422   : > { %3869 = vmatmul.mubr.f32.gmra.mrb[26].mxu1 %v18944_v40  ;;  %9121 = vmatprep.subr.bf16.mxu0 %v18681_v9  ;;  %v4690_v40 = vld [vmem:[%s18356_s5 + $0x418] sm:$0xff] }
 0x423   : > { %3873 = vmatprep.mubr.f32.mxu1 %v14589_v20  ;;  %v4585_v20 = vld [vmem:[%s18356_s5 + $0xd0] sm:$0xff] }
 0x424   : > { %v9128_v41 = vpack.c.bf16 %v4586_v33, %v4585_v20  ;;  %v4694_v20 = vld [vmem:[%s18356_s5 + $0x438] sm:$0xff] }
 0x425   : > { %9123 = vmatpush1.bf16.msra.mxu0 %v9122_v58  ;;  %v10688_v58 = vld [vmem:[%s11764_s30 + $0xe8] sm:$0xff] }
 0x426   : > { %3874 = vmatmul.mubr.f32.gmra.mrb[28].mxu1 %v18945_v32  ;;  %9124 = vmatprep.subr.bf16.mxu0 %v18681_v9 }
 0x427   : > { %3878 = vmatprep.mubr.f32.mxu1 %v14594_v38  ;;  %v4587_v38 = vld [vmem:[%s18356_s5 + $0xe0] sm:$0xff] }
 0x428   : > { %v9131_v34 = vpack.c.bf16 %v4588_v28, %v4587_v38  ;;  %v10691_v28 = vld [vmem:[%s11764_s30 + $0x100] sm:$0xff] }
 0x429   : > { %9126 = vmatpush1.bf16.msra.mxu0 %v9125_v18  ;;  %v9137_v18 = vpack.c.bf16 %v4592_v37, %v4591_v44  ;;  %v10701_v44 = vld [vmem:[%s11764_s30 + $0x139] sm:$0xff] }
 0x42a   : > { %3879 = vmatmul.mubr.f32.gmra.mrb[30].mxu1 %v18946_v24  ;;  %9127 = vmatprep.subr.bf16.mxu0 %v18681_v9  ;;  %v4693_v24 = vld [vmem:[%s18356_s5 + $0x430] sm:$0xff]  ;;  %v10702_v37 = vld [vmem:[%s11764_s30 + $0x138] sm:$0xff] }
 0x42b   : > { %3883 = vmatprep.mubr.f32.mxu1 %v14599_v49  ;;  %v18949_v49 = vld [vmem:[#allocation85_spill] sm:$0xff]  ;;  %v9292_v33 = vpack.c.bf16 %v4694_v20, %v4693_v24  ;;  %v10705_v24 = vld [vmem:[%s11764_s30 + $0x149] sm:$0xff]  ;;  %v4599_v20 = vld [vmem:[%s18356_s5 + $0x140] sm:$0xff] }
 0x42d   : > { %9129 = vmatpush1.bf16.msra.mxu0 %v9128_v41  ;;  %v10690_v41 = vld [vmem:[%s11764_s30 + $0xf8] sm:$0xff] }
 0x42e   : > { %3884 = vmatmul.mubr.f32.gmra.mrb[32].mxu1 %v18947_v60  ;;  %9130 = vmatprep.subr.bf16.mxu0 %v18681_v9  ;;  %v4696_v60 = vld [vmem:[%s18356_s5 + $0x448] sm:$0xff] }
 0x42f   : > { %3888 = vmatprep.mubr.f32.mxu1 %v14604_v53  ;;  %v4589_v53 = vld [vmem:[%s18356_s5 + $0xf0] sm:$0xff] }
 0x431   : > { %9132 = vmatpush1.bf16.msra.mxu0 %v9131_v34  ;;  %v4698_v34 = vld [vmem:[%s18356_s5 + $0x458] sm:$0xff] }
 0x432   : > { %3889 = vmatmul.mubr.f32.gmra.mrb[34].mxu1 %v18948_v31  ;;  %9133 = vmatprep.subr.bf16.mxu0 %v18681_v9 }
 0x433   : > { %3893 = vmatprep.mubr.f32.mxu1 %v14609_v42  ;;  %v4590_v42 = vld [vmem:[%s18356_s5 + $0xf8] sm:$0xff] }
 0x434   : > { %v9134_v15 = vpack.c.bf16 %v4590_v42, %v4589_v53  ;;  %v4699_v42 = vld [vmem:[%s18356_s5 + $0x460] sm:$0xff] }
 0x436   : > { %3894 = vmatmul.mubr.f32.gmra.mrb[36].mxu1 %v18949_v49  ;;  %9135 = vmatpush1.bf16.msra.mxu0 %v9134_v15  ;;  %v4593_v49 = vld [vmem:[%s18356_s5 + $0x110] sm:$0xff]  ;;  %v4700_v15 = vld [vmem:[%s18356_s5 + $0x468] sm:$0xff] }
 0x437   : > { %3898 = vmatprep.mubr.f32.mxu1 %v14614_v12  ;;  %v4457_v12 = vld [vmem:[%s11759_s27 + $0x1] sm:$0xff]  ;;  %9136 = vmatprep.subr.bf16.mxu0 %v18681_v9 }
 0x438   : > { %4774 = vmatprep.mubr.f32.mxu0 %v4457_v12  ;;  %v10693_v12 = vld [vmem:[%s11764_s30 + $0x110] sm:$0xff] }
 0x43a   : > { %3899 = vmatmul.mubr.f32.gmra.mrb[38].mxu1 %v18950_v27  ;;  %v4594_v27 = vld [vmem:[%s18356_s5 + $0x118] sm:$0xff] }
 0x43b   : > { %3903 = vmatprep.mubr.f32.mxu1 %v14619_v2  ;;  %v10687_v2 = vld [vmem:[%s11764_s30 + $0x180] sm:$0xff]  ;;  %v9140_v53 = vpack.c.bf16 %v4594_v27, %v4593_v49  ;;  %v2758_v49 = vld [vmem:[%s11764_s30 + $0x171] sm:$0xff] }
 0x43c   : > { %4775 = vmatmul.mubr.f32.vlgmr.msra.gmra.mrb[138].mxu0 %v10687_v2  ;;  %v2755_v27 = vld [vmem:[%s11764_s30 + $0x170] sm:$0xff] }
 0x43d   : > { %4779 = vmatprep.mubr.f32.mxu0 %v4458_v39  ;;  %9138 = vmatpush1.bf16.msra.mxu0 %v9137_v18  ;;  %v10704_v18 = vld [vmem:[%s11764_s30 + $0x140] sm:$0xff] }
 0x43e   : > { %3904 = vmatmul.mubr.f32.gmra.mrb[40].mxu1 %v18951_v10  ;;  %9139 = vmatprep.subr.bf16.mxu0 %v18681_v9  ;;  %v9304_v10 = vpack.c.bf16 %v4700_v15, %v4699_v42  ;;  %v10710_v15 = vld [vmem:[%s11764_s30 + $0x178] sm:$0xff] }
 0x43f   : > { %3908 = vmatprep.mubr.f32.mxu1 %v14624_v3  ;;  %v4688_v3 = vld [vmem:[%s18356_s5 + $0x408] sm:$0xff] }
 0x440   : > { %v9280_v26 = vpack.c.bf16 %v4688_v3, %v4687_v30  ;;  %4780 = vmatmul.mubr.f32.gmra.mrb[140].mxu0 %v10687_v2  ;;  %v4595_v30 = vld [vmem:[%s18356_s5 + $0x120] sm:$0xff]  ;;  %v10694_v3 = vld [vmem:[%s11764_s30 + $0x118] sm:$0xff] }
 0x441   : > { %4784 = vmatprep.mubr.f32.mxu0 %v4459_v14  ;;  %9141 = vmatpush1.bf16.msra.mxu0 %v9140_v53  ;;  %v10698_v14 = vld [vmem:[%s11764_s30 + $0x128] sm:$0xff]  ;;  %v2759_v53 = vld [vmem:[%s11764_s30 + $0x179] sm:$0xff] }
 0x442   : > { %3909 = vmatmul.mubr.f32.gmra.mrb[42].mxu1 %v18952_v61  ;;  %9281 = vmatprep.subr.bf16.mxu1 %v9280_v26 }
 0x443   : > { %3913 = vmatprep.mubr.f32.mxu1 %v14629_v25  ;;  %9283 = vmatpush3.bf16.msra.mxu1 %v9280_v26  ;;  %v4689_v25 = vld [vmem:[%s18356_s5 + $0x410] sm:$0xff]  ;;  %v10695_v26 = vld [vmem:[%s11764_s30 + $0x121] sm:$0xff] }
 0x444   : > { %v9284_v57 = vpack.c.bf16 %v4690_v40, %v4689_v25  ;;  %4785 = vmatmul.mubr.f32.gmra.mrb[142].mxu0 %v10687_v2  ;;  %9142 = vmatprep.subr.bf16.mxu0 %v18681_v9  ;;  %v4702_v2 = vld [vmem:[%s18356_s5 + $0x478] sm:$0xff]  ;;  %v10696_v25 = vld [vmem:[%s11764_s30 + $0x120] sm:$0xff]  ;;  %v10697_v40 = vld [vmem:[%s11764_s30 + $0x129] sm:$0xff] }
 0x446   : > { %3914 = vmatmul.mubr.f32.gmra.mrb[44].mxu1 %v14255_v36  ;;  %9285 = vmatprep.subr.bf16.mxu1 %v9284_v57  ;;  %v4692_v36 = vld [vmem:[%s18356_s5 + $0x428] sm:$0xff] }
 0x447   : > { %3918 = vmatprep.mubr.f32.mxu1 %v14634_v17  ;;  %9287 = vmatpush3.bf16.msra.mxu1 %v9284_v57  ;;  %v4691_v17 = vld [vmem:[%s18356_s5 + $0x420] sm:$0xff]  ;;  %v10699_v57 = vld [vmem:[%s11764_s30 + $0x131] sm:$0xff] }
 0x448   : > { %v9288_v32 = vpack.c.bf16 %v4692_v36, %v4691_v17  ;;  %v4598_v17 = vld [vmem:[%s18356_s5 + $0x138] sm:$0xff]  ;;  %v10700_v36 = vld [vmem:[%s11764_s30 + $0x130] sm:$0xff] }
 0x44a   : > { %3919 = vmatmul.mubr.f32.gmra.mrb[46].mxu1 %v10688_v58  ;;  %9289 = vmatprep.subr.bf16.mxu1 %v9288_v32  ;;  %v4597_v58 = vld [vmem:[%s18356_s5 + $0x130] sm:$0xff] }
 0x44b   : > { %3923 = vmatprep.mubr.f32.mxu1 %v14639_v54  ;;  %v10689_v54 = vld [vmem:[%s11764_s30 + $0xf0] sm:$0xff]  ;;  %9291 = vmatpush3.bf16.msra.mxu1 %v9288_v32  ;;  %v9146_v32 = vpack.c.bf16 %v4598_v17, %v4597_v58  ;;  %v4614_v17 = vld [vmem:[%s18356_s5 + $0x1b8] sm:$0xff] }
 0x44c   : > { %9293 = vmatprep.subr.bf16.mxu1 %v9292_v33  ;;  %v4613_v58 = vld [vmem:[%s18356_s5 + $0x1b0] sm:$0xff] }
 0x44e   : > { %3924 = vmatmul.mubr.f32.gmra.mrb[48].mxu1 %v10689_v54  ;;  %v10703_v54 = vld [vmem:[%s11764_s30 + $0x141] sm:$0xff] }
 0x44f   : > { %3928 = vmatprep.mubr.f32.mxu1 %v14644_v47  ;;  %9295 = vmatpush3.bf16.msra.mxu1 %v9292_v33  ;;  %v4695_v47 = vld [vmem:[%s18356_s5 + $0x440] sm:$0xff]  ;;  %v4600_v33 = vld [vmem:[%s18356_s5 + $0x148] sm:$0xff] }
 0x450   : > { %v9296_v38 = vpack.c.bf16 %v4696_v60, %v4695_v47  ;;  %v9149_v47 = vpack.c.bf16 %v4600_v33, %v4599_v20  ;;  %v10707_v60 = vld [vmem:[%s11764_s30 + $0x150] sm:$0xff] }
 0x452   : > { %3929 = vmatmul.mubr.f32.gmra.mrb[50].mxu1 %v10690_v41  ;;  %9297 = vmatprep.subr.bf16.mxu1 %v9296_v38  ;;  %v10706_v41 = vld [vmem:[%s11764_s30 + $0x148] sm:$0xff] }
 0x453   : > { %3933 = vmatprep.mubr.f32.mxu1 %v14649_v43  ;;  %9299 = vmatpush3.bf16.msra.mxu1 %v9296_v38  ;;  %v4697_v43 = vld [vmem:[%s18356_s5 + $0x450] sm:$0xff] }
 0x454   : > { %v9300_v31 = vpack.c.bf16 %v4698_v34, %v4697_v43  ;;  %v4601_v38 = vld [vmem:[%s18356_s5 + $0x150] sm:$0xff]  ;;  %v10709_v34 = vld [vmem:[%s11764_s30 + $0x160] sm:$0xff] }
 0x456   : > { %3934 = vmatmul.mubr.f32.gmra.mrb[52].mxu1 %v10691_v28  ;;  %9301 = vmatprep.subr.bf16.mxu1 %v9300_v31  ;;  %v4602_v28 = vld [vmem:[%s18356_s5 + $0x158] sm:$0xff] }
 0x457   : > { %3938 = vmatprep.mubr.f32.mxu1 %v14654_v5  ;;  %v10692_v5 = vld [vmem:[%s11764_s30 + $0x108] sm:$0xff]  ;;  %9303 = vmatpush3.bf16.msra.mxu1 %v9300_v31  ;;  %v9152_v43 = vpack.c.bf16 %v4602_v28, %v4601_v38  ;;  %v18956_v28 = vld [vmem:[#allocation4_spill] sm:$0xff] }
 0x458   : > { %9305 = vmatprep.subr.bf16.mxu1 %v9304_v10  ;;  %v2754_v31 = vld [vmem:[%s11764_s30 + $0x168] sm:$0xff]  ;;  %vm2578_vm1 = vcmp.lt.s32.totalorder %v18956_v28, 14 }
 0x45a   : > { %3939 = vmatmul.mubr.f32.gmra.mrb[54].mxu1 %v10692_v5  ;;  %v4603_v5 = vld [vmem:[%s18356_s5 + $0x160] sm:$0xff] }
 0x45b   : > { %3943 = vmatprep.mubr.f32.mxu1 %v14659_v23  ;;  %9307 = vmatpush3.bf16.msra.mxu1 %v9304_v10  ;;  %v4701_v23 = vld [vmem:[%s18356_s5 + $0x470] sm:$0xff] }
 0x45c   : > { %v9308_v61 = vpack.c.bf16 %v4702_v2, %v4701_v23  ;;  %v4605_v10 = vld [vmem:[%s18356_s5 + $0x170] sm:$0xff]  ;;  %v4607_v2 = vld [vmem:[%s18356_s5 + $0x180] sm:$0xff] }
 0x45e   : > { %3944 = vmatmul.mubr.f32.gmra.mrb[56].mxu1 %v10693_v12  ;;  %9309 = vmatprep.subr.bf16.mxu1 %v9308_v61  ;;  %v4606_v12 = vld [vmem:[%s18356_s5 + $0x178] sm:$0xff] }
 0x45f   : > { %3948 = vmatprep.mubr.f32.mxu1 %v14664_v6  ;;  %v4596_v6 = vld [vmem:[%s18356_s5 + $0x128] sm:$0xff]  ;;  %9311 = vmatpush3.bf16.msra.mxu1 %v9308_v61  ;;  %v9158_v23 = vpack.c.bf16 %v4606_v12, %v4605_v10 }
 0x460   : > { %v9143_v39 = vpack.c.bf16 %v4596_v6, %v4595_v30  ;;  %v4608_v61 = vld [vmem:[%s18356_s5 + $0x188] sm:$0xff]  ;;  %v4609_v6 = vld [vmem:[%s18356_s5 + $0x190] sm:$0xff] }
 0x461   : > { %v9161_v30 = vpack.c.bf16 %v4608_v61, %v4607_v2  ;;  %v18959_v61 = vld [vmem:[#allocation82_spill] sm:$0xff] }
 0x462   : > { %3949 = vmatmul.mubr.f32.gmra.mrb[58].mxu1 %v10694_v3  ;;  %9144 = vmatpush1.bf16.msra.mxu0 %v9143_v39  ;;  %v4610_v3 = vld [vmem:[%s18356_s5 + $0x198] sm:$0xff] }
 0x463   : > { %3953 = vmatprep.mubr.f32.mxu1 %v10695_v26  ;;  %9145 = vmatprep.subr.bf16.mxu0 %v18681_v9  ;;  %v9164_v39 = vpack.c.bf16 %v4610_v3, %v4609_v6  ;;  %v4611_v26 = vld [vmem:[%s18356_s5 + $0x1a0] sm:$0xff] }
 0x464   : > { %v18960_v3 = vld [vmem:[#allocation6_spill] sm:$0xff] }
 0x465   : > { %vm18638_vm4 = vcmp.lt.s32.totalorder %v18960_v3, 14 }
 0x466   : > { %3954 = vmatmul.mubr.f32.gmra.mrb[60].mxu1 %v10696_v25  ;;  %9147 = vmatpush1.bf16.msra.mxu0 %v9146_v32  ;;  %v4612_v25 = vld [vmem:[%s18356_s5 + $0x1a8] sm:$0xff] }
 0x467   : > { %3958 = vmatprep.mubr.f32.mxu1 %v10697_v40  ;;  %9148 = vmatprep.subr.bf16.mxu0 %v18681_v9  ;;  %v9167_v40 = vpack.c.bf16 %v4612_v25, %v4611_v26 }
 0x46a   : > { %3959 = vmatmul.mubr.f32.gmra.mrb[62].mxu1 %v10698_v14  ;;  %9150 = vmatpush1.bf16.msra.mxu0 %v9149_v47  ;;  %v15022_v14 = vld [vmem:[%s18355_s4] ss:$0 sm:$0xff] }
 0x46b   : > { %3963 = vmatprep.mubr.f32.mxu1 %v10699_v57  ;;  %9151 = vmatprep.subr.bf16.mxu0 %v18681_v9 }
 0x46e   : > { %3964 = vmatmul.mubr.f32.gmra.mrb[64].mxu1 %v10700_v36  ;;  %9153 = vmatpush1.bf16.msra.mxu0 %v9152_v43 }
 0x46f   : > { %3968 = vmatprep.mubr.f32.mxu1 %v10701_v44  ;;  %9154 = vmatprep.subr.bf16.mxu0 %v18681_v9  ;;  %v9170_v44 = vpack.c.bf16 %v4614_v17, %v4613_v58  ;;  %v18961_v58 = vld [vmem:[#allocation89_spill] sm:$0xff] }
 0x472   : > { %3969 = vmatmul.mubr.f32.gmra.mrb[66].mxu1 %v10702_v37  ;;  %v18953_v37 = vld [vmem:[#allocation77_spill] sm:$0xff] }
 0x473   : > { %3973 = vmatprep.mubr.f32.mxu1 %v10703_v54 }
 0x476   : > { %3974 = vmatmul.mubr.f32.gmra.mrb[68].mxu1 %v10704_v18  ;;  %v18954_v18 = vld [vmem:[#allocation3_spill] sm:$0xff] }
 0x477   : > { %3978 = vmatprep.mubr.f32.mxu1 %v10705_v24  ;;  %vm2577_vm8 = vcmp.lt.s32.totalorder %v18954_v18, 14 }
 0x47a   : > { %3979 = vmatmul.mubr.f32.gmra.mrb[70].mxu1 %v10706_v41 }
 0x47b   : > { %3983 = vmatprep.mubr.f32.mxu1 %v14681_v56  ;;  %v10708_v56 = vld [vmem:[%s11764_s30 + $0x158] sm:$0xff] }
 0x47e   : > { %3984 = vmatmul.mubr.f32.gmra.mrb[72].mxu1 %v10707_v60  ;;  %v18955_v60 = vld [vmem:[#allocation76_spill] sm:$0xff] }
 0x47f   : > { %3988 = vmatprep.mubr.f32.mxu1 %v14686_v55  ;;  %v2757_v55 = vld [vmem:[%s11764_s30 + $0x169] sm:$0xff] }
 0x482   : > { %3989 = vmatmul.mubr.f32.gmra.mrb[74].mxu1 %v10708_v56 }
 0x483   : > { %3993 = vmatprep.mubr.f32.mxu1 %v14691_v7  ;;  %v4604_v7 = vld [vmem:[%s18356_s5 + $0x168] sm:$0xff] }
 0x484   : > { %v9155_v42 = vpack.c.bf16 %v4604_v7, %v4603_v5  ;;  %v18958_v5 = vld [vmem:[#allocation5_spill] sm:$0xff] }
 0x485   : > { %vm2579_vm9 = vcmp.lt.s32.totalorder %v18958_v5, 14 }
 0x486   : > { %3994 = vmatmul.mubr.f32.gmra.mrb[76].mxu1 %v10709_v34  ;;  %9156 = vmatpush1.bf16.msra.mxu0 %v9155_v42  ;;  %v4616_v42 = vld [vmem:[%s18356_s5 + $0x1c8] sm:$0xff] }
 0x487   : > { %3998 = vmatprep.mubr.f32.mxu1 %v2757_v55  ;;  %9157 = vmatprep.subr.bf16.mxu0 %v18681_v9 }
 0x48a   : > { %3999 = vmatmul.mubr.f32.gmra.mrb[78].mxu1 %v2754_v31  ;;  %9159 = vmatpush1.bf16.msra.mxu0 %v9158_v23 }
 0x48b   : > { %4003 = vmatprep.mubr.f32.mxu1 %v2758_v49  ;;  %9160 = vmatprep.subr.bf16.mxu0 %v18681_v9  ;;  %v18957_v49 = vld [vmem:[#allocation83_spill] sm:$0xff] }
 0x48e   : > { %4004 = vmatmul.mubr.f32.gmra.mrb[80].mxu1 %v2755_v27  ;;  %9162 = vmatpush1.bf16.msra.mxu0 %v9161_v30 }
 0x48f   : > { %4008 = vmatprep.mubr.f32.mxu1 %v2759_v53  ;;  %9163 = vmatprep.subr.bf16.mxu0 %v18681_v9  ;;  %v4615_v53 = vld [vmem:[%s18356_s5 + $0x1c0] sm:$0xff] }
 0x490   : > { %v9173_v23 = vpack.c.bf16 %v4616_v42, %v4615_v53 }
 0x492   : > { %4009 = vmatmul.mubr.f32.gmra.mrb[82].mxu1 %v10710_v15  ;;  %9165 = vmatpush1.bf16.msra.mxu0 %v9164_v39 }
 0x493   : > { %9166 = vmatprep.subr.bf16.mxu0 %v18681_v9 }
 0x496   : > { %9168 = vmatpush1.bf16.msra.mxu0 %v9167_v40 }
 0x497   : > { %9169 = vmatprep.subr.bf16.mxu0 %v18681_v9 }
 0x49a   : > { %9171 = vmatpush1.bf16.msra.mxu0 %v9170_v44 }
 0x49b   : > { %9172 = vmatprep.subr.bf16.mxu0 %v18681_v9 }
 0x49e   : > { %9174 = vmatpush1.bf16.msra.mxu0 %v9173_v23 }
 0x49f   : > { %9175 = vmatprep.subr.bf16.mxu0 %v18681_v9 }
 0x4c1   : > { %v3805_v57 = vpop.f32.mrb[0].mxu1 }
 0x4c2   : > { %v9680_v36 = vadd.f32 %v15022_v14, %v3805_v57  ;;  %v3807_v32 = vpop.f32.mrb[1].mxu1 }
 0x4c3   : > { %v18962_v32 = vld [vmem:[#allocation7_spill] sm:$0xff] }
 0x4c4   : > { %v4081_v54 = vadd.f32 %v9680_v36, %v18953_v37  ;;  %vm18633_vm11 = vcmp.lt.s32.totalorder %v18962_v32, 14  ;;  %v4617_v37 = vld [vmem:[%s18356_s5 + $0x1d0] sm:$0xff] }
 0x4c5   : > { %v3810_v24 = vpop.f32.mrb[2].mxu1 }
 0x4c6   : > { %v4289_v20 = vmax.f32 %v4081_v54, 0.0  ;;  %v9681_v33 = vadd.f32 %v15022_v14, %v3810_v24  ;;  %v3812_v41 = vpop.f32.mrb[3].mxu1  ;;  %v4618_v54 = vld [vmem:[%s18356_s5 + $0x1d8] sm:$0xff] }
 0x4c7   : > { %v9176_v41 = vpack.c.bf16 %v4618_v54, %v4617_v37 }
 0x4c8   : > { %v4331_v47 = vsel %vm2577_vm8, %v4289_v20, 0.0  ;;  %v4086_v38 = vadd.f32 %v9681_v33, %v18955_v60  ;;  %10872 = vmatprep.mubr.msk.f32.mxu0 %vm2577_vm8, %v4289_v20  ;;  %v18963_v60 = vld [vmem:[#allocation88_spill] sm:$0xff] }
 0x4c9   : > { %4373 = vst [vmem:[%s11759_s27 + $0x19] sm:$0xff] %v4331_v47  ;;  %v3815_v56 = vpop.f32.mrb[4].mxu1  ;;  %9177 = vmatpush1.bf16.msra.mxu0 %v9176_v41 }
 0x4ca   : > { %v4290_v43 = vmax.f32 %v4086_v38, 0.0  ;;  %v9682_v34 = vadd.f32 %v15022_v14, %v3815_v56  ;;  %v3817_v55 = vpop.f32.mrb[5].mxu1  ;;  %9178 = vmatprep.subr.bf16.mxu0 %v18681_v9 }
 0x4cc   : > { %v4332_v31 = vsel %vm2578_vm1, %v4290_v43, 0.0  ;;  %v4091_v27 = vadd.f32 %v9682_v34, %v18957_v49 }
 0x4cd   : > { %4374 = vst [vmem:[%s11759_s27 + $0x21] sm:$0xff] %v4332_v31  ;;  %v3820_v7 = vpop.f32.mrb[6].mxu1 }
 0x4ce   : > { %v4291_v15 = vmax.f32 %v4091_v27, 0.0  ;;  %v9683_v10 = vadd.f32 %v15022_v14, %v3820_v7  ;;  %v3822_v12 = vpop.f32.mrb[7].mxu1  ;;  %v18965_v7 = vld [vmem:[#allocation94_spill] sm:$0xff] }
 0x4d0   : > { %v4333_v2 = vsel %vm2579_vm9, %v4291_v15, 0.0  ;;  %v4096_v30 = vadd.f32 %v9683_v10, %v18959_v61  ;;  %v4418_v6 = vld [vmem:[%s11759_s27 + $0x18] sm:$0xff] }
 0x4d1   : > { %4375 = vst [vmem:[%s11759_s27 + $0x29] sm:$0xff] %v4333_v2  ;;  %v3825_v39 = vpop.f32.mrb[8].mxu1  ;;  %4790 = vmatmul.mubr.f32.gmra.mrb[144].mxu0 %v4418_v6 }
 0x4d2   : > { %v4292_v26 = vmax.f32 %v4096_v30, 0.0  ;;  %v9684_v25 = vadd.f32 %v15022_v14, %v3825_v39  ;;  %v3827_v40 = vpop.f32.mrb[9].mxu1  ;;  %10873 = vmatprep.mubr.msk.f32.mxu0 %vm2578_vm1, %v4290_v43  ;;  %v18964_v43 = vld [vmem:[#allocation8_spill] sm:$0xff]  ;;  %v18967_v30 = vld [vmem:[#allocation93_spill] sm:$0xff] }
 0x4d3   : > { %vm18626_vm6 = vcmp.lt.s32.totalorder %v18964_v43, 14 }
 0x4d4   : > { %v4334_v57 = vsel %vm18638_vm4, %v4292_v26, 0.0  ;;  %v4101_v17 = vadd.f32 %v9684_v25, %v18961_v58  ;;  %v15069_v36 = vld [vmem:[%s11759_s27 + $0x20] sm:$0xff]  ;;  %v4620_v58 = vld [vmem:[%s18356_s5 + $0x1e8] sm:$0xff] }
 0x4d5   : > { %4376 = vst [vmem:[%s11759_s27 + $0x31] sm:$0xff] %v4334_v57  ;;  %v3830_v44 = vpop.f32.mrb[10].mxu1  ;;  %4795 = vmatmul.mubr.f32.gmra.mrb[146].mxu0 %v15069_v36  ;;  %v18968_v25 = vld [vmem:[#allocation10_spill] sm:$0xff] }
 0x4d6   : > { %v4293_v24 = vmax.f32 %v4101_v17, 0.0  ;;  %v9685_v20 = vadd.f32 %v15022_v14, %v3830_v44  ;;  %v3832_v33 = vpop.f32.mrb[11].mxu1  ;;  %10874 = vmatprep.mubr.msk.f32.mxu0 %vm2579_vm9, %v4291_v15  ;;  %v18966_v15 = vld [vmem:[#allocation9_spill] sm:$0xff]  ;;  %vm18614_vm14 = vcmp.lt.s32.totalorder %v18968_v25, 14  ;;  %v4619_v57 = vld [vmem:[%s18356_s5 + $0x1e0] sm:$0xff] }
 0x4d7   : > { %vm18620_vm2 = vcmp.lt.s32.totalorder %v18966_v15, 14  ;;  %v9179_v54 = vpack.c.bf16 %v4620_v58, %v4619_v57  ;;  %v18971_v57 = vld [vmem:[#allocation13_spill] sm:$0xff] }
 0x4d8   : > { %v4335_v47 = vsel %vm18633_vm11, %v4293_v24, 0.0  ;;  %v4106_v38 = vadd.f32 %v9685_v20, %v18963_v60  ;;  %v15087_v56 = vld [vmem:[%s11759_s27 + $0x28] sm:$0xff]  ;;  %vm18596_vm13 = vcmp.lt.s32.totalorder %v18971_v57, 14 }
 0x4d9   : > { %4377 = vst [vmem:[%s11759_s27 + $0x39] sm:$0xff] %v4335_v47  ;;  %v3835_v34 = vpop.f32.mrb[12].mxu1  ;;  %4800 = vmatmul.mubr.f32.gmra.mrb[148].mxu0 %v15087_v56  ;;  %v18969_v47 = vld [vmem:[#allocation11_spill] sm:$0xff] }
 0x4da   : > { %v4294_v55 = vmax.f32 %v4106_v38, 0.0  ;;  %v9686_v31 = vadd.f32 %v15022_v14, %v3835_v34  ;;  %v3837_v49 = vpop.f32.mrb[13].mxu1  ;;  %10875 = vmatprep.mubr.msk.f32.mxu0 %vm18638_vm4, %v4292_v26  ;;  %9180 = vmatpush1.bf16.msra.mxu0 %v9179_v54  ;;  %vm18608_vm3 = vcmp.lt.s32.totalorder %v18969_v47, 14 }
 0x4db   : > { %9181 = vmatprep.subr.bf16.mxu0 %v18681_v9 }
 0x4dc   : > { %v4336_v27 = vsel %vm18626_vm6, %v4294_v55, 0.0  ;;  %v4111_v53 = vadd.f32 %v9686_v31, %v18965_v7  ;;  %v15100_v42 = vld [vmem:[%s11759_s27 + $0x30] sm:$0xff] }
 0x4dd   : > { %4378 = vst [vmem:[%s11759_s27 + $0x41] sm:$0xff] %v4336_v27  ;;  %v3840_v10 = vpop.f32.mrb[14].mxu1  ;;  %4805 = vmatmul.mubr.f32.gmra.mrb[150].mxu0 %v15100_v42  ;;  %v4621_v7 = vld [vmem:[%s18356_s5 + $0x1f0] sm:$0xff] }
 0x4de   : > { %v4295_v12 = vmax.f32 %v4111_v53, 0.0  ;;  %v9687_v23 = vadd.f32 %v15022_v14, %v3840_v10  ;;  %v3842_v2 = vpop.f32.mrb[15].mxu1  ;;  %10876 = vmatprep.mubr.msk.f32.mxu0 %vm18633_vm11, %v4293_v24  ;;  %v18970_v53 = vld [vmem:[#allocation12_spill] sm:$0xff] }
 0x4df   : > { %vm18602_vm7 = vcmp.lt.s32.totalorder %v18970_v53, 14 }
 0x4e0   : > { %v4337_v61 = vsel %vm18620_vm2, %v4295_v12, 0.0  ;;  %v4116_v6 = vadd.f32 %v9687_v23, %v18967_v30  ;;  %v4505_v39 = vld [vmem:[%s11759_s27 + $0x32] sm:$0xff] }
 0x4e1   : > { %v15113_v26 = vld [vmem:[%s11759_s27 + $0x38] sm:$0xff]  ;;  %4379 = vst [vmem:[%s11759_s27 + $0x49] sm:$0xff] %v4337_v61  ;;  %v3845_v40 = vpop.f32.mrb[16].mxu1  ;;  %8646 = vmatprep.mubr.f32.mxu1 %v4505_v39 }
 0x4e2   : > { %4810 = vmatmul.mubr.f32.gmra.mrb[152].mxu0 %v15113_v26  ;;  %v4296_v17 = vmax.f32 %v4116_v6, 0.0  ;;  %v9688_v44 = vadd.f32 %v15022_v14, %v3845_v40  ;;  %v3847_v37 = vpop.f32.mrb[17].mxu1 }
 0x4e3   : > { %10877 = vmatprep.mubr.msk.f32.mxu0 %vm18626_vm6, %v4294_v55 }
 0x4e4   : > { %v4338_v24 = vsel %vm18614_vm14, %v4296_v17, 0.0  ;;  %v4121_v20 = vadd.f32 %v9688_v44, %v14267_v0  ;;  %v4506_v33 = vld [vmem:[%s11759_s27 + $0x3a] sm:$0xff] }
 0x4e5   : > { %v15132_v41 = vld [vmem:[%s11759_s27 + $0x40] sm:$0xff]  ;;  %4380 = vst [vmem:[%s11759_s27 + $0x51] sm:$0xff] %v4338_v24  ;;  %v3850_v60 = vpop.f32.mrb[18].mxu1  ;;  %8647 = vmatmul.mubr.f32.vlgmr.msra.gmra.mrb[84].mxu1 %v4506_v33 }
 0x4e6   : > { %4815 = vmatmul.mubr.f32.gmra.mrb[154].mxu0 %v15132_v41  ;;  %v4297_v38 = vmax.f32 %v4121_v20, 0.0  ;;  %v9689_v34 = vadd.f32 %v15022_v14, %v3850_v60  ;;  %v3852_v55 = vpop.f32.mrb[19].mxu1  ;;  %v18972_v33 = vld [vmem:[#allocation14_spill] sm:$0xff] }
 0x4e7   : > { %10878 = vmatprep.mubr.msk.f32.mxu0 %vm18620_vm2, %v4295_v12  ;;  %vm18590_vm10 = vcmp.lt.s32.totalorder %v18972_v33, 14 }
 0x4e8   : > { %v4339_v0 = vsel %vm18608_vm3, %v4297_v38, 0.0  ;;  %v4126_v31 = vadd.f32 %v9689_v34, %v14265_v45  ;;  %v15145_v49 = vld [vmem:[%s11759_s27 + $0x42] sm:$0xff]  ;;  %v4622_v45 = vld [vmem:[%s18356_s5 + $0x1f8] sm:$0xff] }
 0x4e9   : > { %v15148_v27 = vld [vmem:[%s11759_s27 + $0x48] sm:$0xff]  ;;  %4381 = vst [vmem:[%s11759_s27 + $0x59] sm:$0xff] %v4339_v0  ;;  %v3855_v10 = vpop.f32.mrb[20].mxu1  ;;  %8649 = vmatprep.mubr.f32.mxu1 %v15145_v49  ;;  %v9182_v61 = vpack.c.bf16 %v4622_v45, %v4621_v7 }
 0x4ea   : > { %4820 = vmatmul.mubr.f32.gmra.mrb[156].mxu0 %v15148_v27  ;;  %v4298_v12 = vmax.f32 %v4126_v31, 0.0  ;;  %v9690_v23 = vadd.f32 %v15022_v14, %v3855_v10  ;;  %v3857_v2 = vpop.f32.mrb[21].mxu1  ;;  %v18973_v10 = vld [vmem:[#allocation15_spill] sm:$0xff] }
 0x4eb   : > { %10879 = vmatprep.mubr.msk.f32.mxu0 %vm18614_vm14, %v4296_v17  ;;  %9183 = vmatpush1.bf16.msra.mxu0 %v9182_v61  ;;  %vm18534_vm12 = vcmp.lt.s32.totalorder %v18973_v10, 14 }
 0x4ec   : > { %v4340_v30 = vsel %vm18602_vm7, %v4298_v12, 0.0  ;;  %v4131_v6 = vadd.f32 %v9690_v23, %v14282_v50  ;;  %v15167_v39 = vld [vmem:[%s11759_s27 + $0x4a] sm:$0xff]  ;;  %9184 = vmatprep.subr.bf16.mxu0 %v18681_v9 }
 0x4ed   : > { %v15170_v40 = vld [vmem:[%s11759_s27 + $0x50] sm:$0xff]  ;;  %4382 = vst [vmem:[%s11759_s27 + $0x61] sm:$0xff] %v4340_v30  ;;  %v3860_v58 = vpop.f32.mrb[22].mxu1  ;;  %8650 = vmatmul.mubr.f32.gmra.mrb[86].mxu1 %v15167_v39 }
 0x4ee   : > { %4825 = vmatmul.mubr.f32.gmra.mrb[158].mxu0 %v15170_v40  ;;  %v4299_v17 = vmax.f32 %v4131_v6, 0.0  ;;  %v9691_v44 = vadd.f32 %v15022_v14, %v3860_v58  ;;  %v3862_v50 = vpop.f32.mrb[23].mxu1  ;;  %v18974_v58 = vld [vmem:[#allocation16_spill] sm:$0xff] }
 0x4ef   : > { %10880 = vmatprep.mubr.msk.f32.mxu0 %vm18608_vm3, %v4297_v38  ;;  %vm18535_vm0 = vcmp.lt.s32.totalorder %v18974_v58, 14 }
 0x4f0   : > { %v4341_v37 = vsel %vm18596_vm13, %v4299_v17, 0.0  ;;  %v4136_v54 = vadd.f32 %v9691_v44, %v14280_v21  ;;  %v15184_v24 = vld [vmem:[%s11759_s27 + $0x52] sm:$0xff] }
 0x4f1   : > { %v15187_v20 = vld [vmem:[%s11759_s27 + $0x58] sm:$0xff]  ;;  %4383 = vst [vmem:[%s11759_s27 + $0x69] sm:$0xff] %v4341_v37  ;;  %v3865_v60 = vpop.f32.mrb[24].mxu1  ;;  %8652 = vmatprep.mubr.f32.mxu1 %v15184_v24 }
 0x4f2   : > { %4830 = vmatmul.mubr.f32.gmra.mrb[160].mxu0 %v15187_v20  ;;  %v4300_v38 = vmax.f32 %v4136_v54, 0.0  ;;  %v9692_v34 = vadd.f32 %v15022_v14, %v3865_v60  ;;  %v3867_v55 = vpop.f32.mrb[25].mxu1 }
 0x4f3   : > { %10881 = vmatprep.mubr.msk.f32.mxu0 %vm18602_vm7, %v4298_v12  ;;  %v18975_v55 = vld [vmem:[#allocation17_spill] sm:$0xff] }
 0x4f4   : > { %v4342_v21 = vsel %vm18590_vm10, %v4300_v38, 0.0  ;;  %v4141_v0 = vadd.f32 %v9692_v34, %v14294_v59  ;;  %v15200_v31 = vld [vmem:[%s11759_s27 + $0x5a] sm:$0xff]  ;;  %vm18537_vm15 = vcmp.lt.s32.totalorder %v18975_v55, 14 }
 0x4f5   : > { %v15203_v7 = vld [vmem:[%s11759_s27 + $0x60] sm:$0xff]  ;;  %4384 = vst [vmem:[%s11759_s27 + $0x71] sm:$0xff] %v4342_v21  ;;  %v3870_v45 = vpop.f32.mrb[26].mxu1  ;;  %8653 = vmatmul.mubr.f32.gmra.mrb[88].mxu1 %v15200_v31 }
 0x4f6   : > { %4835 = vmatmul.mubr.f32.gmra.mrb[162].mxu0 %v15203_v7  ;;  %v4301_v12 = vmax.f32 %v4141_v0, 0.0  ;;  %v9693_v23 = vadd.f32 %v15022_v14, %v3870_v45  ;;  %v3872_v2 = vpop.f32.mrb[27].mxu1 }
 0x4f7   : > { %10882 = vmatprep.mubr.msk.f32.mxu0 %vm18596_vm13, %v4299_v17 }
 0x4f8   : > { %v4343_v59 = vsel %vm18534_vm12, %v4301_v12, 0.0  ;;  %v4146_v61 = vadd.f32 %v9693_v23, %v14292_v48  ;;  %v15216_v30 = vld [vmem:[%s11759_s27 + $0x62] sm:$0xff] }
 0x4f9   : > { %v15219_v6 = vld [vmem:[%s11759_s27 + $0x68] sm:$0xff]  ;;  %4385 = vst [vmem:[%s11759_s27 + $0x79] sm:$0xff] %v4343_v59  ;;  %v3875_v44 = vpop.f32.mrb[28].mxu1  ;;  %8655 = vmatprep.mubr.f32.mxu1 %v15216_v30 }
 0x4fa   : > { %4840 = vmatmul.mubr.f32.gmra.mrb[164].mxu0 %v15219_v6  ;;  %v4302_v17 = vmax.f32 %v4146_v61, 0.0  ;;  %v9694_v50 = vadd.f32 %v15022_v14, %v3875_v44  ;;  %v3877_v37 = vpop.f32.mrb[29].mxu1  ;;  %v18976_v61 = vld [vmem:[#allocation18_spill] sm:$0xff] }
 0x4fb   : > { %10883 = vmatprep.mubr.msk.f32.mxu0 %vm18590_vm10, %v4300_v38  ;;  %vm18540_vm5 = vcmp.lt.s32.totalorder %v18976_v61, 14 }
 0x4fc   : > { %v4344_v48 = vsel %vm18535_vm0, %v4302_v17, 0.0  ;;  %v4151_v54 = vadd.f32 %v9694_v50, %v14306_v35  ;;  %v15232_v60 = vld [vmem:[%s11759_s27 + $0x6a] sm:$0xff] }
 0x4fd   : > { %v15235_v34 = vld [vmem:[%s11759_s27 + $0x70] sm:$0xff]  ;;  %4386 = vst [vmem:[%s11759_s27 + $0x81] sm:$0xff] %v4344_v48  ;;  %v3880_v21 = vpop.f32.mrb[30].mxu1  ;;  %8656 = vmatmul.mubr.f32.gmra.mrb[90].mxu1 %v15232_v60 }
 0x4fe   : > { %4845 = vmatmul.mubr.f32.gmra.mrb[166].mxu0 %v15235_v34  ;;  %v4303_v38 = vmax.f32 %v4151_v54, 0.0  ;;  %v9695_v0 = vadd.f32 %v15022_v14, %v3880_v21  ;;  %v3882_v45 = vpop.f32.mrb[31].mxu1 }
 0x4ff   : > { %10884 = vmatprep.mubr.msk.f32.mxu0 %vm18534_vm12, %v4301_v12 }
 0x500   : > { %v4345_v35 = vsel %vm18537_vm15, %v4303_v38, 0.0  ;;  %v4156_v23 = vadd.f32 %v9695_v0, %v14304_v19  ;;  %v15248_v2 = vld [vmem:[%s11759_s27 + $0x72] sm:$0xff]  ;;  %v18977_v0 = vld [vmem:[#allocation19_spill] sm:$0xff] }
 0x501   : > { %v15251_v59 = vld [vmem:[%s11759_s27 + $0x78] sm:$0xff]  ;;  %4387 = vst [vmem:[%s11759_s27 + $0x89] sm:$0xff] %v4345_v35  ;;  %v3885_v44 = vpop.f32.mrb[32].mxu1  ;;  %8658 = vmatprep.mubr.f32.mxu1 %v15248_v2  ;;  %vm18543_vm12 = vcmp.lt.s32.totalorder %v18977_v0, 14 }
 0x502   : > { %4850 = vmatmul.mubr.f32.gmra.mrb[168].mxu0 %v15251_v59  ;;  %v4304_v12 = vmax.f32 %v4156_v23, 0.0  ;;  %v9696_v50 = vadd.f32 %v15022_v14, %v3885_v44  ;;  %v3887_v37 = vpop.f32.mrb[33].mxu1 }
 0x503   : > { %10885 = vmatprep.mubr.msk.f32.mxu0 %vm18535_vm0, %v4302_v17 }
 0x504   : > { %v4346_v19 = vsel %vm18540_vm5, %v4304_v12, 0.0  ;;  %v4161_v48 = vadd.f32 %v9696_v50, %v14318_v4  ;;  %v15264_v54 = vld [vmem:[%s11759_s27 + $0x7a] sm:$0xff] }
 0x505   : > { %v15267_v21 = vld [vmem:[%s11759_s27 + $0x80] sm:$0xff]  ;;  %4388 = vst [vmem:[%s11759_s27 + $0x91] sm:$0xff] %v4346_v19  ;;  %v3890_v45 = vpop.f32.mrb[34].mxu1  ;;  %8659 = vmatmul.mubr.f32.gmra.mrb[92].mxu1 %v15264_v54  ;;  %v18978_v19 = vld [vmem:[#allocation20_spill] sm:$0xff] }
 0x506   : > { %4855 = vmatmul.mubr.f32.gmra.mrb[170].mxu0 %v15267_v21  ;;  %v4305_v17 = vmax.f32 %v4161_v48, 0.0  ;;  %v9697_v35 = vadd.f32 %v15022_v14, %v3890_v45  ;;  %v3892_v23 = vpop.f32.mrb[35].mxu1  ;;  %vm18546_vm0 = vcmp.lt.s32.totalorder %v18978_v19, 14 }
 0x507   : > { %10886 = vmatprep.mubr.msk.f32.mxu0 %vm18537_vm15, %v4303_v38 }
 0x508   : > { %v4347_v4 = vsel %vm18543_vm12, %v4305_v17, 0.0  ;;  %v4166_v44 = vadd.f32 %v9697_v35, %v14316_v62  ;;  %v15280_v50 = vld [vmem:[%s11759_s27 + $0x82] sm:$0xff] }
 0x509   : > { %v15283_v37 = vld [vmem:[%s11759_s27 + $0x88] sm:$0xff]  ;;  %4389 = vst [vmem:[%s11759_s27 + $0x99] sm:$0xff] %v4347_v4  ;;  %v3895_v48 = vpop.f32.mrb[36].mxu1  ;;  %8661 = vmatprep.mubr.f32.mxu1 %v15280_v50 }
 0x50a   : > { %4860 = vmatmul.mubr.f32.gmra.mrb[172].mxu0 %v15283_v37  ;;  %v4306_v38 = vmax.f32 %v4166_v44, 0.0  ;;  %v9698_v45 = vadd.f32 %v15022_v14, %v3895_v48  ;;  %v3897_v23 = vpop.f32.mrb[37].mxu1  ;;  %v18979_v44 = vld [vmem:[#allocation21_spill] sm:$0xff] }
 0x50b   : > { %10887 = vmatprep.mubr.msk.f32.mxu0 %vm18540_vm5, %v4304_v12  ;;  %vm18549_vm15 = vcmp.lt.s32.totalorder %v18979_v44, 14 }
 0x50c   : > { %v4348_v62 = vsel %vm18546_vm0, %v4306_v38, 0.0  ;;  %v4171_v35 = vadd.f32 %v9698_v45, %v14330_v46  ;;  %v15296_v4 = vld [vmem:[%s11759_s27 + $0x8a] sm:$0xff] }
 0x50d   : > { %v15299_v55 = vld [vmem:[%s11759_s27 + $0x90] sm:$0xff]  ;;  %4390 = vst [vmem:[%s11759_s27 + $0xa1] sm:$0xff] %v4348_v62  ;;  %v3900_v48 = vpop.f32.mrb[38].mxu1  ;;  %8662 = vmatmul.mubr.f32.gmra.mrb[94].mxu1 %v15296_v4 }
 0x50e   : > { %4865 = vmatmul.mubr.f32.gmra.mrb[174].mxu0 %v15299_v55  ;;  %v4307_v12 = vmax.f32 %v4171_v35, 0.0  ;;  %v9699_v23 = vadd.f32 %v15022_v14, %v3900_v48  ;;  %v3902_v61 = vpop.f32.mrb[39].mxu1  ;;  %v18980_v35 = vld [vmem:[#allocation22_spill] sm:$0xff] }
 0x50f   : > { %10888 = vmatprep.mubr.msk.f32.mxu0 %vm18543_vm12, %v4305_v17  ;;  %vm18552_vm5 = vcmp.lt.s32.totalorder %v18980_v35, 14 }
 0x510   : > { %v4349_v46 = vsel %vm18549_vm15, %v4307_v12, 0.0  ;;  %v4176_v45 = vadd.f32 %v9699_v23, %v14328_v1  ;;  %v15312_v62 = vld [vmem:[%s11759_s27 + $0x92] sm:$0xff] }
 0x511   : > { %v15315_v58 = vld [vmem:[%s11759_s27 + $0x98] sm:$0xff]  ;;  %4391 = vst [vmem:[%s11759_s27 + $0xa9] sm:$0xff] %v4349_v46  ;;  %v3905_v48 = vpop.f32.mrb[40].mxu1  ;;  %8664 = vmatprep.mubr.f32.mxu1 %v15312_v62 }
 0x512   : > { %4870 = vmatmul.mubr.f32.gmra.mrb[176].mxu0 %v15315_v58  ;;  %v4308_v61 = vmax.f32 %v4176_v45, 0.0  ;;  %v9700_v17 = vadd.f32 %v15022_v14, %v3905_v48  ;;  %v3907_v0 = vpop.f32.mrb[41].mxu1  ;;  %v18981_v45 = vld [vmem:[#allocation23_spill] sm:$0xff] }
 0x513   : > { %10889 = vmatprep.mubr.msk.f32.mxu0 %vm18546_vm0, %v4306_v38  ;;  %vm18555_vm12 = vcmp.lt.s32.totalorder %v18981_v45, 14 }
 0x514   : > { %v4350_v1 = vsel %vm18552_vm5, %v4308_v61, 0.0  ;;  %v4181_v23 = vadd.f32 %v9700_v17, %v14342_v8  ;;  %v15328_v46 = vld [vmem:[%s11759_s27 + $0x9a] sm:$0xff] }
 0x515   : > { %v15331_v10 = vld [vmem:[%s11759_s27 + $0xa0] sm:$0xff]  ;;  %4392 = vst [vmem:[%s11759_s27 + $0xb1] sm:$0xff] %v4350_v1  ;;  %v3910_v48 = vpop.f32.mrb[42].mxu1  ;;  %8665 = vmatmul.mubr.f32.gmra.mrb[96].mxu1 %v15328_v46 }
 0x516   : > { %4875 = vmatmul.mubr.f32.gmra.mrb[178].mxu0 %v15331_v10  ;;  %v4309_v0 = vmax.f32 %v4181_v23, 0.0  ;;  %v9701_v38 = vadd.f32 %v15022_v14, %v3910_v48  ;;  %v3912_v19 = vpop.f32.mrb[43].mxu1  ;;  %v18982_v23 = vld [vmem:[#allocation24_spill] sm:$0xff] }
 0x517   : > { %10890 = vmatprep.mubr.msk.f32.mxu0 %vm18549_vm15, %v4307_v12  ;;  %vm18558_vm0 = vcmp.lt.s32.totalorder %v18982_v23, 14 }
 0x518   : > { %v4351_v8 = vsel %vm18555_vm12, %v4309_v0, 0.0  ;;  %v4186_v17 = vadd.f32 %v9701_v38, %v14340_v29  ;;  %v15344_v1 = vld [vmem:[%s11759_s27 + $0xa2] sm:$0xff] }
 0x519   : > { %v15347_v33 = vld [vmem:[%s11759_s27 + $0xa8] sm:$0xff]  ;;  %4393 = vst [vmem:[%s11759_s27 + $0xb9] sm:$0xff] %v4351_v8  ;;  %v3915_v48 = vpop.f32.mrb[44].mxu1  ;;  %8667 = vmatprep.mubr.f32.mxu1 %v15344_v1 }
 0x51a   : > { %4880 = vmatmul.mubr.f32.gmra.mrb[180].mxu0 %v15347_v33  ;;  %v4310_v19 = vmax.f32 %v4186_v17, 0.0  ;;  %v9702_v12 = vadd.f32 %v15022_v14, %v3915_v48  ;;  %v3917_v44 = vpop.f32.mrb[45].mxu1  ;;  %v18983_v17 = vld [vmem:[#allocation25_spill] sm:$0xff] }
 0x51b   : > { %10891 = vmatprep.mubr.msk.f32.mxu0 %vm18552_vm5, %v4308_v61  ;;  %vm18561_vm15 = vcmp.lt.s32.totalorder %v18983_v17, 14 }
 0x51c   : > { %v4352_v29 = vsel %vm18558_vm0, %v4310_v19, 0.0  ;;  %v4191_v38 = vadd.f32 %v9702_v12, %v14356_v63  ;;  %v15360_v8 = vld [vmem:[%s11759_s27 + $0xaa] sm:$0xff] }
 0x51d   : > { %v15363_v57 = vld [vmem:[%s11759_s27 + $0xb0] sm:$0xff]  ;;  %4394 = vst [vmem:[%s11759_s27 + $0xc1] sm:$0xff] %v4352_v29  ;;  %v3920_v48 = vpop.f32.mrb[46].mxu1  ;;  %8668 = vmatmul.mubr.f32.gmra.mrb[98].mxu1 %v15360_v8 }
 0x51e   : > { %4885 = vmatmul.mubr.f32.gmra.mrb[182].mxu0 %v15363_v57  ;;  %v4311_v44 = vmax.f32 %v4191_v38, 0.0  ;;  %v9703_v61 = vadd.f32 %v15022_v14, %v3920_v48  ;;  %v3922_v35 = vpop.f32.mrb[47].mxu1  ;;  %v18984_v38 = vld [vmem:[#allocation26_spill] sm:$0xff] }
 0x51f   : > { %10892 = vmatprep.mubr.msk.f32.mxu0 %vm18555_vm12, %v4309_v0  ;;  %vm18564_vm5 = vcmp.lt.s32.totalorder %v18984_v38, 14 }
 0x520   : > { %v4353_v63 = vsel %vm18561_vm15, %v4311_v44, 0.0  ;;  %v4196_v12 = vadd.f32 %v9703_v61, %v14354_v11  ;;  %v15376_v29 = vld [vmem:[%s11759_s27 + $0xb2] sm:$0xff] }
 0x521   : > { %v15379_v53 = vld [vmem:[%s11759_s27 + $0xb8] sm:$0xff]  ;;  %4395 = vst [vmem:[%s11759_s27 + $0xc9] sm:$0xff] %v4353_v63  ;;  %v3925_v48 = vpop.f32.mrb[48].mxu1  ;;  %8670 = vmatprep.mubr.f32.mxu1 %v15376_v29 }
 0x522   : > { %4890 = vmatmul.mubr.f32.gmra.mrb[184].mxu0 %v15379_v53  ;;  %v4312_v35 = vmax.f32 %v4196_v12, 0.0  ;;  %v9704_v0 = vadd.f32 %v15022_v14, %v3925_v48  ;;  %v3927_v45 = vpop.f32.mrb[49].mxu1  ;;  %v18985_v12 = vld [vmem:[#allocation27_spill] sm:$0xff] }
 0x523   : > { %10893 = vmatprep.mubr.msk.f32.mxu0 %vm18558_vm0, %v4310_v19  ;;  %vm18567_vm12 = vcmp.lt.s32.totalorder %v18985_v12, 14 }
 0x524   : > { %v4354_v11 = vsel %vm18564_vm5, %v4312_v35, 0.0  ;;  %v4201_v61 = vadd.f32 %v9704_v0, %v14379_v13  ;;  %v15392_v63 = vld [vmem:[%s11759_s27 + $0xba] sm:$0xff] }
 0x525   : > { %v15395_v47 = vld [vmem:[%s11759_s27 + $0xc0] sm:$0xff]  ;;  %4396 = vst [vmem:[%s11759_s27 + $0xd1] sm:$0xff] %v4354_v11  ;;  %v3930_v48 = vpop.f32.mrb[50].mxu1  ;;  %8671 = vmatmul.mubr.f32.gmra.mrb[100].mxu1 %v15392_v63 }
 0x526   : > { %4895 = vmatmul.mubr.f32.gmra.mrb[186].mxu0 %v15395_v47  ;;  %v4313_v45 = vmax.f32 %v4201_v61, 0.0  ;;  %v9705_v19 = vadd.f32 %v15022_v14, %v3930_v48  ;;  %v3932_v23 = vpop.f32.mrb[51].mxu1  ;;  %v18986_v61 = vld [vmem:[#allocation28_spill] sm:$0xff] }
 0x527   : > { %10894 = vmatprep.mubr.msk.f32.mxu0 %vm18561_vm15, %v4311_v44  ;;  %vm18571_vm0 = vcmp.lt.s32.totalorder %v18986_v61, 14 }
 0x528   : > { %v4355_v13 = vsel %vm18567_vm12, %v4313_v45, 0.0  ;;  %v4206_v0 = vadd.f32 %v9705_v19, %v14371_v22  ;;  %v15408_v11 = vld [vmem:[%s11759_s27 + $0xc2] sm:$0xff] }
 0x529   : > { %v15411_v25 = vld [vmem:[%s11759_s27 + $0xc8] sm:$0xff]  ;;  %4397 = vst [vmem:[%s11759_s27 + $0xd9] sm:$0xff] %v4355_v13  ;;  %v3935_v48 = vpop.f32.mrb[52].mxu1  ;;  %8673 = vmatprep.mubr.f32.mxu1 %v15408_v11 }
 0x52a   : > { %4900 = vmatmul.mubr.f32.gmra.mrb[188].mxu0 %v15411_v25  ;;  %v4314_v23 = vmax.f32 %v4206_v0, 0.0  ;;  %v9706_v44 = vadd.f32 %v15022_v14, %v3935_v48  ;;  %v3937_v17 = vpop.f32.mrb[53].mxu1  ;;  %v18987_v0 = vld [vmem:[#allocation29_spill] sm:$0xff] }
 0x52b   : > { %10895 = vmatprep.mubr.msk.f32.mxu0 %vm18564_vm5, %v4312_v35  ;;  %vm18575_vm15 = vcmp.lt.s32.totalorder %v18987_v0, 14 }
 0x52c   : > { %v4356_v22 = vsel %vm18571_vm0, %v4314_v23, 0.0  ;;  %v4211_v19 = vadd.f32 %v9706_v44, %v14401_v51  ;;  %v15424_v13 = vld [vmem:[%s11759_s27 + $0xca] sm:$0xff] }
 0x52d   : > { %v15427_v15 = vld [vmem:[%s11759_s27 + $0xd0] sm:$0xff]  ;;  %4398 = vst [vmem:[%s11759_s27 + $0xe1] sm:$0xff] %v4356_v22  ;;  %v3940_v48 = vpop.f32.mrb[54].mxu1  ;;  %8674 = vmatmul.mubr.f32.gmra.mrb[102].mxu1 %v15424_v13 }
 0x52e   : > { %4905 = vmatmul.mubr.f32.gmra.mrb[190].mxu0 %v15427_v15  ;;  %v4315_v17 = vmax.f32 %v4211_v19, 0.0  ;;  %v9707_v35 = vadd.f32 %v15022_v14, %v3940_v48  ;;  %v3942_v38 = vpop.f32.mrb[55].mxu1  ;;  %v18988_v19 = vld [vmem:[#allocation30_spill] sm:$0xff] }
 0x52f   : > { %10896 = vmatprep.mubr.msk.f32.mxu0 %vm18567_vm12, %v4313_v45  ;;  %vm18580_vm5 = vcmp.lt.s32.totalorder %v18988_v19, 14 }
 0x530   : > { %v4357_v51 = vsel %vm18575_vm15, %v4315_v17, 0.0  ;;  %v4216_v44 = vadd.f32 %v9707_v35, %v14392_v52  ;;  %v15440_v22 = vld [vmem:[%s11759_s27 + $0xd2] sm:$0xff] }
 0x531   : > { %v15443_v43 = vld [vmem:[%s11759_s27 + $0xd8] sm:$0xff]  ;;  %4399 = vst [vmem:[%s11759_s27 + $0xe9] sm:$0xff] %v4357_v51  ;;  %v3945_v48 = vpop.f32.mrb[56].mxu1  ;;  %8676 = vmatprep.mubr.f32.mxu1 %v15440_v22 }
 0x532   : > { %4910 = vmatmul.mubr.f32.gmra.mrb[192].mxu0 %v15443_v43  ;;  %v4316_v38 = vmax.f32 %v4216_v44, 0.0  ;;  %v9708_v45 = vadd.f32 %v15022_v14, %v3945_v48  ;;  %v3947_v12 = vpop.f32.mrb[57].mxu1  ;;  %v18989_v44 = vld [vmem:[#allocation31_spill] sm:$0xff] }
 0x533   : > { %10897 = vmatprep.mubr.msk.f32.mxu0 %vm18571_vm0, %v4314_v23  ;;  %vm18584_vm12 = vcmp.lt.s32.totalorder %v18989_v44, 14 }
 0x534   : > { %v4358_v52 = vsel %vm18580_vm5, %v4316_v38, 0.0  ;;  %v4221_v35 = vadd.f32 %v9708_v45, %v14426_v16  ;;  %v15456_v51 = vld [vmem:[%s11759_s27 + $0xda] sm:$0xff] }
 0x535   : > { %v15459_v32 = vld [vmem:[%s11759_s27 + $0xe0] sm:$0xff]  ;;  %4400 = vst [vmem:[%s11759_s27 + $0xf1] sm:$0xff] %v4358_v52  ;;  %v3950_v48 = vpop.f32.mrb[58].mxu1  ;;  %8677 = vmatmul.mubr.f32.gmra.mrb[104].mxu1 %v15456_v51 }
 0x536   : > { %4915 = vmatmul.mubr.f32.gmra.mrb[194].mxu0 %v15459_v32  ;;  %v4317_v12 = vmax.f32 %v4221_v35, 0.0  ;;  %v9709_v23 = vadd.f32 %v15022_v14, %v3950_v48  ;;  %v3952_v61 = vpop.f32.mrb[59].mxu1  ;;  %v18990_v45 = vld [vmem:[#allocation50_spill] sm:$0xff]  ;;  %v18992_v35 = vld [vmem:[#allocation32_spill] sm:$0xff] }
 0x537   : > { %10898 = vmatprep.mubr.msk.f32.mxu0 %vm18575_vm15, %v4315_v17  ;;  %vm2606_vm0 = vcmp.lt.s32.totalorder %v18992_v35, 14 }
 0x538   : > { %v4359_v16 = vsel %vm18584_vm12, %v4317_v12, 0.0  ;;  %v4226_v52 = vadd.f32 %v9709_v23, %v18990_v45  ;;  %v15472_v3 = vld [vmem:[%s11759_s27 + $0xe2] sm:$0xff] }
 0x539   : > { %18991 = vst [vmem:[#allocation80_spill] sm:$0xff] %v15472_v3  ;;  %v15475_v5 = vld [vmem:[%s11759_s27 + $0xe8] sm:$0xff]  ;;  %4401 = vst [vmem:[%s11759_s27 + $0xf9] sm:$0xff] %v4359_v16  ;;  %v3955_v48 = vpop.f32.mrb[60].mxu1  ;;  %8679 = vmatprep.mubr.f32.mxu1 %v15472_v3 }
 0x53a   : > { %4920 = vmatmul.mubr.f32.gmra.mrb[196].mxu0 %v15475_v5  ;;  %v15481_v61 = vmax.f32 %v4226_v52, 0.0  ;;  %v9710_v17 = vadd.f32 %v15022_v14, %v3955_v48  ;;  %v3957_v0 = vpop.f32.mrb[61].mxu1  ;;  %v18994_v16 = vld [vmem:[#allocation95_spill] sm:$0xff]  ;;  %v18996_v52 = vld [vmem:[#allocation33_spill] sm:$0xff] }
 0x53b   : > { %10899 = vmatprep.mubr.msk.f32.mxu0 %vm18580_vm5, %v4316_v38  ;;  %vm2607_vm15 = vcmp.lt.s32.totalorder %v18996_v52, 14 }
 0x53c   : > { %18993 = vst [vmem:[#allocation84_spill] sm:$0xff] %v15481_v61  ;;  %v4360_v23 = vsel %vm2606_vm0, %v15481_v61, 0.0  ;;  %v4231_v45 = vadd.f32 %v9710_v17, %v18994_v16  ;;  %v15491_v28 = vld [vmem:[%s11759_s27 + $0xea] sm:$0xff] }
 0x53d   : > { %18995 = vst [vmem:[#allocation86_spill] sm:$0xff] %v15491_v28  ;;  %v15494_v18 = vld [vmem:[%s11759_s27 + $0xf0] sm:$0xff]  ;;  %4402 = vst [vmem:[%s11759_s27 + $0x101] sm:$0xff] %v4360_v23  ;;  %v3960_v0 = vpop.f32.mrb[62].mxu1  ;;  %8680 = vmatmul.mubr.f32.gmra.mrb[106].mxu1 %v15491_v28 }
 0x53e   : > { %4925 = vmatmul.mubr.f32.gmra.mrb[198].mxu0 %v15494_v18  ;;  %v15500_v38 = vmax.f32 %v4231_v45, 0.0  ;;  %v9711_v48 = vadd.f32 %v15022_v14, %v3960_v0  ;;  %v3962_v19 = vpop.f32.mrb[63].mxu1  ;;  %v18998_v23 = vld [vmem:[#allocation52_spill] sm:$0xff]  ;;  %v19001_v45 = vld [vmem:[#allocation34_spill] sm:$0xff] }
 0x53f   : > { %10900 = vmatprep.mubr.msk.f32.mxu0 %vm18584_vm12, %v4317_v12  ;;  %vm2608_vm5 = vcmp.lt.s32.totalorder %v19001_v45, 14 }
 0x540   : > { %18997 = vst [vmem:[#allocation90_spill] sm:$0xff] %v15500_v38  ;;  %v4361_v17 = vsel %vm2607_vm15, %v15500_v38, 0.0  ;;  %v4236_v16 = vadd.f32 %v9711_v48, %v18998_v23  ;;  %v15510_v28 = vld [vmem:[%s11759_s27 + $0xf2] sm:$0xff] }
 0x541   : > { %18999 = vst [vmem:[#allocation44_spill] sm:$0xff] %v15510_v28  ;;  %v15513_v3 = vld [vmem:[%s11759_s27 + $0xf8] sm:$0xff]  ;;  %4403 = vst [vmem:[%s11759_s27 + $0x109] sm:$0xff] %v4361_v17  ;;  %v3965_v19 = vpop.f32.mrb[64].mxu1  ;;  %8682 = vmatprep.mubr.f32.mxu1 %v15510_v28 }
 0x542   : > { %19000 = vst [vmem:[#allocation46_spill] sm:$0xff] %v15513_v3  ;;  %4930 = vmatmul.mubr.f32.gmra.mrb[200].mxu0 %v15513_v3  ;;  %v15519_v12 = vmax.f32 %v4236_v16, 0.0  ;;  %v9712_v0 = vadd.f32 %v15022_v14, %v3965_v19  ;;  %v3967_v44 = vpop.f32.mrb[65].mxu1  ;;  %v19003_v17 = vld [vmem:[#allocation97_spill] sm:$0xff]  ;;  %v19006_v19 = vld [vmem:[#allocation35_spill] sm:$0xff] }
 0x543   : > { %10901 = vmatprep.mubr.msk.f32.mxu0 %vm2606_vm0, %v15481_v61  ;;  %vm2609_vm12 = vcmp.lt.s32.totalorder %v19006_v19, 14 }
 0x544   : > { %19002 = vst [vmem:[#allocation47_spill] sm:$0xff] %v15519_v12  ;;  %v4362_v48 = vsel %vm2608_vm5, %v15519_v12, 0.0  ;;  %v4241_v23 = vadd.f32 %v9712_v0, %v19003_v17  ;;  %v15530_v28 = vld [vmem:[%s11759_s27 + $0xfa] sm:$0xff] }
 0x545   : > { %19004 = vst [vmem:[#allocation48_spill] sm:$0xff] %v15530_v28  ;;  %v15533_v16 = vld [vmem:[%s11759_s27 + $0x100] sm:$0xff]  ;;  %4404 = vst [vmem:[%s11759_s27 + $0x111] sm:$0xff] %v4362_v48  ;;  %v3970_v44 = vpop.f32.mrb[66].mxu1  ;;  %8683 = vmatmul.mubr.f32.gmra.mrb[108].mxu1 %v15530_v28  ;;  %v19008_v48 = vld [vmem:[#allocation96_spill] sm:$0xff] }
 0x546   : > { %19005 = vst [vmem:[#allocation49_spill] sm:$0xff] %v15533_v16  ;;  %4935 = vmatmul.mubr.f32.gmra.mrb[202].mxu0 %v15533_v16  ;;  %v15539_v35 = vmax.f32 %v4241_v23, 0.0  ;;  %v9713_v61 = vadd.f32 %v15022_v14, %v3970_v44  ;;  %v3972_v3 = vpop.f32.mrb[67].mxu1  ;;  %v19011_v44 = vld [vmem:[#allocation36_spill] sm:$0xff] }
 0x547   : > { %10902 = vmatprep.mubr.msk.f32.mxu0 %vm2607_vm15, %v15500_v38  ;;  %vm2610_vm10 = vcmp.lt.s32.totalorder %v19011_v44, 14 }
 0x548   : > { %19007 = vst [vmem:[#allocation51_spill] sm:$0xff] %v15539_v35  ;;  %v4363_v0 = vsel %vm2609_vm12, %v15539_v35, 0.0  ;;  %v4246_v17 = vadd.f32 %v9713_v61, %v19008_v48  ;;  %v15550_v28 = vld [vmem:[%s11759_s27 + $0x102] sm:$0xff] }
 0x549   : > { %19009 = vst [vmem:[#allocation53_spill] sm:$0xff] %v15550_v28  ;;  %v15553_v23 = vld [vmem:[%s11759_s27 + $0x108] sm:$0xff]  ;;  %4405 = vst [vmem:[%s11759_s27 + $0x119] sm:$0xff] %v4363_v0  ;;  %v3975_v3 = vpop.f32.mrb[68].mxu1  ;;  %8685 = vmatprep.mubr.f32.mxu1 %v15550_v28  ;;  %v19013_v0 = vld [vmem:[#allocation98_spill] sm:$0xff] }
 0x54a   : > { %19010 = vst [vmem:[#allocation54_spill] sm:$0xff] %v15553_v23  ;;  %4940 = vmatmul.mubr.f32.gmra.mrb[204].mxu0 %v15553_v23  ;;  %v15559_v52 = vmax.f32 %v4246_v17, 0.0  ;;  %v9714_v38 = vadd.f32 %v15022_v14, %v3975_v3  ;;  %v3977_v16 = vpop.f32.mrb[69].mxu1  ;;  %v19016_v3 = vld [vmem:[#allocation37_spill] sm:$0xff] }
 0x54b   : > { %10903 = vmatprep.mubr.msk.f32.mxu0 %vm2608_vm5, %v15519_v12  ;;  %vm2611_vm13 = vcmp.lt.s32.totalorder %v19016_v3, 14 }
 0x54c   : > { %19012 = vst [vmem:[#allocation55_spill] sm:$0xff] %v15559_v52  ;;  %v4364_v61 = vsel %vm2610_vm10, %v15559_v52, 0.0  ;;  %v4251_v48 = vadd.f32 %v9714_v38, %v19013_v0  ;;  %v15570_v28 = vld [vmem:[%s11759_s27 + $0x10a] sm:$0xff] }
 0x54d   : > { %19014 = vst [vmem:[#allocation56_spill] sm:$0xff] %v15570_v28  ;;  %v15573_v17 = vld [vmem:[%s11759_s27 + $0x110] sm:$0xff]  ;;  %4406 = vst [vmem:[%s11759_s27 + $0x121] sm:$0xff] %v4364_v61  ;;  %v3980_v16 = vpop.f32.mrb[70].mxu1  ;;  %8686 = vmatmul.mubr.f32.gmra.mrb[110].mxu1 %v15570_v28  ;;  %v19018_v61 = vld [vmem:[#allocation66_spill] sm:$0xff] }
 0x54e   : > { %19015 = vst [vmem:[#allocation57_spill] sm:$0xff] %v15573_v17  ;;  %4945 = vmatmul.mubr.f32.gmra.mrb[206].mxu0 %v15573_v17  ;;  %v15579_v45 = vmax.f32 %v4251_v48, 0.0  ;;  %v9715_v12 = vadd.f32 %v15022_v14, %v3980_v16  ;;  %v3982_v23 = vpop.f32.mrb[71].mxu1  ;;  %v19021_v16 = vld [vmem:[#allocation38_spill] sm:$0xff] }
 0x54f   : > { %10904 = vmatprep.mubr.msk.f32.mxu0 %vm2609_vm12, %v15539_v35  ;;  %vm2612_vm7 = vcmp.lt.s32.totalorder %v19021_v16, 14 }
 0x550   : > { %19017 = vst [vmem:[#allocation58_spill] sm:$0xff] %v15579_v45  ;;  %v4365_v38 = vsel %vm2611_vm13, %v15579_v45, 0.0  ;;  %v4256_v0 = vadd.f32 %v9715_v12, %v19018_v61  ;;  %v15590_v28 = vld [vmem:[%s11759_s27 + $0x112] sm:$0xff] }
 0x551   : > { %19019 = vst [vmem:[#allocation59_spill] sm:$0xff] %v15590_v28  ;;  %v15593_v48 = vld [vmem:[%s11759_s27 + $0x118] sm:$0xff]  ;;  %4407 = vst [vmem:[%s11759_s27 + $0x129] sm:$0xff] %v4365_v38  ;;  %v3985_v23 = vpop.f32.mrb[72].mxu1  ;;  %8688 = vmatprep.mubr.f32.mxu1 %v15590_v28  ;;  %v19023_v38 = vld [vmem:[#allocation99_spill] sm:$0xff] }
 0x552   : > { %19020 = vst [vmem:[#allocation60_spill] sm:$0xff] %v15593_v48  ;;  %4950 = vmatmul.mubr.f32.gmra.mrb[208].mxu0 %v15593_v48  ;;  %v15599_v19 = vmax.f32 %v4256_v0, 0.0  ;;  %v9716_v35 = vadd.f32 %v15022_v14, %v3985_v23  ;;  %v3987_v17 = vpop.f32.mrb[73].mxu1  ;;  %v19026_v23 = vld [vmem:[#allocation39_spill] sm:$0xff] }
 0x553   : > { %10905 = vmatprep.mubr.msk.f32.mxu0 %vm2610_vm10, %v15559_v52  ;;  %vm2613_vm3 = vcmp.lt.s32.totalorder %v19026_v23, 14 }
 0x554   : > { %19022 = vst [vmem:[#allocation61_spill] sm:$0xff] %v15599_v19  ;;  %v4366_v12 = vsel %vm2612_vm7, %v15599_v19, 0.0  ;;  %v4261_v61 = vadd.f32 %v9716_v35, %v19023_v38  ;;  %v15610_v28 = vld [vmem:[%s11759_s27 + $0x11a] sm:$0xff] }
 0x555   : > { %19024 = vst [vmem:[#allocation62_spill] sm:$0xff] %v15610_v28  ;;  %v15613_v0 = vld [vmem:[%s11759_s27 + $0x120] sm:$0xff]  ;;  %4408 = vst [vmem:[%s11759_s27 + $0x131] sm:$0xff] %v4366_v12  ;;  %v3990_v17 = vpop.f32.mrb[74].mxu1  ;;  %8689 = vmatmul.mubr.f32.gmra.mrb[112].mxu1 %v15610_v28 }
 0x556   : > { %19025 = vst [vmem:[#allocation63_spill] sm:$0xff] %v15613_v0  ;;  %4955 = vmatmul.mubr.f32.gmra.mrb[210].mxu0 %v15613_v0  ;;  %v15619_v44 = vmax.f32 %v4261_v61, 0.0  ;;  %v9717_v52 = vadd.f32 %v15022_v14, %v3990_v17  ;;  %v3992_v48 = vpop.f32.mrb[75].mxu1  ;;  %v19028_v12 = vld [vmem:[#allocation70_spill] sm:$0xff]  ;;  %v19031_v17 = vld [vmem:[#allocation40_spill] sm:$0xff] }
 0x557   : > { %10906 = vmatprep.mubr.msk.f32.mxu0 %vm2611_vm13, %v15579_v45  ;;  %vm2614_vm14 = vcmp.lt.s32.totalorder %v19031_v17, 14 }
 0x558   : > { %19027 = vst [vmem:[#allocation64_spill] sm:$0xff] %v15619_v44  ;;  %v4367_v35 = vsel %vm2613_vm3, %v15619_v44, 0.0  ;;  %v4266_v38 = vadd.f32 %v9717_v52, %v19028_v12  ;;  %v15630_v28 = vld [vmem:[%s11759_s27 + $0x122] sm:$0xff] }
 0x559   : > { %19029 = vst [vmem:[#allocation65_spill] sm:$0xff] %v15630_v28  ;;  %v15633_v61 = vld [vmem:[%s11759_s27 + $0x128] sm:$0xff]  ;;  %4409 = vst [vmem:[%s11759_s27 + $0x139] sm:$0xff] %v4367_v35  ;;  %v3995_v48 = vpop.f32.mrb[76].mxu1  ;;  %8691 = vmatprep.mubr.f32.mxu1 %v15630_v28  ;;  %v19033_v35 = vld [vmem:[#allocation74_spill] sm:$0xff] }
 0x55a   : > { %19030 = vst [vmem:[#allocation67_spill] sm:$0xff] %v15633_v61  ;;  %4960 = vmatmul.mubr.f32.gmra.mrb[212].mxu0 %v15633_v61  ;;  %v15639_v3 = vmax.f32 %v4266_v38, 0.0  ;;  %v9718_v45 = vadd.f32 %v15022_v14, %v3995_v48  ;;  %v3997_v0 = vpop.f32.mrb[77].mxu1  ;;  %v19036_v48 = vld [vmem:[#allocation41_spill] sm:$0xff] }
 0x55b   : > { %10907 = vmatprep.mubr.msk.f32.mxu0 %vm2612_vm7, %v15599_v19  ;;  %vm2615_vm2 = vcmp.lt.s32.totalorder %v19036_v48, 14  ;;  %v19047_v48 = vld [vmem:[#allocation45_spill] sm:$0xff] }
 0x55c   : > { %19032 = vst [vmem:[#allocation68_spill] sm:$0xff] %v15639_v3  ;;  %v4368_v52 = vsel %vm2614_vm14, %v15639_v3, 0.0  ;;  %v4271_v12 = vadd.f32 %v9718_v45, %v19033_v35  ;;  %v15650_v28 = vld [vmem:[%s11759_s27 + $0x12a] sm:$0xff]  ;;  %vm2618_vm4 = vcmp.lt.s32.totalorder %v19047_v48, 14 }
 0x55d   : > { %19034 = vst [vmem:[#allocation69_spill] sm:$0xff] %v15650_v28  ;;  %v15653_v38 = vld [vmem:[%s11759_s27 + $0x130] sm:$0xff]  ;;  %4410 = vst [vmem:[%s11759_s27 + $0x141] sm:$0xff] %v4368_v52  ;;  %v4000_v0 = vpop.f32.mrb[78].mxu1  ;;  %8692 = vmatmul.mubr.f32.gmra.mrb[114].mxu1 %v15650_v28 }
 0x55e   : > { %19035 = vst [vmem:[#allocation71_spill] sm:$0xff] %v15653_v38  ;;  %4965 = vmatmul.mubr.f32.gmra.mrb[214].mxu0 %v15653_v38  ;;  %v15659_v16 = vmax.f32 %v4271_v12, 0.0  ;;  %v9719_v19 = vadd.f32 %v15022_v14, %v4000_v0  ;;  %v4002_v61 = vpop.f32.mrb[79].mxu1  ;;  %v19038_v52 = vld [vmem:[#allocation72_spill] sm:$0xff]  ;;  %v19042_v14 = vld [vmem:[#allocation42_spill] sm:$0xff] }
 0x55f   : > { %10908 = vmatprep.mubr.msk.f32.mxu0 %vm2613_vm3, %v15619_v44  ;;  %vm2616_vm6 = vcmp.lt.s32.totalorder %v19042_v14, 14  ;;  %v19043_v44 = vld [vmem:[#allocation100_spill] sm:$0xff] }
 0x560   : > { %19037 = vst [vmem:[#allocation73_spill] sm:$0xff] %v15659_v16  ;;  %v4369_v45 = vsel %vm2615_vm2, %v15659_v16, 0.0  ;;  %v15669_v35 = vadd.f32 %v9719_v19, %v19038_v52  ;;  %v15672_v28 = vld [vmem:[%s11759_s27 + $0x132] sm:$0xff]  ;;  %v10711_v19 = vld [vmem:[%s18355_s4] ss:$0 sm:$0xff] }
 0x561   : > { %19040 = vst [vmem:[#allocation79_spill] sm:$0xff] %v15672_v28  ;;  %v15675_v12 = vld [vmem:[%s11759_s27 + $0x138] sm:$0xff]  ;;  %4411 = vst [vmem:[%s11759_s27 + $0x149] sm:$0xff] %v4369_v45  ;;  %v4005_v61 = vpop.f32.mrb[80].mxu1  ;;  %8694 = vmatprep.mubr.f32.mxu1 %v15672_v28 }
 0x562   : > { %19039 = vst [vmem:[#allocation75_spill] sm:$0xff] %v15669_v35  ;;  %19041 = vst [vmem:[#allocation81_spill] sm:$0xff] %v15675_v12  ;;  %4970 = vmatmul.mubr.f32.gmra.mrb[216].mxu0 %v15675_v12  ;;  %v18635_v0 = vmax.f32 %v15669_v35, 0.0  ;;  %v9720_v52 = vadd.f32 %v10711_v19, %v4005_v61  ;;  %v4007_v23 = vpop.f32.mrb[81].mxu1  ;;  %v19046_v35 = vld [vmem:[#allocation78_spill] sm:$0xff] }
 0x563   : > { %10909 = vmatprep.mubr.msk.f32.mxu0 %vm2614_vm14, %v15639_v3  ;;  %v19044_v23 = vld [vmem:[#allocation43_spill] sm:$0xff] }
 0x564   : > { %v4370_v45 = vsel %vm2616_vm6, %v18635_v0, 0.0  ;;  %v4281_v28 = vadd.f32 %v9720_v52, %v19043_v44  ;;  %v15694_v12 = vld [vmem:[%s11759_s27 + $0x13a] sm:$0xff]  ;;  %vm2617_vm11 = vcmp.lt.s32.totalorder %v19044_v23, 14 }
 0x565   : > { %v15697_v38 = vld [vmem:[%s11759_s27 + $0x140] sm:$0xff]  ;;  %4412 = vst [vmem:[%s11759_s27 + $0x151] sm:$0xff] %v4370_v45  ;;  %v4010_v61 = vpop.f32.mrb[82].mxu1  ;;  %8695 = vmatmul.mubr.f32.gmra.mrb[116].mxu1 %v15694_v12  ;;  %v4624_v45 = vld [vmem:[%s18356_s5 + $0x208] sm:$0xff]  ;;  %v10712_v23 = vld [vmem:[%s11759_s27 + $0x18] sm:$0xff] }
 0x566   : > { %4975 = vmatmul.mubr.f32.gmra.mrb[218].mxu0 %v15697_v38  ;;  %v15703_v14 = vmax.f32 %v4281_v28, 0.0  ;;  %v9721_v0 = vadd.f32 %v10711_v19, %v4010_v61  ;;  %v4012_v44 = vpop.f32.mrb[83].mxu1  ;;  %v4623_v52 = vld [vmem:[%s18356_s5 + $0x200] sm:$0xff] }
 0x567   : > { %10910 = vmatprep.mubr.msk.f32.mxu0 %vm2615_vm2, %v15659_v16 }
 0x568   : > { %19045 = vst [vmem:[#allocation85_spill] sm:$0xff] %v15703_v14  ;;  %v4371_v28 = vsel %vm2617_vm11, %v15703_v14, 0.0  ;;  %v4286_v19 = vadd.f32 %v9721_v0, %v19046_v35  ;;  %v15719_v61 = vld [vmem:[%s11759_s27 + $0x142] sm:$0xff]  ;;  %v9185_v35 = vpack.c.bf16 %v4624_v45, %v4623_v52  ;;  %v4625_v0 = vld [vmem:[%s18356_s5 + $0x210] sm:$0xff] }
 0x569   : > { %v15722_v44 = vld [vmem:[%s11759_s27 + $0x148] sm:$0xff]  ;;  %4413 = vst [vmem:[%s11759_s27 + $0x159] sm:$0xff] %v4371_v28  ;;  %8697 = vmatprep.mubr.f32.mxu1 %v15719_v61  ;;  %v4626_v28 = vld [vmem:[%s18356_s5 + $0x218] sm:$0xff] }
 0x56a   : > { %4980 = vmatmul.mubr.f32.gmra.mrb[220].mxu0 %v15722_v44  ;;  %v15728_v16 = vmax.f32 %v4286_v19, 0.0  ;;  %v4499_v14 = vld [vmem:[%s11759_s27 + $0x2] sm:$0xff]  ;;  %v9188_v52 = vpack.c.bf16 %v4626_v28, %v4625_v0 }
 0x56b   : > { %5049 = vmatprep.mubr.f32.mxu0 %v10712_v23  ;;  %v4500_v23 = vld [vmem:[%s11759_s27 + $0xa] sm:$0xff]  ;;  %v4627_v19 = vld [vmem:[%s18356_s5 + $0x220] sm:$0xff] }
 0x56c   : > { %v4372_v17 = vsel %vm2618_vm4, %v15728_v16, 0.0  ;;  %v15742_v3 = vld [vmem:[%s11759_s27 + $0x14a] sm:$0xff] }
 0x56d   : > { %4414 = vst [vmem:[%s11759_s27 + $0x161] sm:$0xff] %v4372_v17  ;;  %8698 = vmatmul.mubr.f32.gmra.mrb[118].mxu1 %v15742_v3  ;;  %v4628_v17 = vld [vmem:[%s18356_s5 + $0x228] sm:$0xff] }
 0x56e   : > { %5050 = vmatmul.mubr.f32.vlgmr.msra.gmra.mrb[138].mxu0 %v4499_v14  ;;  %v9191_v14 = vpack.c.bf16 %v4628_v17, %v4627_v19  ;;  %v4631_v19 = vld [vmem:[%s18356_s5 + $0x240] sm:$0xff]  ;;  %v4632_v17 = vld [vmem:[%s18356_s5 + $0x248] sm:$0xff] }
 0x56f   : > { %5054 = vmatprep.mubr.f32.mxu0 %v15069_v36  ;;  %9186 = vmatpush1.bf16.msra.mxu0 %v9185_v35  ;;  %v4501_v36 = vld [vmem:[%s11759_s27 + $0x12] sm:$0xff] }
 0x570   : > { %9187 = vmatprep.subr.bf16.mxu0 %v18681_v9  ;;  %v15750_v45 = vld [vmem:[%s11759_s27 + $0x152] sm:$0xff] }
 0x571   : > { %8700 = vmatprep.mubr.f32.mxu1 %v15750_v45  ;;  %v4629_v35 = vld [vmem:[%s18356_s5 + $0x230] sm:$0xff] }
 0x572   : > { %5055 = vmatmul.mubr.f32.gmra.mrb[140].mxu0 %v4500_v23  ;;  %v4630_v23 = vld [vmem:[%s18356_s5 + $0x238] sm:$0xff] }
 0x573   : > { %5059 = vmatprep.mubr.f32.mxu0 %v15087_v56  ;;  %9189 = vmatpush1.bf16.msra.mxu0 %v9188_v52  ;;  %v9194_v56 = vpack.c.bf16 %v4630_v23, %v4629_v35  ;;  %v15778_v52 = vld [vmem:[%s11759_s27 + $0x1a] sm:$0xff]  ;;  %v15802_v23 = vld [vmem:[%s11759_s27 + $0x2a] sm:$0xff] }
 0x574   : > { %9190 = vmatprep.subr.bf16.mxu0 %v18681_v9  ;;  %v15766_v0 = vld [vmem:[%s11759_s27 + $0x15a] sm:$0xff]  ;;  %v15769_v28 = vld [vmem:[%s11759_s27 + $0x162] sm:$0xff] }
 0x575   : > { %8701 = vmatmul.mubr.f32.gmra.mrb[120].mxu1 %v15766_v0  ;;  %v4634_v35 = vld [vmem:[%s18356_s5 + $0x258] sm:$0xff] }
 0x576   : > { %5060 = vmatmul.mubr.f32.gmra.mrb[142].mxu0 %v4501_v36  ;;  %8703 = vmatprep.mubr.f32.mxu1 %v15769_v28  ;;  %v15790_v36 = vld [vmem:[%s11759_s27 + $0x22] sm:$0xff] }
 0x577   : > { %5064 = vmatprep.mubr.f32.mxu0 %v15100_v42  ;;  %9192 = vmatpush1.bf16.msra.mxu0 %v9191_v14  ;;  %v9197_v42 = vpack.c.bf16 %v4632_v17, %v4631_v19  ;;  %v4633_v14 = vld [vmem:[%s18356_s5 + $0x250] sm:$0xff]  ;;  %v4636_v19 = vld [vmem:[%s18356_s5 + $0x268] sm:$0xff] }
 0x578   : > { %9193 = vmatprep.subr.bf16.mxu0 %v18681_v9  ;;  %v4637_v17 = vld [vmem:[%s18356_s5 + $0x270] sm:$0xff] }
 0x57a   : > { %5065 = vmatmul.mubr.f32.gmra.mrb[144].mxu0 %v15778_v52 }
 0x57b   : > { %5069 = vmatprep.mubr.f32.mxu0 %v15113_v26  ;;  %9195 = vmatpush1.bf16.msra.mxu0 %v9194_v56  ;;  %v9200_v26 = vpack.c.bf16 %v4634_v35, %v4633_v14  ;;  %v4635_v56 = vld [vmem:[%s18356_s5 + $0x260] sm:$0xff]  ;;  %v15821_v14 = vld [vmem:[%s11759_s27 + $0x32] sm:$0xff] }
 0x57c   : > { %9196 = vmatprep.subr.bf16.mxu0 %v18681_v9  ;;  %v4639_v35 = vld [vmem:[%s18356_s5 + $0x280] sm:$0xff] }
 0x57e   : > { %5070 = vmatmul.mubr.f32.gmra.mrb[146].mxu0 %v15790_v36 }
 0x57f   : > { %5074 = vmatprep.mubr.f32.mxu0 %v15132_v41  ;;  %9198 = vmatpush1.bf16.msra.mxu0 %v9197_v42  ;;  %v9203_v41 = vpack.c.bf16 %v4636_v19, %v4635_v56  ;;  %v4638_v42 = vld [vmem:[%s18356_s5 + $0x278] sm:$0xff]  ;;  %v4641_v19 = vld [vmem:[%s18356_s5 + $0x290] sm:$0xff] }
 0x580   : > { %9199 = vmatprep.subr.bf16.mxu0 %v18681_v9  ;;  %v15833_v56 = vld [vmem:[%s11759_s27 + $0x3a] sm:$0xff] }
 0x582   : > { %5075 = vmatmul.mubr.f32.gmra.mrb[148].mxu0 %v15802_v23 }
 0x583   : > { %5079 = vmatprep.mubr.f32.mxu0 %v15148_v27  ;;  %9201 = vmatpush1.bf16.msra.mxu0 %v9200_v26  ;;  %v9206_v27 = vpack.c.bf16 %v4638_v42, %v4637_v17  ;;  %v4640_v26 = vld [vmem:[%s18356_s5 + $0x288] sm:$0xff] }
 0x584   : > { %9202 = vmatprep.subr.bf16.mxu0 %v18681_v9  ;;  %v4644_v42 = vld [vmem:[%s18356_s5 + $0x2a8] sm:$0xff] }
 0x586   : > { %5080 = vmatmul.mubr.f32.gmra.mrb[150].mxu0 %v15821_v14 }
 0x587   : > { %5084 = vmatprep.mubr.f32.mxu0 %v15170_v40  ;;  %9204 = vmatpush1.bf16.msra.mxu0 %v9203_v41  ;;  %v9209_v40 = vpack.c.bf16 %v4640_v26, %v4639_v35  ;;  %v4642_v41 = vld [vmem:[%s18356_s5 + $0x298] sm:$0xff]  ;;  %v4648_v35 = vld [vmem:[%s18356_s5 + $0x2c8] sm:$0xff] }
 0x588   : > { %9205 = vmatprep.subr.bf16.mxu0 %v18681_v9  ;;  %v9212_v17 = vpack.c.bf16 %v4642_v41, %v4641_v19  ;;  %v4650_v26 = vld [vmem:[%s18356_s5 + $0x2d8] sm:$0xff]  ;;  %v19064_v41 = vld [vmem:[#allocation67_spill] sm:$0xff] }
 0x589   : > { %v4654_v19 = vld [vmem:[%s18356_s5 + $0x2f8] sm:$0xff] }
 0x58a   : > { %5085 = vmatmul.mubr.f32.gmra.mrb[152].mxu0 %v15833_v56 }
 0x58b   : > { %5089 = vmatprep.mubr.f32.mxu0 %v15187_v20  ;;  %9207 = vmatpush1.bf16.msra.mxu0 %v9206_v27  ;;  %v4643_v20 = vld [vmem:[%s18356_s5 + $0x2a0] sm:$0xff]  ;;  %v4646_v27 = vld [vmem:[%s18356_s5 + $0x2b8] sm:$0xff] }
 0x58c   : > { %9208 = vmatprep.subr.bf16.mxu0 %v18681_v9 }
 0x58e   : > { %5090 = vmatmul.mubr.f32.gmra.mrb[154].mxu0 %v15145_v49  ;;  %v9215_v49 = vpack.c.bf16 %v4644_v42, %v4643_v20  ;;  %v19066_v20 = vld [vmem:[#allocation71_spill] sm:$0xff] }
 0x58f   : > { %5094 = vmatprep.mubr.f32.mxu0 %v15203_v7  ;;  %9210 = vmatpush1.bf16.msra.mxu0 %v9209_v40  ;;  %v4645_v7 = vld [vmem:[%s18356_s5 + $0x2b0] sm:$0xff]  ;;  %v4652_v40 = vld [vmem:[%s18356_s5 + $0x2e8] sm:$0xff] }
 0x590   : > { %9211 = vmatprep.subr.bf16.mxu0 %v18681_v9 }
 0x592   : > { %5095 = vmatmul.mubr.f32.gmra.mrb[156].mxu0 %v15167_v39  ;;  %v9218_v39 = vpack.c.bf16 %v4646_v27, %v4645_v7  ;;  %v19069_v7 = vld [vmem:[#allocation62_spill] sm:$0xff]  ;;  %v19070_v27 = vld [vmem:[#allocation81_spill] sm:$0xff] }
 0x593   : > { %5099 = vmatprep.mubr.f32.mxu0 %v15219_v6  ;;  %9213 = vmatpush1.bf16.msra.mxu0 %v9212_v17  ;;  %v4647_v6 = vld [vmem:[%s18356_s5 + $0x2c0] sm:$0xff]  ;;  %v19065_v17 = vld [vmem:[#allocation59_spill] sm:$0xff] }
 0x594   : > { %9214 = vmatprep.subr.bf16.mxu0 %v18681_v9 }
 0x596   : > { %5100 = vmatmul.mubr.f32.gmra.mrb[158].mxu0 %v15184_v24  ;;  %v9221_v24 = vpack.c.bf16 %v4648_v35, %v4647_v6 }
 0x597   : > { %5104 = vmatprep.mubr.f32.mxu0 %v15235_v34  ;;  %9216 = vmatpush1.bf16.msra.mxu0 %v9215_v49  ;;  %v4649_v34 = vld [vmem:[%s18356_s5 + $0x2d0] sm:$0xff] }
 0x598   : > { %9217 = vmatprep.subr.bf16.mxu0 %v18681_v9 }
 0x59a   : > { %5105 = vmatmul.mubr.f32.gmra.mrb[160].mxu0 %v15200_v31  ;;  %v9224_v31 = vpack.c.bf16 %v4650_v26, %v4649_v34  ;;  %v19075_v34 = vld [vmem:[#allocation79_spill] sm:$0xff]  ;;  %v15990_v26 = vld [vmem:[%s11759_s27 + $0x150] sm:$0xff] }
 0x59b   : > { %5109 = vmatprep.mubr.f32.mxu0 %v15251_v59  ;;  %9219 = vmatpush1.bf16.msra.mxu0 %v9218_v39  ;;  %v4651_v59 = vld [vmem:[%s18356_s5 + $0x2e0] sm:$0xff]  ;;  %v19071_v39 = vld [vmem:[#allocation65_spill] sm:$0xff] }
 0x59c   : > { %9220 = vmatprep.subr.bf16.mxu0 %v18681_v9 }
 0x59e   : > { %5110 = vmatmul.mubr.f32.gmra.mrb[162].mxu0 %v15216_v30  ;;  %v9227_v30 = vpack.c.bf16 %v4652_v40, %v4651_v59  ;;  %v16004_v40 = vld [vmem:[%s11759_s27 + $0x160] sm:$0xff] }
 0x59f   : > { %5114 = vmatprep.mubr.f32.mxu0 %v15267_v21  ;;  %9222 = vmatpush1.bf16.msra.mxu0 %v9221_v24  ;;  %v4653_v21 = vld [vmem:[%s18356_s5 + $0x2f0] sm:$0xff]  ;;  %v19074_v24 = vld [vmem:[#allocation69_spill] sm:$0xff] }
 0x5a0   : > { %9223 = vmatprep.subr.bf16.mxu0 %v18681_v9 }
 0x5a2   : > { %5115 = vmatmul.mubr.f32.gmra.mrb[164].mxu0 %v15232_v60  ;;  %v9230_v60 = vpack.c.bf16 %v4654_v19, %v4653_v21  ;;  %v4656_v21 = vld [vmem:[%s18356_s5 + $0x308] sm:$0xff] }
 0x5a3   : > { %5119 = vmatprep.mubr.f32.mxu0 %v15283_v37  ;;  %9225 = vmatpush1.bf16.msra.mxu0 %v9224_v31 }
 0x5a4   : > { %9226 = vmatprep.subr.bf16.mxu0 %v18681_v9 }
 0x5a6   : > { %5120 = vmatmul.mubr.f32.gmra.mrb[166].mxu0 %v15248_v2 }
 0x5a7   : > { %5124 = vmatprep.mubr.f32.mxu0 %v15299_v55  ;;  %9228 = vmatpush1.bf16.msra.mxu0 %v9227_v30  ;;  %v4655_v30 = vld [vmem:[%s18356_s5 + $0x300] sm:$0xff] }
 0x5a8   : > { %9229 = vmatprep.subr.bf16.mxu0 %v18681_v9 }
 0x5aa   : > { %5125 = vmatmul.mubr.f32.gmra.mrb[168].mxu0 %v15264_v54  ;;  %v19050_v54 = vld [vmem:[#allocation49_spill] sm:$0xff] }
 0x5ab   : > { %5129 = vmatprep.mubr.f32.mxu0 %v15315_v58  ;;  %9231 = vmatpush1.bf16.msra.mxu0 %v9230_v60 }
 0x5ac   : > { %9232 = vmatprep.subr.bf16.mxu0 %v18681_v9 }
 0x5ae   : > { %5130 = vmatmul.mubr.f32.gmra.mrb[170].mxu0 %v15280_v50 }
 0x5af   : > { %5134 = vmatprep.mubr.f32.mxu0 %v15331_v10 }
 0x5b2   : > { %5135 = vmatmul.mubr.f32.gmra.mrb[172].mxu0 %v15296_v4  ;;  %v19052_v4 = vld [vmem:[#allocation54_spill] sm:$0xff] }
 0x5b3   : > { %5139 = vmatprep.mubr.f32.mxu0 %v15347_v33 }
 0x5b6   : > { %5140 = vmatmul.mubr.f32.gmra.mrb[174].mxu0 %v15312_v62  ;;  %v19054_v62 = vld [vmem:[#allocation57_spill] sm:$0xff] }
 0x5b7   : > { %5144 = vmatprep.mubr.f32.mxu0 %v15363_v57 }
 0x5b8   : > { %v15910_v55 = vpop.f32.mrb[84].mxu1 }
 0x5b9   : > { %v15912_v2 = vpop.f32.mrb[85].mxu1 }
 0x5ba   : > { %5145 = vmatmul.mubr.f32.gmra.mrb[176].mxu0 %v15328_v46 }
 0x5bb   : > { %5149 = vmatprep.mubr.f32.mxu0 %v15379_v53 }
 0x5be   : > { %5150 = vmatmul.mubr.f32.gmra.mrb[178].mxu0 %v15344_v1 }
 0x5bf   : > { %5154 = vmatprep.mubr.f32.mxu0 %v15395_v47 }
 0x5c0   : > { %v15918_v10 = vpop.f32.mrb[86].mxu1 }
 0x5c1   : > { %v15920_v58 = vpop.f32.mrb[87].mxu1 }
 0x5c2   : > { %5155 = vmatmul.mubr.f32.gmra.mrb[180].mxu0 %v15360_v8  ;;  %v19057_v8 = vld [vmem:[#allocation48_spill] sm:$0xff] }
 0x5c3   : > { %5159 = vmatprep.mubr.f32.mxu0 %v15411_v25 }
 0x5c6   : > { %5160 = vmatmul.mubr.f32.gmra.mrb[182].mxu0 %v15376_v29  ;;  %v19058_v29 = vld [vmem:[#allocation60_spill] sm:$0xff] }
 0x5c7   : > { %5164 = vmatprep.mubr.f32.mxu0 %v15427_v15 }
 0x5c8   : > { %v15926_v57 = vpop.f32.mrb[88].mxu1 }
 0x5c9   : > { %v15928_v33 = vpop.f32.mrb[89].mxu1 }
 0x5ca   : > { %5165 = vmatmul.mubr.f32.gmra.mrb[184].mxu0 %v15392_v63  ;;  %v19059_v63 = vld [vmem:[#allocation53_spill] sm:$0xff] }
 0x5cb   : > { %5169 = vmatprep.mubr.f32.mxu0 %v15443_v43  ;;  %v19048_v43 = vld [vmem:[#allocation46_spill] sm:$0xff] }
 0x5ce   : > { %5170 = vmatmul.mubr.f32.gmra.mrb[186].mxu0 %v15408_v11  ;;  %v19060_v11 = vld [vmem:[#allocation63_spill] sm:$0xff] }
 0x5cf   : > { %5174 = vmatprep.mubr.f32.mxu0 %v15459_v32  ;;  %v19049_v32 = vld [vmem:[#allocation80_spill] sm:$0xff] }
 0x5d0   : > { %v15934_v47 = vpop.f32.mrb[90].mxu1 }
 0x5d1   : > { %v15936_v53 = vpop.f32.mrb[91].mxu1 }
 0x5d2   : > { %5175 = vmatmul.mubr.f32.gmra.mrb[188].mxu0 %v15424_v13 }
 0x5d3   : > { %5179 = vmatprep.mubr.f32.mxu0 %v15475_v5  ;;  %v19051_v5 = vld [vmem:[#allocation86_spill] sm:$0xff] }
 0x5d6   : > { %5180 = vmatmul.mubr.f32.gmra.mrb[190].mxu0 %v15440_v22 }
 0x5d7   : > { %5184 = vmatprep.mubr.f32.mxu0 %v15494_v18  ;;  %v19053_v18 = vld [vmem:[#allocation44_spill] sm:$0xff] }
 0x5d8   : > { %v15942_v15 = vpop.f32.mrb[92].mxu1 }
 0x5d9   : > { %v15944_v25 = vpop.f32.mrb[93].mxu1 }
 0x5da   : > { %5185 = vmatmul.mubr.f32.gmra.mrb[192].mxu0 %v15456_v51  ;;  %v19063_v51 = vld [vmem:[#allocation56_spill] sm:$0xff] }
 0x5db   : > { %5189 = vmatprep.mubr.f32.mxu0 %v19048_v43  ;;  %v9233_v43 = vpack.c.bf16 %v4656_v21, %v4655_v30  ;;  %v4662_v30 = vld [vmem:[%s18356_s5 + $0x338] sm:$0xff]  ;;  %v10717_v21 = vld [vmem:[%s11759_s27 + $0x29] sm:$0xff] }
 0x5de   : > { %5190 = vmatmul.mubr.f32.gmra.mrb[194].mxu0 %v19049_v32  ;;  %v4657_v32 = vld [vmem:[%s18356_s5 + $0x310] sm:$0xff] }
 0x5df   : > { %5194 = vmatprep.mubr.f32.mxu0 %v19050_v54  ;;  %v4658_v54 = vld [vmem:[%s18356_s5 + $0x318] sm:$0xff] }
 0x5e0   : > { %v15950_v50 = vpop.f32.mrb[94].mxu1 }
 0x5e1   : > { %v15952_v37 = vpop.f32.mrb[95].mxu1 }
 0x5e2   : > { %5195 = vmatmul.mubr.f32.gmra.mrb[196].mxu0 %v19051_v5 }
 0x5e3   : > { %5199 = vmatprep.mubr.f32.mxu0 %v19052_v4  ;;  %v10715_v4 = vld [vmem:[%s11759_s27 + $0x19] sm:$0xff] }
 0x5e6   : > { %5200 = vmatmul.mubr.f32.gmra.mrb[198].mxu0 %v19053_v18 }
 0x5e7   : > { %5204 = vmatprep.mubr.f32.mxu0 %v19054_v62  ;;  %v9236_v62 = vpack.c.bf16 %v4658_v54, %v4657_v32  ;;  %v4664_v32 = vld [vmem:[%s18356_s5 + $0x348] sm:$0xff] }
 0x5e8   : > { %v15958_v46 = vpop.f32.mrb[96].mxu1 }
 0x5e9   : > { %19055 = vst [vmem:[#allocation87_spill] sm:$0xff] %v15958_v46  ;;  %v15960_v1 = vpop.f32.mrb[97].mxu1  ;;  %v19098_v46 = vld [vmem:[#allocation47_spill] sm:$0xff] }
 0x5ea   : > { %19056 = vst [vmem:[#allocation91_spill] sm:$0xff] %v15960_v1  ;;  %5205 = vmatmul.mubr.f32.gmra.mrb[200].mxu0 %v19057_v8  ;;  %v19100_v1 = vld [vmem:[#allocation51_spill] sm:$0xff] }
 0x5eb   : > { %5209 = vmatprep.mubr.f32.mxu0 %v19058_v29  ;;  %v4660_v29 = vld [vmem:[%s18356_s5 + $0x328] sm:$0xff] }
 0x5ee   : > { %5210 = vmatmul.mubr.f32.gmra.mrb[202].mxu0 %v19059_v63 }
 0x5ef   : > { %5214 = vmatprep.mubr.f32.mxu0 %v19060_v11 }
 0x5f0   : > { %v15966_v13 = vpop.f32.mrb[98].mxu1 }
 0x5f1   : > { %19061 = vst [vmem:[#allocation92_spill] sm:$0xff] %v15966_v13  ;;  %v15968_v22 = vpop.f32.mrb[99].mxu1  ;;  %v16279_v13 = vld [vmem:[%s11759_s27 + $0xf1] sm:$0xff] }
 0x5f2   : > { %19062 = vst [vmem:[#allocation77_spill] sm:$0xff] %v15968_v22  ;;  %5215 = vmatmul.mubr.f32.gmra.mrb[204].mxu0 %v19063_v51  ;;  %v19096_v22 = vld [vmem:[#allocation90_spill] sm:$0xff] }
 0x5f3   : > { %5219 = vmatprep.mubr.f32.mxu0 %v19064_v41 }
 0x5f6   : > { %5220 = vmatmul.mubr.f32.gmra.mrb[206].mxu0 %v19065_v17 }
 0x5f7   : > { %5224 = vmatprep.mubr.f32.mxu0 %v19066_v20  ;;  %v10716_v20 = vld [vmem:[%s11759_s27 + $0x21] sm:$0xff] }
 0x5f8   : > { %v15974_v42 = vpop.f32.mrb[100].mxu1 }
 0x5f9   : > { %19067 = vst [vmem:[#allocation76_spill] sm:$0xff] %v15974_v42  ;;  %v15976_v49 = vpop.f32.mrb[101].mxu1  ;;  %v16264_v42 = vld [vmem:[%s11759_s27 + $0xd9] sm:$0xff] }
 0x5fa   : > { %19068 = vst [vmem:[#allocation83_spill] sm:$0xff] %v15976_v49  ;;  %5225 = vmatmul.mubr.f32.gmra.mrb[208].mxu0 %v19069_v7  ;;  %v16269_v49 = vld [vmem:[%s11759_s27 + $0xe1] sm:$0xff] }
 0x5fb   : > { %5229 = vmatprep.mubr.f32.mxu0 %v19070_v27  ;;  %v4661_v27 = vld [vmem:[%s18356_s5 + $0x330] sm:$0xff] }
 0x5fe   : > { %5230 = vmatmul.mubr.f32.gmra.mrb[210].mxu0 %v19071_v39 }
 0x5ff   : > { %5234 = vmatprep.mubr.f32.mxu0 %v15697_v38  ;;  %v15999_v38 = vld [vmem:[%s11759_s27 + $0x158] sm:$0xff] }
 0x600   : > { %v15982_v6 = vpop.f32.mrb[102].mxu1 }
 0x601   : > { %19072 = vst [vmem:[#allocation82_spill] sm:$0xff] %v15982_v6  ;;  %v15984_v35 = vpop.f32.mrb[103].mxu1  ;;  %v16254_v6 = vld [vmem:[%s11759_s27 + $0xc9] sm:$0xff] }
 0x602   : > { %19073 = vst [vmem:[#allocation89_spill] sm:$0xff] %v15984_v35  ;;  %5235 = vmatmul.mubr.f32.gmra.mrb[212].mxu0 %v19074_v24  ;;  %v16259_v35 = vld [vmem:[%s11759_s27 + $0xd1] sm:$0xff] }
 0x603   : > { %5239 = vmatprep.mubr.f32.mxu0 %v15722_v44 }
 0x606   : > { %5240 = vmatmul.mubr.f32.gmra.mrb[214].mxu0 %v19075_v34 }
 0x607   : > { %5244 = vmatprep.mubr.f32.mxu0 %v15990_v26 }
 0x608   : > { %v15993_v31 = vpop.f32.mrb[104].mxu1 }
 0x609   : > { %19076 = vst [vmem:[#allocation88_spill] sm:$0xff] %v15993_v31  ;;  %v15995_v59 = vpop.f32.mrb[105].mxu1  ;;  %v16201_v31 = vld [vmem:[%s11759_s27 + $0x81] sm:$0xff] }
 0x60a   : > { %19077 = vst [vmem:[#allocation94_spill] sm:$0xff] %v15995_v59  ;;  %5245 = vmatmul.mubr.f32.gmra.mrb[216].mxu0 %v15694_v12  ;;  %v16249_v59 = vld [vmem:[%s11759_s27 + $0xc1] sm:$0xff] }
 0x60b   : > { %5249 = vmatprep.mubr.f32.mxu0 %v15999_v38 }
 0x60e   : > { %5250 = vmatmul.mubr.f32.gmra.mrb[218].mxu0 %v15719_v61 }
 0x60f   : > { %5254 = vmatprep.mubr.f32.mxu0 %v16004_v40 }
 0x610   : > { %v16013_v19 = vpop.f32.mrb[106].mxu1 }
 0x611   : > { %19078 = vst [vmem:[#allocation93_spill] sm:$0xff] %v16013_v19  ;;  %v16015_v60 = vpop.f32.mrb[107].mxu1  ;;  %v16173_v19 = vld [vmem:[%s11759_s27 + $0x71] sm:$0xff] }
 0x612   : > { %19079 = vst [vmem:[#allocation50_spill] sm:$0xff] %v16015_v60  ;;  %5255 = vmatmul.mubr.f32.gmra.mrb[220].mxu0 %v15742_v3 }
 0x613   : > { %5324 = vmatprep.mubr.f32.mxu0 %v15778_v52  ;;  %v4659_v52 = vld [vmem:[%s18356_s5 + $0x320] sm:$0xff] }
 0x616   : > { %5325 = vmatmul.mubr.f32.vlgmr.msra.gmra.mrb[138].mxu0 %v10715_v4 }
 0x617   : > { %5329 = vmatprep.mubr.f32.mxu0 %v15790_v36  ;;  %9234 = vmatpush1.bf16.msra.mxu0 %v9233_v43  ;;  %v9239_v36 = vpack.c.bf16 %v4660_v29, %v4659_v52  ;;  %v4663_v43 = vld [vmem:[%s18356_s5 + $0x340] sm:$0xff]  ;;  %v4665_v52 = vld [vmem:[%s18356_s5 + $0x350] sm:$0xff]  ;;  %v4666_v29 = vld [vmem:[%s18356_s5 + $0x358] sm:$0xff] }
 0x618   : > { %9235 = vmatprep.subr.bf16.mxu0 %v18681_v9  ;;  %v16034_v11 = vpop.f32.mrb[108].mxu1 }
 0x619   : > { %19080 = vst [vmem:[#allocation95_spill] sm:$0xff] %v16034_v11  ;;  %v16036_v41 = vpop.f32.mrb[109].mxu1  ;;  %v16145_v11 = vld [vmem:[%s11759_s27 + $0x61] sm:$0xff] }
 0x61a   : > { %19081 = vst [vmem:[#allocation52_spill] sm:$0xff] %v16036_v41  ;;  %5330 = vmatmul.mubr.f32.gmra.mrb[140].mxu0 %v10716_v20  ;;  %v16073_v20 = vld [vmem:[%s11759_s27 + $0x39] sm:$0xff] }
 0x61b   : > { %5334 = vmatprep.mubr.f32.mxu0 %v15802_v23  ;;  %9237 = vmatpush1.bf16.msra.mxu0 %v9236_v62  ;;  %v9242_v23 = vpack.c.bf16 %v4662_v30, %v4661_v27  ;;  %v16061_v62 = vld [vmem:[%s11759_s27 + $0x31] sm:$0xff]  ;;  %v4667_v27 = vld [vmem:[%s18356_s5 + $0x360] sm:$0xff]  ;;  %v4668_v30 = vld [vmem:[%s18356_s5 + $0x368] sm:$0xff] }
 0x61c   : > { %9238 = vmatprep.subr.bf16.mxu0 %v18681_v9 }
 0x61e   : > { %5335 = vmatmul.mubr.f32.gmra.mrb[142].mxu0 %v10717_v21 }
 0x61f   : > { %5339 = vmatprep.mubr.f32.mxu0 %v15821_v14  ;;  %9240 = vmatpush1.bf16.msra.mxu0 %v9239_v36  ;;  %v9245_v14 = vpack.c.bf16 %v4664_v32, %v4663_v43  ;;  %v10720_v36 = vld [vmem:[%s11759_s27 + $0x42] sm:$0xff]  ;;  %v10722_v32 = vld [vmem:[%s11759_s27 + $0x4a] sm:$0xff] }
 0x620   : > { %9241 = vmatprep.subr.bf16.mxu0 %v18681_v9  ;;  %v16056_v54 = vpop.f32.mrb[110].mxu1  ;;  %v16089_v43 = vld [vmem:[%s11759_s27 + $0x41] sm:$0xff] }
 0x621   : > { %19082 = vst [vmem:[#allocation97_spill] sm:$0xff] %v16056_v54  ;;  %v16058_v4 = vpop.f32.mrb[111].mxu1  ;;  %v16117_v54 = vld [vmem:[%s11759_s27 + $0x51] sm:$0xff] }
 0x622   : > { %19083 = vst [vmem:[#allocation96_spill] sm:$0xff] %v16058_v4  ;;  %5340 = vmatmul.mubr.f32.gmra.mrb[144].mxu0 %v16061_v62 }
 0x623   : > { %5344 = vmatprep.mubr.f32.mxu0 %v15833_v56  ;;  %9243 = vmatpush1.bf16.msra.mxu0 %v9242_v23  ;;  %v9248_v56 = vpack.c.bf16 %v4666_v29, %v4665_v52  ;;  %v4669_v52 = vld [vmem:[%s18356_s5 + $0x370] sm:$0xff]  ;;  %v4670_v29 = vld [vmem:[%s18356_s5 + $0x378] sm:$0xff] }
 0x624   : > { %9244 = vmatprep.subr.bf16.mxu0 %v18681_v9 }
 0x626   : > { %5345 = vmatmul.mubr.f32.gmra.mrb[146].mxu0 %v16073_v20 }
 0x627   : > { %5349 = vmatprep.mubr.f32.mxu0 %v10720_v36  ;;  %9246 = vmatpush1.bf16.msra.mxu0 %v9245_v14  ;;  %v9251_v14 = vpack.c.bf16 %v4668_v30, %v4667_v27  ;;  %v16101_v36 = vld [vmem:[%s11759_s27 + $0x49] sm:$0xff]  ;;  %v4671_v27 = vld [vmem:[%s18356_s5 + $0x380] sm:$0xff] }
 0x628   : > { %9247 = vmatprep.subr.bf16.mxu0 %v18681_v9  ;;  %v16084_v21 = vpop.f32.mrb[112].mxu1  ;;  %v4672_v30 = vld [vmem:[%s18356_s5 + $0x388] sm:$0xff] }
 0x629   : > { %19084 = vst [vmem:[#allocation98_spill] sm:$0xff] %v16084_v21  ;;  %v16086_v23 = vpop.f32.mrb[113].mxu1  ;;  %v10724_v21 = vld [vmem:[%s11759_s27 + $0x52] sm:$0xff] }
 0x62a   : > { %19085 = vst [vmem:[#allocation66_spill] sm:$0xff] %v16086_v23  ;;  %5350 = vmatmul.mubr.f32.gmra.mrb[148].mxu0 %v16089_v43 }
 0x62b   : > { %5354 = vmatprep.mubr.f32.mxu0 %v10722_v32  ;;  %9249 = vmatpush1.bf16.msra.mxu0 %v9248_v56  ;;  %v9254_v56 = vpack.c.bf16 %v4670_v29, %v4669_v52  ;;  %v4673_v52 = vld [vmem:[%s18356_s5 + $0x390] sm:$0xff]  ;;  %v4674_v29 = vld [vmem:[%s18356_s5 + $0x398] sm:$0xff] }
 0x62c   : > { %9250 = vmatprep.subr.bf16.mxu0 %v18681_v9 }
 0x62e   : > { %5355 = vmatmul.mubr.f32.gmra.mrb[150].mxu0 %v16101_v36 }
 0x62f   : > { %5359 = vmatprep.mubr.f32.mxu0 %v10724_v21  ;;  %9252 = vmatpush1.bf16.msra.mxu0 %v9251_v14  ;;  %v10726_v21 = vld [vmem:[%s11759_s27 + $0x5a] sm:$0xff]  ;;  %v9257_v14 = vpack.c.bf16 %v4672_v30, %v4671_v27  ;;  %v4676_v30 = vld [vmem:[%s18356_s5 + $0x3a8] sm:$0xff] }
 0x630   : > { %9253 = vmatprep.subr.bf16.mxu0 %v18681_v9  ;;  %v16112_v32 = vpop.f32.mrb[114].mxu1  ;;  %v4675_v27 = vld [vmem:[%s18356_s5 + $0x3a0] sm:$0xff] }
 0x631   : > { %19086 = vst [vmem:[#allocation99_spill] sm:$0xff] %v16112_v32  ;;  %v16114_v23 = vpop.f32.mrb[115].mxu1  ;;  %v16129_v32 = vld [vmem:[%s11759_s27 + $0x59] sm:$0xff] }
 0x632   : > { %19087 = vst [vmem:[#allocation70_spill] sm:$0xff] %v16114_v23  ;;  %5360 = vmatmul.mubr.f32.gmra.mrb[152].mxu0 %v16117_v54  ;;  %v10728_v23 = vld [vmem:[%s11759_s27 + $0x62] sm:$0xff] }
 0x633   : > { %5364 = vmatprep.mubr.f32.mxu0 %v10726_v21  ;;  %9255 = vmatpush1.bf16.msra.mxu0 %v9254_v56  ;;  %v9260_v56 = vpack.c.bf16 %v4674_v29, %v4673_v52  ;;  %v4677_v52 = vld [vmem:[%s18356_s5 + $0x3b0] sm:$0xff]  ;;  %v4678_v29 = vld [vmem:[%s18356_s5 + $0x3b8] sm:$0xff] }
 0x634   : > { %9256 = vmatprep.subr.bf16.mxu0 %v18681_v9 }
 0x636   : > { %5365 = vmatmul.mubr.f32.gmra.mrb[154].mxu0 %v16129_v32 }
 0x637   : > { %5369 = vmatprep.mubr.f32.mxu0 %v10728_v23  ;;  %9258 = vmatpush1.bf16.msra.mxu0 %v9257_v14  ;;  %v10730_v23 = vld [vmem:[%s11759_s27 + $0x6a] sm:$0xff]  ;;  %v9263_v14 = vpack.c.bf16 %v4676_v30, %v4675_v27  ;;  %v4679_v27 = vld [vmem:[%s18356_s5 + $0x3c0] sm:$0xff] }
 0x638   : > { %9259 = vmatprep.subr.bf16.mxu0 %v18681_v9  ;;  %v16140_v21 = vpop.f32.mrb[116].mxu1  ;;  %v4680_v30 = vld [vmem:[%s18356_s5 + $0x3c8] sm:$0xff] }
 0x639   : > { %19088 = vst [vmem:[#allocation74_spill] sm:$0xff] %v16140_v21  ;;  %v16142_v4 = vpop.f32.mrb[117].mxu1  ;;  %v16157_v21 = vld [vmem:[%s11759_s27 + $0x69] sm:$0xff] }
 0x63a   : > { %19089 = vst [vmem:[#allocation72_spill] sm:$0xff] %v16142_v4  ;;  %5370 = vmatmul.mubr.f32.gmra.mrb[156].mxu0 %v16145_v11  ;;  %v10732_v4 = vld [vmem:[%s11759_s27 + $0x72] sm:$0xff] }
 0x63b   : > { %5374 = vmatprep.mubr.f32.mxu0 %v10730_v23  ;;  %9261 = vmatpush1.bf16.msra.mxu0 %v9260_v56  ;;  %v9266_v56 = vpack.c.bf16 %v4678_v29, %v4677_v52  ;;  %v4681_v52 = vld [vmem:[%s18356_s5 + $0x3d0] sm:$0xff]  ;;  %v4682_v29 = vld [vmem:[%s18356_s5 + $0x3d8] sm:$0xff] }
 0x63c   : > { %9262 = vmatprep.subr.bf16.mxu0 %v18681_v9 }
 0x63e   : > { %5375 = vmatmul.mubr.f32.gmra.mrb[158].mxu0 %v16157_v21 }
 0x63f   : > { %5379 = vmatprep.mubr.f32.mxu0 %v10732_v4  ;;  %9264 = vmatpush1.bf16.msra.mxu0 %v9263_v14  ;;  %v10734_v4 = vld [vmem:[%s11759_s27 + $0x7a] sm:$0xff]  ;;  %v9269_v14 = vpack.c.bf16 %v4680_v30, %v4679_v27  ;;  %v4684_v30 = vld [vmem:[%s18356_s5 + $0x3e8] sm:$0xff] }
 0x640   : > { %9265 = vmatprep.subr.bf16.mxu0 %v18681_v9  ;;  %v16168_v23 = vpop.f32.mrb[118].mxu1  ;;  %v4683_v27 = vld [vmem:[%s18356_s5 + $0x3e0] sm:$0xff] }
 0x641   : > { %19090 = vst [vmem:[#allocation100_spill] sm:$0xff] %v16168_v23  ;;  %v16170_v41 = vpop.f32.mrb[119].mxu1  ;;  %v16185_v23 = vld [vmem:[%s11759_s27 + $0x79] sm:$0xff] }
 0x642   : > { %19091 = vst [vmem:[#allocation78_spill] sm:$0xff] %v16170_v41  ;;  %5380 = vmatmul.mubr.f32.gmra.mrb[160].mxu0 %v16173_v19  ;;  %v10736_v41 = vld [vmem:[%s11759_s27 + $0x82] sm:$0xff] }
 0x643   : > { %5384 = vmatprep.mubr.f32.mxu0 %v10734_v4  ;;  %9267 = vmatpush1.bf16.msra.mxu0 %v9266_v56  ;;  %v9272_v56 = vpack.c.bf16 %v4682_v29, %v4681_v52  ;;  %v4685_v52 = vld [vmem:[%s18356_s5 + $0x3f0] sm:$0xff]  ;;  %v4686_v29 = vld [vmem:[%s18356_s5 + $0x3f8] sm:$0xff] }
 0x644   : > { %9268 = vmatprep.subr.bf16.mxu0 %v18681_v9 }
 0x646   : > { %5385 = vmatmul.mubr.f32.gmra.mrb[162].mxu0 %v16185_v23 }
 0x647   : > { %5389 = vmatprep.mubr.f32.mxu0 %v10736_v41  ;;  %9270 = vmatpush1.bf16.msra.mxu0 %v9269_v14  ;;  %v10738_v41 = vld [vmem:[%s11759_s27 + $0x8a] sm:$0xff]  ;;  %v9275_v14 = vpack.c.bf16 %v4684_v30, %v4683_v27  ;;  %v10742_v30 = vld [vmem:[%s11759_s27 + $0x9a] sm:$0xff] }
 0x648   : > { %9271 = vmatprep.subr.bf16.mxu0 %v18681_v9  ;;  %v16196_v4 = vpop.f32.mrb[120].mxu1  ;;  %v16219_v27 = vld [vmem:[%s11759_s27 + $0x91] sm:$0xff] }
 0x649   : > { %19092 = vst [vmem:[#allocation45_spill] sm:$0xff] %v16196_v4  ;;  %v16198_v60 = vpop.f32.mrb[121].mxu1  ;;  %v16213_v4 = vld [vmem:[%s11759_s27 + $0x89] sm:$0xff] }
 0x64a   : > { %19093 = vst [vmem:[#allocation46_spill] sm:$0xff] %v16198_v60  ;;  %5390 = vmatmul.mubr.f32.gmra.mrb[164].mxu0 %v16201_v31  ;;  %v16224_v60 = vld [vmem:[%s11759_s27 + $0x99] sm:$0xff] }
 0x64b   : > { %5394 = vmatprep.mubr.f32.mxu0 %v10738_v41  ;;  %9273 = vmatpush1.bf16.msra.mxu0 %v9272_v56  ;;  %v10740_v41 = vld [vmem:[%s11759_s27 + $0x92] sm:$0xff]  ;;  %v9278_v56 = vpack.c.bf16 %v4686_v29, %v4685_v52  ;;  %v16229_v52 = vld [vmem:[%s11759_s27 + $0xa1] sm:$0xff]  ;;  %v16234_v29 = vld [vmem:[%s11759_s27 + $0xa9] sm:$0xff] }
 0x64c   : > { %9274 = vmatprep.subr.bf16.mxu0 %v18681_v9 }
 0x64e   : > { %5395 = vmatmul.mubr.f32.gmra.mrb[166].mxu0 %v16213_v4 }
 0x64f   : > { %5399 = vmatprep.mubr.f32.mxu0 %v10740_v41  ;;  %9276 = vmatpush1.bf16.msra.mxu0 %v9275_v14  ;;  %v10744_v14 = vld [vmem:[%s11759_s27 + $0xa2] sm:$0xff]  ;;  %v10748_v41 = vld [vmem:[%s11759_s27 + $0xb2] sm:$0xff] }
 0x650   : > { %9277 = vmatprep.subr.bf16.mxu0 %v18681_v9  ;;  %v10746_v9 = vld [vmem:[%s11759_s27 + $0xaa] sm:$0xff] }
 0x652   : > { %5400 = vmatmul.mubr.f32.gmra.mrb[168].mxu0 %v16219_v27 }
 0x653   : > { %5404 = vmatprep.mubr.f32.mxu0 %v10742_v30  ;;  %9279 = vmatpush1.bf16.msra.mxu0 %v9278_v56  ;;  %v16239_v56 = vld [vmem:[%s11759_s27 + $0xb1] sm:$0xff]  ;;  %v10750_v30 = vld [vmem:[%s11759_s27 + $0xba] sm:$0xff] }
 0x656   : > { %5405 = vmatmul.mubr.f32.gmra.mrb[170].mxu0 %v16224_v60 }
 0x657   : > { %5409 = vmatprep.mubr.f32.mxu0 %v10744_v14  ;;  %v16244_v14 = vld [vmem:[%s11759_s27 + $0xb9] sm:$0xff] }
 0x65a   : > { %5410 = vmatmul.mubr.f32.gmra.mrb[172].mxu0 %v16229_v52 }
 0x65b   : > { %5414 = vmatprep.mubr.f32.mxu0 %v10746_v9  ;;  %v10752_v9 = vld [vmem:[%s11759_s27 + $0xc2] sm:$0xff] }
 0x65e   : > { %5415 = vmatmul.mubr.f32.gmra.mrb[174].mxu0 %v16234_v29 }
 0x65f   : > { %5419 = vmatprep.mubr.f32.mxu0 %v10748_v41  ;;  %v10754_v41 = vld [vmem:[%s11759_s27 + $0xca] sm:$0xff] }
 0x662   : > { %5420 = vmatmul.mubr.f32.gmra.mrb[176].mxu0 %v16239_v56 }
 0x663   : > { %5424 = vmatprep.mubr.f32.mxu0 %v10750_v30  ;;  %v10756_v30 = vld [vmem:[%s11759_s27 + $0xd2] sm:$0xff] }
 0x666   : > { %5425 = vmatmul.mubr.f32.gmra.mrb[178].mxu0 %v16244_v14 }
 0x667   : > { %5429 = vmatprep.mubr.f32.mxu0 %v10752_v9  ;;  %v10758_v9 = vld [vmem:[%s11759_s27 + $0xda] sm:$0xff] }
 0x66a   : > { %5430 = vmatmul.mubr.f32.gmra.mrb[180].mxu0 %v16249_v59 }
 0x66b   : > { %5434 = vmatprep.mubr.f32.mxu0 %v10754_v41  ;;  %v10760_v41 = vld [vmem:[%s11759_s27 + $0xe2] sm:$0xff] }
 0x66e   : > { %5435 = vmatmul.mubr.f32.gmra.mrb[182].mxu0 %v16254_v6 }
 0x66f   : > { %5439 = vmatprep.mubr.f32.mxu0 %v10756_v30  ;;  %v16274_v30 = vld [vmem:[%s11759_s27 + $0xe9] sm:$0xff] }
 0x672   : > { %5440 = vmatmul.mubr.f32.gmra.mrb[184].mxu0 %v16259_v35 }
 0x673   : > { %5444 = vmatprep.mubr.f32.mxu0 %v10758_v9  ;;  %v16284_v9 = vld [vmem:[%s11759_s27 + $0xf9] sm:$0xff] }
 0x676   : > { %5445 = vmatmul.mubr.f32.gmra.mrb[186].mxu0 %v16264_v42 }
 0x677   : > { %5449 = vmatprep.mubr.f32.mxu0 %v10760_v41  ;;  %v19094_v41 = vld [vmem:[#allocation84_spill] sm:$0xff] }
 0x67a   : > { %5450 = vmatmul.mubr.f32.gmra.mrb[188].mxu0 %v16269_v49 }
 0x67b   : > { %5454 = vmatprep.mubr.f32.mxu0 %v19051_v5 }
 0x67e   : > { %5455 = vmatmul.mubr.f32.gmra.mrb[190].mxu0 %v16274_v30 }
 0x67f   : > { %5459 = vmatprep.mubr.f32.mxu0 %v19053_v18 }
 0x682   : > { %5460 = vmatmul.mubr.f32.gmra.mrb[192].mxu0 %v16279_v13 }
 0x683   : > { %5464 = vmatprep.mubr.f32.mxu0 %v19057_v8 }
 0x686   : > { %5465 = vmatmul.mubr.f32.gmra.mrb[194].mxu0 %v16284_v9 }
 0x687   : > { %5469 = vmatprep.mubr.f32.mxu0 %v19059_v63 }
 0x68a   : > { %10911 = vmatmul.mubr.msk.f32.gmra.mrb[196].mxu0 %vm2606_vm0, %v19094_v41  ;;  %v19102_v41 = vld [vmem:[#allocation55_spill] sm:$0xff] }
 0x68b   : > { %5474 = vmatprep.mubr.f32.mxu0 %v19063_v51 }
 0x68e   : > { %10912 = vmatmul.mubr.msk.f32.gmra.mrb[198].mxu0 %vm2607_vm15, %v19096_v22  ;;  %v19104_v22 = vld [vmem:[#allocation58_spill] sm:$0xff] }
 0x68f   : > { %5479 = vmatprep.mubr.f32.mxu0 %v19065_v17 }
 0x692   : > { %10913 = vmatmul.mubr.msk.f32.gmra.mrb[200].mxu0 %vm2608_vm5, %v19098_v46  ;;  %v19106_v46 = vld [vmem:[#allocation61_spill] sm:$0xff] }
 0x693   : > { %5484 = vmatprep.mubr.f32.mxu0 %v19069_v7 }
 0x696   : > { %10914 = vmatmul.mubr.msk.f32.gmra.mrb[202].mxu0 %vm2609_vm12, %v19100_v1  ;;  %v19108_v1 = vld [vmem:[#allocation64_spill] sm:$0xff] }
 0x697   : > { %5489 = vmatprep.mubr.f32.mxu0 %v19071_v39 }
 0x69a   : > { %10915 = vmatmul.mubr.msk.f32.gmra.mrb[204].mxu0 %vm2610_vm10, %v19102_v41 }
 0x69b   : > { %5494 = vmatprep.mubr.f32.mxu0 %v19074_v24  ;;  %v19110_v24 = vld [vmem:[#allocation68_spill] sm:$0xff] }
 0x69e   : > { %10916 = vmatmul.mubr.msk.f32.gmra.mrb[206].mxu0 %vm2611_vm13, %v19104_v22 }
 0x69f   : > { %5499 = vmatprep.mubr.f32.mxu0 %v19075_v34  ;;  %v19112_v34 = vld [vmem:[#allocation73_spill] sm:$0xff] }
 0x6a2   : > { %10917 = vmatmul.mubr.msk.f32.gmra.mrb[208].mxu0 %vm2612_vm7, %v19106_v46 }
 0x6a3   : > { %5504 = vmatprep.mubr.f32.mxu0 %v15694_v12  ;;  %v19114_v12 = vld [vmem:[#allocation75_spill] sm:$0xff] }
 0x6a4   : > { %v19115_v46 = vmax.f32 %v19114_v12, 0.0  ;;  %v10777_v12 = vld [vmem:[%s11759_s27 + $0x90] sm:$0xff] }
 0x6a6   : > { %10918 = vmatmul.mubr.msk.f32.gmra.mrb[210].mxu0 %vm2613_vm3, %v19108_v1 }
 0x6a7   : > { %5509 = vmatprep.mubr.f32.mxu0 %v15719_v61  ;;  %v19117_v61 = vld [vmem:[#allocation85_spill] sm:$0xff] }
 0x6aa   : > { %10919 = vmatmul.mubr.msk.f32.gmra.mrb[212].mxu0 %vm2614_vm14, %v19110_v24  ;;  %v4556_v24 = vld [vmem:[%s11759_s27 + $0x16a] sm:$0xff] }
 0x6ab   : > { %5514 = vmatprep.mubr.f32.mxu0 %v15742_v3  ;;  %v10765_v3 = vld [vmem:[%s11759_s27 + $0x30] sm:$0xff]  ;;  %8704 = vmatmul.mubr.f32.gmra.mrb[122].mxu1 %v4556_v24 }
 0x6ae   : > { %10920 = vmatmul.mubr.msk.f32.gmra.mrb[214].mxu0 %vm2615_vm2, %v19112_v34  ;;  %v4558_v34 = vld [vmem:[%s11759_s27 + $0x17a] sm:$0xff] }
 0x6af   : > { %5519 = vmatprep.mubr.f32.mxu0 %v15750_v45  ;;  %v10766_v45 = vld [vmem:[%s11759_s27 + $0x38] sm:$0xff] }
 0x6b2   : > { %10921 = vmatmul.mubr.msk.f32.gmra.mrb[216].mxu0 %vm2616_vm6, %v19115_v46  ;;  %v10791_v46 = vld [vmem:[%s11759_s27 + $0x101] sm:$0xff] }
 0x6b3   : > { %5524 = vmatprep.mubr.f32.mxu0 %v15766_v0  ;;  %v10767_v0 = vld [vmem:[%s11759_s27 + $0x40] sm:$0xff] }
 0x6b6   : > { %10922 = vmatmul.mubr.msk.f32.gmra.mrb[218].mxu0 %vm2617_vm11, %v19117_v61 }
 0x6b7   : > { %5529 = vmatprep.mubr.f32.mxu0 %v15769_v28  ;;  %v10768_v28 = vld [vmem:[%s11759_s27 + $0x48] sm:$0xff] }
 0x6ba   : > { %10923 = vmatmul.mubr.msk.f32.gmra.mrb[220].mxu0 %vm2618_vm4, %v15728_v16 }
 0x6bb   : > { %5599 = vmatprep.mubr.f32.mxu0 %v16061_v62  ;;  %v10769_v62 = vld [vmem:[%s11759_s27 + $0x50] sm:$0xff] }
 0x6be   : > { %5600 = vmatmul.mubr.f32.vlgmr.msra.gmra.mrb[138].mxu0 %v10765_v3  ;;  %v10793_v3 = vld [vmem:[%s11759_s27 + $0x109] sm:$0xff] }
 0x6bf   : > { %5604 = vmatprep.mubr.f32.mxu0 %v16073_v20  ;;  %v10770_v20 = vld [vmem:[%s11759_s27 + $0x58] sm:$0xff] }
 0x6c2   : > { %5605 = vmatmul.mubr.f32.gmra.mrb[140].mxu0 %v10766_v45  ;;  %v10795_v45 = vld [vmem:[%s11759_s27 + $0x111] sm:$0xff] }
 0x6c3   : > { %5609 = vmatprep.mubr.f32.mxu0 %v16089_v43  ;;  %v10771_v43 = vld [vmem:[%s11759_s27 + $0x60] sm:$0xff] }
 0x6c6   : > { %5610 = vmatmul.mubr.f32.gmra.mrb[142].mxu0 %v10767_v0 }
 0x6c7   : > { %5614 = vmatprep.mubr.f32.mxu0 %v16101_v36  ;;  %v10772_v36 = vld [vmem:[%s11759_s27 + $0x68] sm:$0xff] }
 0x6ca   : > { %5615 = vmatmul.mubr.f32.gmra.mrb[144].mxu0 %v10768_v28  ;;  %v10796_v28 = vld [vmem:[%s11759_s27 + $0x110] sm:$0xff] }
 0x6cb   : > { %5619 = vmatprep.mubr.f32.mxu0 %v16117_v54  ;;  %v10773_v54 = vld [vmem:[%s11759_s27 + $0x70] sm:$0xff] }
 0x6ce   : > { %5620 = vmatmul.mubr.f32.gmra.mrb[146].mxu0 %v10769_v62  ;;  %v6662_v62 = vld [vmem:[%s18358_s7 + $0x10] sm:$0xff] }
 0x6cf   : > { %5624 = vmatprep.mubr.f32.mxu0 %v16129_v32  ;;  %v4557_v32 = vld [vmem:[%s11759_s27 + $0x172] sm:$0xff] }
 0x6d0   : > { %8706 = vmatprep.mubr.f32.mxu1 %v4557_v32  ;;  %v6665_v32 = vld [vmem:[%s18358_s7 + $0x28] sm:$0xff] }
 0x6d1   : > { %8707 = vmatmul.mubr.f32.gmra.mrb[124].mxu1 %v4558_v34  ;;  %v10799_v34 = vld [vmem:[%s11759_s27 + $0x121] sm:$0xff] }
 0x6d2   : > { %5625 = vmatmul.mubr.f32.gmra.mrb[148].mxu0 %v10770_v20  ;;  %v6663_v20 = vld [vmem:[%s18358_s7 + $0x18] sm:$0xff] }
 0x6d3   : > { %5629 = vmatprep.mubr.f32.mxu0 %v16145_v11  ;;  %v10774_v11 = vld [vmem:[%s11759_s27 + $0x78] sm:$0xff]  ;;  %v9316_v24 = vpack.c.bf16 %v6663_v20, %v6662_v62  ;;  %v4553_v20 = vld [vmem:[%s11759_s27 + $0x169] sm:$0xff] }
 0x6d4   : > { %v10810_v62 = vld [vmem:[%s11759_s27 + $0x151] sm:$0xff] }
 0x6d6   : > { %5630 = vmatmul.mubr.f32.gmra.mrb[150].mxu0 %v10771_v43  ;;  %v10797_v43 = vld [vmem:[%s11759_s27 + $0x119] sm:$0xff] }
 0x6d7   : > { %5634 = vmatprep.mubr.f32.mxu0 %v16157_v21  ;;  %v10775_v21 = vld [vmem:[%s11759_s27 + $0x80] sm:$0xff] }
 0x6da   : > { %5635 = vmatmul.mubr.f32.gmra.mrb[152].mxu0 %v10772_v36  ;;  %v10798_v36 = vld [vmem:[%s11759_s27 + $0x118] sm:$0xff] }
 0x6db   : > { %5639 = vmatprep.mubr.f32.mxu0 %v16173_v19  ;;  %v10776_v19 = vld [vmem:[%s11759_s27 + $0x88] sm:$0xff] }
 0x6de   : > { %5640 = vmatmul.mubr.f32.gmra.mrb[154].mxu0 %v10773_v54  ;;  %v6664_v54 = vld [vmem:[%s18358_s7 + $0x20] sm:$0xff] }
 0x6df   : > { %5644 = vmatprep.mubr.f32.mxu0 %v16185_v23  ;;  %v10778_v23 = vld [vmem:[%s11759_s27 + $0x98] sm:$0xff] }
 0x6e2   : > { %5645 = vmatmul.mubr.f32.gmra.mrb[156].mxu0 %v10774_v11  ;;  %v9320_v11 = vpack.c.bf16 %v6665_v32, %v6664_v54 }
 0x6e3   : > { %5649 = vmatprep.mubr.f32.mxu0 %v16201_v31  ;;  %v10779_v31 = vld [vmem:[%s11759_s27 + $0xa0] sm:$0xff] }
 0x6e6   : > { %5650 = vmatmul.mubr.f32.gmra.mrb[158].mxu0 %v10775_v21  ;;  %v10800_v21 = vld [vmem:[%s11759_s27 + $0x120] sm:$0xff] }
 0x6e7   : > { %5654 = vmatprep.mubr.f32.mxu0 %v16213_v4  ;;  %v10780_v4 = vld [vmem:[%s11759_s27 + $0xa8] sm:$0xff] }
 0x6ea   : > { %5655 = vmatmul.mubr.f32.gmra.mrb[160].mxu0 %v10776_v19  ;;  %v6666_v19 = vld [vmem:[%s18358_s7 + $0x30] sm:$0xff] }
 0x6eb   : > { %5659 = vmatprep.mubr.f32.mxu0 %v16219_v27  ;;  %v10781_v27 = vld [vmem:[%s11759_s27 + $0xb0] sm:$0xff] }
 0x6ee   : > { %5660 = vmatmul.mubr.f32.gmra.mrb[162].mxu0 %v10777_v12  ;;  %v6667_v12 = vld [vmem:[%s18358_s7 + $0x38] sm:$0xff] }
 0x6ef   : > { %5664 = vmatprep.mubr.f32.mxu0 %v16224_v60  ;;  %v10782_v60 = vld [vmem:[%s11759_s27 + $0xb8] sm:$0xff] }
 0x6f2   : > { %5665 = vmatmul.mubr.f32.gmra.mrb[164].mxu0 %v10778_v23  ;;  %v10801_v23 = vld [vmem:[%s11759_s27 + $0x129] sm:$0xff] }
 0x6f3   : > { %5669 = vmatprep.mubr.f32.mxu0 %v16229_v52  ;;  %v10783_v52 = vld [vmem:[%s11759_s27 + $0xc0] sm:$0xff] }
 0x6f6   : > { %5670 = vmatmul.mubr.f32.gmra.mrb[166].mxu0 %v10779_v31  ;;  %v9324_v31 = vpack.c.bf16 %v6667_v12, %v6666_v19 }
 0x6f7   : > { %5674 = vmatprep.mubr.f32.mxu0 %v16234_v29  ;;  %v10784_v29 = vld [vmem:[%s11759_s27 + $0xc8] sm:$0xff] }
 0x6fa   : > { %5675 = vmatmul.mubr.f32.gmra.mrb[168].mxu0 %v10780_v4  ;;  %v10802_v4 = vld [vmem:[%s11759_s27 + $0x128] sm:$0xff] }
 0x6fb   : > { %5679 = vmatprep.mubr.f32.mxu0 %v16239_v56  ;;  %v10785_v56 = vld [vmem:[%s11759_s27 + $0xd0] sm:$0xff] }
 0x6fe   : > { %5680 = vmatmul.mubr.f32.gmra.mrb[170].mxu0 %v10781_v27  ;;  %v6668_v27 = vld [vmem:[%s18358_s7 + $0x40] sm:$0xff] }
 0x6ff   : > { %5684 = vmatprep.mubr.f32.mxu0 %v16244_v14  ;;  %v10786_v14 = vld [vmem:[%s11759_s27 + $0xd8] sm:$0xff] }
 0x702   : > { %5685 = vmatmul.mubr.f32.gmra.mrb[172].mxu0 %v10782_v60  ;;  %v6669_v60 = vld [vmem:[%s18358_s7 + $0x48] sm:$0xff] }
 0x703   : > { %5689 = vmatprep.mubr.f32.mxu0 %v16249_v59  ;;  %v10787_v59 = vld [vmem:[%s11759_s27 + $0xe0] sm:$0xff] }
 0x706   : > { %5690 = vmatmul.mubr.f32.gmra.mrb[174].mxu0 %v10783_v52  ;;  %v10803_v52 = vld [vmem:[%s11759_s27 + $0x131] sm:$0xff] }
 0x707   : > { %5694 = vmatprep.mubr.f32.mxu0 %v16254_v6  ;;  %v10788_v6 = vld [vmem:[%s11759_s27 + $0xe8] sm:$0xff] }
 0x70a   : > { %5695 = vmatmul.mubr.f32.gmra.mrb[176].mxu0 %v10784_v29  ;;  %v9328_v29 = vpack.c.bf16 %v6669_v60, %v6668_v27  ;;  %v19120_v60 = vld [vmem:[#allocation4_spill] sm:$0xff] }
 0x70b   : > { %5699 = vmatprep.mubr.f32.mxu0 %v16259_v35  ;;  %v10789_v35 = vld [vmem:[%s11759_s27 + $0xf0] sm:$0xff] }
 0x70e   : > { %5700 = vmatmul.mubr.f32.gmra.mrb[178].mxu0 %v10785_v56  ;;  %v10804_v56 = vld [vmem:[%s11759_s27 + $0x130] sm:$0xff] }
 0x70f   : > { %5704 = vmatprep.mubr.f32.mxu0 %v16264_v42  ;;  %v10790_v42 = vld [vmem:[%s11759_s27 + $0xf8] sm:$0xff] }
 0x712   : > { %5705 = vmatmul.mubr.f32.gmra.mrb[180].mxu0 %v10786_v14  ;;  %v6670_v14 = vld [vmem:[%s18358_s7 + $0x50] sm:$0xff] }
 0x713   : > { %5709 = vmatprep.mubr.f32.mxu0 %v16269_v49  ;;  %v10792_v49 = vld [vmem:[%s11759_s27 + $0x100] sm:$0xff] }
 0x716   : > { %5710 = vmatmul.mubr.f32.gmra.mrb[182].mxu0 %v10787_v59  ;;  %v6671_v59 = vld [vmem:[%s18358_s7 + $0x58] sm:$0xff] }
 0x717   : > { %5714 = vmatprep.mubr.f32.mxu0 %v16274_v30  ;;  %v10794_v30 = vld [vmem:[%s11759_s27 + $0x108] sm:$0xff] }
 0x71a   : > { %5715 = vmatmul.mubr.f32.gmra.mrb[184].mxu0 %v10788_v6  ;;  %v10805_v6 = vld [vmem:[%s11759_s27 + $0x139] sm:$0xff] }
 0x71b   : > { %5719 = vmatprep.mubr.f32.mxu0 %v16279_v13  ;;  %v6660_v13 = vld [vmem:[%s18358_s7] sm:$0xff] }
 0x71e   : > { %5720 = vmatmul.mubr.f32.gmra.mrb[186].mxu0 %v10789_v35  ;;  %v9332_v35 = vpack.c.bf16 %v6671_v59, %v6670_v14 }
 0x71f   : > { %5724 = vmatprep.mubr.f32.mxu0 %v16284_v9  ;;  %v6661_v9 = vld [vmem:[%s18358_s7 + $0x8] sm:$0xff] }
 0x720   : > { %v9312_v0 = vpack.c.bf16 %v6661_v9, %v6660_v13  ;;  %v10808_v13 = vld [vmem:[%s11759_s27 + $0x140] sm:$0xff]  ;;  %v10809_v9 = vld [vmem:[%s11759_s27 + $0x149] sm:$0xff] }
 0x722   : > { %5725 = vmatmul.mubr.f32.gmra.mrb[188].mxu0 %v10790_v42  ;;  %9313 = vmatprep.subr.bf16.mxu1 %v9312_v0  ;;  %v10806_v42 = vld [vmem:[%s11759_s27 + $0x138] sm:$0xff] }
 0x723   : > { %5729 = vmatprep.mubr.f32.mxu0 %v10791_v46  ;;  %9315 = vmatpush3.bf16.msra.mxu1 %v9312_v0  ;;  %v6672_v46 = vld [vmem:[%s18358_s7 + $0x60] sm:$0xff]  ;;  %v6675_v0 = vld [vmem:[%s18358_s7 + $0x78] sm:$0xff] }
 0x724   : > { %9317 = vmatprep.subr.bf16.mxu1 %v9316_v24 }
 0x726   : > { %5730 = vmatmul.mubr.f32.gmra.mrb[190].mxu0 %v10792_v49  ;;  %v6673_v49 = vld [vmem:[%s18358_s7 + $0x68] sm:$0xff] }
 0x727   : > { %5734 = vmatprep.mubr.f32.mxu0 %v10793_v3  ;;  %9319 = vmatpush3.bf16.msra.mxu1 %v9316_v24  ;;  %v10807_v3 = vld [vmem:[%s11759_s27 + $0x141] sm:$0xff]  ;;  %v4555_v24 = vld [vmem:[%s11759_s27 + $0x179] sm:$0xff] }
 0x728   : > { %9321 = vmatprep.subr.bf16.mxu1 %v9320_v11 }
 0x72a   : > { %5735 = vmatmul.mubr.f32.gmra.mrb[192].mxu0 %v10794_v30  ;;  %v9336_v30 = vpack.c.bf16 %v6673_v49, %v6672_v46 }
 0x72b   : > { %5739 = vmatprep.mubr.f32.mxu0 %v10795_v45  ;;  %9323 = vmatpush3.bf16.msra.mxu1 %v9320_v11  ;;  %v6674_v45 = vld [vmem:[%s18358_s7 + $0x70] sm:$0xff] }
 0x72c   : > { %9325 = vmatprep.subr.bf16.mxu1 %v9324_v31 }
 0x72e   : > { %5740 = vmatmul.mubr.f32.gmra.mrb[194].mxu0 %v10796_v28  ;;  %v9340_v28 = vpack.c.bf16 %v6675_v0, %v6674_v45 }
 0x72f   : > { %5744 = vmatprep.mubr.f32.mxu0 %v10797_v43  ;;  %9327 = vmatpush3.bf16.msra.mxu1 %v9324_v31  ;;  %v4550_v43 = vld [vmem:[%s11759_s27 + $0x168] sm:$0xff] }
 0x730   : > { %9329 = vmatprep.subr.bf16.mxu1 %v9328_v29 }
 0x732   : > { %5745 = vmatmul.mubr.f32.gmra.mrb[196].mxu0 %v10798_v36 }
 0x733   : > { %5749 = vmatprep.mubr.f32.mxu0 %v10799_v34  ;;  %9331 = vmatpush3.bf16.msra.mxu1 %v9328_v29 }
 0x734   : > { %9333 = vmatprep.subr.bf16.mxu1 %v9332_v35 }
 0x736   : > { %5750 = vmatmul.mubr.f32.gmra.mrb[198].mxu0 %v10800_v21  ;;  %v19119_v21 = vld [vmem:[#allocation3_spill] sm:$0xff] }
 0x737   : > { %5754 = vmatprep.mubr.f32.mxu0 %v10801_v23  ;;  %9335 = vmatpush3.bf16.msra.mxu1 %v9332_v35 }
 0x738   : > { %9337 = vmatprep.subr.bf16.mxu1 %v9336_v30 }
 0x73a   : > { %5755 = vmatmul.mubr.f32.gmra.mrb[200].mxu0 %v10802_v4 }
 0x73b   : > { %5759 = vmatprep.mubr.f32.mxu0 %v10803_v52  ;;  %9339 = vmatpush3.bf16.msra.mxu1 %v9336_v30  ;;  %v19122_v30 = vld [vmem:[#allocation6_spill] sm:$0xff] }
 0x73c   : > { %9341 = vmatprep.subr.bf16.mxu1 %v9340_v28 }
 0x73e   : > { %5760 = vmatmul.mubr.f32.gmra.mrb[202].mxu0 %v10804_v56 }
 0x73f   : > { %5764 = vmatprep.mubr.f32.mxu0 %v10805_v6  ;;  %9343 = vmatpush3.bf16.msra.mxu1 %v9340_v28  ;;  %v19121_v6 = vld [vmem:[#allocation5_spill] sm:$0xff]  ;;  %v19124_v28 = vld [vmem:[#allocation7_spill] sm:$0xff] }
 0x742   : > { %5765 = vmatmul.mubr.f32.gmra.mrb[204].mxu0 %v10806_v42 }
 0x743   : > { %5769 = vmatprep.mubr.f32.mxu0 %v10807_v3 }
 0x746   : > { %5770 = vmatmul.mubr.f32.gmra.mrb[206].mxu0 %v10808_v13 }
 0x747   : > { %5774 = vmatprep.mubr.f32.mxu0 %v10809_v9 }
 0x74a   : > { %5775 = vmatmul.mubr.f32.gmra.mrb[208].mxu0 %v15722_v44  ;;  %v4554_v44 = vld [vmem:[%s11759_s27 + $0x171] sm:$0xff]  ;;  %s10487_s27 = smul.u32 144, %s19225_s22 }
 0x74b   : > { %5779 = vmatprep.mubr.f32.mxu0 %v10810_v62 }
 0x74c   : > { %s16581_s29 = scalar_lea.vmem %s18365_s14, %s10487_s27 }
 0x74e   : > { %5780 = vmatmul.mubr.f32.gmra.mrb[210].mxu0 %v15990_v26  ;;  %v16478_v26 = vld [vmem:[%s11764_s30 + $0x180] sm:$0xff] }
 0x74f   : > { %10924 = vmatprep.mubr.msk.f32.mxu0 %vm2617_vm11, %v19117_v61  ;;  %760 = vst [vmem:[%s16646_s24 + $0x90] sm:$0xff] %v16478_v26 }
 0x752   : > { %5785 = vmatmul.mubr.f32.gmra.mrb[212].mxu0 %v15999_v38 }
 0x753   : > { %10925 = vmatprep.mubr.msk.f32.mxu0 %vm2618_vm4, %v15728_v16  ;;  %v16485_v16 = vld [vmem:[%s18357_s6] ss:$0 sm:$0xff] }
 0x756   : > { %5790 = vmatmul.mubr.f32.gmra.mrb[214].mxu0 %v16004_v40 }
 0x757   : > { %5794 = vmatprep.mubr.f32.mxu0 %v4553_v20 }
 0x75a   : > { %5795 = vmatmul.mubr.f32.gmra.mrb[216].mxu0 %v4550_v43 }
 0x75b   : > { %5799 = vmatprep.mubr.f32.mxu0 %v4554_v44 }
 0x75e   : > { %5800 = vmatmul.mubr.f32.gmra.mrb[218].mxu0 %v16478_v26 }
 0x75f   : > { %5804 = vmatprep.mubr.f32.mxu0 %v4555_v24 }
 0x762   : > { %5805 = vmatmul.mubr.f32.gmra.mrb[220].mxu0 %v16478_v26 }
 0x791   : > { %v5601_v38 = vpop.f32.mrb[138].mxu0 }
 0x792   : > { %v9722_v40 = vadd.f32 %v16485_v16, %v5601_v38  ;;  %v5603_v61 = vpop.f32.mrb[139].mxu0  ;;  %v19126_v38 = vld [vmem:[#allocation8_spill] sm:$0xff] }
 0x794   : > { %v5877_v36 = vadd.f32 %v9722_v40, %v15912_v2 }
 0x795   : > { %v5606_v54 = vpop.f32.mrb[140].mxu0 }
 0x796   : > { %v6085_v32 = vmax.f32 %v5877_v36, 0.0  ;;  %v9723_v34 = vadd.f32 %v16485_v16, %v5606_v54  ;;  %v5608_v11 = vpop.f32.mrb[141].mxu0 }
 0x798   : > { %v6127_v19 = vsel %vm2577_vm8, %v6085_v32, 0.0  ;;  %v5882_v12 = vadd.f32 %v9723_v34, %v15910_v55  ;;  %vm19123_vm8 = vcmp.lt.s32.totalorder %v19122_v30, 14  ;;  %v16521_v34 = vpop.f32.mrb[122].mxu1 }
 0x799   : > { %6169 = vst [vmem:[%s11769_s20] sm:$0xff] %v6127_v19  ;;  %v5611_v23 = vpop.f32.mrb[142].mxu0 }
 0x79a   : > { %v6086_v31 = vmax.f32 %v5882_v12, 0.0  ;;  %v9724_v4 = vadd.f32 %v16485_v16, %v5611_v23  ;;  %v5613_v27 = vpop.f32.mrb[143].mxu0  ;;  %v16524_v12 = vpop.f32.mrb[123].mxu1 }
 0x79b   : > { %v19128_v27 = vld [vmem:[#allocation9_spill] sm:$0xff] }
 0x79c   : > { %v6128_v2 = vsel %vm2578_vm1, %v6086_v31, 0.0  ;;  %v5887_v52 = vadd.f32 %v9724_v4, %v15920_v58  ;;  %vm19125_vm1 = vcmp.lt.s32.totalorder %v19124_v28, 14 }
 0x79d   : > { %6170 = vst [vmem:[%s11769_s20 + $0x8] sm:$0xff] %v6128_v2  ;;  %v5616_v29 = vpop.f32.mrb[144].mxu0 }
 0x79e   : > { %v6087_v56 = vmax.f32 %v5887_v52, 0.0  ;;  %v9725_v14 = vadd.f32 %v16485_v16, %v5616_v29  ;;  %v5618_v59 = vpop.f32.mrb[145].mxu0 }
 0x7a0   : > { %v6129_v55 = vsel %vm2579_vm9, %v6087_v56, 0.0  ;;  %v5892_v35 = vadd.f32 %v9725_v14, %v15918_v10  ;;  %vm19127_vm9 = vcmp.lt.s32.totalorder %v19126_v38, 14 }
 0x7a1   : > { %6171 = vst [vmem:[%s11769_s20 + $0x10] sm:$0xff] %v6129_v55  ;;  %v5621_v42 = vpop.f32.mrb[146].mxu0 }
 0x7a2   : > { %v6088_v46 = vmax.f32 %v5892_v35, 0.0  ;;  %v9726_v49 = vadd.f32 %v16485_v16, %v5621_v42  ;;  %v5623_v3 = vpop.f32.mrb[147].mxu0 }
 0x7a4   : > { %v6130_v58 = vsel %vm19123_vm8, %v6088_v46, 0.0  ;;  %v5897_v13 = vadd.f32 %v9726_v49, %v15928_v33  ;;  %v6229_v36 = vld [vmem:[%s11769_s20] ss:$2 sm:$0xff]  ;;  %v8267_v54 = vld [vmem:[%s11769_s20 + $0x1] ss:$2 sm:$0xff]  ;;  %vm19129_vm8 = vcmp.lt.s32.totalorder %v19128_v27, 14 }
 0x7a5   : > { %6172 = vst [vmem:[%s11769_s20 + $0x18] sm:$0xff] %v6130_v58  ;;  %v5626_v9 = vpop.f32.mrb[148].mxu0  ;;  %v6300_v31 = vmax.f32 %v6229_v36, %v8267_v54  ;;  %v16538_v58 = vpop.f32.mrb[124].mxu1 }
 0x7a6   : > { %v6089_v45 = vmax.f32 %v5897_v13, 0.0  ;;  %v9727_v0 = vadd.f32 %v16485_v16, %v5626_v9  ;;  %v5628_v10 = vpop.f32.mrb[149].mxu0 }
 0x7a7   : > { %v16543_v10 = vpop.f32.mrb[125].mxu1 }
 0x7a8   : > { %v6131_v62 = vsel %vm19125_vm1, %v6089_v45, 0.0  ;;  %v5902_v20 = vadd.f32 %v9727_v0, %v15926_v57  ;;  %v8285_v23 = vld [vmem:[%s11769_s20 + $0x2] ss:$2 sm:$0xff] }
 0x7a9   : > { %6173 = vst [vmem:[%s11769_s20 + $0x20] sm:$0xff] %v6131_v62  ;;  %v5631_v44 = vpop.f32.mrb[150].mxu0  ;;  %v6354_v29 = vmax.f32 %v6300_v31, %v8285_v23  ;;  %v19134_v23 = vld [vmem:[#allocation12_spill] sm:$0xff] }
 0x7aa   : > { %v6090_v43 = vmax.f32 %v5902_v20, 0.0  ;;  %v9728_v24 = vadd.f32 %v16485_v16, %v5631_v44  ;;  %v5633_v33 = vpop.f32.mrb[151].mxu0  ;;  %v19132_v44 = vld [vmem:[#allocation11_spill] sm:$0xff] }
 0x7ac   : > { %v6132_v40 = vsel %vm19127_vm9, %v6090_v43, 0.0  ;;  %v5907_v61 = vadd.f32 %v9728_v24, %v15936_v53  ;;  %v8250_v55 = vld [vmem:[%s11769_s20 + $0x10] ss:$2 sm:$0xff]  ;;  %v8268_v35 = vld [vmem:[%s11769_s20 + $0x11] ss:$2 sm:$0xff]  ;;  %vm19133_vm9 = vcmp.lt.s32.totalorder %v19132_v44, 14 }
 0x7ad   : > { %6174 = vst [vmem:[%s11769_s20 + $0x28] sm:$0xff] %v6132_v40  ;;  %v5636_v32 = vpop.f32.mrb[152].mxu0  ;;  %v6301_v62 = vmax.f32 %v8250_v55, %v8268_v35 }
 0x7ae   : > { %v6091_v57 = vmax.f32 %v5907_v61, 0.0  ;;  %v9729_v11 = vadd.f32 %v16485_v16, %v5636_v32  ;;  %v5638_v19 = vpop.f32.mrb[153].mxu0 }
 0x7b0   : > { %v5912_v4 = vadd.f32 %v9729_v11, %v15934_v47  ;;  %v8303_v53 = vld [vmem:[%s11769_s20 + $0x18] ss:$2 sm:$0xff]  ;;  %v6133_v2 = vsel %vm19129_vm8, %v6091_v57, 0.0  ;;  %vm19135_vm8 = vcmp.lt.s32.totalorder %v19134_v23, 14 }
 0x7b1   : > { %v5641_v52 = vpop.f32.mrb[154].mxu0  ;;  %6175 = vst [vmem:[%s11769_s20 + $0x30] sm:$0xff] %v6133_v2  ;;  %v6408_v42 = vmax.f32 %v6354_v29, %v8303_v53  ;;  %v19130_v47 = vld [vmem:[#allocation10_spill] sm:$0xff] }
 0x7b2   : > { %v6092_v56 = vmax.f32 %v5912_v4, 0.0  ;;  %v9730_v14 = vadd.f32 %v16485_v16, %v5641_v52  ;;  %v5643_v59 = vpop.f32.mrb[155].mxu0  ;;  %vm19131_vm1 = vcmp.lt.s32.totalorder %v19130_v47, 14  ;;  %v8286_v13 = vld [vmem:[%s11769_s20 + $0x12] ss:$2 sm:$0xff] }
 0x7b3   : > { %v6355_v33 = vmax.f32 %v6301_v62, %v8286_v13 }
 0x7b4   : > { %v5917_v46 = vadd.f32 %v9730_v14, %v15944_v25  ;;  %v6134_v49 = vsel %vm19131_vm1, %v6092_v56, 0.0  ;;  %v8321_v25 = vld [vmem:[%s11769_s20 + $0x19] ss:$2 sm:$0xff]  ;;  %v8339_v40 = vld [vmem:[%s11769_s20 + $0x1a] ss:$2 sm:$0xff] }
 0x7b5   : > { %v5646_v3 = vpop.f32.mrb[156].mxu0  ;;  %6176 = vst [vmem:[%s11769_s20 + $0x38] sm:$0xff] %v6134_v49  ;;  %v6462_v20 = vmax.f32 %v6408_v42, %v8321_v25  ;;  %v8251_v4 = vld [vmem:[%s11769_s20 + $0x20] ss:$2 sm:$0xff] }
 0x7b6   : > { %v6093_v9 = vmax.f32 %v5917_v46, 0.0  ;;  %v9731_v45 = vadd.f32 %v16485_v16, %v5646_v3  ;;  %v5648_v0 = vpop.f32.mrb[157].mxu0 }
 0x7b7   : > { %v6516_v19 = vmax.f32 %v6462_v20, %v8339_v40  ;;  %v19136_v0 = vld [vmem:[#allocation13_spill] sm:$0xff] }
 0x7b8   : > { %v6135_v43 = vsel %vm19133_vm9, %v6093_v9, 0.0  ;;  %v5922_v24 = vadd.f32 %v9731_v45, %v15942_v15  ;;  %v8304_v61 = vld [vmem:[%s11769_s20 + $0x28] ss:$2 sm:$0xff]  ;;  %v8269_v15 = vld [vmem:[%s11769_s20 + $0x21] ss:$2 sm:$0xff]  ;;  %vm19137_vm1 = vcmp.lt.s32.totalorder %v19136_v0, 14 }
 0x7b9   : > { %6177 = vst [vmem:[%s11769_s20 + $0x40] sm:$0xff] %v6135_v43  ;;  %v5651_v54 = vpop.f32.mrb[158].mxu0  ;;  %v6409_v32 = vmax.f32 %v6355_v33, %v8304_v61  ;;  %v8322_v52 = vld [vmem:[%s11769_s20 + $0x29] ss:$2 sm:$0xff]  ;;  %v8287_v14 = vld [vmem:[%s11769_s20 + $0x22] ss:$2 sm:$0xff]  ;;  %v6302_v49 = vmax.f32 %v8251_v4, %v8269_v15 }
 0x7ba   : > { %v6094_v36 = vmax.f32 %v5922_v24, 0.0  ;;  %v9732_v57 = vadd.f32 %v16485_v16, %v5651_v54  ;;  %v5653_v11 = vpop.f32.mrb[159].mxu0  ;;  %vm18645_vm9 = vcmp.lt.s32.totalorder %v19119_v21, 6 }
 0x7bb   : > { %v6463_v59 = vmax.f32 %v6409_v32, %v8322_v52  ;;  %v6356_v20 = vmax.f32 %v6302_v49, %v8287_v14  ;;  %v19138_v32 = vld [vmem:[#allocation91_spill] sm:$0xff]  ;;  %v19139_v11 = vld [vmem:[#allocation14_spill] sm:$0xff] }
 0x7bc   : > { %v6136_v31 = vsel %vm19135_vm8, %v6094_v36, 0.0  ;;  %v8252_v53 = vld [vmem:[%s11769_s20 + $0x30] ss:$2 sm:$0xff]  ;;  %v5927_v2 = vadd.f32 %v9732_v57, %v15952_v37  ;;  %v8270_v55 = vld [vmem:[%s11769_s20 + $0x31] ss:$2 sm:$0xff]  ;;  %vm19140_vm8 = vcmp.lt.s32.totalorder %v19139_v11, 14 }
 0x7bd   : > { %6178 = vst [vmem:[%s11769_s20 + $0x48] sm:$0xff] %v6136_v31  ;;  %v6540_v29 = vmax.f32 %v6516_v19, %v8252_v53  ;;  %v5656_v56 = vpop.f32.mrb[160].mxu0  ;;  %v8340_v3 = vld [vmem:[%s11769_s20 + $0x2a] ss:$2 sm:$0xff] }
 0x7be   : > { %v6095_v35 = vmax.f32 %v5927_v2, 0.0  ;;  %v9733_v42 = vadd.f32 %v16485_v16, %v5656_v56  ;;  %v5658_v46 = vpop.f32.mrb[161].mxu0  ;;  %v6517_v40 = vmax.f32 %v6463_v59, %v8340_v3  ;;  %v6303_v59 = vmax.f32 %v8252_v53, %v8270_v55  ;;  %v19143_v49 = vld [vmem:[#allocation87_spill] sm:$0xff] }
 0x7bf   : > { %v6564_v9 = vmax.f32 %v6540_v29, %v8270_v55 }
 0x7c0   : > { %v8288_v13 = vld [vmem:[%s11769_s20 + $0x32] ss:$2 sm:$0xff]  ;;  %v6137_v37 = vsel %vm19137_vm1, %v6095_v35, 0.0  ;;  %v5932_v62 = vadd.f32 %v9733_v42, %v15950_v50  ;;  %vm18647_vm1 = vcmp.lt.s32.totalorder %v19120_v60, 6  ;;  %v8323_v56 = vld [vmem:[%s11769_s20 + $0x39] ss:$2 sm:$0xff] }
 0x7c1   : > { %v8305_v45 = vld [vmem:[%s11769_s20 + $0x38] ss:$2 sm:$0xff]  ;;  %v5661_v25 = vpop.f32.mrb[162].mxu0  ;;  %6179 = vst [vmem:[%s11769_s20 + $0x50] sm:$0xff] %v6137_v37  ;;  %v6588_v33 = vmax.f32 %v6564_v9, %v8288_v13  ;;  %v19141_v42 = vld [vmem:[#allocation15_spill] sm:$0xff] }
 0x7c2   : > { %v9734_v43 = vadd.f32 %v16485_v16, %v5661_v25  ;;  %v5663_v24 = vpop.f32.mrb[163].mxu0  ;;  %v6096_v61 = vmax.f32 %v5932_v62, 0.0  ;;  %v6410_v36 = vmax.f32 %v6356_v20, %v8305_v45 }
 0x7c3   : > { %v6606_v29 = vsel %vm18645_vm9, %v6588_v33, 0.0  ;;  %10926 = vmatprep.mubr.msk.f32.mxu1 %vm18645_vm9, %v6588_v33  ;;  %v19144_v33 = vld [vmem:[#allocation16_spill] sm:$0xff] }
 0x7c4   : > { %v16575_v54 = vld [vmem:[%s11769_s20 + $0x40] ss:$2 sm:$0xff]  ;;  %v5937_v57 = vadd.f32 %v9734_v43, %v19138_v32  ;;  %v6138_v19 = vsel %vm19140_vm8, %v6096_v61, 0.0  ;;  %v16587_v4 = vld [vmem:[%s11769_s20 + $0x41] ss:$2 sm:$0xff]  ;;  %6624 = vst [vmem:[%s16581_s29] sm:$0xff] %v6606_v29  ;;  %v6464_v35 = vmax.f32 %v6410_v36, %v8323_v56  ;;  %vm19142_vm8 = vcmp.lt.s32.totalorder %v19141_v42, 14 }
 0x7c5   : > { %v6541_v50 = vmax.f32 %v6517_v40, %v16575_v54  ;;  %v5666_v31 = vpop.f32.mrb[164].mxu0  ;;  %6180 = vst [vmem:[%s11769_s20 + $0x58] sm:$0xff] %v6138_v19  ;;  %v8341_v9 = vld [vmem:[%s11769_s20 + $0x3a] ss:$2 sm:$0xff]  ;;  %v6357_v43 = vmax.f32 %v6303_v59, %v8288_v13 }
 0x7c6   : > { %v6097_v15 = vmax.f32 %v5937_v57, 0.0  ;;  %v9735_v2 = vadd.f32 %v16485_v16, %v5666_v31  ;;  %v5668_v52 = vpop.f32.mrb[165].mxu0  ;;  %v6518_v24 = vmax.f32 %v6464_v35, %v8341_v9  ;;  %v6959_v32 = vld [vmem:[%s18360_s9 + $0x8] sm:$0xff]  ;;  %v6961_v13 = vld [vmem:[%s18360_s9 + $0x18] sm:$0xff]  ;;  %v6958_v57 = vld [vmem:[%s18360_s9] sm:$0xff] }
 0x7c7   : > { %v6565_v14 = vmax.f32 %v6541_v50, %v16587_v4  ;;  %v9344_v52 = vpack.c.bf16 %v6961_v13, %v6959_v32  ;;  %v6963_v59 = vld [vmem:[%s18360_s9 + $0x28] sm:$0xff]  ;;  %v6965_v35 = vld [vmem:[%s18360_s9 + $0x38] sm:$0xff] }
 0x7c8   : > { %v6139_v46 = vsel %vm19142_vm8, %v6097_v15, 0.0  ;;  %v5942_v3 = vadd.f32 %v9735_v2, %v19143_v49  ;;  %v8289_v45 = vld [vmem:[%s11769_s20 + $0x42] ss:$2 sm:$0xff]  ;;  %vm19145_vm8 = vcmp.lt.s32.totalorder %v19144_v33, 14  ;;  %v8324_v50 = vld [vmem:[%s11769_s20 + $0x49] ss:$2 sm:$0xff] }
 0x7c9   : > { %v8306_v37 = vld [vmem:[%s11769_s20 + $0x48] ss:$2 sm:$0xff]  ;;  %6181 = vst [vmem:[%s11769_s20 + $0x60] sm:$0xff] %v6139_v46  ;;  %v6589_v62 = vmax.f32 %v6565_v14, %v8289_v45  ;;  %v5671_v20 = vpop.f32.mrb[166].mxu0  ;;  %v19146_v15 = vld [vmem:[#allocation77_spill] sm:$0xff]  ;;  %9345 = vmatprep.subr.bf16.mxu1 %v9344_v52 }
 0x7ca   : > { %v6098_v25 = vmax.f32 %v5942_v3, 0.0  ;;  %v9736_v53 = vadd.f32 %v16485_v16, %v5671_v20  ;;  %v5673_v55 = vpop.f32.mrb[167].mxu0  ;;  %v6411_v61 = vmax.f32 %v6357_v43, %v8306_v37  ;;  %v6960_v14 = vld [vmem:[%s18360_s9 + $0x10] sm:$0xff]  ;;  %v9348_v37 = vpack.c.bf16 %v6965_v35, %v6963_v59  ;;  %v6967_v20 = vld [vmem:[%s18360_s9 + $0x48] sm:$0xff]  ;;  %v19147_v32 = vld [vmem:[#allocation17_spill] sm:$0xff] }
 0x7cb   : > { %v6607_v36 = vsel %vm18647_vm1, %v6589_v62, 0.0  ;;  %10927 = vmatmul.mubr.msk.f32.vlgmr.msra.gmra.mrb[126].mxu1 %vm18647_vm1, %v6589_v62  ;;  %v9346_v9 = vpack.c.bf16 %v6960_v14, %v6958_v57  ;;  %v6962_v62 = vld [vmem:[%s18360_s9 + $0x20] sm:$0xff]  ;;  %v6304_v43 = vmax.f32 %v16575_v54, %v16587_v4  ;;  %vm19148_vm9 = vcmp.lt.s32.totalorder %v19147_v32, 14  ;;  %v19149_v57 = vld [vmem:[#allocation92_spill] sm:$0xff]  ;;  %v6969_v54 = vld [vmem:[%s18360_s9 + $0x58] sm:$0xff] }
 0x7cc   : > { %v6140_v40 = vsel %vm19145_vm8, %v6098_v25, 0.0  ;;  %v16623_v19 = vld [vmem:[%s11769_s20 + $0x50] ss:$2 sm:$0xff]  ;;  %v16626_v31 = vld [vmem:[%s11769_s20 + $0x51] ss:$2 sm:$0xff]  ;;  %v5947_v2 = vadd.f32 %v9736_v53, %v19146_v15  ;;  %6625 = vst [vmem:[%s16581_s29 + $0x8] sm:$0xff] %v6607_v36  ;;  %v6465_v55 = vmax.f32 %v6411_v61, %v8324_v50 }
 0x7cd   : > { %6182 = vst [vmem:[%s11769_s20 + $0x68] sm:$0xff] %v6140_v40  ;;  %v6542_v29 = vmax.f32 %v6518_v24, %v16623_v19  ;;  %v5676_v56 = vpop.f32.mrb[168].mxu0  ;;  %v6964_v25 = vld [vmem:[%s18360_s9 + $0x30] sm:$0xff]  ;;  %vm18646_vm8 = vcmp.lt.s32.totalorder %v19121_v6, 6  ;;  %9347 = vmatpush1.bf16.msra.mxu1 %v9346_v9  ;;  %v6358_v4 = vmax.f32 %v6304_v43, %v8289_v45  ;;  %v6971_v45 = vld [vmem:[%s18360_s9 + $0x68] sm:$0xff]  ;;  %v6973_v35 = vld [vmem:[%s18360_s9 + $0x78] sm:$0xff] }
 0x7ce   : > { %v6099_v46 = vmax.f32 %v5947_v2, 0.0  ;;  %v9737_v49 = vadd.f32 %v16485_v16, %v5676_v56  ;;  %v5678_v3 = vpop.f32.mrb[169].mxu0  ;;  %v8342_v53 = vld [vmem:[%s11769_s20 + $0x4a] ss:$2 sm:$0xff]  ;;  %v9350_v26 = vpack.c.bf16 %v6964_v25, %v6962_v62  ;;  %9349 = vmatprep.subr.bf16.mxu1 %v9348_v37  ;;  %v6966_v56 = vld [vmem:[%s18360_s9 + $0x40] sm:$0xff]  ;;  %vm18648_vm1 = vcmp.lt.s32.totalorder %v19124_v28, 6 }
 0x7cf   : > { %v6566_v40 = vmax.f32 %v6542_v29, %v16626_v31  ;;  %v9352_v29 = vpack.c.bf16 %v6969_v54, %v6967_v20  ;;  %v6968_v14 = vld [vmem:[%s18360_s9 + $0x50] sm:$0xff]  ;;  %v19150_v3 = vld [vmem:[#allocation83_spill] sm:$0xff]  ;;  %v6519_v37 = vmax.f32 %v6465_v55, %v8342_v53  ;;  %v19151_v62 = vld [vmem:[#allocation18_spill] sm:$0xff]  ;;  %v9356_v55 = vpack.c.bf16 %v6973_v35, %v6971_v45 }
 0x7d0   : > { %v8290_v24 = vld [vmem:[%s11769_s20 + $0x52] ss:$2 sm:$0xff]  ;;  %v6141_v13 = vsel %vm19148_vm9, %v6099_v46, 0.0  ;;  %v5952_v15 = vadd.f32 %v9737_v49, %v19149_v57  ;;  %vm19152_vm9 = vcmp.lt.s32.totalorder %v19151_v62, 14  ;;  %v6305_v54 = vmax.f32 %v16623_v19, %v16626_v31 }
 0x7d1   : > { %v8307_v36 = vld [vmem:[%s11769_s20 + $0x58] ss:$2 sm:$0xff]  ;;  %v5681_v2 = vpop.f32.mrb[170].mxu0  ;;  %6183 = vst [vmem:[%s11769_s20 + $0x70] sm:$0xff] %v6141_v13  ;;  %v6590_v52 = vmax.f32 %v6566_v40, %v8290_v24  ;;  %9351 = vmatpush1.bf16.msra.mxu1 %v9350_v26  ;;  %v9354_v40 = vpack.c.bf16 %v6968_v14, %v6966_v56  ;;  %v8325_v13 = vld [vmem:[%s11769_s20 + $0x59] ss:$2 sm:$0xff] }
 0x7d2   : > { %v9738_v61 = vadd.f32 %v16485_v16, %v5681_v2  ;;  %v5683_v50 = vpop.f32.mrb[171].mxu0  ;;  %v6100_v59 = vmax.f32 %v5952_v15, 0.0  ;;  %v6412_v46 = vmax.f32 %v6358_v4, %v8307_v36  ;;  %9353 = vmatprep.subr.bf16.mxu1 %v9352_v29  ;;  %v6970_v2 = vld [vmem:[%s18360_s9 + $0x60] sm:$0xff]  ;;  %v6972_v26 = vld [vmem:[%s18360_s9 + $0x70] sm:$0xff]  ;;  %v19153_v29 = vld [vmem:[#allocation19_spill] sm:$0xff] }
 0x7d3   : > { %v6608_v43 = vsel %vm18646_vm8, %v6590_v52, 0.0  ;;  %10928 = vmatprep.mubr.msk.f32.mxu1 %vm18646_vm8, %v6590_v52  ;;  %v6977_v50 = vld [vmem:[%s18360_s9 + $0x98] sm:$0xff]  ;;  %v19155_v14 = vld [vmem:[#allocation76_spill] sm:$0xff] }
 0x7d4   : > { %v16688_v49 = vld [vmem:[%s11769_s20 + $0x60] ss:$2 sm:$0xff]  ;;  %v5957_v9 = vadd.f32 %v9738_v61, %v19150_v3  ;;  %v6142_v25 = vsel %vm19152_vm9, %v6100_v59, 0.0  ;;  %6626 = vst [vmem:[%s16581_s29 + $0x10] sm:$0xff] %v6608_v43  ;;  %v16711_v4 = vld [vmem:[%s11769_s20 + $0x61] ss:$2 sm:$0xff]  ;;  %v6466_v52 = vmax.f32 %v6412_v46, %v8325_v13  ;;  %v6359_v3 = vmax.f32 %v6305_v54, %v8290_v24 }
 0x7d5   : > { %v5686_v20 = vpop.f32.mrb[172].mxu0  ;;  %6184 = vst [vmem:[%s11769_s20 + $0x78] sm:$0xff] %v6142_v25  ;;  %v6543_v53 = vmax.f32 %v6519_v37, %v16688_v49  ;;  %v6975_v61 = vld [vmem:[%s18360_s9 + $0x88] sm:$0xff]  ;;  %vm19154_vm9 = vcmp.lt.s32.totalorder %v19153_v29, 14  ;;  %9355 = vmatpush1.bf16.msra.mxu1 %v9354_v40  ;;  %v6974_v13 = vld [vmem:[%s18360_s9 + $0x80] sm:$0xff]  ;;  %v6976_v24 = vld [vmem:[%s18360_s9 + $0x90] sm:$0xff] }
 0x7d6   : > { %v6101_v57 = vmax.f32 %v5957_v9, 0.0  ;;  %v9739_v36 = vadd.f32 %v16485_v16, %v5686_v20  ;;  %v5688_v15 = vpop.f32.mrb[173].mxu0  ;;  %v8343_v19 = vld [vmem:[%s11769_s20 + $0x5a] ss:$2 sm:$0xff]  ;;  %v9358_v9 = vpack.c.bf16 %v6972_v26, %v6970_v2  ;;  %9357 = vmatprep.subr.bf16.mxu1 %v9356_v55  ;;  %v9360_v43 = vpack.c.bf16 %v6977_v50, %v6975_v61  ;;  %v19156_v55 = vld [vmem:[#allocation20_spill] sm:$0xff] }
 0x7d7   : > { %v6567_v45 = vmax.f32 %v6543_v53, %v16711_v4  ;;  %v6981_v15 = vld [vmem:[%s18360_s9 + $0xb8] sm:$0xff]  ;;  %v6520_v53 = vmax.f32 %v6466_v52, %v8343_v19  ;;  %vm19157_vm8 = vcmp.lt.s32.totalorder %v19156_v55, 14  ;;  %v9362_v50 = vpack.c.bf16 %v6976_v24, %v6974_v13 }
 0x7d8   : > { %v6143_v56 = vsel %vm19154_vm9, %v6101_v57, 0.0  ;;  %v5962_v59 = vadd.f32 %v9739_v36, %v19155_v14  ;;  %v8308_v31 = vld [vmem:[%s11769_s20 + $0x68] ss:$2 sm:$0xff]  ;;  %vm18652_vm9 = vcmp.lt.s32.totalorder %v19122_v30, 6  ;;  %v19158_v26 = vld [vmem:[#allocation89_spill] sm:$0xff]  ;;  %v6306_v13 = vmax.f32 %v16688_v49, %v16711_v4 }
 0x7d9   : > { %6185 = vst [vmem:[%s11769_s20 + $0x80] sm:$0xff] %v6143_v56  ;;  %v5691_v35 = vpop.f32.mrb[174].mxu0  ;;  %v8291_v20 = vld [vmem:[%s11769_s20 + $0x62] ss:$2 sm:$0xff]  ;;  %v6413_v40 = vmax.f32 %v6359_v3, %v8308_v31  ;;  %9359 = vmatpush1.bf16.msra.mxu1 %v9358_v9  ;;  %v8326_v14 = vld [vmem:[%s11769_s20 + $0x69] ss:$2 sm:$0xff] }
 0x7da   : > { %v6102_v37 = vmax.f32 %v5962_v59, 0.0  ;;  %v9740_v25 = vadd.f32 %v16485_v16, %v5691_v35  ;;  %v5693_v46 = vpop.f32.mrb[175].mxu0  ;;  %v6591_v57 = vmax.f32 %v6567_v45, %v8291_v20  ;;  %v6979_v36 = vld [vmem:[%s18360_s9 + $0xa8] sm:$0xff]  ;;  %v6978_v56 = vld [vmem:[%s18360_s9 + $0xa0] sm:$0xff]  ;;  %9361 = vmatprep.subr.bf16.mxu1 %v9360_v43  ;;  %v6980_v35 = vld [vmem:[%s18360_s9 + $0xb0] sm:$0xff]  ;;  %v6360_v4 = vmax.f32 %v6306_v13, %v8291_v20 }
 0x7db   : > { %v9364_v31 = vpack.c.bf16 %v6981_v15, %v6979_v36  ;;  %v6467_v9 = vmax.f32 %v6413_v40, %v8326_v14  ;;  %v6983_v46 = vld [vmem:[%s18360_s9 + $0xc8] sm:$0xff]  ;;  %v6985_v43 = vld [vmem:[%s18360_s9 + $0xd8] sm:$0xff]  ;;  %v9366_v14 = vpack.c.bf16 %v6980_v35, %v6978_v56  ;;  %v19162_v35 = vld [vmem:[#allocation94_spill] sm:$0xff] }
 0x7dc   : > { %v6144_v2 = vsel %vm19157_vm8, %v6102_v37, 0.0  ;;  %v5967_v54 = vadd.f32 %v9740_v25, %v19158_v26  ;;  %v16745_v61 = vld [vmem:[%s11769_s20 + $0x70] ss:$2 sm:$0xff]  ;;  %v6609_v19 = vsel %vm18652_vm9, %v6591_v57, 0.0  ;;  %v16759_v3 = vld [vmem:[%s11769_s20 + $0x71] ss:$2 sm:$0xff]  ;;  %10929 = vmatmul.mubr.msk.f32.gmra.mrb[128].mxu1 %vm18652_vm9, %v6591_v57 }
 0x7dd   : > { %6186 = vst [vmem:[%s11769_s20 + $0x88] sm:$0xff] %v6144_v2  ;;  %v6544_v59 = vmax.f32 %v6520_v53, %v16745_v61  ;;  %v5696_v45 = vpop.f32.mrb[176].mxu0  ;;  %6627 = vst [vmem:[%s16581_s29 + $0x18] sm:$0xff] %v6609_v19  ;;  %v8344_v24 = vld [vmem:[%s11769_s20 + $0x6a] ss:$2 sm:$0xff]  ;;  %v19161_v53 = vld [vmem:[#allocation82_spill] sm:$0xff]  ;;  %9363 = vmatpush1.bf16.msra.mxu1 %v9362_v50 }
 0x7de   : > { %v6103_v52 = vmax.f32 %v5967_v54, 0.0  ;;  %v9741_v37 = vadd.f32 %v16485_v16, %v5696_v45  ;;  %v5698_v25 = vpop.f32.mrb[177].mxu0  ;;  %v19159_v40 = vld [vmem:[#allocation21_spill] sm:$0xff]  ;;  %9365 = vmatprep.subr.bf16.mxu1 %v9364_v31  ;;  %v6521_v50 = vmax.f32 %v6467_v9, %v8344_v24  ;;  %v6987_v56 = vld [vmem:[%s18360_s9 + $0xe8] sm:$0xff]  ;;  %v19163_v13 = vld [vmem:[#allocation22_spill] sm:$0xff]  ;;  %vm6220_vm9 = vcmp.lt.s32.totalorder %v19134_v23, 6 }
 0x7df   : > { %vm19160_vm8 = vcmp.lt.s32.totalorder %v19159_v40, 14  ;;  %v6568_v15 = vmax.f32 %v6544_v59, %v16759_v3  ;;  %v6982_v59 = vld [vmem:[%s18360_s9 + $0xc0] sm:$0xff]  ;;  %v6989_v20 = vld [vmem:[%s18360_s9 + $0xf8] sm:$0xff] }
 0x7e0   : > { %v6145_v36 = vsel %vm19160_vm8, %v6103_v52, 0.0  ;;  %v8309_v57 = vld [vmem:[%s11769_s20 + $0x78] ss:$2 sm:$0xff]  ;;  %v5972_v2 = vadd.f32 %v9741_v37, %v19161_v53  ;;  %v9368_v52 = vpack.c.bf16 %v6985_v43, %v6983_v46  ;;  %v6984_v37 = vld [vmem:[%s18360_s9 + $0xd0] sm:$0xff]  ;;  %vm19164_vm8 = vcmp.lt.s32.totalorder %v19163_v13, 14 }
 0x7e1   : > { %6187 = vst [vmem:[%s11769_s20 + $0x90] sm:$0xff] %v6145_v36  ;;  %v5701_v26 = vpop.f32.mrb[178].mxu0  ;;  %v8292_v54 = vld [vmem:[%s11769_s20 + $0x72] ss:$2 sm:$0xff]  ;;  %v6414_v43 = vmax.f32 %v6360_v4, %v8309_v57  ;;  %9367 = vmatpush1.bf16.msra.mxu1 %v9366_v14  ;;  %v6307_v14 = vmax.f32 %v16745_v61, %v16759_v3  ;;  %v6991_v61 = vld [vmem:[%s18360_s9 + $0x108] sm:$0xff] }
 0x7e2   : > { %v9742_v45 = vadd.f32 %v16485_v16, %v5701_v26  ;;  %v5703_v49 = vpop.f32.mrb[179].mxu0  ;;  %v6592_v19 = vmax.f32 %v6568_v15, %v8292_v54  ;;  %v6104_v25 = vmax.f32 %v5972_v2, 0.0  ;;  %v9370_v15 = vpack.c.bf16 %v6984_v37, %v6982_v59  ;;  %9369 = vmatprep.subr.bf16.mxu1 %v9368_v52  ;;  %v6986_v59 = vld [vmem:[%s18360_s9 + $0xe0] sm:$0xff]  ;;  %v6988_v37 = vld [vmem:[%s18360_s9 + $0xf0] sm:$0xff]  ;;  %v6993_v3 = vld [vmem:[%s18360_s9 + $0x118] sm:$0xff] }
 0x7e3   : > { %v8327_v49 = vld [vmem:[%s11769_s20 + $0x79] ss:$2 sm:$0xff]  ;;  %v6361_v13 = vmax.f32 %v6307_v14, %v8292_v54  ;;  %v6992_v54 = vld [vmem:[%s18360_s9 + $0x110] sm:$0xff] }
 0x7e4   : > { %v16796_v31 = vld [vmem:[%s11769_s20 + $0x80] ss:$2 sm:$0xff]  ;;  %v5977_v46 = vadd.f32 %v9742_v45, %v19162_v35  ;;  %v6146_v40 = vsel %vm19164_vm8, %v6104_v25, 0.0  ;;  %v6610_v9 = vsel %vm18648_vm1, %v6592_v19, 0.0  ;;  %v16805_v53 = vld [vmem:[%s11769_s20 + $0x81] ss:$2 sm:$0xff]  ;;  %10930 = vmatprep.mubr.msk.f32.mxu1 %vm18648_vm1, %v6592_v19  ;;  %v9372_v45 = vpack.c.bf16 %v6989_v20, %v6987_v56 }
 0x7e5   : > { %v5706_v36 = vpop.f32.mrb[180].mxu0  ;;  %v6545_v24 = vmax.f32 %v6521_v50, %v16796_v31  ;;  %6188 = vst [vmem:[%s11769_s20 + $0x98] sm:$0xff] %v6146_v40  ;;  %6628 = vst [vmem:[%s16581_s29 + $0x20] sm:$0xff] %v6610_v9  ;;  %v19165_v19 = vld [vmem:[#allocation23_spill] sm:$0xff]  ;;  %v6468_v50 = vmax.f32 %v6414_v43, %v8327_v49  ;;  %v19167_v56 = vld [vmem:[#allocation88_spill] sm:$0xff]  ;;  %vm18649_vm1 = vcmp.lt.s32.totalorder %v19126_v38, 6  ;;  %9371 = vmatpush1.bf16.msra.mxu1 %v9370_v15 }
 0x7e6   : > { %v6105_v2 = vmax.f32 %v5977_v46, 0.0  ;;  %v9743_v26 = vadd.f32 %v16485_v16, %v5706_v36  ;;  %v5708_v57 = vpop.f32.mrb[181].mxu0  ;;  %vm19166_vm8 = vcmp.lt.s32.totalorder %v19165_v19, 14  ;;  %v8345_v35 = vld [vmem:[%s11769_s20 + $0x7a] ss:$2 sm:$0xff]  ;;  %9373 = vmatprep.subr.bf16.mxu1 %v9372_v45  ;;  %v19168_v15 = vld [vmem:[#allocation24_spill] sm:$0xff] }
 0x7e7   : > { %v6569_v4 = vmax.f32 %v6545_v24, %v16805_v53  ;;  %v9376_v57 = vpack.c.bf16 %v6993_v3, %v6991_v61  ;;  %v6990_v49 = vld [vmem:[%s18360_s9 + $0x100] sm:$0xff] }
 0x7e8   : > { %v8310_v25 = vld [vmem:[%s11769_s20 + $0x88] ss:$2 sm:$0xff]  ;;  %v6147_v52 = vsel %vm19166_vm8, %v6105_v2, 0.0  ;;  %v5982_v20 = vadd.f32 %v9743_v26, %v19167_v56  ;;  %v9374_v2 = vpack.c.bf16 %v6988_v37, %v6986_v59  ;;  %vm19169_vm8 = vcmp.lt.s32.totalorder %v19168_v15, 14  ;;  %v19170_v19 = vld [vmem:[#allocation50_spill] sm:$0xff]  ;;  %v6997_v37 = vld [vmem:[%s18360_s9 + $0x138] sm:$0xff] }
 0x7e9   : > { %6189 = vst [vmem:[%s11769_s20 + $0xa0] sm:$0xff] %v6147_v52  ;;  %v5711_v46 = vpop.f32.mrb[182].mxu0  ;;  %v8293_v40 = vld [vmem:[%s11769_s20 + $0x82] ss:$2 sm:$0xff]  ;;  %v6415_v26 = vmax.f32 %v6361_v13, %v8310_v25  ;;  %v8328_v56 = vld [vmem:[%s11769_s20 + $0x89] ss:$2 sm:$0xff]  ;;  %v9378_v3 = vpack.c.bf16 %v6992_v54, %v6990_v49 }
 0x7ea   : > { %v6106_v36 = vmax.f32 %v5982_v20, 0.0  ;;  %v9744_v43 = vadd.f32 %v16485_v16, %v5711_v46  ;;  %v5713_v9 = vpop.f32.mrb[183].mxu0  ;;  %v6593_v24 = vmax.f32 %v6569_v4, %v8293_v40  ;;  %v6522_v4 = vmax.f32 %v6468_v50, %v8345_v35  ;;  %v6995_v59 = vld [vmem:[%s18360_s9 + $0x128] sm:$0xff]  ;;  %9375 = vmatpush1.bf16.msra.mxu1 %v9374_v2  ;;  %v19171_v54 = vld [vmem:[#allocation25_spill] sm:$0xff] }
 0x7eb   : > { %v6469_v46 = vmax.f32 %v6415_v26, %v8328_v56  ;;  %9377 = vmatprep.subr.bf16.mxu1 %v9376_v57  ;;  %v6994_v9 = vld [vmem:[%s18360_s9 + $0x120] sm:$0xff]  ;;  %v6308_v2 = vmax.f32 %v16796_v31, %v16805_v53  ;;  %v6999_v57 = vld [vmem:[%s18360_s9 + $0x148] sm:$0xff] }
 0x7ec   : > { %v6148_v14 = vsel %vm19169_vm8, %v6106_v36, 0.0  ;;  %v5987_v52 = vadd.f32 %v9744_v43, %v19170_v19  ;;  %v6611_v45 = vsel %vm18649_vm1, %v6593_v24, 0.0  ;;  %v16855_v25 = vld [vmem:[%s11769_s20 + $0x90] ss:$2 sm:$0xff]  ;;  %10931 = vmatmul.mubr.msk.f32.gmra.mrb[130].mxu1 %vm18649_vm1, %v6593_v24  ;;  %v16864_v35 = vld [vmem:[%s11769_s20 + $0x91] ss:$2 sm:$0xff]  ;;  %v9380_v43 = vpack.c.bf16 %v6997_v37, %v6995_v59 }
 0x7ed   : > { %6190 = vst [vmem:[%s11769_s20 + $0xa8] sm:$0xff] %v6148_v14  ;;  %6629 = vst [vmem:[%s16581_s29 + $0x28] sm:$0xff] %v6611_v45  ;;  %v5716_v61 = vpop.f32.mrb[184].mxu0  ;;  %v6546_v50 = vmax.f32 %v6522_v4, %v16855_v25  ;;  %v6996_v24 = vld [vmem:[%s18360_s9 + $0x130] sm:$0xff]  ;;  %vm19172_vm8 = vcmp.lt.s32.totalorder %v19171_v54, 14  ;;  %v7001_v14 = vld [vmem:[%s18360_s9 + $0x158] sm:$0xff]  ;;  %v6362_v37 = vmax.f32 %v6308_v2, %v8293_v40 }
 0x7ee   : > { %v6107_v20 = vmax.f32 %v5987_v52, 0.0  ;;  %v9745_v13 = vadd.f32 %v16485_v16, %v5716_v61  ;;  %v5718_v36 = vpop.f32.mrb[185].mxu0  ;;  %v8346_v49 = vld [vmem:[%s11769_s20 + $0x8a] ss:$2 sm:$0xff]  ;;  %vm18650_vm1 = vcmp.lt.s32.totalorder %v19128_v27, 6  ;;  %9379 = vmatpush1.bf16.msra.mxu1 %v9378_v3  ;;  %v6998_v54 = vld [vmem:[%s18360_s9 + $0x140] sm:$0xff] }
 0x7ef   : > { %v6570_v15 = vmax.f32 %v6546_v50, %v16864_v35  ;;  %v19173_v52 = vld [vmem:[#allocation93_spill] sm:$0xff]  ;;  %v6523_v50 = vmax.f32 %v6469_v46, %v8346_v49  ;;  %9381 = vmatprep.subr.bf16.mxu1 %v9380_v43  ;;  %v9384_v36 = vpack.c.bf16 %v7001_v14, %v6999_v57  ;;  %v19174_v40 = vld [vmem:[#allocation52_spill] sm:$0xff]  ;;  %v7003_v46 = vld [vmem:[%s18360_s9 + $0x168] sm:$0xff] }
 0x7f0   : > { %v6149_v26 = vsel %vm19172_vm8, %v6107_v20, 0.0  ;;  %v8311_v19 = vld [vmem:[%s11769_s20 + $0x98] ss:$2 sm:$0xff]  ;;  %v5992_v31 = vadd.f32 %v9745_v13, %v19173_v52  ;;  %v9382_v20 = vpack.c.bf16 %v6996_v24, %v6994_v9  ;;  %v7000_v13 = vld [vmem:[%s18360_s9 + $0x150] sm:$0xff] }
 0x7f1   : > { %6191 = vst [vmem:[%s11769_s20 + $0xb0] sm:$0xff] %v6149_v26  ;;  %v5721_v53 = vpop.f32.mrb[186].mxu0  ;;  %v8294_v45 = vld [vmem:[%s11769_s20 + $0x92] ss:$2 sm:$0xff]  ;;  %v6416_v9 = vmax.f32 %v6362_v37, %v8311_v19 }
 0x7f2   : > { %v9746_v4 = vadd.f32 %v16485_v16, %v5721_v53  ;;  %v5723_v59 = vpop.f32.mrb[187].mxu0  ;;  %v6594_v56 = vmax.f32 %v6570_v15, %v8294_v45  ;;  %v6108_v61 = vmax.f32 %v5992_v31, 0.0  ;;  %v7005_v43 = vld [vmem:[%s18360_s9 + $0x178] sm:$0xff]  ;;  %v19175_v24 = vld [vmem:[#allocation26_spill] sm:$0xff]  ;;  %9383 = vmatpush1.bf16.msra.mxu1 %v9382_v20  ;;  %v9386_v53 = vpack.c.bf16 %v7000_v13, %v6998_v54  ;;  %v19177_v20 = vld [vmem:[#allocation27_spill] sm:$0xff] }
 0x7f3   : > { %vm19176_vm8 = vcmp.lt.s32.totalorder %v19175_v24, 14  ;;  %v8329_v59 = vld [vmem:[%s11769_s20 + $0x99] ss:$2 sm:$0xff]  ;;  %9385 = vmatprep.subr.bf16.mxu1 %v9384_v36 }
 0x7f4   : > { %v16898_v26 = vld [vmem:[%s11769_s20 + $0xa0] ss:$2 sm:$0xff]  ;;  %v5997_v3 = vadd.f32 %v9746_v4, %v19174_v40  ;;  %v6150_v2 = vsel %vm19176_vm8, %v6108_v61, 0.0  ;;  %v6612_v15 = vsel %vm18650_vm1, %v6594_v56, 0.0  ;;  %v16913_v14 = vld [vmem:[%s11769_s20 + $0xa1] ss:$2 sm:$0xff]  ;;  %10932 = vmatprep.mubr.msk.f32.mxu1 %vm18650_vm1, %v6594_v56  ;;  %v6309_v4 = vmax.f32 %v16855_v25, %v16864_v35 }
 0x7f5   : > { %v5726_v49 = vpop.f32.mrb[188].mxu0  ;;  %v6547_v57 = vmax.f32 %v6523_v50, %v16898_v26  ;;  %6192 = vst [vmem:[%s11769_s20 + $0xb8] sm:$0xff] %v6150_v2  ;;  %6630 = vst [vmem:[%s16581_s29 + $0x30] sm:$0xff] %v6612_v15  ;;  %v9388_v61 = vpack.c.bf16 %v7005_v43, %v7003_v46  ;;  %v7002_v50 = vld [vmem:[%s18360_s9 + $0x160] sm:$0xff]  ;;  %v7004_v56 = vld [vmem:[%s18360_s9 + $0x170] sm:$0xff]  ;;  %vm19178_vm8 = vcmp.lt.s32.totalorder %v19177_v20, 14  ;;  %v6470_v13 = vmax.f32 %v6416_v9, %v8329_v59 }
 0x7f6   : > { %v6109_v19 = vmax.f32 %v5997_v3, 0.0  ;;  %v9747_v52 = vadd.f32 %v16485_v16, %v5726_v49  ;;  %v5728_v31 = vpop.f32.mrb[189].mxu0  ;;  %v19179_v25 = vld [vmem:[#allocation95_spill] sm:$0xff]  ;;  %vm18651_vm1 = vcmp.lt.s32.totalorder %v19130_v47, 6  ;;  %v6363_v46 = vmax.f32 %v6309_v4, %v8294_v45  ;;  %9387 = vmatpush1.bf16.msra.mxu1 %v9386_v53 }
 0x7f7   : > { %v6571_v37 = vmax.f32 %v6547_v57, %v16913_v14  ;;  %v8347_v3 = vld [vmem:[%s11769_s20 + $0x9a] ss:$2 sm:$0xff]  ;;  %v9390_v9 = vpack.c.bf16 %v7004_v56, %v7002_v50  ;;  %9389 = vmatprep.subr.bf16.mxu1 %v9388_v61  ;;  %v19182_v31 = vld [vmem:[#allocation96_spill] sm:$0xff] }
 0x7f8   : > { %v8312_v40 = vld [vmem:[%s11769_s20 + $0xa8] ss:$2 sm:$0xff]  ;;  %v6151_v54 = vsel %vm19178_vm8, %v6109_v19, 0.0  ;;  %v6002_v35 = vadd.f32 %v9747_v52, %v19179_v25  ;;  %v6524_v4 = vmax.f32 %v6470_v13, %v8347_v3  ;;  %v8330_v53 = vld [vmem:[%s11769_s20 + $0xa9] ss:$2 sm:$0xff]  ;;  %v6310_v13 = vmax.f32 %v16898_v26, %v16913_v14  ;;  %v19183_v3 = vld [vmem:[#allocation29_spill] sm:$0xff] }
 0x7f9   : > { %6193 = vst [vmem:[%s11769_s20 + $0xc0] sm:$0xff] %v6151_v54  ;;  %v5731_v36 = vpop.f32.mrb[190].mxu0  ;;  %v8295_v43 = vld [vmem:[%s11769_s20 + $0xa2] ss:$2 sm:$0xff]  ;;  %v6417_v57 = vmax.f32 %v6363_v46, %v8312_v40 }
 0x7fa   : > { %v6110_v24 = vmax.f32 %v6002_v35, 0.0  ;;  %v9748_v2 = vadd.f32 %v16485_v16, %v5731_v36  ;;  %v5733_v49 = vpop.f32.mrb[191].mxu0  ;;  %v6595_v15 = vmax.f32 %v6571_v37, %v8295_v43  ;;  %v19180_v19 = vld [vmem:[#allocation28_spill] sm:$0xff]  ;;  %9391 = vmatpush1.bf16.msra.mxu1 %v9390_v9  ;;  %v6364_v26 = vmax.f32 %v6310_v13, %v8295_v43 }
 0x7fb   : > { %vm19181_vm8 = vcmp.lt.s32.totalorder %v19180_v19, 14  ;;  %v6471_v40 = vmax.f32 %v6417_v57, %v8330_v53 }
 0x7fc   : > { %v6152_v52 = vsel %vm19181_vm8, %v6110_v24, 0.0  ;;  %v6007_v59 = vadd.f32 %v9748_v2, %v19182_v31  ;;  %v6613_v45 = vsel %vm18651_vm1, %v6595_v15, 0.0  ;;  %v8260_v20 = vld [vmem:[%s11769_s20 + $0xb0] ss:$2 sm:$0xff]  ;;  %10933 = vmatmul.mubr.msk.f32.gmra.mrb[132].mxu1 %vm18651_vm1, %v6595_v15  ;;  %v8278_v56 = vld [vmem:[%s11769_s20 + $0xb1] ss:$2 sm:$0xff] }
 0x7fd   : > { %6194 = vst [vmem:[%s11769_s20 + $0xc8] sm:$0xff] %v6152_v52  ;;  %6631 = vst [vmem:[%s16581_s29 + $0x38] sm:$0xff] %v6613_v45  ;;  %v5736_v61 = vpop.f32.mrb[192].mxu0  ;;  %v6548_v50 = vmax.f32 %v6524_v4, %v8260_v20  ;;  %v8348_v35 = vld [vmem:[%s11769_s20 + $0xaa] ss:$2 sm:$0xff]  ;;  %vm19184_vm8 = vcmp.lt.s32.totalorder %v19183_v3, 14  ;;  %v6311_v3 = vmax.f32 %v8260_v20, %v8278_v56 }
 0x7fe   : > { %v6111_v37 = vmax.f32 %v6007_v59, 0.0  ;;  %v9749_v54 = vadd.f32 %v16485_v16, %v5736_v61  ;;  %v5738_v25 = vpop.f32.mrb[193].mxu0  ;;  %v19185_v2 = vld [vmem:[#allocation97_spill] sm:$0xff]  ;;  %vm6219_vm1 = vcmp.lt.s32.totalorder %v19132_v44, 6  ;;  %v6525_v31 = vmax.f32 %v6471_v40, %v8348_v35  ;;  %v19186_v45 = vld [vmem:[#allocation66_spill] sm:$0xff] }
 0x7ff   : > { %v6572_v46 = vmax.f32 %v6548_v50, %v8278_v56 }
 0x800   : > { %v6153_v36 = vsel %vm19184_vm8, %v6111_v37, 0.0  ;;  %v8313_v24 = vld [vmem:[%s11769_s20 + $0xb8] ss:$2 sm:$0xff]  ;;  %v6012_v49 = vadd.f32 %v9749_v54, %v19185_v2  ;;  %v19189_v2 = vld [vmem:[#allocation31_spill] sm:$0xff] }
 0x801   : > { %6195 = vst [vmem:[%s11769_s20 + $0xd0] sm:$0xff] %v6153_v36  ;;  %v5741_v15 = vpop.f32.mrb[194].mxu0  ;;  %v8296_v9 = vld [vmem:[%s11769_s20 + $0xb2] ss:$2 sm:$0xff]  ;;  %v6418_v53 = vmax.f32 %v6364_v26, %v8313_v24  ;;  %v8331_v36 = vld [vmem:[%s11769_s20 + $0xb9] ss:$2 sm:$0xff] }
 0x802   : > { %v9750_v57 = vadd.f32 %v16485_v16, %v5741_v15  ;;  %v5743_v19 = vpop.f32.mrb[195].mxu0  ;;  %v6596_v14 = vmax.f32 %v6572_v46, %v8296_v9  ;;  %v6112_v52 = vmax.f32 %v6012_v49, 0.0  ;;  %v19187_v37 = vld [vmem:[#allocation30_spill] sm:$0xff] }
 0x803   : > { %vm19188_vm8 = vcmp.lt.s32.totalorder %v19187_v37, 14  ;;  %v6472_v15 = vmax.f32 %v6418_v53, %v8331_v36  ;;  %v17000_v36 = vld [vmem:[%s18357_s6] ss:$0 sm:$0xff] }
 0x804   : > { %v8261_v59 = vld [vmem:[%s11769_s20 + $0xc0] ss:$2 sm:$0xff]  ;;  %v6017_v4 = vadd.f32 %v9750_v57, %v19186_v45  ;;  %v6154_v61 = vsel %vm19188_vm8, %v6112_v52, 0.0  ;;  %v6614_v54 = vsel %vm6219_vm1, %v6596_v14, 0.0  ;;  %v8279_v43 = vld [vmem:[%s11769_s20 + $0xc1] ss:$2 sm:$0xff]  ;;  %10934 = vmatprep.mubr.msk.f32.mxu1 %vm6219_vm1, %v6596_v14  ;;  %v6365_v14 = vmax.f32 %v6311_v3, %v8296_v9 }
 0x805   : > { %v5746_v50 = vpop.f32.mrb[196].mxu0  ;;  %v6549_v25 = vmax.f32 %v6525_v31, %v8261_v59  ;;  %6196 = vst [vmem:[%s11769_s20 + $0xd8] sm:$0xff] %v6154_v61  ;;  %6632 = vst [vmem:[%s16581_s29 + $0x40] sm:$0xff] %v6614_v54  ;;  %vm19190_vm8 = vcmp.lt.s32.totalorder %v19189_v2, 14  ;;  %v19191_v57 = vld [vmem:[#allocation98_spill] sm:$0xff]  ;;  %v6312_v2 = vmax.f32 %v8261_v59, %v8279_v43 }
 0x806   : > { %v6113_v13 = vmax.f32 %v6017_v4, 0.0  ;;  %v9751_v40 = vadd.f32 %v16485_v16, %v5746_v50  ;;  %v5748_v35 = vpop.f32.mrb[197].mxu0  ;;  %v8349_v26 = vld [vmem:[%s11769_s20 + $0xba] ss:$2 sm:$0xff] }
 0x807   : > { %v6573_v46 = vmax.f32 %v6549_v25, %v8279_v43  ;;  %v19192_v61 = vld [vmem:[#allocation70_spill] sm:$0xff]  ;;  %v6526_v25 = vmax.f32 %v6472_v15, %v8349_v26  ;;  %v19193_v26 = vld [vmem:[#allocation99_spill] sm:$0xff] }
 0x808   : > { %v8314_v24 = vld [vmem:[%s11769_s20 + $0xc8] ss:$2 sm:$0xff]  ;;  %v6155_v49 = vsel %vm19190_vm8, %v6113_v13, 0.0  ;;  %v6022_v19 = vadd.f32 %v9751_v40, %v19191_v57 }
 0x809   : > { %6197 = vst [vmem:[%s11769_s20 + $0xe0] sm:$0xff] %v6155_v49  ;;  %v5751_v52 = vpop.f32.mrb[198].mxu0  ;;  %v8297_v20 = vld [vmem:[%s11769_s20 + $0xc2] ss:$2 sm:$0xff]  ;;  %v6419_v53 = vmax.f32 %v6365_v14, %v8314_v24 }
 0x80a   : > { %v6114_v56 = vmax.f32 %v6022_v19, 0.0  ;;  %v9752_v31 = vadd.f32 %v16485_v16, %v5751_v52  ;;  %v5753_v45 = vpop.f32.mrb[199].mxu0  ;;  %v6597_v4 = vmax.f32 %v6573_v46, %v8297_v20  ;;  %v8332_v16 = vld [vmem:[%s11769_s20 + $0xc9] ss:$2 sm:$0xff]  ;;  %v6366_v59 = vmax.f32 %v6312_v2, %v8297_v20 }
 0x80b   : > { %v6473_v3 = vmax.f32 %v6419_v53, %v8332_v16 }
 0x80c   : > { %v6156_v37 = vsel %vm2606_vm0, %v6114_v56, 0.0  ;;  %v6027_v50 = vadd.f32 %v9752_v31, %v19192_v61  ;;  %v6615_v54 = vsel %vm6220_vm9, %v6597_v4, 0.0  ;;  %v8262_v13 = vld [vmem:[%s11769_s20 + $0xd0] ss:$2 sm:$0xff]  ;;  %10935 = vmatmul.mubr.msk.f32.gmra.mrb[134].mxu1 %vm6220_vm9, %v6597_v4  ;;  %v8280_v35 = vld [vmem:[%s11769_s20 + $0xd1] ss:$2 sm:$0xff] }
 0x80d   : > { %6198 = vst [vmem:[%s11769_s20 + $0xe8] sm:$0xff] %v6156_v37  ;;  %6633 = vst [vmem:[%s16581_s29 + $0x48] sm:$0xff] %v6615_v54  ;;  %v5756_v5 = vpop.f32.mrb[200].mxu0  ;;  %v6550_v40 = vmax.f32 %v6526_v25, %v8262_v13  ;;  %v8350_v49 = vld [vmem:[%s11769_s20 + $0xca] ss:$2 sm:$0xff]  ;;  %vm6221_vm0 = vcmp.lt.s32.totalorder %v19136_v0, 6  ;;  %v6313_v8 = vmax.f32 %v8262_v13, %v8280_v35 }
 0x80e   : > { %v6115_v9 = vmax.f32 %v6027_v50, 0.0  ;;  %v9753_v46 = vadd.f32 %v17000_v36, %v5756_v5  ;;  %v5758_v24 = vpop.f32.mrb[201].mxu0  ;;  %v6527_v18 = vmax.f32 %v6473_v3, %v8350_v49  ;;  %v19194_v37 = vld [vmem:[#allocation72_spill] sm:$0xff] }
 0x80f   : > { %v6574_v57 = vmax.f32 %v6550_v40, %v8280_v35 }
 0x810   : > { %v6157_v15 = vsel %vm2607_vm15, %v6115_v9, 0.0  ;;  %v8315_v19 = vld [vmem:[%s11769_s20 + $0xd8] ss:$2 sm:$0xff]  ;;  %v6032_v52 = vadd.f32 %v9753_v46, %v19193_v26  ;;  %v8333_v46 = vld [vmem:[%s11769_s20 + $0xd9] ss:$2 sm:$0xff]  ;;  %vm6222_vm15 = vcmp.lt.s32.totalorder %v19139_v11, 6 }
 0x811   : > { %6199 = vst [vmem:[%s11769_s20 + $0xf0] sm:$0xff] %v6157_v15  ;;  %v5761_v14 = vpop.f32.mrb[202].mxu0  ;;  %v8298_v56 = vld [vmem:[%s11769_s20 + $0xd2] ss:$2 sm:$0xff]  ;;  %v6420_v50 = vmax.f32 %v6366_v59, %v8315_v19 }
 0x812   : > { %v9754_v31 = vadd.f32 %v17000_v36, %v5761_v14  ;;  %v5763_v45 = vpop.f32.mrb[203].mxu0  ;;  %v6598_v43 = vmax.f32 %v6574_v57, %v8298_v56  ;;  %v6116_v4 = vmax.f32 %v6032_v52, 0.0  ;;  %v19195_v57 = vld [vmem:[#allocation74_spill] sm:$0xff]  ;;  %v6367_v14 = vmax.f32 %v6313_v8, %v8298_v56  ;;  %v7007_v8 = vld [vmem:[%s18360_s9 + $0x188] sm:$0xff] }
 0x813   : > { %v6474_v15 = vmax.f32 %v6420_v50, %v8333_v46  ;;  %v7009_v46 = vld [vmem:[%s18360_s9 + $0x198] sm:$0xff] }
 0x814   : > { %v8263_v53 = vld [vmem:[%s11769_s20 + $0xe0] ss:$2 sm:$0xff]  ;;  %v6037_v61 = vadd.f32 %v9754_v31, %v19194_v37  ;;  %v6158_v54 = vsel %vm2608_vm5, %v6116_v4, 0.0  ;;  %v6616_v16 = vsel %vm6221_vm0, %v6598_v43, 0.0  ;;  %v8281_v20 = vld [vmem:[%s11769_s20 + $0xe1] ss:$2 sm:$0xff]  ;;  %10936 = vmatprep.mubr.msk.f32.mxu1 %vm6221_vm0, %v6598_v43 }
 0x815   : > { %v5766_v25 = vpop.f32.mrb[204].mxu0  ;;  %v6551_v9 = vmax.f32 %v6527_v18, %v8263_v53  ;;  %6200 = vst [vmem:[%s11769_s20 + $0xf8] sm:$0xff] %v6158_v54  ;;  %6634 = vst [vmem:[%s16581_s29 + $0x50] sm:$0xff] %v6616_v16  ;;  %v8351_v26 = vld [vmem:[%s11769_s20 + $0xda] ss:$2 sm:$0xff]  ;;  %v6314_v16 = vmax.f32 %v8263_v53, %v8281_v20  ;;  %vm19205_vm5 = vcmp.lt.s32.totalorder %v19121_v6, 6 }
 0x816   : > { %v6117_v5 = vmax.f32 %v6037_v61, 0.0  ;;  %v9755_v40 = vadd.f32 %v17000_v36, %v5766_v25  ;;  %v5768_v3 = vpop.f32.mrb[205].mxu0  ;;  %v19196_v4 = vld [vmem:[#allocation78_spill] sm:$0xff]  ;;  %v6528_v61 = vmax.f32 %v6474_v15, %v8351_v26 }
 0x817   : > { %v6575_v24 = vmax.f32 %v6551_v9, %v8281_v20  ;;  %v7006_v15 = vld [vmem:[%s18360_s9 + $0x180] sm:$0xff] }
 0x818   : > { %v8316_v2 = vld [vmem:[%s11769_s20 + $0xe8] ss:$2 sm:$0xff]  ;;  %v6159_v49 = vsel %vm2609_vm12, %v6117_v5, 0.0  ;;  %v6042_v19 = vadd.f32 %v9755_v40, %v19195_v57  ;;  %v8334_v56 = vld [vmem:[%s11769_s20 + $0xe9] ss:$2 sm:$0xff]  ;;  %vm19204_vm12 = vcmp.lt.s32.totalorder %v19122_v30, 6 }
 0x819   : > { %6201 = vst [vmem:[%s11769_s20 + $0x100] sm:$0xff] %v6159_v49  ;;  %v5771_v52 = vpop.f32.mrb[206].mxu0  ;;  %v8299_v13 = vld [vmem:[%s11769_s20 + $0xe2] ss:$2 sm:$0xff]  ;;  %v6421_v59 = vmax.f32 %v6367_v14, %v8316_v2  ;;  %v9392_v49 = vpack.c.bf16 %v7009_v46, %v7007_v8 }
 0x81a   : > { %v6118_v35 = vmax.f32 %v6042_v19, 0.0  ;;  %v9756_v31 = vadd.f32 %v17000_v36, %v5771_v52  ;;  %v5773_v45 = vpop.f32.mrb[207].mxu0  ;;  %v6599_v63 = vmax.f32 %v6575_v24, %v8299_v13  ;;  %v19197_v57 = vld [vmem:[#allocation100_spill] sm:$0xff]  ;;  %v6368_v52 = vmax.f32 %v6314_v16, %v8299_v13  ;;  %v7011_v13 = vld [vmem:[%s18360_s9 + $0x1a8] sm:$0xff] }
 0x81b   : > { %v6475_v5 = vmax.f32 %v6421_v59, %v8334_v56  ;;  %9393 = vmatprep.subr.bf16.mxu1 %v9392_v49 }
 0x81c   : > { %v6160_v43 = vsel %vm2610_vm10, %v6118_v35, 0.0  ;;  %v6047_v18 = vadd.f32 %v9756_v31, %v19196_v4  ;;  %v6617_v37 = vsel %vm6222_vm15, %v6599_v63, 0.0  ;;  %v17040_v50 = vld [vmem:[%s11769_s20 + $0xf0] ss:$2 sm:$0xff]  ;;  %10937 = vmatmul.mubr.msk.f32.gmra.mrb[136].mxu1 %vm6222_vm15, %v6599_v63  ;;  %v17049_v9 = vld [vmem:[%s11769_s20 + $0xf1] ss:$2 sm:$0xff] }
 0x81d   : > { %6202 = vst [vmem:[%s11769_s20 + $0x108] sm:$0xff] %v6160_v43  ;;  %6635 = vst [vmem:[%s16581_s29 + $0x58] sm:$0xff] %v6617_v37  ;;  %v5776_v51 = vpop.f32.mrb[208].mxu0  ;;  %v6552_v25 = vmax.f32 %v6528_v61, %v17040_v50  ;;  %v8352_v24 = vld [vmem:[%s11769_s20 + $0xea] ss:$2 sm:$0xff]  ;;  %v19198_v61 = vld [vmem:[#allocation46_spill] sm:$0xff] }
 0x81e   : > { %v6119_v54 = vmax.f32 %v6047_v18, 0.0  ;;  %v9757_v40 = vadd.f32 %v17000_v36, %v5776_v51  ;;  %v5778_v3 = vpop.f32.mrb[209].mxu0  ;;  %v7008_v35 = vld [vmem:[%s18360_s9 + $0x190] sm:$0xff]  ;;  %v6529_v4 = vmax.f32 %v6475_v5, %v8352_v24  ;;  %v7013_v18 = vld [vmem:[%s18360_s9 + $0x1b8] sm:$0xff] }
 0x81f   : > { %v6576_v20 = vmax.f32 %v6552_v25, %v17049_v9  ;;  %v9394_v63 = vpack.c.bf16 %v7008_v35, %v7006_v15  ;;  %v7012_v3 = vld [vmem:[%s18360_s9 + $0x1b0] sm:$0xff] }
 0x820   : > { %v8317_v2 = vld [vmem:[%s11769_s20 + $0xf8] ss:$2 sm:$0xff]  ;;  %v6161_v53 = vsel %vm2611_vm13, %v6119_v54, 0.0  ;;  %v6052_v19 = vadd.f32 %v9757_v40, %v19197_v57  ;;  %vm6223_vm13 = vcmp.lt.s32.totalorder %v19141_v42, 6  ;;  %v9396_v54 = vpack.c.bf16 %v7013_v18, %v7011_v13  ;;  %v8335_v8 = vld [vmem:[%s11769_s20 + $0xf9] ss:$2 sm:$0xff] }
 0x821   : > { %6203 = vst [vmem:[%s11769_s20 + $0x110] sm:$0xff] %v6161_v53  ;;  %v5781_v26 = vpop.f32.mrb[210].mxu0  ;;  %v8300_v14 = vld [vmem:[%s11769_s20 + $0xf2] ss:$2 sm:$0xff]  ;;  %v6422_v43 = vmax.f32 %v6368_v52, %v8317_v2  ;;  %9395 = vmatpush1.bf16.msra.mxu1 %v9394_v63  ;;  %v7015_v57 = vld [vmem:[%s18360_s9 + $0x1c8] sm:$0xff] }
 0x822   : > { %v9758_v17 = vadd.f32 %v17000_v36, %v5781_v26  ;;  %v5783_v31 = vpop.f32.mrb[211].mxu0  ;;  %v6600_v45 = vmax.f32 %v6576_v20, %v8300_v14  ;;  %v6120_v59 = vmax.f32 %v6052_v19, 0.0  ;;  %v7010_v40 = vld [vmem:[%s18360_s9 + $0x1a0] sm:$0xff]  ;;  %9397 = vmatprep.subr.bf16.mxu1 %v9396_v54  ;;  %v6315_v20 = vmax.f32 %v17040_v50, %v17049_v9  ;;  %v7017_v19 = vld [vmem:[%s18360_s9 + $0x1d8] sm:$0xff]  ;;  %v7016_v63 = vld [vmem:[%s18360_s9 + $0x1d0] sm:$0xff] }
 0x823   : > { %v9398_v53 = vpack.c.bf16 %v7012_v3, %v7010_v40  ;;  %v6476_v49 = vmax.f32 %v6422_v43, %v8335_v8  ;;  %v7014_v26 = vld [vmem:[%s18360_s9 + $0x1c0] sm:$0xff]  ;;  %v19200_v9 = vld [vmem:[#allocation45_spill] sm:$0xff]  ;;  %v7019_v18 = vld [vmem:[%s18360_s9 + $0x1e8] sm:$0xff] }
 0x824   : > { %v17081_v37 = vld [vmem:[%s11769_s20 + $0x100] ss:$2 sm:$0xff]  ;;  %v6057_v56 = vadd.f32 %v9758_v17, %v19198_v61  ;;  %v6162_v51 = vsel %vm2612_vm7, %v6120_v59, 0.0  ;;  %v6618_v16 = vsel %vm6223_vm13, %v6600_v45, 0.0  ;;  %v17097_v46 = vld [vmem:[%s11769_s20 + $0x101] ss:$2 sm:$0xff]  ;;  %10938 = vmatprep.mubr.msk.f32.mxu1 %vm6223_vm13, %v6600_v45  ;;  %v9400_v45 = vpack.c.bf16 %v7017_v19, %v7015_v57 }
 0x825   : > { %v5786_v25 = vpop.f32.mrb[212].mxu0  ;;  %v6553_v5 = vmax.f32 %v6529_v4, %v17081_v37  ;;  %6204 = vst [vmem:[%s11769_s20 + $0x118] sm:$0xff] %v6162_v51  ;;  %6636 = vst [vmem:[%s16581_s29 + $0x60] sm:$0xff] %v6618_v16  ;;  %v8353_v52 = vld [vmem:[%s11769_s20 + $0xfa] ss:$2 sm:$0xff]  ;;  %9399 = vmatpush1.bf16.msra.mxu1 %v9398_v53  ;;  %vm6224_vm7 = vcmp.lt.s32.totalorder %v19144_v33, 6  ;;  %v6369_v43 = vmax.f32 %v6315_v20, %v8300_v14 }
 0x826   : > { %v6121_v7 = vmax.f32 %v6057_v56, 0.0  ;;  %v9759_v24 = vadd.f32 %v17000_v36, %v5786_v25  ;;  %v5788_v2 = vpop.f32.mrb[213].mxu0  ;;  %v9402_v13 = vpack.c.bf16 %v7016_v63, %v7014_v26  ;;  %v7021_v61 = vld [vmem:[%s18360_s9 + $0x1f8] sm:$0xff]  ;;  %9401 = vmatprep.subr.bf16.mxu1 %v9400_v45  ;;  %v7018_v14 = vld [vmem:[%s18360_s9 + $0x1e0] sm:$0xff]  ;;  %v7020_v16 = vld [vmem:[%s18360_s9 + $0x1f0] sm:$0xff]  ;;  %v6530_v40 = vmax.f32 %v6476_v49, %v8353_v52 }
 0x827   : > { %v6577_v15 = vmax.f32 %v6553_v5, %v17097_v46  ;;  %v9404_v3 = vpack.c.bf16 %v7021_v61, %v7019_v18  ;;  %v9406_v2 = vpack.c.bf16 %v7020_v16, %v7018_v14  ;;  %v6316_v52 = vmax.f32 %v17081_v37, %v17097_v46 }
 0x828   : > { %v8318_v35 = vld [vmem:[%s11769_s20 + $0x108] ss:$2 sm:$0xff]  ;;  %v6163_v50 = vsel %vm2613_vm3, %v6121_v7, 0.0  ;;  %v6062_v31 = vadd.f32 %v9759_v24, %v19200_v9  ;;  %v8336_v20 = vld [vmem:[%s11769_s20 + $0x109] ss:$2 sm:$0xff]  ;;  %vm19202_vm3 = vcmp.lt.s32.totalorder %v19119_v21, 6 }
 0x829   : > { %6205 = vst [vmem:[%s11769_s20 + $0x120] sm:$0xff] %v6163_v50  ;;  %v5791_v59 = vpop.f32.mrb[214].mxu0  ;;  %v8301_v4 = vld [vmem:[%s11769_s20 + $0x102] ss:$2 sm:$0xff]  ;;  %v6423_v5 = vmax.f32 %v6369_v43, %v8318_v35  ;;  %9403 = vmatpush1.bf16.msra.mxu1 %v9402_v13  ;;  %vm19203_vm10 = vmmov %vm19202_vm3 }
 0x82a   : > { %v6122_v56 = vmax.f32 %v6062_v31, 0.0  ;;  %v9760_v54 = vadd.f32 %v17000_v36, %v5791_v59  ;;  %v5793_v51 = vpop.f32.mrb[215].mxu0  ;;  %v6601_v25 = vmax.f32 %v6577_v15, %v8301_v4  ;;  %9405 = vmatprep.subr.bf16.mxu1 %v9404_v3  ;;  %v6370_v46 = vmax.f32 %v6316_v52, %v8301_v4 }
 0x82b   : > { %v6477_v57 = vmax.f32 %v6423_v5, %v8336_v20 }
 0x82c   : > { %v6164_v8 = vsel %vm2614_vm14, %v6122_v56, 0.0  ;;  %v6067_v7 = vadd.f32 %v9760_v54, %v16524_v12  ;;  %v6619_v24 = vsel %vm6224_vm7, %v6601_v25, 0.0  ;;  %v8266_v53 = vld [vmem:[%s11769_s20 + $0x110] ss:$2 sm:$0xff]  ;;  %10939 = vmatmul.mubr.msk.f32.gmra.mrb[138].mxu1 %vm6224_vm7, %v6601_v25  ;;  %v8284_v15 = vld [vmem:[%s11769_s20 + $0x111] ss:$2 sm:$0xff] }
 0x82d   : > { %6206 = vst [vmem:[%s11769_s20 + $0x128] sm:$0xff] %v6164_v8  ;;  %6637 = vst [vmem:[%s16581_s29 + $0x68] sm:$0xff] %v6619_v24  ;;  %v5796_v49 = vpop.f32.mrb[216].mxu0  ;;  %v6554_v12 = vmax.f32 %v6530_v40, %v8266_v53  ;;  %v8354_v35 = vld [vmem:[%s11769_s20 + $0x10a] ss:$2 sm:$0xff]  ;;  %9407 = vmatpush1.bf16.msra.mxu1 %v9406_v2  ;;  %vm6225_vm14 = vcmp.lt.s32.totalorder %v19147_v32, 6  ;;  %v6317_v39 = vmax.f32 %v8266_v53, %v8284_v15 }
 0x82e   : > { %v6123_v41 = vmax.f32 %v6067_v7, 0.0  ;;  %v9761_v19 = vadd.f32 %v17000_v36, %v5796_v49  ;;  %v5798_v26 = vpop.f32.mrb[217].mxu0  ;;  %v6531_v18 = vmax.f32 %v6477_v57, %v8354_v35  ;;  %v10813_v32 = vld [vmem:[%s11764_s30 + $0x180] sm:$0xff] }
 0x82f   : > { %v6578_v50 = vmax.f32 %v6554_v12, %v8284_v15 }
 0x830   : > { %v8302_v17 = vld [vmem:[%s11769_s20 + $0x112] ss:$2 sm:$0xff]  ;;  %v6165_v31 = vsel %vm2615_vm2, %v6123_v41, 0.0  ;;  %v6072_v45 = vadd.f32 %v9761_v19, %v16521_v34  ;;  %vm19201_vm2 = vcmp.lt.s32.totalorder %v19120_v60, 6 }
 0x831   : > { %v8319_v9 = vld [vmem:[%s11769_s20 + $0x118] ss:$2 sm:$0xff]  ;;  %v5801_v63 = vpop.f32.mrb[218].mxu0  ;;  %6207 = vst [vmem:[%s11769_s20 + $0x130] sm:$0xff] %v6165_v31  ;;  %v6602_v43 = vmax.f32 %v6578_v50, %v8302_v17  ;;  %v6371_v24 = vmax.f32 %v6317_v39, %v8302_v17  ;;  %vm19206_vm8 = vmmov %vm19201_vm2 }
 0x832   : > { %v9762_v59 = vadd.f32 %v17000_v36, %v5801_v63  ;;  %v5803_v37 = vpop.f32.mrb[219].mxu0  ;;  %v6124_v13 = vmax.f32 %v6072_v45, 0.0  ;;  %v6424_v56 = vmax.f32 %v6370_v46, %v8319_v9  ;;  %v7022_v39 = vld [vmem:[%s18360_s9 + $0x200] sm:$0xff] }
 0x833   : > { %v6620_v51 = vsel %vm6225_vm14, %v6602_v43, 0.0  ;;  %10940 = vmatprep.mubr.msk.f32.mxu1 %vm6225_vm14, %v6602_v43 }
 0x834   : > { %v8357_v61 = vld [vmem:[%s11769_s20 + $0x120] ss:$2 sm:$0xff]  ;;  %v6077_v22 = vadd.f32 %v9762_v59, %v16543_v10  ;;  %v6166_v34 = vsel %vm2616_vm6, %v6124_v13, 0.0  ;;  %v8360_v14 = vld [vmem:[%s11769_s20 + $0x121] ss:$2 sm:$0xff]  ;;  %6638 = vst [vmem:[%s16581_s29 + $0x70] sm:$0xff] %v6620_v51 }
 0x835   : > { %v5806_v54 = vpop.f32.mrb[220].mxu0  ;;  %v6555_v25 = vmax.f32 %v6531_v18, %v8357_v61  ;;  %6208 = vst [vmem:[%s11769_s20 + $0x138] sm:$0xff] %v6166_v34  ;;  %v8337_v10 = vld [vmem:[%s11769_s20 + $0x119] ss:$2 sm:$0xff]  ;;  %vm6226_vm6 = vcmp.lt.s32.totalorder %v19151_v62, 6  ;;  %v7023_v18 = vld [vmem:[%s18360_s9 + $0x208] sm:$0xff] }
 0x836   : > { %v6125_v4 = vmax.f32 %v6077_v22, 0.0  ;;  %v9763_v16 = vadd.f32 %v17000_v36, %v5806_v54  ;;  %v5808_v5 = vpop.f32.mrb[221].mxu0  ;;  %v6478_v8 = vmax.f32 %v6424_v56, %v8337_v10  ;;  %v8355_v36 = vld [vmem:[%s11769_s20 + $0x11a] ss:$2 sm:$0xff]  ;;  %v7024_v10 = vld [vmem:[%s18360_s9 + $0x210] sm:$0xff] }
 0x837   : > { %v6579_v40 = vmax.f32 %v6555_v25, %v8360_v14  ;;  %v7025_v61 = vld [vmem:[%s18360_s9 + $0x218] sm:$0xff]  ;;  %v17222_v56 = vld [vmem:[%s18359_s8] ss:$0 sm:$0xff] }
 0x838   : > { %v6167_v3 = vsel %vm2617_vm11, %v6125_v4, 0.0  ;;  %v6082_v7 = vadd.f32 %v9763_v16, %v16538_v58  ;;  %v8320_v2 = vld [vmem:[%s11769_s20 + $0x128] ss:$2 sm:$0xff]  ;;  %v6532_v58 = vmax.f32 %v6478_v8, %v8355_v36  ;;  %v8338_v57 = vld [vmem:[%s11769_s20 + $0x129] ss:$2 sm:$0xff]  ;;  %vm6228_vm11 = vcmp.lt.s32.totalorder %v19156_v55, 6 }
 0x839   : > { %v8363_v20 = vld [vmem:[%s11769_s20 + $0x122] ss:$2 sm:$0xff]  ;;  %6209 = vst [vmem:[%s11769_s20 + $0x140] sm:$0xff] %v6167_v3  ;;  %v6425_v49 = vmax.f32 %v6371_v24, %v8320_v2  ;;  %v9408_v22 = vpack.c.bf16 %v7025_v61, %v7023_v18  ;;  %v7029_v3 = vld [vmem:[%s18360_s9 + $0x238] sm:$0xff]  ;;  %v9410_v8 = vpack.c.bf16 %v7024_v10, %v7022_v39 }
 0x83a   : > { %v6126_v53 = vmax.f32 %v6082_v7, 0.0  ;;  %v6603_v41 = vmax.f32 %v6579_v40, %v8363_v20  ;;  %v7027_v40 = vld [vmem:[%s18360_s9 + $0x228] sm:$0xff]  ;;  %v7026_v24 = vld [vmem:[%s18360_s9 + $0x220] sm:$0xff]  ;;  %v7028_v2 = vld [vmem:[%s18360_s9 + $0x230] sm:$0xff] }
 0x83b   : > { %v6479_v26 = vmax.f32 %v6425_v49, %v8338_v57  ;;  %9409 = vmatprep.subr.bf16.mxu1 %v9408_v22  ;;  %v9412_v36 = vpack.c.bf16 %v7029_v3, %v7027_v40  ;;  %v7031_v20 = vld [vmem:[%s18360_s9 + $0x248] sm:$0xff]  ;;  %v7040_v18 = vld [vmem:[%s18360_s9 + $0x290] sm:$0xff]  ;;  %v7045_v22 = vld [vmem:[%s18360_s9 + $0x2b8] sm:$0xff] }
 0x83c   : > { %v6168_v1 = vsel %vm2618_vm4, %v6126_v53, 0.0  ;;  %v6621_v12 = vsel %vm6226_vm6, %v6603_v41, 0.0  ;;  %v8358_v15 = vld [vmem:[%s11769_s20 + $0x130] ss:$2 sm:$0xff]  ;;  %10941 = vmatmul.mubr.msk.f32.gmra.mrb[140].mxu1 %vm6226_vm6, %v6603_v41  ;;  %v8361_v52 = vld [vmem:[%s11769_s20 + $0x131] ss:$2 sm:$0xff]  ;;  %v9414_v41 = vpack.c.bf16 %v7028_v2, %v7026_v24 }
 0x83d   : > { %6210 = vst [vmem:[%s11769_s20 + $0x148] sm:$0xff] %v6168_v1  ;;  %6639 = vst [vmem:[%s16581_s29 + $0x78] sm:$0xff] %v6621_v12  ;;  %v6556_v19 = vmax.f32 %v6532_v58, %v8358_v15  ;;  %v8356_v48 = vld [vmem:[%s11769_s20 + $0x12a] ss:$2 sm:$0xff]  ;;  %vm6227_vm4 = vcmp.lt.s32.totalorder %v19153_v29, 6  ;;  %v7030_v12 = vld [vmem:[%s18360_s9 + $0x240] sm:$0xff] }
 0x83e   : > { %v6533_v9 = vmax.f32 %v6479_v26, %v8356_v48  ;;  %v7033_v53 = vld [vmem:[%s18360_s9 + $0x258] sm:$0xff]  ;;  %v7032_v58 = vld [vmem:[%s18360_s9 + $0x250] sm:$0xff]  ;;  %v7043_v61 = vld [vmem:[%s18360_s9 + $0x2a8] sm:$0xff] }
 0x83f   : > { %v6580_v17 = vmax.f32 %v6556_v19, %v8361_v52  ;;  %v9416_v1 = vpack.c.bf16 %v7033_v53, %v7031_v20  ;;  %v7035_v19 = vld [vmem:[%s18360_s9 + $0x268] sm:$0xff]  ;;  %v7037_v26 = vld [vmem:[%s18360_s9 + $0x278] sm:$0xff]  ;;  %v7046_v2 = vld [vmem:[%s18360_s9 + $0x2c0] sm:$0xff] }
 0x840   : > { %v8364_v35 = vld [vmem:[%s11769_s20 + $0x132] ss:$2 sm:$0xff] }
 0x841   : > { %v6604_v50 = vmax.f32 %v6580_v17, %v8364_v35  ;;  %v9418_v35 = vpack.c.bf16 %v7032_v58, %v7030_v12  ;;  %v7048_v20 = vld [vmem:[%s18360_s9 + $0x2d0] sm:$0xff] }
 0x843   : > { %v6622_v45 = vsel %vm6227_vm4, %v6604_v50, 0.0  ;;  %10942 = vmatprep.mubr.msk.f32.mxu1 %vm6227_vm4, %v6604_v50  ;;  %v9420_v50 = vpack.c.bf16 %v7037_v26, %v7035_v19  ;;  %v7055_v19 = vld [vmem:[%s18360_s9 + $0x308] sm:$0xff]  ;;  %v7057_v26 = vld [vmem:[%s18360_s9 + $0x318] sm:$0xff] }
 0x844   : > { %v8359_v31 = vld [vmem:[%s11769_s20 + $0x140] ss:$2 sm:$0xff]  ;;  %6640 = vst [vmem:[%s16581_s29 + $0x80] sm:$0xff] %v6622_v45  ;;  %v8362_v59 = vld [vmem:[%s11769_s20 + $0x141] ss:$2 sm:$0xff] }
 0x845   : > { %v6557_v63 = vmax.f32 %v6533_v9, %v8359_v31  ;;  %v8365_v46 = vld [vmem:[%s11769_s20 + $0x142] ss:$2 sm:$0xff] }
 0x846   : > { %v7034_v9 = vld [vmem:[%s18360_s9 + $0x260] sm:$0xff]  ;;  %v7036_v31 = vld [vmem:[%s18360_s9 + $0x270] sm:$0xff] }
 0x847   : > { %v6581_v37 = vmax.f32 %v6557_v63, %v8362_v59  ;;  %v7039_v63 = vld [vmem:[%s18360_s9 + $0x288] sm:$0xff]  ;;  %v7041_v59 = vld [vmem:[%s18360_s9 + $0x298] sm:$0xff] }
 0x849   : > { %v6605_v43 = vmax.f32 %v6581_v37, %v8365_v46  ;;  %v9422_v46 = vpack.c.bf16 %v7036_v31, %v7034_v9  ;;  %v7059_v9 = vld [vmem:[%s18360_s9 + $0x328] sm:$0xff]  ;;  %v7061_v31 = vld [vmem:[%s18360_s9 + $0x338] sm:$0xff] }
 0x84b   : > { %v6623_v13 = vsel %vm6228_vm11, %v6605_v43, 0.0  ;;  %10943 = vmatmul.mubr.msk.f32.gmra.mrb[142].mxu1 %vm6228_vm11, %v6605_v43  ;;  %v9424_v43 = vpack.c.bf16 %v7041_v59, %v7039_v63  ;;  %v9444_v59 = vpack.c.bf16 %v7061_v31, %v7059_v9  ;;  %v7081_v9 = vld [vmem:[%s18360_s9 + $0x3d8] sm:$0xff] }
 0x84c   : > { %6641 = vst [vmem:[%s16581_s29 + $0x88] sm:$0xff] %v6623_v13  ;;  %v7038_v13 = vld [vmem:[%s18360_s9 + $0x280] sm:$0xff] }
 0x89e   : > { %v8743_v34 = vpop.f32.mrb[126].mxu1 }
 0x89f   : > { %v17225_v54 = vadd.f32 %v8743_v34, %v17222_v56  ;;  %v6749_v51 = vpop.f32.mrb[127].mxu1  ;;  %v9426_v34 = vpack.c.bf16 %v7040_v18, %v7038_v13  ;;  %v7065_v13 = vld [vmem:[%s18360_s9 + $0x358] sm:$0xff] }
 0x8a0   : > { %v6750_v25 = vadd.f32 %v17222_v56, %v6749_v51  ;;  %v9428_v51 = vpack.c.bf16 %v7045_v22, %v7043_v61 }
 0x8a1   : > { %v6839_v14 = vmax.f32 %v17225_v54, 0.0  ;;  %v7051_v54 = vld [vmem:[%s18360_s9 + $0x2e8] sm:$0xff] }
 0x8a2   : > { %v6838_v4 = vmax.f32 %v6750_v25, 0.0  ;;  %v7042_v25 = vld [vmem:[%s18360_s9 + $0x2a0] sm:$0xff] }
 0x8a3   : > { %v6857_v16 = vsel %vm19201_vm2, %v6839_v14, 0.0  ;;  %vm19207_vm2 = vcmp.lt.s32.totalorder %v19126_v38, 6 }
 0x8a4   : > { %6875 = vst [vmem:[%s16646_s24 + $0x8] sm:$0xff] %v6857_v16  ;;  %v6856_v5 = vsel %vm19202_vm3, %v6838_v4, 0.0  ;;  %v7047_v16 = vld [vmem:[%s18360_s9 + $0x2c8] sm:$0xff]  ;;  %vm19208_vm3 = vcmp.lt.s32.totalorder %v19124_v28, 6 }
 0x8a5   : > { %6874 = vst [vmem:[%s16646_s24] sm:$0xff] %v6856_v5  ;;  %v7049_v5 = vld [vmem:[%s18360_s9 + $0x2d8] sm:$0xff] }
 0x8a6   : > { %v9432_v24 = vpack.c.bf16 %v7049_v5, %v7047_v16  ;;  %v7062_v16 = vld [vmem:[%s18360_s9 + $0x340] sm:$0xff]  ;;  %v7064_v5 = vld [vmem:[%s18360_s9 + $0x350] sm:$0xff] }
 0x8ac   : > { %v6916_v7 = vld [vmem:[%s16646_s24 + $0x1] sm:$0xff] }
 0x8ad   : > { %7322 = vmatprep.mubr.f32.mxu1 %v6916_v7 }
 0x8ae   : > { %10944 = vmatmul.mubr.msk.f32.vlgmr.msra.gmra.mrb[144].mxu1 %vm19203_vm10, %v6838_v4  ;;  %v7044_v4 = vld [vmem:[%s18360_s9 + $0x2b0] sm:$0xff]  ;;  %vm19209_vm10 = vmmov %vm19205_vm5 }
 0x8af   : > { %9411 = vmatpush1.bf16.msra.mxu1 %v9410_v8  ;;  %v8746_v49 = vpop.f32.mrb[128].mxu1  ;;  %v9430_v8 = vpack.c.bf16 %v7044_v4, %v7042_v25 }
 0x8b0   : > { %9413 = vmatprep.subr.bf16.mxu1 %v9412_v36  ;;  %v6765_v15 = vadd.f32 %v8746_v49, %v17222_v56  ;;  %v6759_v57 = vpop.f32.mrb[129].mxu1 }
 0x8b1   : > { %v6760_v52 = vadd.f32 %v17222_v56, %v6759_v57  ;;  %v7052_v57 = vld [vmem:[%s18360_s9 + $0x2f0] sm:$0xff] }
 0x8b2   : > { %v17278_v48 = vmax.f32 %v6765_v15, 0.0  ;;  %v7050_v15 = vld [vmem:[%s18360_s9 + $0x2e0] sm:$0xff] }
 0x8b3   : > { %9415 = vmatpush1.bf16.msra.mxu1 %v9414_v41  ;;  %v6840_v17 = vmax.f32 %v6760_v52, 0.0  ;;  %v9438_v52 = vpack.c.bf16 %v7052_v57, %v7050_v15  ;;  %v7075_v15 = vld [vmem:[%s18360_s9 + $0x3a8] sm:$0xff]  ;;  %v7077_v57 = vld [vmem:[%s18360_s9 + $0x3b8] sm:$0xff] }
 0x8b4   : > { %9417 = vmatprep.subr.bf16.mxu1 %v9416_v1  ;;  %v6859_v45 = vsel %vm19204_vm12, %v17278_v48, 0.0  ;;  %v9434_v1 = vpack.c.bf16 %v7048_v20, %v7046_v2  ;;  %v7066_v2 = vld [vmem:[%s18360_s9 + $0x360] sm:$0xff]  ;;  %v7068_v20 = vld [vmem:[%s18360_s9 + $0x370] sm:$0xff] }
 0x8b5   : > { %6877 = vst [vmem:[%s16646_s24 + $0x18] sm:$0xff] %v6859_v45  ;;  %v6858_v37 = vsel %vm19205_vm5, %v6840_v17, 0.0  ;;  %vm19210_vm5 = vmmov %vm19208_vm3 }
 0x8b6   : > { %6876 = vst [vmem:[%s16646_s24 + $0x10] sm:$0xff] %v6858_v37  ;;  %v7058_v37 = vld [vmem:[%s18360_s9 + $0x320] sm:$0xff] }
 0x8b7   : > { %9419 = vmatpush1.bf16.msra.mxu1 %v9418_v35  ;;  %v9440_v35 = vpack.c.bf16 %v7057_v26, %v7055_v19 }
 0x8b8   : > { %9421 = vmatprep.subr.bf16.mxu1 %v9420_v50  ;;  %v7056_v50 = vld [vmem:[%s18360_s9 + $0x310] sm:$0xff] }
 0x8bb   : > { %9423 = vmatpush1.bf16.msra.mxu1 %v9422_v46  ;;  %v7060_v46 = vld [vmem:[%s18360_s9 + $0x330] sm:$0xff] }
 0x8bc   : > { %9425 = vmatprep.subr.bf16.mxu1 %v9424_v43  ;;  %v7063_v43 = vld [vmem:[%s18360_s9 + $0x348] sm:$0xff] }
 0x8bd   : > { %v6917_v39 = vld [vmem:[%s16646_s24 + $0x9] sm:$0xff]  ;;  %v6918_v36 = vld [vmem:[%s16646_s24 + $0x11] sm:$0xff]  ;;  %v9448_v4 = vpack.c.bf16 %v7065_v13, %v7063_v43 }
 0x8be   : > { %7328 = vmatprep.mubr.f32.mxu1 %v6917_v39 }
 0x8bf   : > { %v8749_v10 = vpop.f32.mrb[130].mxu1  ;;  %9427 = vmatpush1.bf16.msra.mxu1 %v9426_v34 }
 0x8c0   : > { %v6775_v40 = vadd.f32 %v8749_v10, %v17222_v56  ;;  %v6769_v3 = vpop.f32.mrb[131].mxu1  ;;  %10945 = vmatmul.mubr.msk.f32.gmra.mrb[146].mxu1 %vm19206_vm8, %v6839_v14  ;;  %9429 = vmatprep.subr.bf16.mxu1 %v9428_v51  ;;  %v7053_v14 = vld [vmem:[%s18360_s9 + $0x2f8] sm:$0xff]  ;;  %v9446_v51 = vpack.c.bf16 %v7060_v46, %v7058_v37  ;;  %v7067_v10 = vld [vmem:[%s18360_s9 + $0x368] sm:$0xff]  ;;  %vm19211_vm8 = vcmp.lt.s32.totalorder %v19130_v47, 6 }
 0x8c1   : > { %v6770_v7 = vadd.f32 %v17222_v56, %v6769_v3  ;;  %7334 = vmatprep.mubr.f32.mxu1 %v6918_v36  ;;  %v9436_v58 = vpack.c.bf16 %v7053_v14, %v7051_v54  ;;  %v7071_v54 = vld [vmem:[%s18360_s9 + $0x388] sm:$0xff]  ;;  %v7073_v14 = vld [vmem:[%s18360_s9 + $0x398] sm:$0xff] }
 0x8c2   : > { %v17337_v53 = vmax.f32 %v6775_v40, 0.0  ;;  %v7069_v40 = vld [vmem:[%s18360_s9 + $0x378] sm:$0xff] }
 0x8c3   : > { %v17345_v41 = vmax.f32 %v6770_v7, 0.0  ;;  %9431 = vmatpush1.bf16.msra.mxu1 %v9430_v8  ;;  %v9450_v7 = vpack.c.bf16 %v7064_v5, %v7062_v16 }
 0x8c4   : > { %v6861_v49 = vsel %vm19207_vm2, %v17337_v53, 0.0  ;;  %10946 = vmatmul.mubr.msk.f32.gmra.mrb[148].mxu1 %vm19209_vm10, %v6840_v17  ;;  %9433 = vmatprep.subr.bf16.mxu1 %v9432_v24  ;;  %v7054_v17 = vld [vmem:[%s18360_s9 + $0x300] sm:$0xff]  ;;  %vm19212_vm2 = vcmp.lt.s32.totalorder %v19128_v27, 6  ;;  %v9452_v24 = vpack.c.bf16 %v7069_v40, %v7067_v10 }
 0x8c5   : > { %6879 = vst [vmem:[%s16646_s24 + $0x28] sm:$0xff] %v6861_v49  ;;  %v6860_v12 = vsel %vm19208_vm3, %v17345_v41, 0.0  ;;  %v9442_v45 = vpack.c.bf16 %v7056_v50, %v7054_v17  ;;  %v9454_v49 = vpack.c.bf16 %v7068_v20, %v7066_v2  ;;  %v7076_v17 = vld [vmem:[%s18360_s9 + $0x3b0] sm:$0xff]  ;;  %v7079_v50 = vld [vmem:[%s18360_s9 + $0x3c8] sm:$0xff]  ;;  %vm19213_vm3 = vcmp.lt.s32.totalorder %v19126_v38, 6  ;;  %vm19214_vm10 = vmmov %vm19212_vm2 }
 0x8c6   : > { %6878 = vst [vmem:[%s16646_s24 + $0x20] sm:$0xff] %v6860_v12  ;;  %v7070_v12 = vld [vmem:[%s18360_s9 + $0x380] sm:$0xff]  ;;  %v9464_v13 = vpack.c.bf16 %v7081_v9, %v7079_v50 }
 0x8c7   : > { %9435 = vmatpush1.bf16.msra.mxu1 %v9434_v1  ;;  %v9456_v1 = vpack.c.bf16 %v7073_v14, %v7071_v54 }
 0x8c8   : > { %9437 = vmatprep.subr.bf16.mxu1 %v9436_v58  ;;  %v7072_v58 = vld [vmem:[%s18360_s9 + $0x390] sm:$0xff] }
 0x8c9   : > { %v9458_v19 = vpack.c.bf16 %v7072_v58, %v7070_v12 }
 0x8cb   : > { %9439 = vmatpush1.bf16.msra.mxu1 %v9438_v52  ;;  %v9460_v52 = vpack.c.bf16 %v7077_v57, %v7075_v15 }
 0x8cc   : > { %9441 = vmatprep.subr.bf16.mxu1 %v9440_v35  ;;  %v7074_v35 = vld [vmem:[%s18360_s9 + $0x3a0] sm:$0xff] }
 0x8cd   : > { %v17382_v63 = vld [vmem:[%s16646_s24 + $0x19] sm:$0xff]  ;;  %v17401_v61 = vld [vmem:[%s16646_s24 + $0x21] sm:$0xff]  ;;  %v9462_v46 = vpack.c.bf16 %v7076_v17, %v7074_v35 }
 0x8ce   : > { %7340 = vmatprep.mubr.f32.mxu1 %v17382_v63 }
 0x8cf   : > { %v8752_v18 = vpop.f32.mrb[132].mxu1  ;;  %10947 = vmatmul.mubr.msk.f32.gmra.mrb[150].mxu1 %vm19204_vm12, %v17278_v48  ;;  %vm19215_vm12 = vmmov %vm19211_vm8 }
 0x8d0   : > { %v6785_v22 = vadd.f32 %v8752_v18, %v17222_v56  ;;  %v6779_v34 = vpop.f32.mrb[133].mxu1  ;;  %7346 = vmatprep.mubr.f32.mxu1 %v17401_v61  ;;  %9443 = vmatpush1.bf16.msra.mxu1 %v9442_v45  ;;  %v7078_v18 = vld [vmem:[%s18360_s9 + $0x3c0] sm:$0xff] }
 0x8d1   : > { %v6780_v25 = vadd.f32 %v17222_v56, %v6779_v34  ;;  %9445 = vmatprep.subr.bf16.mxu1 %v9444_v59 }
 0x8d2   : > { %v17412_v39 = vmax.f32 %v6785_v22, 0.0  ;;  %v7080_v22 = vld [vmem:[%s18360_s9 + $0x3d0] sm:$0xff] }
 0x8d3   : > { %v17420_v3 = vmax.f32 %v6780_v25, 0.0  ;;  %10948 = vmatmul.mubr.msk.f32.gmra.mrb[152].mxu1 %vm19210_vm5, %v17345_v41  ;;  %v7085_v25 = vld [vmem:[%s18360_s9 + $0x3f8] sm:$0xff]  ;;  %v9466_v5 = vpack.c.bf16 %v7080_v22, %v7078_v18  ;;  %v7086_v22 = vld [vmem:[%s18360_s9 + $0x400] sm:$0xff]  ;;  %vm19216_vm5 = vcmp.lt.s32.totalorder %v19122_v30, 6 }
 0x8d4   : > { %v6863_v8 = vsel %vm19211_vm8, %v17412_v39, 0.0  ;;  %9447 = vmatpush1.bf16.msra.mxu1 %v9446_v51  ;;  %v7083_v51 = vld [vmem:[%s18360_s9 + $0x3e8] sm:$0xff]  ;;  %vm19217_vm8 = vcmp.lt.s32.totalorder %v19124_v28, 6 }
 0x8d5   : > { %6881 = vst [vmem:[%s16646_s24 + $0x38] sm:$0xff] %v6863_v8  ;;  %v6862_v36 = vsel %vm19212_vm2, %v17420_v3, 0.0  ;;  %9449 = vmatprep.subr.bf16.mxu1 %v9448_v4  ;;  %v9468_v40 = vpack.c.bf16 %v7085_v25, %v7083_v51  ;;  %v7082_v8 = vld [vmem:[%s18360_s9 + $0x3e0] sm:$0xff]  ;;  %v7088_v51 = vld [vmem:[%s18360_s9 + $0x410] sm:$0xff]  ;;  %v7091_v25 = vld [vmem:[%s18360_s9 + $0x428] sm:$0xff] }
 0x8d6   : > { %6880 = vst [vmem:[%s16646_s24 + $0x30] sm:$0xff] %v6862_v36  ;;  %v7087_v36 = vld [vmem:[%s18360_s9 + $0x408] sm:$0xff]  ;;  %vm19218_vm2 = vmmov %vm19213_vm3 }
 0x8d8   : > { %9451 = vmatpush1.bf16.msra.mxu1 %v9450_v7  ;;  %v7084_v7 = vld [vmem:[%s18360_s9 + $0x3f0] sm:$0xff] }
 0x8d9   : > { %9453 = vmatprep.subr.bf16.mxu1 %v9452_v24  ;;  %v7089_v24 = vld [vmem:[%s18360_s9 + $0x418] sm:$0xff]  ;;  %v9470_v2 = vpack.c.bf16 %v7084_v7, %v7082_v8  ;;  %v9474_v8 = vpack.c.bf16 %v7088_v51, %v7086_v22  ;;  %v7098_v51 = vld [vmem:[%s18360_s9 + $0x460] sm:$0xff] }
 0x8da   : > { %v9472_v20 = vpack.c.bf16 %v7089_v24, %v7087_v36  ;;  %v7090_v24 = vld [vmem:[%s18360_s9 + $0x420] sm:$0xff] }
 0x8dc   : > { %9455 = vmatpush1.bf16.msra.mxu1 %v9454_v49 }
 0x8dd   : > { %v17458_v26 = vld [vmem:[%s16646_s24 + $0x29] sm:$0xff]  ;;  %9457 = vmatprep.subr.bf16.mxu1 %v9456_v1  ;;  %v17477_v45 = vld [vmem:[%s16646_s24 + $0x31] sm:$0xff] }
 0x8de   : > { %7352 = vmatprep.mubr.f32.mxu1 %v17458_v26 }
 0x8df   : > { %v8755_v31 = vpop.f32.mrb[134].mxu1  ;;  %10949 = vmatmul.mubr.msk.f32.gmra.mrb[154].mxu1 %vm19213_vm3, %v17337_v53  ;;  %vm19219_vm3 = vmmov %vm19214_vm10 }
 0x8e0   : > { %v6795_v59 = vadd.f32 %v8755_v31, %v17222_v56  ;;  %v6789_v37 = vpop.f32.mrb[135].mxu1  ;;  %7358 = vmatprep.mubr.f32.mxu1 %v17477_v45  ;;  %9459 = vmatpush1.bf16.msra.mxu1 %v9458_v19 }
 0x8e1   : > { %v6790_v43 = vadd.f32 %v17222_v56, %v6789_v37  ;;  %9461 = vmatprep.subr.bf16.mxu1 %v9460_v52 }
 0x8e2   : > { %v17488_v34 = vmax.f32 %v6795_v59, 0.0 }
 0x8e3   : > { %v17496_v4 = vmax.f32 %v6790_v43, 0.0  ;;  %10950 = vmatmul.mubr.msk.f32.gmra.mrb[156].mxu1 %vm19214_vm10, %v17420_v3  ;;  %vm19220_vm10 = vmmov %vm19215_vm12 }
 0x8e4   : > { %v6865_v16 = vsel %vm6220_vm9, %v17488_v34, 0.0  ;;  %9463 = vmatpush1.bf16.msra.mxu1 %v9462_v46 }
 0x8e5   : > { %6883 = vst [vmem:[%s16646_s24 + $0x48] sm:$0xff] %v6865_v16  ;;  %v6864_v10 = vsel %vm6219_vm1, %v17496_v4, 0.0  ;;  %9465 = vmatprep.subr.bf16.mxu1 %v9464_v13  ;;  %v7093_v16 = vld [vmem:[%s18360_s9 + $0x438] sm:$0xff] }
 0x8e6   : > { %6882 = vst [vmem:[%s16646_s24 + $0x40] sm:$0xff] %v6864_v10  ;;  %v9476_v36 = vpack.c.bf16 %v7093_v16, %v7091_v25  ;;  %v7100_v25 = vld [vmem:[%s18360_s9 + $0x470] sm:$0xff] }
 0x8e7   : > { %v6930_v16 = vld [vmem:[%s16646_s24 + $0x12] sm:$0xff] }
 0x8e8   : > { %9467 = vmatpush1.bf16.msra.mxu1 %v9466_v5 }
 0x8e9   : > { %9469 = vmatprep.subr.bf16.mxu1 %v9468_v40 }
 0x8ec   : > { %9471 = vmatpush1.bf16.msra.mxu1 %v9470_v2  ;;  %v7092_v2 = vld [vmem:[%s18360_s9 + $0x430] sm:$0xff] }
 0x8ed   : > { %v17522_v54 = vld [vmem:[%s16646_s24 + $0x39] sm:$0xff]  ;;  %9473 = vmatprep.subr.bf16.mxu1 %v9472_v20  ;;  %v17529_v49 = vld [vmem:[%s16646_s24 + $0x41] sm:$0xff] }
 0x8ee   : > { %7364 = vmatprep.mubr.f32.mxu1 %v17522_v54 }
 0x8ef   : > { %v8758_v14 = vpop.f32.mrb[136].mxu1  ;;  %10951 = vmatmul.mubr.msk.f32.gmra.mrb[158].mxu1 %vm19215_vm12, %v17412_v39  ;;  %vm19221_vm12 = vmmov %vm19219_vm3 }
 0x8f0   : > { %v6805_v1 = vadd.f32 %v8758_v14, %v17222_v56  ;;  %v6799_v12 = vpop.f32.mrb[137].mxu1  ;;  %7370 = vmatprep.mubr.f32.mxu1 %v17529_v49  ;;  %v6928_v14 = vld [vmem:[%s16646_s24 + $0x2] sm:$0xff] }
 0x8f1   : > { %v6800_v58 = vadd.f32 %v17222_v56, %v6799_v12 }
 0x8f2   : > { %v17534_v15 = vmax.f32 %v6805_v1, 0.0  ;;  %v7097_v1 = vld [vmem:[%s18360_s9 + $0x458] sm:$0xff] }
 0x8f3   : > { %v17536_v57 = vmax.f32 %v6800_v58, 0.0  ;;  %10952 = vmatmul.mubr.msk.f32.gmra.mrb[160].mxu1 %vm6219_vm1, %v17496_v4 }
 0x8f4   : > { %v6867_v19 = vsel %vm6222_vm15, %v17534_v15, 0.0 }
 0x8f5   : > { %6885 = vst [vmem:[%s16646_s24 + $0x58] sm:$0xff] %v6867_v19  ;;  %v6866_v52 = vsel %vm6221_vm0, %v17536_v57, 0.0  ;;  %v9478_v19 = vpack.c.bf16 %v7092_v2, %v7090_v24  ;;  %v17670_v2 = vld [vmem:[%s16646_s24 + $0x1a] sm:$0xff] }
 0x8f6   : > { %6884 = vst [vmem:[%s16646_s24 + $0x50] sm:$0xff] %v6866_v52 }
 0x8fd   : > { %v17550_v35 = vld [vmem:[%s16646_s24 + $0x49] sm:$0xff]  ;;  %v17557_v50 = vld [vmem:[%s16646_s24 + $0x51] sm:$0xff] }
 0x8fe   : > { %7376 = vmatprep.mubr.f32.mxu1 %v17550_v35 }
 0x8ff   : > { %v8761_v17 = vpop.f32.mrb[138].mxu1  ;;  %10953 = vmatmul.mubr.msk.f32.gmra.mrb[162].mxu1 %vm6220_vm9, %v17488_v34 }
 0x900   : > { %v6815_v9 = vadd.f32 %v8761_v17, %v17222_v56  ;;  %v6809_v31 = vpop.f32.mrb[139].mxu1  ;;  %7382 = vmatprep.mubr.f32.mxu1 %v17557_v50 }
 0x901   : > { %v6810_v59 = vadd.f32 %v17222_v56, %v6809_v31  ;;  %v7096_v31 = vld [vmem:[%s18360_s9 + $0x450] sm:$0xff] }
 0x902   : > { %v17562_v37 = vmax.f32 %v6815_v9, 0.0  ;;  %v7094_v9 = vld [vmem:[%s18360_s9 + $0x440] sm:$0xff] }
 0x903   : > { %v17564_v46 = vmax.f32 %v6810_v59, 0.0  ;;  %10954 = vmatmul.mubr.msk.f32.gmra.mrb[164].mxu1 %vm6221_vm0, %v17536_v57  ;;  %v6929_v59 = vld [vmem:[%s16646_s24 + $0xa] sm:$0xff] }
 0x904   : > { %v6869_v43 = vsel %vm6224_vm7, %v17562_v37, 0.0 }
 0x905   : > { %6887 = vst [vmem:[%s16646_s24 + $0x68] sm:$0xff] %v6869_v43  ;;  %v6868_v13 = vsel %vm6223_vm13, %v17564_v46, 0.0  ;;  %v7101_v43 = vld [vmem:[%s18360_s9 + $0x478] sm:$0xff] }
 0x906   : > { %6886 = vst [vmem:[%s16646_s24 + $0x60] sm:$0xff] %v6868_v13  ;;  %v9482_v13 = vpack.c.bf16 %v7096_v31, %v7094_v9  ;;  %v7106_v31 = vld [vmem:[%s18360_s9 + $0x4a0] sm:$0xff] }
 0x90d   : > { %v17578_v18 = vld [vmem:[%s16646_s24 + $0x59] sm:$0xff] }
 0x90e   : > { %7388 = vmatprep.mubr.f32.mxu1 %v17578_v18 }
 0x90f   : > { %v8764_v5 = vpop.f32.mrb[140].mxu1  ;;  %10955 = vmatmul.mubr.msk.f32.gmra.mrb[166].mxu1 %vm6222_vm15, %v17534_v15 }
 0x910   : > { %v17597_v10 = vadd.f32 %v8764_v5, %v17222_v56  ;;  %v6819_v40 = vpop.f32.mrb[141].mxu1  ;;  %10956 = vmatprep.mubr.msk.f32.mxu1 %vm19216_vm5, %v17278_v48  ;;  %v7095_v48 = vld [vmem:[%s18360_s9 + $0x448] sm:$0xff]  ;;  %vm19222_vm5 = vmmov %vm19220_vm10 }
 0x911   : > { %v6820_v7 = vadd.f32 %v17222_v56, %v6819_v40  ;;  %v9480_v17 = vpack.c.bf16 %v7097_v1, %v7095_v48  ;;  %v7103_v5 = vld [vmem:[%s18360_s9 + $0x488] sm:$0xff]  ;;  %v9486_v40 = vpack.c.bf16 %v7100_v25, %v7098_v51  ;;  %v7109_v48 = vld [vmem:[%s18360_s9 + $0x4b8] sm:$0xff] }
 0x912   : > { %v6853_v20 = vmax.f32 %v17597_v10, 0.0 }
 0x913   : > { %v17617_v12 = vmax.f32 %v6820_v7, 0.0  ;;  %7460 = vmatmul.mubr.f32.vlgmr.msra.gmra.mrb[144].mxu1 %v6928_v14  ;;  %v7102_v7 = vld [vmem:[%s18360_s9 + $0x480] sm:$0xff]  ;;  %v7107_v14 = vld [vmem:[%s18360_s9 + $0x4a8] sm:$0xff] }
 0x914   : > { %v6871_v58 = vsel %vm6226_vm6, %v6853_v20, 0.0  ;;  %9475 = vmatpush1.bf16.msra.mxu1 %v9474_v8  ;;  %10957 = vmatprep.mubr.msk.f32.mxu1 %vm19217_vm8, %v17345_v41  ;;  %v7099_v41 = vld [vmem:[%s18360_s9 + $0x468] sm:$0xff]  ;;  %v9492_v9 = vpack.c.bf16 %v7109_v48, %v7107_v14  ;;  %v7114_v14 = vld [vmem:[%s18360_s9 + $0x4e0] sm:$0xff]  ;;  %v7116_v48 = vld [vmem:[%s18360_s9 + $0x4f0] sm:$0xff]  ;;  %vm6902_vm8 = vcmp.lt.s32.totalorder %v19136_v0, 4 }
 0x915   : > { %6889 = vst [vmem:[%s16646_s24 + $0x78] sm:$0xff] %v6871_v58  ;;  %v6870_v52 = vsel %vm6225_vm14, %v17617_v12, 0.0  ;;  %9477 = vmatprep.subr.bf16.mxu1 %v9476_v36  ;;  %v9484_v22 = vpack.c.bf16 %v7101_v43, %v7099_v41  ;;  %v7104_v36 = vld [vmem:[%s18360_s9 + $0x490] sm:$0xff]  ;;  %v17697_v41 = vld [vmem:[%s16646_s24 + $0x22] sm:$0xff] }
 0x916   : > { %6888 = vst [vmem:[%s16646_s24 + $0x70] sm:$0xff] %v6870_v52  ;;  %v9490_v52 = vpack.c.bf16 %v7104_v36, %v7102_v7  ;;  %v7111_v43 = vld [vmem:[%s18360_s9 + $0x4c8] sm:$0xff]  ;;  %v7117_v7 = vld [vmem:[%s18360_s9 + $0x4f8] sm:$0xff] }
 0x917   : > { %7466 = vmatmul.mubr.f32.gmra.mrb[146].mxu1 %v6929_v59  ;;  %v7108_v59 = vld [vmem:[%s18360_s9 + $0x4b0] sm:$0xff] }
 0x918   : > { %9479 = vmatpush1.bf16.msra.mxu1 %v9478_v19  ;;  %10958 = vmatprep.mubr.msk.f32.mxu1 %vm19218_vm2, %v17337_v53  ;;  %v7105_v53 = vld [vmem:[%s18360_s9 + $0x498] sm:$0xff]  ;;  %v9494_v25 = vpack.c.bf16 %v7108_v59, %v7106_v31  ;;  %v9502_v31 = vpack.c.bf16 %v7116_v48, %v7114_v14  ;;  %vm6903_vm2 = vcmp.lt.s32.totalorder %v19139_v11, 4 }
 0x919   : > { %9481 = vmatprep.subr.bf16.mxu1 %v9480_v17  ;;  %v9488_v8 = vpack.c.bf16 %v7105_v53, %v7103_v5  ;;  %v7110_v5 = vld [vmem:[%s18360_s9 + $0x4c0] sm:$0xff]  ;;  %v7112_v53 = vld [vmem:[%s18360_s9 + $0x4d0] sm:$0xff] }
 0x91a   : > { %v9498_v36 = vpack.c.bf16 %v7112_v53, %v7110_v5  ;;  %v7122_v53 = vld [vmem:[%s18360_s9 + $0x520] sm:$0xff] }
 0x91b   : > { %7472 = vmatmul.mubr.f32.gmra.mrb[148].mxu1 %v6930_v16 }
 0x91c   : > { %9483 = vmatpush1.bf16.msra.mxu1 %v9482_v13  ;;  %10959 = vmatprep.mubr.msk.f32.mxu1 %vm19219_vm3, %v17420_v3  ;;  %v7113_v13 = vld [vmem:[%s18360_s9 + $0x4d8] sm:$0xff] }
 0x91d   : > { %9485 = vmatprep.subr.bf16.mxu1 %v9484_v22  ;;  %v9496_v16 = vpack.c.bf16 %v7113_v13, %v7111_v43  ;;  %v7118_v43 = vld [vmem:[%s18360_s9 + $0x500] sm:$0xff]  ;;  %v7120_v13 = vld [vmem:[%s18360_s9 + $0x510] sm:$0xff] }
 0x91e   : > { %v8767_v24 = vpop.f32.mrb[142].mxu1 }
 0x91f   : > { %v17679_v1 = vadd.f32 %v8767_v24, %v17222_v56  ;;  %7478 = vmatmul.mubr.f32.gmra.mrb[150].mxu1 %v17670_v2  ;;  %v6829_v58 = vpop.f32.mrb[143].mxu1 }
 0x920   : > { %9487 = vmatpush1.bf16.msra.mxu1 %v9486_v40  ;;  %v17683_v19 = vadd.f32 %v17222_v56, %v6829_v58  ;;  %10960 = vmatprep.mubr.msk.f32.mxu1 %vm19220_vm10, %v17412_v39  ;;  %v17726_v40 = vld [vmem:[%s16646_s24 + $0x2a] sm:$0xff]  ;;  %v17745_v58 = vld [vmem:[%s16646_s24 + $0x32] sm:$0xff] }
 0x921   : > { %v6855_v17 = vmax.f32 %v17679_v1, 0.0  ;;  %9489 = vmatprep.subr.bf16.mxu1 %v9488_v8  ;;  %v7115_v8 = vld [vmem:[%s18360_s9 + $0x4e8] sm:$0xff] }
 0x922   : > { %v6854_v56 = vmax.f32 %v17683_v19, 0.0  ;;  %v9500_v24 = vpack.c.bf16 %v7117_v7, %v7115_v8  ;;  %v7124_v8 = vld [vmem:[%s18360_s9 + $0x530] sm:$0xff]  ;;  %v17783_v7 = vld [vmem:[%s16646_s24 + $0x42] sm:$0xff] }
 0x923   : > { %v6873_v22 = vsel %vm6228_vm11, %v6855_v17, 0.0  ;;  %7484 = vmatmul.mubr.f32.gmra.mrb[152].mxu1 %v17697_v41  ;;  %v9510_v14 = vpack.c.bf16 %v7124_v8, %v7122_v53  ;;  %v7135_v53 = vld [vmem:[%s18360_s9 + $0x588] sm:$0xff]  ;;  %v7137_v8 = vld [vmem:[%s18360_s9 + $0x598] sm:$0xff] }
 0x924   : > { %6891 = vst [vmem:[%s16646_s24 + $0x88] sm:$0xff] %v6873_v22  ;;  %v6872_v51 = vsel %vm6227_vm4, %v6854_v56, 0.0  ;;  %9491 = vmatpush1.bf16.msra.mxu1 %v9490_v52  ;;  %10961 = vmatprep.mubr.msk.f32.mxu1 %vm6219_vm1, %v17496_v4  ;;  %v7119_v52 = vld [vmem:[%s18360_s9 + $0x508] sm:$0xff]  ;;  %v17764_v22 = vld [vmem:[%s16646_s24 + $0x3a] sm:$0xff] }
 0x925   : > { %6890 = vst [vmem:[%s16646_s24 + $0x80] sm:$0xff] %v6872_v51  ;;  %9493 = vmatprep.subr.bf16.mxu1 %v9492_v9  ;;  %v7121_v9 = vld [vmem:[%s18360_s9 + $0x518] sm:$0xff]  ;;  %v7123_v51 = vld [vmem:[%s18360_s9 + $0x528] sm:$0xff] }
 0x926   : > { %v9504_v59 = vpack.c.bf16 %v7121_v9, %v7119_v52  ;;  %v7126_v52 = vld [vmem:[%s18360_s9 + $0x540] sm:$0xff]  ;;  %v7128_v9 = vld [vmem:[%s18360_s9 + $0x550] sm:$0xff] }
 0x927   : > { %7490 = vmatmul.mubr.f32.gmra.mrb[154].mxu1 %v17726_v40 }
 0x928   : > { %9495 = vmatpush1.bf16.msra.mxu1 %v9494_v25  ;;  %10962 = vmatprep.mubr.msk.f32.mxu1 %vm6220_vm9, %v17488_v34  ;;  %v7125_v25 = vld [vmem:[%s18360_s9 + $0x538] sm:$0xff] }
 0x929   : > { %9497 = vmatprep.subr.bf16.mxu1 %v9496_v16  ;;  %v9506_v16 = vpack.c.bf16 %v7120_v13, %v7118_v43  ;;  %v9508_v5 = vpack.c.bf16 %v7125_v25, %v7123_v51  ;;  %v7133_v43 = vld [vmem:[%s18360_s9 + $0x578] sm:$0xff]  ;;  %v9514_v13 = vpack.c.bf16 %v7128_v9, %v7126_v52  ;;  %v7130_v25 = vld [vmem:[%s18360_s9 + $0x560] sm:$0xff]  ;;  %v7139_v9 = vld [vmem:[%s18360_s9 + $0x5a8] sm:$0xff] }
 0x92a   : > { %v17840_v52 = vld [vmem:[%s16646_s24 + $0x5a] sm:$0xff] }
 0x92b   : > { %7496 = vmatmul.mubr.f32.gmra.mrb[156].mxu1 %v17745_v58  ;;  %v6954_v33 = vld [vmem:[%s16646_s24 + $0x89] sm:$0xff] }
 0x92c   : > { %9499 = vmatpush1.bf16.msra.mxu1 %v9498_v36  ;;  %10963 = vmatprep.mubr.msk.f32.mxu1 %vm6221_vm0, %v17536_v57  ;;  %v7127_v36 = vld [vmem:[%s18360_s9 + $0x548] sm:$0xff]  ;;  %v6952_v42 = vld [vmem:[%s16646_s24 + $0x79] sm:$0xff] }
 0x92d   : > { %9501 = vmatprep.subr.bf16.mxu1 %v9500_v24  ;;  %v7129_v24 = vld [vmem:[%s18360_s9 + $0x558] sm:$0xff]  ;;  %v6956_v29 = vld [vmem:[%s16646_s24 + $0x82] sm:$0xff]  ;;  %v6957_v55 = vld [vmem:[%s16646_s24 + $0x8a] sm:$0xff] }
 0x92e   : > { %v9512_v48 = vpack.c.bf16 %v7129_v24, %v7127_v36  ;;  %v9520_v24 = vpack.c.bf16 %v7137_v8, %v7135_v53  ;;  %v7145_v53 = vld [vmem:[%s18360_s9 + $0x5d8] sm:$0xff] }
 0x92f   : > { %7502 = vmatmul.mubr.f32.gmra.mrb[158].mxu1 %v17764_v22  ;;  %v6955_v62 = vld [vmem:[%s16646_s24 + $0x7a] sm:$0xff] }
 0x930   : > { %9503 = vmatpush1.bf16.msra.mxu1 %v9502_v31  ;;  %10964 = vmatprep.mubr.msk.f32.mxu1 %vm6222_vm15, %v17534_v15  ;;  %v17802_v31 = vld [vmem:[%s16646_s24 + $0x4a] sm:$0xff] }
 0x931   : > { %9505 = vmatprep.subr.bf16.mxu1 %v9504_v59  ;;  %v7131_v59 = vld [vmem:[%s18360_s9 + $0x568] sm:$0xff] }
 0x932   : > { %v9516_v51 = vpack.c.bf16 %v7133_v43, %v7131_v59  ;;  %v7141_v59 = vld [vmem:[%s18360_s9 + $0x5b8] sm:$0xff] }
 0x933   : > { %7508 = vmatmul.mubr.f32.gmra.mrb[160].mxu1 %v17783_v7 }
 0x934   : > { %9507 = vmatpush1.bf16.msra.mxu1 %v9506_v16  ;;  %10965 = vmatprep.mubr.msk.f32.mxu1 %vm6223_vm13, %v17564_v46  ;;  %v7132_v16 = vld [vmem:[%s18360_s9 + $0x570] sm:$0xff] }
 0x935   : > { %9509 = vmatprep.subr.bf16.mxu1 %v9508_v5  ;;  %v17821_v5 = vld [vmem:[%s16646_s24 + $0x52] sm:$0xff]  ;;  %v9518_v36 = vpack.c.bf16 %v7132_v16, %v7130_v25  ;;  %v7143_v16 = vld [vmem:[%s18360_s9 + $0x5c8] sm:$0xff] }
 0x936   : > { %v7140_v25 = vld [vmem:[%s18360_s9 + $0x5b0] sm:$0xff]  ;;  %v9528_v8 = vpack.c.bf16 %v7145_v53, %v7143_v16 }
 0x937   : > { %7514 = vmatmul.mubr.f32.gmra.mrb[162].mxu1 %v17802_v31 }
 0x938   : > { %9511 = vmatpush1.bf16.msra.mxu1 %v9510_v14  ;;  %10966 = vmatprep.mubr.msk.f32.mxu1 %vm6224_vm7, %v17562_v37  ;;  %v7134_v14 = vld [vmem:[%s18360_s9 + $0x580] sm:$0xff] }
 0x939   : > { %9513 = vmatprep.subr.bf16.mxu1 %v9512_v48  ;;  %v7136_v48 = vld [vmem:[%s18360_s9 + $0x590] sm:$0xff] }
 0x93a   : > { %v9522_v43 = vpack.c.bf16 %v7136_v48, %v7134_v14  ;;  %v7147_v14 = vld [vmem:[%s18360_s9 + $0x5e8] sm:$0xff]  ;;  %v7149_v48 = vld [vmem:[%s18360_s9 + $0x5f8] sm:$0xff] }
 0x93b   : > { %7520 = vmatmul.mubr.f32.gmra.mrb[164].mxu1 %v17821_v5 }
 0x93c   : > { %9515 = vmatpush1.bf16.msra.mxu1 %v9514_v13  ;;  %10967 = vmatprep.mubr.msk.f32.mxu1 %vm6225_vm14, %v17617_v12  ;;  %v9524_v13 = vpack.c.bf16 %v7141_v59, %v7139_v9  ;;  %v9532_v59 = vpack.c.bf16 %v7149_v48, %v7147_v14 }
 0x93d   : > { %9517 = vmatprep.subr.bf16.mxu1 %v9516_v51  ;;  %v7138_v51 = vld [vmem:[%s18360_s9 + $0x5a0] sm:$0xff] }
 0x93f   : > { %7526 = vmatmul.mubr.f32.gmra.mrb[166].mxu1 %v17840_v52 }
 0x940   : > { %9519 = vmatpush1.bf16.msra.mxu1 %v9518_v36  ;;  %7596 = vmatprep.mubr.f32.mxu1 %v17670_v2  ;;  %v9526_v2 = vpack.c.bf16 %v7140_v25, %v7138_v51  ;;  %v7142_v36 = vld [vmem:[%s18360_s9 + $0x5c0] sm:$0xff]  ;;  %v7151_v51 = vld [vmem:[%s18360_s9 + $0x608] sm:$0xff]  ;;  %v7153_v25 = vld [vmem:[%s18360_s9 + $0x618] sm:$0xff] }
 0x941   : > { %9521 = vmatprep.subr.bf16.mxu1 %v9520_v24  ;;  %v7144_v24 = vld [vmem:[%s18360_s9 + $0x5d0] sm:$0xff]  ;;  %v9536_v53 = vpack.c.bf16 %v7153_v25, %v7151_v51 }
 0x942   : > { %v9530_v9 = vpack.c.bf16 %v7144_v24, %v7142_v36  ;;  %v7155_v36 = vld [vmem:[%s18360_s9 + $0x628] sm:$0xff]  ;;  %v7157_v24 = vld [vmem:[%s18360_s9 + $0x638] sm:$0xff] }
 0x943   : > { %v9540_v48 = vpack.c.bf16 %v7157_v24, %v7155_v36  ;;  %v7162_v36 = vld [vmem:[%s18360_s9 + $0x660] sm:$0xff]  ;;  %v7164_v24 = vld [vmem:[%s18360_s9 + $0x670] sm:$0xff] }
 0x944   : > { %9523 = vmatpush1.bf16.msra.mxu1 %v9522_v43  ;;  %v7146_v43 = vld [vmem:[%s18360_s9 + $0x5e0] sm:$0xff] }
 0x945   : > { %9525 = vmatprep.subr.bf16.mxu1 %v9524_v13  ;;  %v7148_v13 = vld [vmem:[%s18360_s9 + $0x5f0] sm:$0xff] }
 0x946   : > { %v9534_v16 = vpack.c.bf16 %v7148_v13, %v7146_v43  ;;  %v7159_v43 = vld [vmem:[%s18360_s9 + $0x648] sm:$0xff]  ;;  %v7161_v13 = vld [vmem:[%s18360_s9 + $0x658] sm:$0xff] }
 0x947   : > { %v9544_v25 = vpack.c.bf16 %v7161_v13, %v7159_v43  ;;  %v7171_v43 = vld [vmem:[%s18360_s9 + $0x6a8] sm:$0xff] }
 0x948   : > { %9527 = vmatpush1.bf16.msra.mxu1 %v9526_v2  ;;  %v7150_v2 = vld [vmem:[%s18360_s9 + $0x600] sm:$0xff] }
 0x949   : > { %9529 = vmatprep.subr.bf16.mxu1 %v9528_v8  ;;  %v7152_v8 = vld [vmem:[%s18360_s9 + $0x610] sm:$0xff] }
 0x94a   : > { %v9538_v14 = vpack.c.bf16 %v7152_v8, %v7150_v2  ;;  %v7163_v2 = vld [vmem:[%s18360_s9 + $0x668] sm:$0xff] }
 0x94c   : > { %9531 = vmatpush1.bf16.msra.mxu1 %v9530_v9  ;;  %v7154_v9 = vld [vmem:[%s18360_s9 + $0x620] sm:$0xff] }
 0x94d   : > { %9533 = vmatprep.subr.bf16.mxu1 %v9532_v59  ;;  %v7156_v59 = vld [vmem:[%s18360_s9 + $0x630] sm:$0xff] }
 0x94e   : > { %v9542_v51 = vpack.c.bf16 %v7156_v59, %v7154_v9  ;;  %v7166_v9 = vld [vmem:[%s18360_s9 + $0x680] sm:$0xff]  ;;  %v7168_v59 = vld [vmem:[%s18360_s9 + $0x690] sm:$0xff] }
 0x94f   : > { %v9554_v13 = vpack.c.bf16 %v7168_v59, %v7166_v9  ;;  %v7180_v9 = vld [vmem:[%s18360_s9 + $0x6f0] sm:$0xff]  ;;  %v7183_v59 = vld [vmem:[%s18360_s9 + $0x708] sm:$0xff] }
 0x950   : > { %9535 = vmatpush1.bf16.msra.mxu1 %v9534_v16  ;;  %v7158_v16 = vld [vmem:[%s18360_s9 + $0x640] sm:$0xff] }
 0x951   : > { %9537 = vmatprep.subr.bf16.mxu1 %v9536_v53  ;;  %v7160_v53 = vld [vmem:[%s18360_s9 + $0x650] sm:$0xff] }
 0x953   : > { %7597 = vmatmul.mubr.f32.vlgmr.msra.gmra.mrb[144].mxu1 %v17382_v63  ;;  %v7165_v63 = vld [vmem:[%s18360_s9 + $0x678] sm:$0xff] }
 0x954   : > { %7602 = vmatprep.mubr.f32.mxu1 %v17697_v41  ;;  %9539 = vmatpush1.bf16.msra.mxu1 %v9538_v14  ;;  %v9546_v41 = vpack.c.bf16 %v7160_v53, %v7158_v16  ;;  %v9548_v8 = vpack.c.bf16 %v7165_v63, %v7163_v2  ;;  %v7167_v14 = vld [vmem:[%s18360_s9 + $0x688] sm:$0xff]  ;;  %v7172_v16 = vld [vmem:[%s18360_s9 + $0x6b0] sm:$0xff]  ;;  %v7177_v2 = vld [vmem:[%s18360_s9 + $0x6d8] sm:$0xff] }
 0x955   : > { %9541 = vmatprep.subr.bf16.mxu1 %v9540_v48  ;;  %v7175_v53 = vld [vmem:[%s18360_s9 + $0x6c8] sm:$0xff] }
 0x957   : > { %7603 = vmatmul.mubr.f32.gmra.mrb[146].mxu1 %v17401_v61  ;;  %v7169_v61 = vld [vmem:[%s18360_s9 + $0x698] sm:$0xff] }
 0x958   : > { %7608 = vmatprep.mubr.f32.mxu1 %v17726_v40  ;;  %9543 = vmatpush1.bf16.msra.mxu1 %v9542_v51  ;;  %v9550_v40 = vpack.c.bf16 %v7164_v24, %v7162_v36  ;;  %v9552_v48 = vpack.c.bf16 %v7169_v61, %v7167_v14  ;;  %v7176_v36 = vld [vmem:[%s18360_s9 + $0x6d0] sm:$0xff]  ;;  %v7179_v24 = vld [vmem:[%s18360_s9 + $0x6e8] sm:$0xff]  ;;  %v7181_v14 = vld [vmem:[%s18360_s9 + $0x6f8] sm:$0xff] }
 0x959   : > { %9545 = vmatprep.subr.bf16.mxu1 %v9544_v25  ;;  %v7170_v25 = vld [vmem:[%s18360_s9 + $0x6a0] sm:$0xff] }
 0x95a   : > { %v9558_v63 = vpack.c.bf16 %v7172_v16, %v7170_v25  ;;  %v7184_v25 = vld [vmem:[%s18360_s9 + $0x710] sm:$0xff]  ;;  %v7187_v16 = vld [vmem:[%s18360_s9 + $0x728] sm:$0xff] }
 0x95b   : > { %7609 = vmatmul.mubr.f32.gmra.mrb[148].mxu1 %v17458_v26  ;;  %v7173_v26 = vld [vmem:[%s18360_s9 + $0x6b8] sm:$0xff] }
 0x95c   : > { %7614 = vmatprep.mubr.f32.mxu1 %v17745_v58  ;;  %9547 = vmatpush1.bf16.msra.mxu1 %v9546_v41  ;;  %v9556_v51 = vpack.c.bf16 %v7173_v26, %v7171_v43  ;;  %v9560_v41 = vpack.c.bf16 %v7177_v2, %v7175_v53  ;;  %v7185_v43 = vld [vmem:[%s18360_s9 + $0x718] sm:$0xff] }
 0x95d   : > { %9549 = vmatprep.subr.bf16.mxu1 %v9548_v8  ;;  %v7174_v8 = vld [vmem:[%s18360_s9 + $0x6c0] sm:$0xff]  ;;  %v7189_v53 = vld [vmem:[%s18360_s9 + $0x738] sm:$0xff] }
 0x95e   : > { %v9562_v61 = vpack.c.bf16 %v7176_v36, %v7174_v8  ;;  %v7188_v8 = vld [vmem:[%s18360_s9 + $0x730] sm:$0xff]  ;;  %v7191_v36 = vld [vmem:[%s18360_s9 + $0x748] sm:$0xff] }
 0x95f   : > { %7615 = vmatmul.mubr.f32.gmra.mrb[150].mxu1 %v17477_v45 }
 0x960   : > { %7620 = vmatprep.mubr.f32.mxu1 %v17764_v22  ;;  %9551 = vmatpush1.bf16.msra.mxu1 %v9550_v40  ;;  %v9564_v40 = vpack.c.bf16 %v7181_v14, %v7179_v24  ;;  %v7193_v24 = vld [vmem:[%s18360_s9 + $0x758] sm:$0xff]  ;;  %v18024_v14 = vld [vmem:[%s16646_s24 + $0x62] sm:$0xff] }
 0x961   : > { %9553 = vmatprep.subr.bf16.mxu1 %v9552_v48  ;;  %v7178_v48 = vld [vmem:[%s18360_s9 + $0x6e0] sm:$0xff] }
 0x962   : > { %v9566_v26 = vpack.c.bf16 %v7180_v9, %v7178_v48  ;;  %v7190_v48 = vld [vmem:[%s18360_s9 + $0x740] sm:$0xff]  ;;  %v7192_v9 = vld [vmem:[%s18360_s9 + $0x750] sm:$0xff] }
 0x963   : > { %7621 = vmatmul.mubr.f32.gmra.mrb[152].mxu1 %v17522_v54 }
 0x964   : > { %7626 = vmatprep.mubr.f32.mxu1 %v17783_v7  ;;  %9555 = vmatpush1.bf16.msra.mxu1 %v9554_v13  ;;  %v9568_v13 = vpack.c.bf16 %v7185_v43, %v7183_v59  ;;  %v18034_v59 = vld [vmem:[%s16646_s24 + $0x61] sm:$0xff] }
 0x965   : > { %9557 = vmatprep.subr.bf16.mxu1 %v9556_v51  ;;  %v7182_v51 = vld [vmem:[%s18360_s9 + $0x700] sm:$0xff]  ;;  %v7195_v43 = vld [vmem:[%s18360_s9 + $0x768] sm:$0xff] }
 0x966   : > { %v9570_v2 = vpack.c.bf16 %v7184_v25, %v7182_v51  ;;  %v9578_v51 = vpack.c.bf16 %v7192_v9, %v7190_v48  ;;  %v18074_v48 = vld [vmem:[%s16646_s24 + $0x71] sm:$0xff]  ;;  %v7203_v9 = vld [vmem:[%s18360_s9 + $0x7a8] sm:$0xff] }
 0x967   : > { %7627 = vmatmul.mubr.f32.gmra.mrb[154].mxu1 %v17529_v49 }
 0x968   : > { %7632 = vmatprep.mubr.f32.mxu1 %v17802_v31  ;;  %9559 = vmatpush1.bf16.msra.mxu1 %v9558_v63  ;;  %v9572_v63 = vpack.c.bf16 %v7189_v53, %v7187_v16  ;;  %v7194_v16 = vld [vmem:[%s18360_s9 + $0x760] sm:$0xff]  ;;  %v7196_v53 = vld [vmem:[%s18360_s9 + $0x770] sm:$0xff] }
 0x969   : > { %9561 = vmatprep.subr.bf16.mxu1 %v9560_v41  ;;  %v7186_v41 = vld [vmem:[%s18360_s9 + $0x720] sm:$0xff] }
 0x96b   : > { %7633 = vmatmul.mubr.f32.gmra.mrb[156].mxu1 %v17550_v35 }
 0x96c   : > { %7638 = vmatprep.mubr.f32.mxu1 %v17821_v5  ;;  %9563 = vmatpush1.bf16.msra.mxu1 %v9562_v61  ;;  %v9574_v61 = vpack.c.bf16 %v7188_v8, %v7186_v41  ;;  %v7201_v41 = vld [vmem:[%s18360_s9 + $0x798] sm:$0xff] }
 0x96d   : > { %9565 = vmatprep.subr.bf16.mxu1 %v9564_v40  ;;  %v9576_v40 = vpack.c.bf16 %v7193_v24, %v7191_v36  ;;  %v18064_v8 = vld [vmem:[%s16646_s24 + $0x72] sm:$0xff]  ;;  %v9582_v36 = vpack.c.bf16 %v7196_v53, %v7194_v16  ;;  %v7207_v53 = vld [vmem:[%s18360_s9 + $0x7c8] sm:$0xff] }
 0x96e   : > { %v7204_v16 = vld [vmem:[%s18360_s9 + $0x7b0] sm:$0xff] }
 0x96f   : > { %7639 = vmatmul.mubr.f32.gmra.mrb[158].mxu1 %v17557_v50 }
 0x970   : > { %7644 = vmatprep.mubr.f32.mxu1 %v17840_v52  ;;  %9567 = vmatpush1.bf16.msra.mxu1 %v9566_v26  ;;  %v7197_v26 = vld [vmem:[%s18360_s9 + $0x778] sm:$0xff] }
 0x971   : > { %9569 = vmatprep.subr.bf16.mxu1 %v9568_v13  ;;  %v18044_v13 = vld [vmem:[%s16646_s24 + $0x6a] sm:$0xff]  ;;  %v9580_v25 = vpack.c.bf16 %v7197_v26, %v7195_v43  ;;  %v7205_v43 = vld [vmem:[%s18360_s9 + $0x7b8] sm:$0xff] }
 0x973   : > { %7645 = vmatmul.mubr.f32.gmra.mrb[160].mxu1 %v17578_v18 }
 0x974   : > { %7650 = vmatprep.mubr.f32.mxu1 %v18024_v14  ;;  %9571 = vmatpush1.bf16.msra.mxu1 %v9570_v2  ;;  %v18054_v2 = vld [vmem:[%s16646_s24 + $0x69] sm:$0xff] }
 0x975   : > { %9573 = vmatprep.subr.bf16.mxu1 %v9572_v63  ;;  %v7199_v63 = vld [vmem:[%s18360_s9 + $0x788] sm:$0xff] }
 0x976   : > { %v9584_v24 = vpack.c.bf16 %v7201_v41, %v7199_v63  ;;  %v7209_v63 = vld [vmem:[%s18360_s9 + $0x7d8] sm:$0xff] }
 0x977   : > { %7651 = vmatmul.mubr.f32.gmra.mrb[162].mxu1 %v18034_v59  ;;  %v9592_v41 = vpack.c.bf16 %v7209_v63, %v7207_v53 }
 0x978   : > { %7656 = vmatprep.mubr.f32.mxu1 %v18044_v13  ;;  %9575 = vmatpush1.bf16.msra.mxu1 %v9574_v61  ;;  %v7198_v61 = vld [vmem:[%s18360_s9 + $0x780] sm:$0xff] }
 0x979   : > { %9577 = vmatprep.subr.bf16.mxu1 %v9576_v40  ;;  %v7200_v40 = vld [vmem:[%s18360_s9 + $0x790] sm:$0xff] }
 0x97a   : > { %v9586_v26 = vpack.c.bf16 %v7200_v40, %v7198_v61  ;;  %v7211_v61 = vld [vmem:[%s18360_s9 + $0x7e8] sm:$0xff]  ;;  %v7213_v40 = vld [vmem:[%s18360_s9 + $0x7f8] sm:$0xff] }
 0x97b   : > { %7657 = vmatmul.mubr.f32.gmra.mrb[164].mxu1 %v18054_v2 }
 0x97c   : > { %7662 = vmatprep.mubr.f32.mxu1 %v18064_v8  ;;  %9579 = vmatpush1.bf16.msra.mxu1 %v9578_v51  ;;  %v9588_v51 = vpack.c.bf16 %v7205_v43, %v7203_v9  ;;  %v9596_v43 = vpack.c.bf16 %v7213_v40, %v7211_v61 }
 0x97d   : > { %9581 = vmatprep.subr.bf16.mxu1 %v9580_v25  ;;  %v7202_v25 = vld [vmem:[%s18360_s9 + $0x7a0] sm:$0xff] }
 0x97f   : > { %7663 = vmatmul.mubr.f32.gmra.mrb[166].mxu1 %v18074_v48 }
 0x980   : > { %9583 = vmatpush1.bf16.msra.mxu1 %v9582_v36  ;;  %7733 = vmatprep.mubr.f32.mxu1 %v17477_v45  ;;  %v9590_v45 = vpack.c.bf16 %v7204_v16, %v7202_v25  ;;  %v7206_v36 = vld [vmem:[%s18360_s9 + $0x7c0] sm:$0xff]  ;;  %v7215_v25 = vld [vmem:[%s18360_s9 + $0x808] sm:$0xff]  ;;  %v7217_v16 = vld [vmem:[%s18360_s9 + $0x818] sm:$0xff] }
 0x981   : > { %9585 = vmatprep.subr.bf16.mxu1 %v9584_v24  ;;  %v7208_v24 = vld [vmem:[%s18360_s9 + $0x7d0] sm:$0xff]  ;;  %v9600_v63 = vpack.c.bf16 %v7217_v16, %v7215_v25 }
 0x982   : > { %v9594_v9 = vpack.c.bf16 %v7208_v24, %v7206_v36  ;;  %v7219_v36 = vld [vmem:[%s18360_s9 + $0x828] sm:$0xff]  ;;  %v7221_v24 = vld [vmem:[%s18360_s9 + $0x838] sm:$0xff] }
 0x983   : > { %v9604_v40 = vpack.c.bf16 %v7221_v24, %v7219_v36  ;;  %v7226_v36 = vld [vmem:[%s18360_s9 + $0x860] sm:$0xff]  ;;  %v7228_v24 = vld [vmem:[%s18360_s9 + $0x870] sm:$0xff] }
 0x984   : > { %9587 = vmatpush1.bf16.msra.mxu1 %v9586_v26  ;;  %v7210_v26 = vld [vmem:[%s18360_s9 + $0x7e0] sm:$0xff] }
 0x985   : > { %9589 = vmatprep.subr.bf16.mxu1 %v9588_v51  ;;  %v7212_v51 = vld [vmem:[%s18360_s9 + $0x7f0] sm:$0xff] }
 0x986   : > { %v9598_v53 = vpack.c.bf16 %v7212_v51, %v7210_v26  ;;  %v7223_v26 = vld [vmem:[%s18360_s9 + $0x848] sm:$0xff]  ;;  %v7225_v51 = vld [vmem:[%s18360_s9 + $0x858] sm:$0xff] }
 0x987   : > { %v9608_v16 = vpack.c.bf16 %v7225_v51, %v7223_v26  ;;  %v7235_v26 = vld [vmem:[%s18360_s9 + $0x8a8] sm:$0xff] }
 0x988   : > { %9591 = vmatpush1.bf16.msra.mxu1 %v9590_v45  ;;  %v7214_v45 = vld [vmem:[%s18360_s9 + $0x800] sm:$0xff] }
 0x989   : > { %9593 = vmatprep.subr.bf16.mxu1 %v9592_v41  ;;  %v7216_v41 = vld [vmem:[%s18360_s9 + $0x810] sm:$0xff] }
 0x98a   : > { %v9602_v61 = vpack.c.bf16 %v7216_v41, %v7214_v45  ;;  %v7227_v45 = vld [vmem:[%s18360_s9 + $0x868] sm:$0xff] }
 0x98c   : > { %9595 = vmatpush1.bf16.msra.mxu1 %v9594_v9  ;;  %v7218_v9 = vld [vmem:[%s18360_s9 + $0x820] sm:$0xff] }
 0x98d   : > { %9597 = vmatprep.subr.bf16.mxu1 %v9596_v43  ;;  %v7220_v43 = vld [vmem:[%s18360_s9 + $0x830] sm:$0xff] }
 0x98e   : > { %v9606_v25 = vpack.c.bf16 %v7220_v43, %v7218_v9  ;;  %v7230_v9 = vld [vmem:[%s18360_s9 + $0x880] sm:$0xff]  ;;  %v7232_v43 = vld [vmem:[%s18360_s9 + $0x890] sm:$0xff] }
 0x990   : > { %9599 = vmatpush1.bf16.msra.mxu1 %v9598_v53  ;;  %v7222_v53 = vld [vmem:[%s18360_s9 + $0x840] sm:$0xff] }
 0x991   : > { %9601 = vmatprep.subr.bf16.mxu1 %v9600_v63  ;;  %v7224_v63 = vld [vmem:[%s18360_s9 + $0x850] sm:$0xff] }
 0x993   : > { %10968 = vmatmul.mubr.msk.f32.vlgmr.msra.gmra.mrb[144].mxu1 %vm19221_vm12, %v17420_v3  ;;  %v7229_v3 = vld [vmem:[%s18360_s9 + $0x878] sm:$0xff] }
 0x994   : > { %7739 = vmatprep.mubr.f32.mxu1 %v17522_v54  ;;  %9603 = vmatpush1.bf16.msra.mxu1 %v9602_v61  ;;  %v9610_v54 = vpack.c.bf16 %v7224_v63, %v7222_v53  ;;  %v9612_v41 = vpack.c.bf16 %v7229_v3, %v7227_v45  ;;  %v7231_v61 = vld [vmem:[%s18360_s9 + $0x888] sm:$0xff]  ;;  %v7238_v45 = vld [vmem:[%s18360_s9 + $0x8c0] sm:$0xff]  ;;  %v7240_v3 = vld [vmem:[%s18360_s9 + $0x8d0] sm:$0xff] }
 0x995   : > { %9605 = vmatprep.subr.bf16.mxu1 %v9604_v40  ;;  %v7239_v53 = vld [vmem:[%s18360_s9 + $0x8c8] sm:$0xff] }
 0x997   : > { %10969 = vmatmul.mubr.msk.f32.gmra.mrb[146].mxu1 %vm19222_vm5, %v17412_v39  ;;  %v7233_v39 = vld [vmem:[%s18360_s9 + $0x898] sm:$0xff] }
 0x998   : > { %7745 = vmatprep.mubr.f32.mxu1 %v17529_v49  ;;  %9607 = vmatpush1.bf16.msra.mxu1 %v9606_v25  ;;  %v9614_v49 = vpack.c.bf16 %v7228_v24, %v7226_v36  ;;  %v9616_v40 = vpack.c.bf16 %v7233_v39, %v7231_v61  ;;  %v7234_v25 = vld [vmem:[%s18360_s9 + $0x8a0] sm:$0xff]  ;;  %v7244_v24 = vld [vmem:[%s18360_s9 + $0x8f0] sm:$0xff] }
 0x999   : > { %9609 = vmatprep.subr.bf16.mxu1 %v9608_v16  ;;  %v7236_v16 = vld [vmem:[%s18360_s9 + $0x8b0] sm:$0xff]  ;;  %v7242_v36 = vld [vmem:[%s18360_s9 + $0x8e0] sm:$0xff] }
 0x99b   : > { %10970 = vmatmul.mubr.msk.f32.gmra.mrb[148].mxu1 %vm6219_vm1, %v17496_v4  ;;  %v7237_v4 = vld [vmem:[%s18360_s9 + $0x8b8] sm:$0xff]  ;;  %vm6892_vm1 = vcmp.lt.s32.totalorder %v19119_v21, 4 }
 0x99c   : > { %7751 = vmatprep.mubr.f32.mxu1 %v17550_v35  ;;  %9611 = vmatpush1.bf16.msra.mxu1 %v9610_v54  ;;  %v9618_v35 = vpack.c.bf16 %v7232_v43, %v7230_v9  ;;  %v9620_v51 = vpack.c.bf16 %v7237_v4, %v7235_v26  ;;  %v7243_v54 = vld [vmem:[%s18360_s9 + $0x8e8] sm:$0xff] }
 0x99d   : > { %9613 = vmatprep.subr.bf16.mxu1 %v9612_v41 }
 0x99f   : > { %10971 = vmatmul.mubr.msk.f32.gmra.mrb[150].mxu1 %vm6220_vm9, %v17488_v34  ;;  %v7241_v34 = vld [vmem:[%s18360_s9 + $0x8d8] sm:$0xff]  ;;  %vm6893_vm9 = vcmp.lt.s32.totalorder %v19120_v60, 4 }
 0x9a0   : > { %7757 = vmatprep.mubr.f32.mxu1 %v17557_v50  ;;  %9615 = vmatpush1.bf16.msra.mxu1 %v9614_v49  ;;  %v9622_v50 = vpack.c.bf16 %v7236_v16, %v7234_v25  ;;  %v9624_v63 = vpack.c.bf16 %v7241_v34, %v7239_v53 }
 0x9a1   : > { %9617 = vmatprep.subr.bf16.mxu1 %v9616_v40 }
 0x9a3   : > { %10972 = vmatmul.mubr.msk.f32.gmra.mrb[152].mxu1 %vm6221_vm0, %v17536_v57  ;;  %v7245_v57 = vld [vmem:[%s18360_s9 + $0x8f8] sm:$0xff]  ;;  %vm6894_vm0 = vcmp.lt.s32.totalorder %v19121_v6, 4 }
 0x9a4   : > { %7763 = vmatprep.mubr.f32.mxu1 %v17578_v18  ;;  %9619 = vmatpush1.bf16.msra.mxu1 %v9618_v35  ;;  %v9626_v18 = vpack.c.bf16 %v7240_v3, %v7238_v45  ;;  %v9628_v41 = vpack.c.bf16 %v7245_v57, %v7243_v54 }
 0x9a5   : > { %9621 = vmatprep.subr.bf16.mxu1 %v9620_v51 }
 0x9a7   : > { %10973 = vmatmul.mubr.msk.f32.gmra.mrb[154].mxu1 %vm6222_vm15, %v17534_v15  ;;  %v9630_v15 = vpack.c.bf16 %v7244_v24, %v7242_v36  ;;  %vm6895_vm15 = vcmp.lt.s32.totalorder %v19122_v30, 4 }
 0x9a8   : > { %7769 = vmatprep.mubr.f32.mxu1 %v18034_v59  ;;  %9623 = vmatpush1.bf16.msra.mxu1 %v9622_v50 }
 0x9a9   : > { %9625 = vmatprep.subr.bf16.mxu1 %v9624_v63 }
 0x9ab   : > { %10974 = vmatmul.mubr.msk.f32.gmra.mrb[156].mxu1 %vm6223_vm13, %v17564_v46  ;;  %v6953_v46 = vld [vmem:[%s16646_s24 + $0x81] sm:$0xff]  ;;  %vm6896_vm13 = vcmp.lt.s32.totalorder %v19124_v28, 4 }
 0x9ac   : > { %7775 = vmatprep.mubr.f32.mxu1 %v18054_v2  ;;  %9627 = vmatpush1.bf16.msra.mxu1 %v9626_v18 }
 0x9ad   : > { %9629 = vmatprep.subr.bf16.mxu1 %v9628_v41 }
 0x9af   : > { %10975 = vmatmul.mubr.msk.f32.gmra.mrb[158].mxu1 %vm6224_vm7, %v17562_v37  ;;  %v19223_v37 = vld [vmem:[#allocation2_spill] sm:$0xff]  ;;  %vm6897_vm7 = vcmp.lt.s32.totalorder %v19126_v38, 4 }
 0x9b0   : > { %7781 = vmatprep.mubr.f32.mxu1 %v18074_v48  ;;  %9631 = vmatpush1.bf16.msra.mxu1 %v9630_v15  ;;  %v7250_v10 = vsub.s32 0, %v19223_v37 }
 0x9b3   : > { %10976 = vmatmul.mubr.msk.f32.gmra.mrb[160].mxu1 %vm6225_vm14, %v17617_v12  ;;  %v7254_v12 = vsub.s32 1, %v19223_v37  ;;  %vm6898_vm14 = vcmp.lt.s32.totalorder %v19128_v27, 4 }
 0x9b4   : > { %7787 = vmatprep.mubr.f32.mxu1 %v6952_v42 }
 0x9b7   : > { %10977 = vmatmul.mubr.msk.f32.gmra.mrb[162].mxu1 %vm6226_vm6, %v6853_v20  ;;  %v7246_v20 = vld [vmem:[%s18361_s10] sm:$0x3]  ;;  %vm6899_vm6 = vcmp.lt.s32.totalorder %v19130_v47, 4 }
 0x9b8   : > { %7793 = vmatprep.mubr.f32.mxu1 %v6953_v46  ;;  %v18278_v1 = vrot.slane %v7246_v20, %v7250_v10  ;;  %v18280_v19 = vrot.slane %v7246_v20, %v7254_v12 }
 0x9bb   : > { %10978 = vmatmul.mubr.msk.f32.gmra.mrb[164].mxu1 %vm6227_vm4, %v6854_v56  ;;  %vm6900_vm4 = vcmp.lt.s32.totalorder %v19132_v44, 4 }
 0x9bc   : > { %7799 = vmatprep.mubr.f32.mxu1 %v6954_v33 }
 0x9bf   : > { %10979 = vmatmul.mubr.msk.f32.gmra.mrb[166].mxu1 %vm6228_vm11, %v6855_v17  ;;  %vm6901_vm11 = vcmp.lt.s32.totalorder %v19134_v23, 4 }
 0x9c0   : > { %7870 = vmatprep.mubr.f32.mxu1 %v10813_v32 }
 0x9c3   : > { %7871 = vmatmul.mubr.f32.vlgmr.msra.gmra.mrb[144].mxu1 %v17745_v58 }
 0x9c4   : > { %7876 = vmatprep.mubr.f32.mxu1 %v10813_v32 }
 0x9c7   : > { %7877 = vmatmul.mubr.f32.gmra.mrb[146].mxu1 %v17764_v22 }
 0x9c8   : > { %7882 = vmatprep.mubr.f32.mxu1 %v10813_v32 }
 0x9cb   : > { %7883 = vmatmul.mubr.f32.gmra.mrb[148].mxu1 %v17783_v7 }
 0x9cc   : > { %7888 = vmatprep.mubr.f32.mxu1 %v10813_v32 }
 0x9cf   : > { %7889 = vmatmul.mubr.f32.gmra.mrb[150].mxu1 %v17802_v31 }
 0x9d0   : > { %7894 = vmatprep.mubr.f32.mxu1 %v10813_v32 }
 0x9d3   : > { %7895 = vmatmul.mubr.f32.gmra.mrb[152].mxu1 %v17821_v5 }
 0x9d4   : > { %7900 = vmatprep.mubr.f32.mxu1 %v10813_v32 }
 0x9d7   : > { %7901 = vmatmul.mubr.f32.gmra.mrb[154].mxu1 %v17840_v52 }
 0x9d8   : > { %7906 = vmatprep.mubr.f32.mxu1 %v10813_v32 }
 0x9db   : > { %7907 = vmatmul.mubr.f32.gmra.mrb[156].mxu1 %v18024_v14 }
 0x9dc   : > { %7912 = vmatprep.mubr.f32.mxu1 %v10813_v32 }
 0x9df   : > { %7913 = vmatmul.mubr.f32.gmra.mrb[158].mxu1 %v18044_v13 }
 0x9e0   : > { %7918 = vmatprep.mubr.f32.mxu1 %v10813_v32 }
 0x9e3   : > { %7919 = vmatmul.mubr.f32.gmra.mrb[160].mxu1 %v18064_v8 }
 0x9e4   : > { %7924 = vmatprep.mubr.f32.mxu1 %v10813_v32 }
 0x9e7   : > { %7925 = vmatmul.mubr.f32.gmra.mrb[162].mxu1 %v6955_v62 }
 0x9e8   : > { %7930 = vmatprep.mubr.f32.mxu1 %v10813_v32 }
 0x9eb   : > { %7931 = vmatmul.mubr.f32.gmra.mrb[164].mxu1 %v6956_v29 }
 0x9ec   : > { %7936 = vmatprep.mubr.f32.mxu1 %v10813_v32 }
 0x9ef   : > { %7937 = vmatmul.mubr.f32.gmra.mrb[166].mxu1 %v6957_v55 }
 0xa96   : > { %v7872_v17 = vpop.f32.mrb[144].mxu1 }
 0xa97   : > { %v9764_v56 = vadd.f32 %v7872_v17, %v18278_v1  ;;  %v7874_v58 = vpop.f32.mrb[145].mxu1 }
 0xa98   : > { %v9765_v22 = vadd.f32 %v7874_v58, %v18280_v19 }
 0xa99   : > { %v7943_v7 = vmax.f32 %v9764_v56, 0.0 }
 0xa9a   : > { %v7944_v31 = vmax.f32 %v9765_v22, 0.0  ;;  %v7878_v5 = vpop.f32.mrb[146].mxu1 }
 0xa9b   : > { %v7967_v52 = vsel %vm6892_vm1, %v7943_v7, 0.0  ;;  %v9766_v14 = vadd.f32 %v7878_v5, %v18278_v1  ;;  %v7880_v59 = vpop.f32.mrb[147].mxu1 }
 0xa9c   : > { %7991 = vst [vmem:[%s18289_s17] sm:$0xff] %v7967_v52  ;;  %v7968_v21 = vsel %vm6892_vm1, %v7944_v31, 0.0  ;;  %v9767_v13 = vadd.f32 %v7880_v59, %v18280_v19 }
 0xa9d   : > { %7992 = vst [vmem:[%s18289_s17 + $0x8] sm:$0xff] %v7968_v21  ;;  %v7945_v2 = vmax.f32 %v9766_v14, 0.0 }
 0xa9e   : > { %v7946_v8 = vmax.f32 %v9767_v13, 0.0  ;;  %v7884_v48 = vpop.f32.mrb[148].mxu1 }
 0xa9f   : > { %v7969_v61 = vsel %vm6893_vm9, %v7945_v2, 0.0  ;;  %v9768_v39 = vadd.f32 %v7884_v48, %v18278_v1  ;;  %v7886_v49 = vpop.f32.mrb[149].mxu1 }
 0xaa0   : > { %7993 = vst [vmem:[%s18289_s17 + $0x10] sm:$0xff] %v7969_v61  ;;  %v7970_v40 = vsel %vm6893_vm9, %v7946_v8, 0.0  ;;  %v9769_v9 = vadd.f32 %v7886_v49, %v18280_v19 }
 0xaa1   : > { %7994 = vst [vmem:[%s18289_s17 + $0x18] sm:$0xff] %v7970_v40  ;;  %v7947_v60 = vmax.f32 %v9768_v39, 0.0 }
 0xaa2   : > { %v7948_v43 = vmax.f32 %v9769_v9, 0.0  ;;  %v7890_v26 = vpop.f32.mrb[150].mxu1 }
 0xaa3   : > { %v7971_v4 = vsel %vm6894_vm0, %v7947_v60, 0.0  ;;  %v9770_v35 = vadd.f32 %v7890_v26, %v18278_v1  ;;  %v7892_v51 = vpop.f32.mrb[151].mxu1 }
 0xaa4   : > { %7995 = vst [vmem:[%s18289_s17 + $0x20] sm:$0xff] %v7971_v4  ;;  %v7972_v25 = vsel %vm6894_vm0, %v7948_v43, 0.0  ;;  %v9771_v16 = vadd.f32 %v7892_v51, %v18280_v19 }
 0xaa5   : > { %7996 = vst [vmem:[%s18289_s17 + $0x28] sm:$0xff] %v7972_v25  ;;  %v7949_v6 = vmax.f32 %v9770_v35, 0.0 }
 0xaa6   : > { %v7950_v53 = vmax.f32 %v9771_v16, 0.0  ;;  %v7896_v34 = vpop.f32.mrb[152].mxu1 }
 0xaa7   : > { %v7973_v50 = vsel %vm6895_vm15, %v7949_v6, 0.0  ;;  %v9772_v63 = vadd.f32 %v7896_v34, %v18278_v1  ;;  %v7898_v45 = vpop.f32.mrb[153].mxu1 }
 0xaa8   : > { %7997 = vst [vmem:[%s18289_s17 + $0x30] sm:$0xff] %v7973_v50  ;;  %v7974_v3 = vsel %vm6895_vm15, %v7950_v53, 0.0  ;;  %v9773_v54 = vadd.f32 %v7898_v45, %v18280_v19 }
 0xaa9   : > { %7998 = vst [vmem:[%s18289_s17 + $0x38] sm:$0xff] %v7974_v3  ;;  %v7951_v30 = vmax.f32 %v9772_v63, 0.0 }
 0xaaa   : > { %v7952_v57 = vmax.f32 %v9773_v54, 0.0  ;;  %v7902_v18 = vpop.f32.mrb[154].mxu1 }
 0xaab   : > { %v7975_v41 = vsel %vm6896_vm13, %v7951_v30, 0.0  ;;  %v9774_v36 = vadd.f32 %v7902_v18, %v18278_v1  ;;  %v7904_v24 = vpop.f32.mrb[155].mxu1 }
 0xaac   : > { %7999 = vst [vmem:[%s18289_s17 + $0x40] sm:$0xff] %v7975_v41  ;;  %v7976_v15 = vsel %vm6896_vm13, %v7952_v57, 0.0  ;;  %v9775_v42 = vadd.f32 %v7904_v24, %v18280_v19 }
 0xaad   : > { %8000 = vst [vmem:[%s18289_s17 + $0x48] sm:$0xff] %v7976_v15  ;;  %v7953_v28 = vmax.f32 %v9774_v36, 0.0 }
 0xaae   : > { %v7954_v46 = vmax.f32 %v9775_v42, 0.0  ;;  %v7908_v33 = vpop.f32.mrb[156].mxu1 }
 0xaaf   : > { %v7977_v32 = vsel %vm6897_vm7, %v7953_v28, 0.0  ;;  %v9776_v62 = vadd.f32 %v7908_v33, %v18278_v1  ;;  %v7910_v29 = vpop.f32.mrb[157].mxu1 }
 0xab0   : > { %8001 = vst [vmem:[%s18289_s17 + $0x50] sm:$0xff] %v7977_v32  ;;  %v7978_v55 = vsel %vm6897_vm7, %v7954_v46, 0.0  ;;  %v9777_v37 = vadd.f32 %v7910_v29, %v18280_v19 }
 0xab1   : > { %8002 = vst [vmem:[%s18289_s17 + $0x58] sm:$0xff] %v7978_v55  ;;  %v7955_v38 = vmax.f32 %v9776_v62, 0.0 }
 0xab2   : > { %v7956_v10 = vmax.f32 %v9777_v37, 0.0  ;;  %v7914_v20 = vpop.f32.mrb[158].mxu1 }
 0xab3   : > { %v7979_v12 = vsel %vm6898_vm14, %v7955_v38, 0.0  ;;  %v9778_v17 = vadd.f32 %v7914_v20, %v18278_v1  ;;  %v7916_v56 = vpop.f32.mrb[159].mxu1 }
 0xab4   : > { %8003 = vst [vmem:[%s18289_s17 + $0x60] sm:$0xff] %v7979_v12  ;;  %v7980_v58 = vsel %vm6898_vm14, %v7956_v10, 0.0  ;;  %v9779_v22 = vadd.f32 %v7916_v56, %v18280_v19 }
 0xab5   : > { %8004 = vst [vmem:[%s18289_s17 + $0x68] sm:$0xff] %v7980_v58  ;;  %v7957_v27 = vmax.f32 %v9778_v17, 0.0 }
 0xab6   : > { %v7958_v7 = vmax.f32 %v9779_v22, 0.0  ;;  %v7920_v31 = vpop.f32.mrb[160].mxu1 }
 0xab7   : > { %v7981_v5 = vsel %vm6899_vm6, %v7957_v27, 0.0  ;;  %v9780_v52 = vadd.f32 %v7920_v31, %v18278_v1  ;;  %v7922_v14 = vpop.f32.mrb[161].mxu1 }
 0xab8   : > { %8005 = vst [vmem:[%s18289_s17 + $0x70] sm:$0xff] %v7981_v5  ;;  %v7982_v59 = vsel %vm6899_vm6, %v7958_v7, 0.0  ;;  %v9781_v21 = vadd.f32 %v7922_v14, %v18280_v19 }
 0xab9   : > { %8006 = vst [vmem:[%s18289_s17 + $0x78] sm:$0xff] %v7982_v59  ;;  %v7959_v47 = vmax.f32 %v9780_v52, 0.0 }
 0xaba   : > { %v7960_v13 = vmax.f32 %v9781_v21, 0.0  ;;  %v7926_v2 = vpop.f32.mrb[162].mxu1 }
 0xabb   : > { %v7983_v8 = vsel %vm6900_vm4, %v7959_v47, 0.0  ;;  %v9782_v48 = vadd.f32 %v7926_v2, %v18278_v1  ;;  %v7928_v61 = vpop.f32.mrb[163].mxu1 }
 0xabc   : > { %8007 = vst [vmem:[%s18289_s17 + $0x80] sm:$0xff] %v7983_v8  ;;  %v7984_v39 = vsel %vm6900_vm4, %v7960_v13, 0.0  ;;  %v9783_v49 = vadd.f32 %v7928_v61, %v18280_v19 }
 0xabd   : > { %8008 = vst [vmem:[%s18289_s17 + $0x88] sm:$0xff] %v7984_v39  ;;  %v7961_v44 = vmax.f32 %v9782_v48, 0.0 }
 0xabe   : > { %v7962_v40 = vmax.f32 %v9783_v49, 0.0  ;;  %v7932_v9 = vpop.f32.mrb[164].mxu1 }
 0xabf   : > { %v7985_v60 = vsel %vm6901_vm11, %v7961_v44, 0.0  ;;  %v9784_v43 = vadd.f32 %v7932_v9, %v18278_v1  ;;  %v7934_v26 = vpop.f32.mrb[165].mxu1 }
 0xac0   : > { %8009 = vst [vmem:[%s18289_s17 + $0x90] sm:$0xff] %v7985_v60  ;;  %v7986_v4 = vsel %vm6901_vm11, %v7962_v40, 0.0  ;;  %v9785_v35 = vadd.f32 %v7934_v26, %v18280_v19 }
 0xac1   : > { %8010 = vst [vmem:[%s18289_s17 + $0x98] sm:$0xff] %v7986_v4  ;;  %v7963_v23 = vmax.f32 %v9784_v43, 0.0 }
 0xac2   : > { %v7964_v51 = vmax.f32 %v9785_v35, 0.0  ;;  %v7938_v25 = vpop.f32.mrb[166].mxu1 }
 0xac3   : > { %v7987_v16 = vsel %vm6902_vm8, %v7963_v23, 0.0  ;;  %v9786_v6 = vadd.f32 %v7938_v25, %v18278_v1  ;;  %v7940_v53 = vpop.f32.mrb[167].mxu1 }
 0xac4   : > { %8011 = vst [vmem:[%s18289_s17 + $0xa0] sm:$0xff] %v7987_v16  ;;  %v7988_v34 = vsel %vm6902_vm8, %v7964_v51, 0.0  ;;  %v9787_v50 = vadd.f32 %v7940_v53, %v18280_v19 }
 0xac5   : > { %8012 = vst [vmem:[%s18289_s17 + $0xa8] sm:$0xff] %v7988_v34  ;;  %v7965_v0 = vmax.f32 %v9786_v6, 0.0 }
 0xac6   : > { %v7966_v63 = vmax.f32 %v9787_v50, 0.0 }
 0xac7   : > { %v7989_v45 = vsel %vm6903_vm2, %v7965_v0, 0.0 }
 0xac8   : > { %8013 = vst [vmem:[%s18289_s17 + $0xb0] sm:$0xff] %v7989_v45  ;;  %v7990_v3 = vsel %vm6903_vm2, %v7966_v63, 0.0 }
 0xac9   : > { %8014 = vst [vmem:[%s18289_s17 + $0xb8] sm:$0xff] %v7990_v3 }
 0xaca PF: > { %s27_s21 = sadd.s32 1, %s10986_s21  }
 0xacb   : > { %p24_p4 = scmp.ge.s32.totalorder %s27_s21, 4  }
 0xacd   :  { %26 = sbr.rel (!%p24_p4) target bundleno = 2 (0x2), region = 270 }

</bundles_post_ra>
